<compile_context>
chip_gen: v7x
topology: tpu7x:2x2x1
jax: 0.10.0
libtpu: 0.0.40
codegen_flags: <defaults>
</compile_context>

<pallas_src>
import math
import numpy as np
import jax
import jax.numpy as jnp
from jax.experimental import pallas as pl
from jax.experimental.pallas import tpu as pltpu


B_TILE = 64  # batch rows per grid step (multiple of 16; even, for the 2-sub-tile split)
# TODO(synk): generation-tuned B_TILE (256 on v6e, <=128 on v7x) once production shapes
#             and VMEM budgets are known; 64 is a safe default for all three chips.


def _round_up(x, m):
    return (x + m - 1) // m * m


def rnn_attn_kernel(emb_ref, wih_ref, whh_ref, b_ref, fcw_ref, fcb_ref,
                    out_ref, xg_ref, rnn_ref):
    # emb_ref: (T, B, E_pad)    bf16  time-major embedded tokens (one batch tile)
    # wih_ref: (E_pad, 4*H_pad) bf16  W_ih^T (gate k at cols [k*H_pad, k*H_pad+H))
    # whh_ref: (H_pad, 4*H_pad) bf16  W_hh^T (same gate layout)
    # b_ref:   (1, 4*H_pad)     f32   b_ih + b_hh (zero in padded gate lanes)
    # fcw_ref: (H_pad, N_pad)   bf16  fc.weight^T
    # fcb_ref: (1, N_pad)       f32   fc.bias
    # out_ref: (B, N_pad)       f32   logits (padded lanes exactly 0)
    # xg_ref:  (T, B, 4*H_pad)  bf16  scratch: hoisted input projection (+bias)
    # rnn_ref: (T, B, H_pad)    f32   scratch: all LSTM hidden states
    T, B, E = emb_ref.shape
    H = whh_ref.shape[0]
    B2 = B // 2

    # ---- Phase 1: hoisted input projection, chunked over T.  Each chunk is one
    #      well-shaped bf16 MXU dot whose result streams straight into a bf16 store,
    #      so the live range stays a few vregs instead of the whole (T*B, 4H) slab.
    @pl.loop(0, T)
    def _(t):
        g = jnp.dot(emb_ref[t], wih_ref[...],
                    preferred_element_type=jnp.float32) + b_ref[...]
        xg_ref[t] = g.astype(jnp.bfloat16)

    # ---- Phase 2: recurrence — only h @ W_hh is on the serial critical path.
    #      Two independent batch sub-tiles per step let the LLO scheduler overlap one
    #      sub-tile's gate nonlinearities (EUP/VPU) with the other's MXU work.
    def lstm_half(xg_half, h, c):
        gates = xg_half.astype(jnp.float32) + jnp.dot(
            h.astype(jnp.bfloat16), whh_ref[...],
            preferred_element_type=jnp.float32)                      # (B2, 4*H_pad)
        # sigmoid(x) = 0.5*tanh(0.5x)+0.5  -> one EUP push per gate instead of two.
        i_g = 0.5 * jnp.tanh(0.5 * gates[:, 0 * H:1 * H]) + 0.5
        f_g = 0.5 * jnp.tanh(0.5 * gates[:, 1 * H:2 * H]) + 0.5
        g_g = jnp.tanh(gates[:, 2 * H:3 * H])
        o_g = 0.5 * jnp.tanh(0.5 * gates[:, 3 * H:4 * H]) + 0.5
        c_new = f_g * c + i_g * g_g
        h_new = o_g * jnp.tanh(c_new)
        return h_new, c_new

    def step(t, carry):
        h_a, c_a, h_b, c_b = carry
        xg_t = xg_ref[t]                                             # (B, 4*H_pad) bf16
        h_a, c_a = lstm_half(xg_t[0:B2], h_a, c_a)
        h_b, c_b = lstm_half(xg_t[B2:B], h_b, c_b)
        rnn_ref[t] = jnp.concatenate([h_a, h_b], axis=0)             # full-tile store
        return (h_a, c_a, h_b, c_b)

    zh = jnp.zeros((B2, H), jnp.float32)
    rec_unroll = True if T <= 8 else 8      # bounded unroll at production T
    h_a, c_a, h_b, c_b = jax.lax.fori_loop(0, T, step, (zh, zh, zh, zh),
                                           unroll=rec_unroll)
    h_n = jnp.concatenate([h_a, h_b], axis=0)                        # (B, H) f32

    # ---- Phase 3: attention, streamed over T with online softmax (never materializes
    #      the full (T, B, H) hidden-state slab in registers).
    def attn_step(t, carry):
        m, l, acc = carry
        r_t = rnn_ref[t]                                             # (B, H) f32
        s = jnp.sum(r_t * h_n, axis=-1, keepdims=True)               # (B, 1) scores
        m_new = jnp.maximum(m, s)
        alpha = jnp.exp(m - m_new)
        p = jnp.exp(s - m_new)
        l = alpha * l + p
        acc = alpha * acc + p * r_t
        return (m_new, l, acc)

    m0 = jnp.full((B, 1), -jnp.inf, jnp.float32)
    l0 = jnp.zeros((B, 1), jnp.float32)
    a0 = jnp.zeros((B, H), jnp.float32)
    _, l_fin, acc_fin = jax.lax.fori_loop(0, T, attn_step, (m0, l0, a0),
                                          unroll=True if T <= 8 else 4)
    attn = acc_fin * pl.reciprocal(l_fin, approx=True)               # EUP slot (free)

    logits = jnp.dot(attn.astype(jnp.bfloat16), fcw_ref[...],
                     preferred_element_type=jnp.float32) + fcb_ref[...]
    out_ref[...] = logits                                            # lane-dense store


def prepare_params(params):
    """Pad weights to TPU-friendly shapes and cast matmul operands to bf16."""
    E, H4 = params["wih_t"].shape
    H = H4 // 4
    n_out = params["fcw_t"].shape[1]
    E_pad = _round_up(E, 128)
    H_pad = _round_up(H, 128)
    N_pad = _round_up(n_out, 128)

    V = params["emb"].shape[0]
    emb_p = jnp.zeros((V, E_pad), jnp.bfloat16).at[:, :E].set(
        params["emb"].astype(jnp.bfloat16))

    def pad_gates(w, in_dim, in_pad):
        out = jnp.zeros((in_pad, 4 * H_pad), w.dtype)
        for k in range(4):
            out = out.at[:in_dim, k * H_pad:k * H_pad + H].set(w[:, k * H:(k + 1) * H])
        return out

    wih_p = pad_gates(params["wih_t"], E, E_pad).astype(jnp.bfloat16)
    whh_p = pad_gates(params["whh_t"], H, H_pad).astype(jnp.bfloat16)
    b_p = pad_gates(params["b"], 1, 1).astype(jnp.float32)
    fcw_p = (jnp.zeros((H_pad, N_pad), jnp.float32)
             .at[:H, :n_out].set(params["fcw_t"]).astype(jnp.bfloat16))
    fcb_p = jnp.zeros((1, N_pad), jnp.float32).at[:, :n_out].set(params["fcb"])

    return {"emb": emb_p, "wih_t": wih_p, "whh_t": whh_p, "b": b_p,
            "fcw_t": fcw_p, "fcb": fcb_p,
            "dims": (E, H, n_out, E_pad, H_pad, N_pad)}


def forward(X, params, padded=None):
    """Full forward pass. X: (B, T) int32 token ids. Returns (B, n_out) f32 logits."""
    if padded is None:
        padded = prepare_params(params)
    E, H, n_out, E_pad, H_pad, N_pad = padded["dims"]
    B, T = X.shape
    # Pad the batch so the parallel grid has >= 2 steps (keeps v7x's 2nd TC busy;
    # no-op on v5e/v6e which have a single TensorCore).
    B_pad = max(_round_up(B, B_TILE), 2 * B_TILE)

    # Pad batch with token 0; padded rows are independent and sliced off below.
    X_p = jnp.zeros((B_pad, T), jnp.int32).at[:B, :].set(X)

    # Time-major embedding gather directly (no (B,T,E) slab + swapaxes HBM round trip).
    # TODO(synk): fuse this gather into the kernel (scalar-prefetch the token ids and
    #             DMA embedding rows); per-row DMAs need batching to beat the XLA
    #             gather, so it is deferred here.
    emb_tm = jnp.take(padded["emb"], X_p.T, axis=0)              # (T, B_pad, E_pad) bf16

    # Explicit scoped-VMEM budget (inputs double-buffered, scratches single-buffered).
    vmem_need = (
        2 * T * B_TILE * E_pad * 2                      # emb tile (bf16) x2 buffers
        + 2 * (E_pad + H_pad) * 4 * H_pad * 2           # W_ih^T, W_hh^T (bf16) x2
        + 2 * H_pad * N_pad * 2                         # fc W^T (bf16) x2
        + 2 * (4 * H_pad + N_pad) * 4                   # biases (f32) x2
        + 2 * B_TILE * N_pad * 4                        # output tile x2
        + T * B_TILE * 4 * H_pad * 2                    # xg scratch (bf16)
        + T * B_TILE * H_pad * 4)                       # rnn scratch (f32)
    vmem_limit = int(min(max(2 * vmem_need, 16 * 2**20), 48 * 2**20))

    grid = (B_pad // B_TILE,)
    out = pl.pallas_call(
        rnn_attn_kernel,
        out_shape=jax.ShapeDtypeStruct((B_pad, N_pad), jnp.float32),
        grid=grid,
        in_specs=[
            pl.BlockSpec((T, B_TILE, E_pad), lambda i: (0, i, 0)),   # emb tile / batch block
            # TODO(synk): mark resident weights single-buffered (pipeline_mode) once the
            #             buffer-count=1 path is verified; matters mainly on v7x VMEM.
            pl.BlockSpec((E_pad, 4 * H_pad), lambda i: (0, 0)),      # W_ih^T (resident)
            pl.BlockSpec((H_pad, 4 * H_pad), lambda i: (0, 0)),      # W_hh^T (resident)
            pl.BlockSpec((1, 4 * H_pad), lambda i: (0, 0)),          # bias
            pl.BlockSpec((H_pad, N_pad), lambda i: (0, 0)),          # fc W^T
            pl.BlockSpec((1, N_pad), lambda i: (0, 0)),              # fc bias
        ],
        out_specs=pl.BlockSpec((B_TILE, N_pad), lambda i: (i, 0)),
        scratch_shapes=[
            pltpu.VMEM((T, B_TILE, 4 * H_pad), jnp.bfloat16),  # hoisted input projection
            pltpu.VMEM((T, B_TILE, H_pad), jnp.float32),       # all LSTM hidden states
        ],
        compiler_params=pltpu.CompilerParams(
            dimension_semantics=("parallel",),
            vmem_limit_bytes=vmem_limit),
    )(emb_tm, padded["wih_t"], padded["whh_t"], padded["b"],
      padded["fcw_t"], padded["fcb"])

    return out[:B, :n_out]


def reference_forward(X, params):
    """Pure-JAX reference mirroring the PyTorch semantics (same bf16 matmul operands)."""
    emb = jnp.take(params["emb"], X, axis=0).astype(jnp.bfloat16)    # (B, T, E)
    wih = params["wih_t"].astype(jnp.bfloat16)
    whh = params["whh_t"].astype(jnp.bfloat16)
    fcw = params["fcw_t"].astype(jnp.bfloat16)
    b = params["b"][0]
    fcb = params["fcb"][0]
    B, T, E = emb.shape
    H = params["whh_t"].shape[0]

    def step(carry, x_t):
        h, c = carry
        gates = (jnp.dot(x_t, wih, preferred_element_type=jnp.float32)
                 + jnp.dot(h.astype(jnp.bfloat16), whh, preferred_element_type=jnp.float32)
                 + b)
        i, f, g, o = jnp.split(gates, 4, axis=-1)
        i, f, o = jax.nn.sigmoid(i), jax.nn.sigmoid(f), jax.nn.sigmoid(o)
        g = jnp.tanh(g)
        c = f * c + i * g
        h = o * jnp.tanh(c)
        return (h, c), h

    init = (jnp.zeros((B, H), jnp.float32), jnp.zeros((B, H), jnp.float32))
    (h_n, _), hs = jax.lax.scan(step, init, jnp.swapaxes(emb, 0, 1))
    rnn = jnp.swapaxes(hs, 0, 1)                       # (B, T, H)
    scores = jnp.einsum("bth,bh->bt", rnn, h_n)
    w = jax.nn.softmax(scores, axis=1)                 # softmax over T
    attn = jnp.einsum("bth,bt->bh", rnn, w)
    return jnp.dot(attn.astype(jnp.bfloat16), fcw,
                   preferred_element_type=jnp.float32) + fcb


def init_params(key, vocab_size, embedding_dim, cell_size, n_out):
    """Deterministic parameter init mimicking PyTorch default inits (f32, unpadded)."""
    ks = jax.random.split(key, 8)
    H, E = cell_size, embedding_dim
    k_lstm = 1.0 / math.sqrt(H)
    k_fc = 1.0 / math.sqrt(H)
    return {
        "emb": jax.random.normal(ks[0], (vocab_size, E), jnp.float32),
        "wih_t": jax.random.uniform(ks[1], (E, 4 * H), jnp.float32, -k_lstm, k_lstm),
        "whh_t": jax.random.uniform(ks[2], (H, 4 * H), jnp.float32, -k_lstm, k_lstm),
        "b": (jax.random.uniform(ks[3], (1, 4 * H), jnp.float32, -k_lstm, k_lstm)
              + jax.random.uniform(ks[4], (1, 4 * H), jnp.float32, -k_lstm, k_lstm)),
        "fcw_t": jax.random.uniform(ks[5], (H, n_out), jnp.float32, -k_fc, k_fc),
        "fcb": jax.random.uniform(ks[6], (1, n_out), jnp.float32, -k_fc, k_fc),
    }


if __name__ == "__main__":
    vocab_size = 50
    embedding_dim = 32
    cell_size = 32
    n_out = 2
    B, T = 2, 8

    key = jax.random.PRNGKey(0)
    k_param, k_data = jax.random.split(key)
    params = init_params(k_param, vocab_size, embedding_dim, cell_size, n_out)
    X = jax.random.randint(k_data, (B, T), 0, vocab_size, dtype=jnp.int32)

    logits = forward(X, params)
    logits = jax.block_until_ready(logits)

    ref = jax.block_until_ready(reference_forward(X, params))
    assert logits.shape == (B, n_out)
    # Tolerance slightly looser than before: the hoisted input projection is now stored
    # bf16 and the softmax denominator uses the EUP approx reciprocal (per perf review).
    assert np.allclose(np.asarray(logits), np.asarray(ref), atol=5e-3, rtol=5e-3), (
        "mismatch vs pure-JAX reference")

    print("KERNEL_OK")
</pallas_src>

<mosaic_0001>
module attributes {stable_mosaic.version = 11 : i64} {
  func.func @rnn_attn_kernel(%arg0: i32, %arg1: memref<8x64x128xbf16, #tpu.memory_space<vmem>>, %arg2: memref<128x512xbf16, #tpu.memory_space<vmem>>, %arg3: memref<128x512xbf16, #tpu.memory_space<vmem>>, %arg4: memref<1x512xf32, #tpu.memory_space<vmem>>, %arg5: memref<128x128xbf16, #tpu.memory_space<vmem>>, %arg6: memref<1x128xf32, #tpu.memory_space<vmem>>, %arg7: memref<64x128xf32, #tpu.memory_space<vmem>>, %arg8: memref<8x64x512xbf16, #tpu.memory_space<vmem>>, %arg9: memref<8x64x128xf32, #tpu.memory_space<vmem>>) attributes {dimension_semantics = [#tpu.dimension_semantics<parallel>], iteration_bounds = array<i64: 2>, scalar_prefetch = 0 : i64, scratch_operands = 2 : i64, tpu.core_type = #tpu.core_type<tc>, window_params = [{transform_indices = @transform_0, window_bounds = array<i64: 8, 64, 128>}, {pipeline_mode = #tpu.pipeline_mode<synchronous>, transform_indices = @transform_1, window_bounds = array<i64: 128, 512>}, {pipeline_mode = #tpu.pipeline_mode<synchronous>, transform_indices = @transform_2, window_bounds = array<i64: 128, 512>}, {pipeline_mode = #tpu.pipeline_mode<synchronous>, transform_indices = @transform_3, window_bounds = array<i64: 1, 512>}, {pipeline_mode = #tpu.pipeline_mode<synchronous>, transform_indices = @transform_4, window_bounds = array<i64: 128, 128>}, {pipeline_mode = #tpu.pipeline_mode<synchronous>, transform_indices = @transform_5, window_bounds = array<i64: 1, 128>}, {transform_indices = @transform_6, window_bounds = array<i64: 64, 128>}]} {
    %c0_i32 = arith.constant 0 : i32
    %c8_i32 = arith.constant 8 : i32
    %0 = arith.addi %c0_i32, %c8_i32 : i32
    %c1_i32 = arith.constant 1 : i32
    scf.for %arg10 = %c0_i32 to %0 step %c1_i32  : i32 {
      %c1_i32_270 = arith.constant 1 : i32
      %816 = arith.muli %arg10, %c1_i32_270 : i32
      %c0_i32_271 = arith.constant 0 : i32
      %817 = arith.addi %c0_i32_271, %816 : i32
      %818 = arith.index_cast %817 : i32 to index
      %c0_272 = arith.constant 0 : index
      %c0_273 = arith.constant 0 : index
      %819 = vector.load %arg1[%818, %c0_272, %c0_273] : memref<8x64x128xbf16, #tpu.memory_space<vmem>>, vector<1x64x128xbf16>
      %820 = vector.shape_cast %819 : vector<1x64x128xbf16> to vector<64x128xbf16>
      %c0_274 = arith.constant 0 : index
      %c0_275 = arith.constant 0 : index
      %821 = vector.load %arg2[%c0_274, %c0_275] : memref<128x512xbf16, #tpu.memory_space<vmem>>, vector<128x512xbf16>
      %cst_276 = arith.constant dense<0.000000e+00> : vector<64x512xf32>
      %822 = tpu.matmul %820, %821, %cst_276 {dimension_numbers = #tpu.dot_dimension_numbers<[1], [0], [0], [1], [0, 0, 1, 1], [], []>} : vector<64x128xbf16>, vector<128x512xbf16>, vector<64x512xf32> -> vector<64x512xf32>
      %c0_277 = arith.constant 0 : index
      %c0_278 = arith.constant 0 : index
      %823 = vector.load %arg4[%c0_277, %c0_278] : memref<1x512xf32, #tpu.memory_space<vmem>>, vector<1x512xf32>
      %824 = vector.broadcast %823 : vector<1x512xf32> to vector<64x512xf32>
      %825 = arith.addf %822, %824 : vector<64x512xf32>
      %826 = arith.truncf %825 : vector<64x512xf32> to vector<64x512xbf16>
      %827 = arith.index_cast %817 : i32 to index
      %c0_279 = arith.constant 0 : index
      %c0_280 = arith.constant 0 : index
      %828 = vector.load %arg8[%827, %c0_279, %c0_280] : memref<8x64x512xbf16, #tpu.memory_space<vmem>>, vector<1x64x512xbf16>
      %829 = vector.shape_cast %828 : vector<1x64x512xbf16> to vector<64x512xbf16>
      %830 = vector.shape_cast %826 : vector<64x512xbf16> to vector<1x64x512xbf16>
      tpu.vector_store %arg8[%827, %c0_279, %c0_280], %830 {strides = array<i32>} : memref<8x64x512xbf16, #tpu.memory_space<vmem>>, vector<1x64x512xbf16>,
    }
    %c8_i32_0 = arith.constant 8 : i32
    %cst = arith.constant 0.000000e+00 : f32
    %1 = vector.broadcast %cst : f32 to vector<32x128xf32>
    %c0_i32_1 = arith.constant 0 : i32
    %2 = arith.index_cast %c0_i32_1 : i32 to index
    %c0 = arith.constant 0 : index
    %c0_2 = arith.constant 0 : index
    %3 = vector.load %arg8[%2, %c0, %c0_2] : memref<8x64x512xbf16, #tpu.memory_space<vmem>>, vector<1x64x512xbf16>
    %4 = vector.shape_cast %3 : vector<1x64x512xbf16> to vector<64x512xbf16>
    %5 = vector.extract_strided_slice %4 {offsets = [0, 0], sizes = [32, 512], strides = [1, 1]} : vector<64x512xbf16> to vector<32x512xbf16>
    %6 = arith.extf %5 : vector<32x512xbf16> to vector<32x512xf32>
    %7 = arith.truncf %1 : vector<32x128xf32> to vector<32x128xbf16>
    %c0_3 = arith.constant 0 : index
    %c0_4 = arith.constant 0 : index
    %8 = vector.load %arg3[%c0_3, %c0_4] : memref<128x512xbf16, #tpu.memory_space<vmem>>, vector<128x512xbf16>
    %cst_5 = arith.constant dense<0.000000e+00> : vector<32x512xf32>
    %9 = tpu.matmul %7, %8, %cst_5 {dimension_numbers = #tpu.dot_dimension_numbers<[1], [0], [0], [1], [0, 0, 1, 1], [], []>} : vector<32x128xbf16>, vector<128x512xbf16>, vector<32x512xf32> -> vector<32x512xf32>
    %10 = arith.addf %6, %9 : vector<32x512xf32>
    %11 = vector.extract_strided_slice %10 {offsets = [0, 0], sizes = [32, 128], strides = [1, 1]} : vector<32x512xf32> to vector<32x128xf32>
    %cst_6 = arith.constant 5.000000e-01 : f32
    %12 = vector.broadcast %cst_6 : f32 to vector<32x128xf32>
    %13 = arith.mulf %12, %11 : vector<32x128xf32>
    %14 = math.tanh %13 : vector<32x128xf32>
    %cst_7 = arith.constant 5.000000e-01 : f32
    %15 = vector.broadcast %cst_7 : f32 to vector<32x128xf32>
    %16 = arith.mulf %15, %14 : vector<32x128xf32>
    %cst_8 = arith.constant 5.000000e-01 : f32
    %17 = vector.broadcast %cst_8 : f32 to vector<32x128xf32>
    %18 = arith.addf %16, %17 : vector<32x128xf32>
    %19 = vector.extract_strided_slice %10 {offsets = [0, 128], sizes = [32, 128], strides = [1, 1]} : vector<32x512xf32> to vector<32x128xf32>
    %cst_9 = arith.constant 5.000000e-01 : f32
    %20 = vector.broadcast %cst_9 : f32 to vector<32x128xf32>
    %21 = arith.mulf %20, %19 : vector<32x128xf32>
    %22 = math.tanh %21 : vector<32x128xf32>
    %cst_10 = arith.constant 5.000000e-01 : f32
    %23 = vector.broadcast %cst_10 : f32 to vector<32x128xf32>
    %24 = arith.mulf %23, %22 : vector<32x128xf32>
    %cst_11 = arith.constant 5.000000e-01 : f32
    %25 = vector.broadcast %cst_11 : f32 to vector<32x128xf32>
    %26 = arith.addf %24, %25 : vector<32x128xf32>
    %27 = vector.extract_strided_slice %10 {offsets = [0, 256], sizes = [32, 128], strides = [1, 1]} : vector<32x512xf32> to vector<32x128xf32>
    %28 = math.tanh %27 : vector<32x128xf32>
    %29 = vector.extract_strided_slice %10 {offsets = [0, 384], sizes = [32, 128], strides = [1, 1]} : vector<32x512xf32> to vector<32x128xf32>
    %cst_12 = arith.constant 5.000000e-01 : f32
    %30 = vector.broadcast %cst_12 : f32 to vector<32x128xf32>
    %31 = arith.mulf %30, %29 : vector<32x128xf32>
    %32 = math.tanh %31 : vector<32x128xf32>
    %cst_13 = arith.constant 5.000000e-01 : f32
    %33 = vector.broadcast %cst_13 : f32 to vector<32x128xf32>
    %34 = arith.mulf %33, %32 : vector<32x128xf32>
    %cst_14 = arith.constant 5.000000e-01 : f32
    %35 = vector.broadcast %cst_14 : f32 to vector<32x128xf32>
    %36 = arith.addf %34, %35 : vector<32x128xf32>
    %37 = arith.mulf %26, %1 : vector<32x128xf32>
    %38 = arith.mulf %18, %28 : vector<32x128xf32>
    %39 = arith.addf %37, %38 : vector<32x128xf32>
    %40 = math.tanh %39 : vector<32x128xf32>
    %41 = arith.mulf %36, %40 : vector<32x128xf32>
    %42 = vector.extract_strided_slice %4 {offsets = [32, 0], sizes = [32, 512], strides = [1, 1]} : vector<64x512xbf16> to vector<32x512xbf16>
    %43 = arith.extf %42 : vector<32x512xbf16> to vector<32x512xf32>
    %44 = arith.truncf %1 : vector<32x128xf32> to vector<32x128xbf16>
    %c0_15 = arith.constant 0 : index
    %c0_16 = arith.constant 0 : index
    %45 = vector.load %arg3[%c0_15, %c0_16] : memref<128x512xbf16, #tpu.memory_space<vmem>>, vector<128x512xbf16>
    %cst_17 = arith.constant dense<0.000000e+00> : vector<32x512xf32>
    %46 = tpu.matmul %44, %45, %cst_17 {dimension_numbers = #tpu.dot_dimension_numbers<[1], [0], [0], [1], [0, 0, 1, 1], [], []>} : vector<32x128xbf16>, vector<128x512xbf16>, vector<32x512xf32> -> vector<32x512xf32>
    %47 = arith.addf %43, %46 : vector<32x512xf32>
    %48 = vector.extract_strided_slice %47 {offsets = [0, 0], sizes = [32, 128], strides = [1, 1]} : vector<32x512xf32> to vector<32x128xf32>
    %cst_18 = arith.constant 5.000000e-01 : f32
    %49 = vector.broadcast %cst_18 : f32 to vector<32x128xf32>
    %50 = arith.mulf %49, %48 : vector<32x128xf32>
    %51 = math.tanh %50 : vector<32x128xf32>
    %cst_19 = arith.constant 5.000000e-01 : f32
    %52 = vector.broadcast %cst_19 : f32 to vector<32x128xf32>
    %53 = arith.mulf %52, %51 : vector<32x128xf32>
    %cst_20 = arith.constant 5.000000e-01 : f32
    %54 = vector.broadcast %cst_20 : f32 to vector<32x128xf32>
    %55 = arith.addf %53, %54 : vector<32x128xf32>
    %56 = vector.extract_strided_slice %47 {offsets = [0, 128], sizes = [32, 128], strides = [1, 1]} : vector<32x512xf32> to vector<32x128xf32>
    %cst_21 = arith.constant 5.000000e-01 : f32
    %57 = vector.broadcast %cst_21 : f32 to vector<32x128xf32>
    %58 = arith.mulf %57, %56 : vector<32x128xf32>
    %59 = math.tanh %58 : vector<32x128xf32>
    %cst_22 = arith.constant 5.000000e-01 : f32
    %60 = vector.broadcast %cst_22 : f32 to vector<32x128xf32>
    %61 = arith.mulf %60, %59 : vector<32x128xf32>
    %cst_23 = arith.constant 5.000000e-01 : f32
    %62 = vector.broadcast %cst_23 : f32 to vector<32x128xf32>
    %63 = arith.addf %61, %62 : vector<32x128xf32>
    %64 = vector.extract_strided_slice %47 {offsets = [0, 256], sizes = [32, 128], strides = [1, 1]} : vector<32x512xf32> to vector<32x128xf32>
    %65 = math.tanh %64 : vector<32x128xf32>
    %66 = vector.extract_strided_slice %47 {offsets = [0, 384], sizes = [32, 128], strides = [1, 1]} : vector<32x512xf32> to vector<32x128xf32>
    %cst_24 = arith.constant 5.000000e-01 : f32
    %67 = vector.broadcast %cst_24 : f32 to vector<32x128xf32>
    %68 = arith.mulf %67, %66 : vector<32x128xf32>
    %69 = math.tanh %68 : vector<32x128xf32>
    %cst_25 = arith.constant 5.000000e-01 : f32
    %70 = vector.broadcast %cst_25 : f32 to vector<32x128xf32>
    %71 = arith.mulf %70, %69 : vector<32x128xf32>
    %cst_26 = arith.constant 5.000000e-01 : f32
    %72 = vector.broadcast %cst_26 : f32 to vector<32x128xf32>
    %73 = arith.addf %71, %72 : vector<32x128xf32>
    %74 = arith.mulf %63, %1 : vector<32x128xf32>
    %75 = arith.mulf %55, %65 : vector<32x128xf32>
    %76 = arith.addf %74, %75 : vector<32x128xf32>
    %77 = math.tanh %76 : vector<32x128xf32>
    %78 = arith.mulf %73, %77 : vector<32x128xf32>
    %79 = tpu.concatenate %41, %78 in 0 : vector<32x128xf32>, vector<32x128xf32> -> vector<64x128xf32>
    %80 = arith.index_cast %c0_i32_1 : i32 to index
    %c0_27 = arith.constant 0 : index
    %c0_28 = arith.constant 0 : index
    %81 = vector.load %arg9[%80, %c0_27, %c0_28] : memref<8x64x128xf32, #tpu.memory_space<vmem>>, vector<1x64x128xf32>
    %82 = vector.shape_cast %81 : vector<1x64x128xf32> to vector<64x128xf32>
    %83 = vector.shape_cast %79 : vector<64x128xf32> to vector<1x64x128xf32>
    tpu.vector_store %arg9[%80, %c0_27, %c0_28], %83 {strides = array<i32>} : memref<8x64x128xf32, #tpu.memory_space<vmem>>, vector<1x64x128xf32>,
    %c1_i32_29 = arith.constant 1 : i32
    %84 = arith.index_cast %c1_i32_29 : i32 to index
    %c0_30 = arith.constant 0 : index
    %c0_31 = arith.constant 0 : index
    %85 = vector.load %arg8[%84, %c0_30, %c0_31] : memref<8x64x512xbf16, #tpu.memory_space<vmem>>, vector<1x64x512xbf16>
    %86 = vector.shape_cast %85 : vector<1x64x512xbf16> to vector<64x512xbf16>
    %87 = vector.extract_strided_slice %86 {offsets = [0, 0], sizes = [32, 512], strides = [1, 1]} : vector<64x512xbf16> to vector<32x512xbf16>
    %88 = arith.extf %87 : vector<32x512xbf16> to vector<32x512xf32>
    %89 = arith.truncf %41 : vector<32x128xf32> to vector<32x128xbf16>
    %c0_32 = arith.constant 0 : index
    %c0_33 = arith.constant 0 : index
    %90 = vector.load %arg3[%c0_32, %c0_33] : memref<128x512xbf16, #tpu.memory_space<vmem>>, vector<128x512xbf16>
    %cst_34 = arith.constant dense<0.000000e+00> : vector<32x512xf32>
    %91 = tpu.matmul %89, %90, %cst_34 {dimension_numbers = #tpu.dot_dimension_numbers<[1], [0], [0], [1], [0, 0, 1, 1], [], []>} : vector<32x128xbf16>, vector<128x512xbf16>, vector<32x512xf32> -> vector<32x512xf32>
    %92 = arith.addf %88, %91 : vector<32x512xf32>
    %93 = vector.extract_strided_slice %92 {offsets = [0, 0], sizes = [32, 128], strides = [1, 1]} : vector<32x512xf32> to vector<32x128xf32>
    %cst_35 = arith.constant 5.000000e-01 : f32
    %94 = vector.broadcast %cst_35 : f32 to vector<32x128xf32>
    %95 = arith.mulf %94, %93 : vector<32x128xf32>
    %96 = math.tanh %95 : vector<32x128xf32>
    %cst_36 = arith.constant 5.000000e-01 : f32
    %97 = vector.broadcast %cst_36 : f32 to vector<32x128xf32>
    %98 = arith.mulf %97, %96 : vector<32x128xf32>
    %cst_37 = arith.constant 5.000000e-01 : f32
    %99 = vector.broadcast %cst_37 : f32 to vector<32x128xf32>
    %100 = arith.addf %98, %99 : vector<32x128xf32>
    %101 = vector.extract_strided_slice %92 {offsets = [0, 128], sizes = [32, 128], strides = [1, 1]} : vector<32x512xf32> to vector<32x128xf32>
    %cst_38 = arith.constant 5.000000e-01 : f32
    %102 = vector.broadcast %cst_38 : f32 to vector<32x128xf32>
    %103 = arith.mulf %102, %101 : vector<32x128xf32>
    %104 = math.tanh %103 : vector<32x128xf32>
    %cst_39 = arith.constant 5.000000e-01 : f32
    %105 = vector.broadcast %cst_39 : f32 to vector<32x128xf32>
    %106 = arith.mulf %105, %104 : vector<32x128xf32>
    %cst_40 = arith.constant 5.000000e-01 : f32
    %107 = vector.broadcast %cst_40 : f32 to vector<32x128xf32>
    %108 = arith.addf %106, %107 : vector<32x128xf32>
    %109 = vector.extract_strided_slice %92 {offsets = [0, 256], sizes = [32, 128], strides = [1, 1]} : vector<32x512xf32> to vector<32x128xf32>
    %110 = math.tanh %109 : vector<32x128xf32>
    %111 = vector.extract_strided_slice %92 {offsets = [0, 384], sizes = [32, 128], strides = [1, 1]} : vector<32x512xf32> to vector<32x128xf32>
    %cst_41 = arith.constant 5.000000e-01 : f32
    %112 = vector.broadcast %cst_41 : f32 to vector<32x128xf32>
    %113 = arith.mulf %112, %111 : vector<32x128xf32>
    %114 = math.tanh %113 : vector<32x128xf32>
    %cst_42 = arith.constant 5.000000e-01 : f32
    %115 = vector.broadcast %cst_42 : f32 to vector<32x128xf32>
    %116 = arith.mulf %115, %114 : vector<32x128xf32>
    %cst_43 = arith.constant 5.000000e-01 : f32
    %117 = vector.broadcast %cst_43 : f32 to vector<32x128xf32>
    %118 = arith.addf %116, %117 : vector<32x128xf32>
    %119 = arith.mulf %108, %39 : vector<32x128xf32>
    %120 = arith.mulf %100, %110 : vector<32x128xf32>
    %121 = arith.addf %119, %120 : vector<32x128xf32>
    %122 = math.tanh %121 : vector<32x128xf32>
    %123 = arith.mulf %118, %122 : vector<32x128xf32>
    %124 = vector.extract_strided_slice %86 {offsets = [32, 0], sizes = [32, 512], strides = [1, 1]} : vector<64x512xbf16> to vector<32x512xbf16>
    %125 = arith.extf %124 : vector<32x512xbf16> to vector<32x512xf32>
    %126 = arith.truncf %78 : vector<32x128xf32> to vector<32x128xbf16>
    %c0_44 = arith.constant 0 : index
    %c0_45 = arith.constant 0 : index
    %127 = vector.load %arg3[%c0_44, %c0_45] : memref<128x512xbf16, #tpu.memory_space<vmem>>, vector<128x512xbf16>
    %cst_46 = arith.constant dense<0.000000e+00> : vector<32x512xf32>
    %128 = tpu.matmul %126, %127, %cst_46 {dimension_numbers = #tpu.dot_dimension_numbers<[1], [0], [0], [1], [0, 0, 1, 1], [], []>} : vector<32x128xbf16>, vector<128x512xbf16>, vector<32x512xf32> -> vector<32x512xf32>
    %129 = arith.addf %125, %128 : vector<32x512xf32>
    %130 = vector.extract_strided_slice %129 {offsets = [0, 0], sizes = [32, 128], strides = [1, 1]} : vector<32x512xf32> to vector<32x128xf32>
    %cst_47 = arith.constant 5.000000e-01 : f32
    %131 = vector.broadcast %cst_47 : f32 to vector<32x128xf32>
    %132 = arith.mulf %131, %130 : vector<32x128xf32>
    %133 = math.tanh %132 : vector<32x128xf32>
    %cst_48 = arith.constant 5.000000e-01 : f32
    %134 = vector.broadcast %cst_48 : f32 to vector<32x128xf32>
    %135 = arith.mulf %134, %133 : vector<32x128xf32>
    %cst_49 = arith.constant 5.000000e-01 : f32
    %136 = vector.broadcast %cst_49 : f32 to vector<32x128xf32>
    %137 = arith.addf %135, %136 : vector<32x128xf32>
    %138 = vector.extract_strided_slice %129 {offsets = [0, 128], sizes = [32, 128], strides = [1, 1]} : vector<32x512xf32> to vector<32x128xf32>
    %cst_50 = arith.constant 5.000000e-01 : f32
    %139 = vector.broadcast %cst_50 : f32 to vector<32x128xf32>
    %140 = arith.mulf %139, %138 : vector<32x128xf32>
    %141 = math.tanh %140 : vector<32x128xf32>
    %cst_51 = arith.constant 5.000000e-01 : f32
    %142 = vector.broadcast %cst_51 : f32 to vector<32x128xf32>
    %143 = arith.mulf %142, %141 : vector<32x128xf32>
    %cst_52 = arith.constant 5.000000e-01 : f32
    %144 = vector.broadcast %cst_52 : f32 to vector<32x128xf32>
    %145 = arith.addf %143, %144 : vector<32x128xf32>
    %146 = vector.extract_strided_slice %129 {offsets = [0, 256], sizes = [32, 128], strides = [1, 1]} : vector<32x512xf32> to vector<32x128xf32>
    %147 = math.tanh %146 : vector<32x128xf32>
    %148 = vector.extract_strided_slice %129 {offsets = [0, 384], sizes = [32, 128], strides = [1, 1]} : vector<32x512xf32> to vector<32x128xf32>
    %cst_53 = arith.constant 5.000000e-01 : f32
    %149 = vector.broadcast %cst_53 : f32 to vector<32x128xf32>
    %150 = arith.mulf %149, %148 : vector<32x128xf32>
    %151 = math.tanh %150 : vector<32x128xf32>
    %cst_54 = arith.constant 5.000000e-01 : f32
    %152 = vector.broadcast %cst_54 : f32 to vector<32x128xf32>
    %153 = arith.mulf %152, %151 : vector<32x128xf32>
    %cst_55 = arith.constant 5.000000e-01 : f32
    %154 = vector.broadcast %cst_55 : f32 to vector<32x128xf32>
    %155 = arith.addf %153, %154 : vector<32x128xf32>
    %156 = arith.mulf %145, %76 : vector<32x128xf32>
    %157 = arith.mulf %137, %147 : vector<32x128xf32>
    %158 = arith.addf %156, %157 : vector<32x128xf32>
    %159 = math.tanh %158 : vector<32x128xf32>
    %160 = arith.mulf %155, %159 : vector<32x128xf32>
    %161 = tpu.concatenate %123, %160 in 0 : vector<32x128xf32>, vector<32x128xf32> -> vector<64x128xf32>
    %162 = arith.index_cast %c1_i32_29 : i32 to index
    %c0_56 = arith.constant 0 : index
    %c0_57 = arith.constant 0 : index
    %163 = vector.load %arg9[%162, %c0_56, %c0_57] : memref<8x64x128xf32, #tpu.memory_space<vmem>>, vector<1x64x128xf32>
    %164 = vector.shape_cast %163 : vector<1x64x128xf32> to vector<64x128xf32>
    %165 = vector.shape_cast %161 : vector<64x128xf32> to vector<1x64x128xf32>
    tpu.vector_store %arg9[%162, %c0_56, %c0_57], %165 {strides = array<i32>} : memref<8x64x128xf32, #tpu.memory_space<vmem>>, vector<1x64x128xf32>,
    %c2_i32 = arith.constant 2 : i32
    %166 = arith.index_cast %c2_i32 : i32 to index
    %c0_58 = arith.constant 0 : index
    %c0_59 = arith.constant 0 : index
    %167 = vector.load %arg8[%166, %c0_58, %c0_59] : memref<8x64x512xbf16, #tpu.memory_space<vmem>>, vector<1x64x512xbf16>
    %168 = vector.shape_cast %167 : vector<1x64x512xbf16> to vector<64x512xbf16>
    %169 = vector.extract_strided_slice %168 {offsets = [0, 0], sizes = [32, 512], strides = [1, 1]} : vector<64x512xbf16> to vector<32x512xbf16>
    %170 = arith.extf %169 : vector<32x512xbf16> to vector<32x512xf32>
    %171 = arith.truncf %123 : vector<32x128xf32> to vector<32x128xbf16>
    %c0_60 = arith.constant 0 : index
    %c0_61 = arith.constant 0 : index
    %172 = vector.load %arg3[%c0_60, %c0_61] : memref<128x512xbf16, #tpu.memory_space<vmem>>, vector<128x512xbf16>
    %cst_62 = arith.constant dense<0.000000e+00> : vector<32x512xf32>
    %173 = tpu.matmul %171, %172, %cst_62 {dimension_numbers = #tpu.dot_dimension_numbers<[1], [0], [0], [1], [0, 0, 1, 1], [], []>} : vector<32x128xbf16>, vector<128x512xbf16>, vector<32x512xf32> -> vector<32x512xf32>
    %174 = arith.addf %170, %173 : vector<32x512xf32>
    %175 = vector.extract_strided_slice %174 {offsets = [0, 0], sizes = [32, 128], strides = [1, 1]} : vector<32x512xf32> to vector<32x128xf32>
    %cst_63 = arith.constant 5.000000e-01 : f32
    %176 = vector.broadcast %cst_63 : f32 to vector<32x128xf32>
    %177 = arith.mulf %176, %175 : vector<32x128xf32>
    %178 = math.tanh %177 : vector<32x128xf32>
    %cst_64 = arith.constant 5.000000e-01 : f32
    %179 = vector.broadcast %cst_64 : f32 to vector<32x128xf32>
    %180 = arith.mulf %179, %178 : vector<32x128xf32>
    %cst_65 = arith.constant 5.000000e-01 : f32
    %181 = vector.broadcast %cst_65 : f32 to vector<32x128xf32>
    %182 = arith.addf %180, %181 : vector<32x128xf32>
    %183 = vector.extract_strided_slice %174 {offsets = [0, 128], sizes = [32, 128], strides = [1, 1]} : vector<32x512xf32> to vector<32x128xf32>
    %cst_66 = arith.constant 5.000000e-01 : f32
    %184 = vector.broadcast %cst_66 : f32 to vector<32x128xf32>
    %185 = arith.mulf %184, %183 : vector<32x128xf32>
    %186 = math.tanh %185 : vector<32x128xf32>
    %cst_67 = arith.constant 5.000000e-01 : f32
    %187 = vector.broadcast %cst_67 : f32 to vector<32x128xf32>
    %188 = arith.mulf %187, %186 : vector<32x128xf32>
    %cst_68 = arith.constant 5.000000e-01 : f32
    %189 = vector.broadcast %cst_68 : f32 to vector<32x128xf32>
    %190 = arith.addf %188, %189 : vector<32x128xf32>
    %191 = vector.extract_strided_slice %174 {offsets = [0, 256], sizes = [32, 128], strides = [1, 1]} : vector<32x512xf32> to vector<32x128xf32>
    %192 = math.tanh %191 : vector<32x128xf32>
    %193 = vector.extract_strided_slice %174 {offsets = [0, 384], sizes = [32, 128], strides = [1, 1]} : vector<32x512xf32> to vector<32x128xf32>
    %cst_69 = arith.constant 5.000000e-01 : f32
    %194 = vector.broadcast %cst_69 : f32 to vector<32x128xf32>
    %195 = arith.mulf %194, %193 : vector<32x128xf32>
    %196 = math.tanh %195 : vector<32x128xf32>
    %cst_70 = arith.constant 5.000000e-01 : f32
    %197 = vector.broadcast %cst_70 : f32 to vector<32x128xf32>
    %198 = arith.mulf %197, %196 : vector<32x128xf32>
    %cst_71 = arith.constant 5.000000e-01 : f32
    %199 = vector.broadcast %cst_71 : f32 to vector<32x128xf32>
    %200 = arith.addf %198, %199 : vector<32x128xf32>
    %201 = arith.mulf %190, %121 : vector<32x128xf32>
    %202 = arith.mulf %182, %192 : vector<32x128xf32>
    %203 = arith.addf %201, %202 : vector<32x128xf32>
    %204 = math.tanh %203 : vector<32x128xf32>
    %205 = arith.mulf %200, %204 : vector<32x128xf32>
    %206 = vector.extract_strided_slice %168 {offsets = [32, 0], sizes = [32, 512], strides = [1, 1]} : vector<64x512xbf16> to vector<32x512xbf16>
    %207 = arith.extf %206 : vector<32x512xbf16> to vector<32x512xf32>
    %208 = arith.truncf %160 : vector<32x128xf32> to vector<32x128xbf16>
    %c0_72 = arith.constant 0 : index
    %c0_73 = arith.constant 0 : index
    %209 = vector.load %arg3[%c0_72, %c0_73] : memref<128x512xbf16, #tpu.memory_space<vmem>>, vector<128x512xbf16>
    %cst_74 = arith.constant dense<0.000000e+00> : vector<32x512xf32>
    %210 = tpu.matmul %208, %209, %cst_74 {dimension_numbers = #tpu.dot_dimension_numbers<[1], [0], [0], [1], [0, 0, 1, 1], [], []>} : vector<32x128xbf16>, vector<128x512xbf16>, vector<32x512xf32> -> vector<32x512xf32>
    %211 = arith.addf %207, %210 : vector<32x512xf32>
    %212 = vector.extract_strided_slice %211 {offsets = [0, 0], sizes = [32, 128], strides = [1, 1]} : vector<32x512xf32> to vector<32x128xf32>
    %cst_75 = arith.constant 5.000000e-01 : f32
    %213 = vector.broadcast %cst_75 : f32 to vector<32x128xf32>
    %214 = arith.mulf %213, %212 : vector<32x128xf32>
    %215 = math.tanh %214 : vector<32x128xf32>
    %cst_76 = arith.constant 5.000000e-01 : f32
    %216 = vector.broadcast %cst_76 : f32 to vector<32x128xf32>
    %217 = arith.mulf %216, %215 : vector<32x128xf32>
    %cst_77 = arith.constant 5.000000e-01 : f32
    %218 = vector.broadcast %cst_77 : f32 to vector<32x128xf32>
    %219 = arith.addf %217, %218 : vector<32x128xf32>
    %220 = vector.extract_strided_slice %211 {offsets = [0, 128], sizes = [32, 128], strides = [1, 1]} : vector<32x512xf32> to vector<32x128xf32>
    %cst_78 = arith.constant 5.000000e-01 : f32
    %221 = vector.broadcast %cst_78 : f32 to vector<32x128xf32>
    %222 = arith.mulf %221, %220 : vector<32x128xf32>
    %223 = math.tanh %222 : vector<32x128xf32>
    %cst_79 = arith.constant 5.000000e-01 : f32
    %224 = vector.broadcast %cst_79 : f32 to vector<32x128xf32>
    %225 = arith.mulf %224, %223 : vector<32x128xf32>
    %cst_80 = arith.constant 5.000000e-01 : f32
    %226 = vector.broadcast %cst_80 : f32 to vector<32x128xf32>
    %227 = arith.addf %225, %226 : vector<32x128xf32>
    %228 = vector.extract_strided_slice %211 {offsets = [0, 256], sizes = [32, 128], strides = [1, 1]} : vector<32x512xf32> to vector<32x128xf32>
    %229 = math.tanh %228 : vector<32x128xf32>
    %230 = vector.extract_strided_slice %211 {offsets = [0, 384], sizes = [32, 128], strides = [1, 1]} : vector<32x512xf32> to vector<32x128xf32>
    %cst_81 = arith.constant 5.000000e-01 : f32
    %231 = vector.broadcast %cst_81 : f32 to vector<32x128xf32>
    %232 = arith.mulf %231, %230 : vector<32x128xf32>
    %233 = math.tanh %232 : vector<32x128xf32>
    %cst_82 = arith.constant 5.000000e-01 : f32
    %234 = vector.broadcast %cst_82 : f32 to vector<32x128xf32>
    %235 = arith.mulf %234, %233 : vector<32x128xf32>
    %cst_83 = arith.constant 5.000000e-01 : f32
    %236 = vector.broadcast %cst_83 : f32 to vector<32x128xf32>
    %237 = arith.addf %235, %236 : vector<32x128xf32>
    %238 = arith.mulf %227, %158 : vector<32x128xf32>
    %239 = arith.mulf %219, %229 : vector<32x128xf32>
    %240 = arith.addf %238, %239 : vector<32x128xf32>
    %241 = math.tanh %240 : vector<32x128xf32>
    %242 = arith.mulf %237, %241 : vector<32x128xf32>
    %243 = tpu.concatenate %205, %242 in 0 : vector<32x128xf32>, vector<32x128xf32> -> vector<64x128xf32>
    %244 = arith.index_cast %c2_i32 : i32 to index
    %c0_84 = arith.constant 0 : index
    %c0_85 = arith.constant 0 : index
    %245 = vector.load %arg9[%244, %c0_84, %c0_85] : memref<8x64x128xf32, #tpu.memory_space<vmem>>, vector<1x64x128xf32>
    %246 = vector.shape_cast %245 : vector<1x64x128xf32> to vector<64x128xf32>
    %247 = vector.shape_cast %243 : vector<64x128xf32> to vector<1x64x128xf32>
    tpu.vector_store %arg9[%244, %c0_84, %c0_85], %247 {strides = array<i32>} : memref<8x64x128xf32, #tpu.memory_space<vmem>>, vector<1x64x128xf32>,
    %c3_i32 = arith.constant 3 : i32
    %248 = arith.index_cast %c3_i32 : i32 to index
    %c0_86 = arith.constant 0 : index
    %c0_87 = arith.constant 0 : index
    %249 = vector.load %arg8[%248, %c0_86, %c0_87] : memref<8x64x512xbf16, #tpu.memory_space<vmem>>, vector<1x64x512xbf16>
    %250 = vector.shape_cast %249 : vector<1x64x512xbf16> to vector<64x512xbf16>
    %251 = vector.extract_strided_slice %250 {offsets = [0, 0], sizes = [32, 512], strides = [1, 1]} : vector<64x512xbf16> to vector<32x512xbf16>
    %252 = arith.extf %251 : vector<32x512xbf16> to vector<32x512xf32>
    %253 = arith.truncf %205 : vector<32x128xf32> to vector<32x128xbf16>
    %c0_88 = arith.constant 0 : index
    %c0_89 = arith.constant 0 : index
    %254 = vector.load %arg3[%c0_88, %c0_89] : memref<128x512xbf16, #tpu.memory_space<vmem>>, vector<128x512xbf16>
    %cst_90 = arith.constant dense<0.000000e+00> : vector<32x512xf32>
    %255 = tpu.matmul %253, %254, %cst_90 {dimension_numbers = #tpu.dot_dimension_numbers<[1], [0], [0], [1], [0, 0, 1, 1], [], []>} : vector<32x128xbf16>, vector<128x512xbf16>, vector<32x512xf32> -> vector<32x512xf32>
    %256 = arith.addf %252, %255 : vector<32x512xf32>
    %257 = vector.extract_strided_slice %256 {offsets = [0, 0], sizes = [32, 128], strides = [1, 1]} : vector<32x512xf32> to vector<32x128xf32>
    %cst_91 = arith.constant 5.000000e-01 : f32
    %258 = vector.broadcast %cst_91 : f32 to vector<32x128xf32>
    %259 = arith.mulf %258, %257 : vector<32x128xf32>
    %260 = math.tanh %259 : vector<32x128xf32>
    %cst_92 = arith.constant 5.000000e-01 : f32
    %261 = vector.broadcast %cst_92 : f32 to vector<32x128xf32>
    %262 = arith.mulf %261, %260 : vector<32x128xf32>
    %cst_93 = arith.constant 5.000000e-01 : f32
    %263 = vector.broadcast %cst_93 : f32 to vector<32x128xf32>
    %264 = arith.addf %262, %263 : vector<32x128xf32>
    %265 = vector.extract_strided_slice %256 {offsets = [0, 128], sizes = [32, 128], strides = [1, 1]} : vector<32x512xf32> to vector<32x128xf32>
    %cst_94 = arith.constant 5.000000e-01 : f32
    %266 = vector.broadcast %cst_94 : f32 to vector<32x128xf32>
    %267 = arith.mulf %266, %265 : vector<32x128xf32>
    %268 = math.tanh %267 : vector<32x128xf32>
    %cst_95 = arith.constant 5.000000e-01 : f32
    %269 = vector.broadcast %cst_95 : f32 to vector<32x128xf32>
    %270 = arith.mulf %269, %268 : vector<32x128xf32>
    %cst_96 = arith.constant 5.000000e-01 : f32
    %271 = vector.broadcast %cst_96 : f32 to vector<32x128xf32>
    %272 = arith.addf %270, %271 : vector<32x128xf32>
    %273 = vector.extract_strided_slice %256 {offsets = [0, 256], sizes = [32, 128], strides = [1, 1]} : vector<32x512xf32> to vector<32x128xf32>
    %274 = math.tanh %273 : vector<32x128xf32>
    %275 = vector.extract_strided_slice %256 {offsets = [0, 384], sizes = [32, 128], strides = [1, 1]} : vector<32x512xf32> to vector<32x128xf32>
    %cst_97 = arith.constant 5.000000e-01 : f32
    %276 = vector.broadcast %cst_97 : f32 to vector<32x128xf32>
    %277 = arith.mulf %276, %275 : vector<32x128xf32>
    %278 = math.tanh %277 : vector<32x128xf32>
    %cst_98 = arith.constant 5.000000e-01 : f32
    %279 = vector.broadcast %cst_98 : f32 to vector<32x128xf32>
    %280 = arith.mulf %279, %278 : vector<32x128xf32>
    %cst_99 = arith.constant 5.000000e-01 : f32
    %281 = vector.broadcast %cst_99 : f32 to vector<32x128xf32>
    %282 = arith.addf %280, %281 : vector<32x128xf32>
    %283 = arith.mulf %272, %203 : vector<32x128xf32>
    %284 = arith.mulf %264, %274 : vector<32x128xf32>
    %285 = arith.addf %283, %284 : vector<32x128xf32>
    %286 = math.tanh %285 : vector<32x128xf32>
    %287 = arith.mulf %282, %286 : vector<32x128xf32>
    %288 = vector.extract_strided_slice %250 {offsets = [32, 0], sizes = [32, 512], strides = [1, 1]} : vector<64x512xbf16> to vector<32x512xbf16>
    %289 = arith.extf %288 : vector<32x512xbf16> to vector<32x512xf32>
    %290 = arith.truncf %242 : vector<32x128xf32> to vector<32x128xbf16>
    %c0_100 = arith.constant 0 : index
    %c0_101 = arith.constant 0 : index
    %291 = vector.load %arg3[%c0_100, %c0_101] : memref<128x512xbf16, #tpu.memory_space<vmem>>, vector<128x512xbf16>
    %cst_102 = arith.constant dense<0.000000e+00> : vector<32x512xf32>
    %292 = tpu.matmul %290, %291, %cst_102 {dimension_numbers = #tpu.dot_dimension_numbers<[1], [0], [0], [1], [0, 0, 1, 1], [], []>} : vector<32x128xbf16>, vector<128x512xbf16>, vector<32x512xf32> -> vector<32x512xf32>
    %293 = arith.addf %289, %292 : vector<32x512xf32>
    %294 = vector.extract_strided_slice %293 {offsets = [0, 0], sizes = [32, 128], strides = [1, 1]} : vector<32x512xf32> to vector<32x128xf32>
    %cst_103 = arith.constant 5.000000e-01 : f32
    %295 = vector.broadcast %cst_103 : f32 to vector<32x128xf32>
    %296 = arith.mulf %295, %294 : vector<32x128xf32>
    %297 = math.tanh %296 : vector<32x128xf32>
    %cst_104 = arith.constant 5.000000e-01 : f32
    %298 = vector.broadcast %cst_104 : f32 to vector<32x128xf32>
    %299 = arith.mulf %298, %297 : vector<32x128xf32>
    %cst_105 = arith.constant 5.000000e-01 : f32
    %300 = vector.broadcast %cst_105 : f32 to vector<32x128xf32>
    %301 = arith.addf %299, %300 : vector<32x128xf32>
    %302 = vector.extract_strided_slice %293 {offsets = [0, 128], sizes = [32, 128], strides = [1, 1]} : vector<32x512xf32> to vector<32x128xf32>
    %cst_106 = arith.constant 5.000000e-01 : f32
    %303 = vector.broadcast %cst_106 : f32 to vector<32x128xf32>
    %304 = arith.mulf %303, %302 : vector<32x128xf32>
    %305 = math.tanh %304 : vector<32x128xf32>
    %cst_107 = arith.constant 5.000000e-01 : f32
    %306 = vector.broadcast %cst_107 : f32 to vector<32x128xf32>
    %307 = arith.mulf %306, %305 : vector<32x128xf32>
    %cst_108 = arith.constant 5.000000e-01 : f32
    %308 = vector.broadcast %cst_108 : f32 to vector<32x128xf32>
    %309 = arith.addf %307, %308 : vector<32x128xf32>
    %310 = vector.extract_strided_slice %293 {offsets = [0, 256], sizes = [32, 128], strides = [1, 1]} : vector<32x512xf32> to vector<32x128xf32>
    %311 = math.tanh %310 : vector<32x128xf32>
    %312 = vector.extract_strided_slice %293 {offsets = [0, 384], sizes = [32, 128], strides = [1, 1]} : vector<32x512xf32> to vector<32x128xf32>
    %cst_109 = arith.constant 5.000000e-01 : f32
    %313 = vector.broadcast %cst_109 : f32 to vector<32x128xf32>
    %314 = arith.mulf %313, %312 : vector<32x128xf32>
    %315 = math.tanh %314 : vector<32x128xf32>
    %cst_110 = arith.constant 5.000000e-01 : f32
    %316 = vector.broadcast %cst_110 : f32 to vector<32x128xf32>
    %317 = arith.mulf %316, %315 : vector<32x128xf32>
    %cst_111 = arith.constant 5.000000e-01 : f32
    %318 = vector.broadcast %cst_111 : f32 to vector<32x128xf32>
    %319 = arith.addf %317, %318 : vector<32x128xf32>
    %320 = arith.mulf %309, %240 : vector<32x128xf32>
    %321 = arith.mulf %301, %311 : vector<32x128xf32>
    %322 = arith.addf %320, %321 : vector<32x128xf32>
    %323 = math.tanh %322 : vector<32x128xf32>
    %324 = arith.mulf %319, %323 : vector<32x128xf32>
    %325 = tpu.concatenate %287, %324 in 0 : vector<32x128xf32>, vector<32x128xf32> -> vector<64x128xf32>
    %326 = arith.index_cast %c3_i32 : i32 to index
    %c0_112 = arith.constant 0 : index
    %c0_113 = arith.constant 0 : index
    %327 = vector.load %arg9[%326, %c0_112, %c0_113] : memref<8x64x128xf32, #tpu.memory_space<vmem>>, vector<1x64x128xf32>
    %328 = vector.shape_cast %327 : vector<1x64x128xf32> to vector<64x128xf32>
    %329 = vector.shape_cast %325 : vector<64x128xf32> to vector<1x64x128xf32>
    tpu.vector_store %arg9[%326, %c0_112, %c0_113], %329 {strides = array<i32>} : memref<8x64x128xf32, #tpu.memory_space<vmem>>, vector<1x64x128xf32>,
    %c4_i32 = arith.constant 4 : i32
    %330 = arith.index_cast %c4_i32 : i32 to index
    %c0_114 = arith.constant 0 : index
    %c0_115 = arith.constant 0 : index
    %331 = vector.load %arg8[%330, %c0_114, %c0_115] : memref<8x64x512xbf16, #tpu.memory_space<vmem>>, vector<1x64x512xbf16>
    %332 = vector.shape_cast %331 : vector<1x64x512xbf16> to vector<64x512xbf16>
    %333 = vector.extract_strided_slice %332 {offsets = [0, 0], sizes = [32, 512], strides = [1, 1]} : vector<64x512xbf16> to vector<32x512xbf16>
    %334 = arith.extf %333 : vector<32x512xbf16> to vector<32x512xf32>
    %335 = arith.truncf %287 : vector<32x128xf32> to vector<32x128xbf16>
    %c0_116 = arith.constant 0 : index
    %c0_117 = arith.constant 0 : index
    %336 = vector.load %arg3[%c0_116, %c0_117] : memref<128x512xbf16, #tpu.memory_space<vmem>>, vector<128x512xbf16>
    %cst_118 = arith.constant dense<0.000000e+00> : vector<32x512xf32>
    %337 = tpu.matmul %335, %336, %cst_118 {dimension_numbers = #tpu.dot_dimension_numbers<[1], [0], [0], [1], [0, 0, 1, 1], [], []>} : vector<32x128xbf16>, vector<128x512xbf16>, vector<32x512xf32> -> vector<32x512xf32>
    %338 = arith.addf %334, %337 : vector<32x512xf32>
    %339 = vector.extract_strided_slice %338 {offsets = [0, 0], sizes = [32, 128], strides = [1, 1]} : vector<32x512xf32> to vector<32x128xf32>
    %cst_119 = arith.constant 5.000000e-01 : f32
    %340 = vector.broadcast %cst_119 : f32 to vector<32x128xf32>
    %341 = arith.mulf %340, %339 : vector<32x128xf32>
    %342 = math.tanh %341 : vector<32x128xf32>
    %cst_120 = arith.constant 5.000000e-01 : f32
    %343 = vector.broadcast %cst_120 : f32 to vector<32x128xf32>
    %344 = arith.mulf %343, %342 : vector<32x128xf32>
    %cst_121 = arith.constant 5.000000e-01 : f32
    %345 = vector.broadcast %cst_121 : f32 to vector<32x128xf32>
    %346 = arith.addf %344, %345 : vector<32x128xf32>
    %347 = vector.extract_strided_slice %338 {offsets = [0, 128], sizes = [32, 128], strides = [1, 1]} : vector<32x512xf32> to vector<32x128xf32>
    %cst_122 = arith.constant 5.000000e-01 : f32
    %348 = vector.broadcast %cst_122 : f32 to vector<32x128xf32>
    %349 = arith.mulf %348, %347 : vector<32x128xf32>
    %350 = math.tanh %349 : vector<32x128xf32>
    %cst_123 = arith.constant 5.000000e-01 : f32
    %351 = vector.broadcast %cst_123 : f32 to vector<32x128xf32>
    %352 = arith.mulf %351, %350 : vector<32x128xf32>
    %cst_124 = arith.constant 5.000000e-01 : f32
    %353 = vector.broadcast %cst_124 : f32 to vector<32x128xf32>
    %354 = arith.addf %352, %353 : vector<32x128xf32>
    %355 = vector.extract_strided_slice %338 {offsets = [0, 256], sizes = [32, 128], strides = [1, 1]} : vector<32x512xf32> to vector<32x128xf32>
    %356 = math.tanh %355 : vector<32x128xf32>
    %357 = vector.extract_strided_slice %338 {offsets = [0, 384], sizes = [32, 128], strides = [1, 1]} : vector<32x512xf32> to vector<32x128xf32>
    %cst_125 = arith.constant 5.000000e-01 : f32
    %358 = vector.broadcast %cst_125 : f32 to vector<32x128xf32>
    %359 = arith.mulf %358, %357 : vector<32x128xf32>
    %360 = math.tanh %359 : vector<32x128xf32>
    %cst_126 = arith.constant 5.000000e-01 : f32
    %361 = vector.broadcast %cst_126 : f32 to vector<32x128xf32>
    %362 = arith.mulf %361, %360 : vector<32x128xf32>
    %cst_127 = arith.constant 5.000000e-01 : f32
    %363 = vector.broadcast %cst_127 : f32 to vector<32x128xf32>
    %364 = arith.addf %362, %363 : vector<32x128xf32>
    %365 = arith.mulf %354, %285 : vector<32x128xf32>
    %366 = arith.mulf %346, %356 : vector<32x128xf32>
    %367 = arith.addf %365, %366 : vector<32x128xf32>
    %368 = math.tanh %367 : vector<32x128xf32>
    %369 = arith.mulf %364, %368 : vector<32x128xf32>
    %370 = vector.extract_strided_slice %332 {offsets = [32, 0], sizes = [32, 512], strides = [1, 1]} : vector<64x512xbf16> to vector<32x512xbf16>
    %371 = arith.extf %370 : vector<32x512xbf16> to vector<32x512xf32>
    %372 = arith.truncf %324 : vector<32x128xf32> to vector<32x128xbf16>
    %c0_128 = arith.constant 0 : index
    %c0_129 = arith.constant 0 : index
    %373 = vector.load %arg3[%c0_128, %c0_129] : memref<128x512xbf16, #tpu.memory_space<vmem>>, vector<128x512xbf16>
    %cst_130 = arith.constant dense<0.000000e+00> : vector<32x512xf32>
    %374 = tpu.matmul %372, %373, %cst_130 {dimension_numbers = #tpu.dot_dimension_numbers<[1], [0], [0], [1], [0, 0, 1, 1], [], []>} : vector<32x128xbf16>, vector<128x512xbf16>, vector<32x512xf32> -> vector<32x512xf32>
    %375 = arith.addf %371, %374 : vector<32x512xf32>
    %376 = vector.extract_strided_slice %375 {offsets = [0, 0], sizes = [32, 128], strides = [1, 1]} : vector<32x512xf32> to vector<32x128xf32>
    %cst_131 = arith.constant 5.000000e-01 : f32
    %377 = vector.broadcast %cst_131 : f32 to vector<32x128xf32>
    %378 = arith.mulf %377, %376 : vector<32x128xf32>
    %379 = math.tanh %378 : vector<32x128xf32>
    %cst_132 = arith.constant 5.000000e-01 : f32
    %380 = vector.broadcast %cst_132 : f32 to vector<32x128xf32>
    %381 = arith.mulf %380, %379 : vector<32x128xf32>
    %cst_133 = arith.constant 5.000000e-01 : f32
    %382 = vector.broadcast %cst_133 : f32 to vector<32x128xf32>
    %383 = arith.addf %381, %382 : vector<32x128xf32>
    %384 = vector.extract_strided_slice %375 {offsets = [0, 128], sizes = [32, 128], strides = [1, 1]} : vector<32x512xf32> to vector<32x128xf32>
    %cst_134 = arith.constant 5.000000e-01 : f32
    %385 = vector.broadcast %cst_134 : f32 to vector<32x128xf32>
    %386 = arith.mulf %385, %384 : vector<32x128xf32>
    %387 = math.tanh %386 : vector<32x128xf32>
    %cst_135 = arith.constant 5.000000e-01 : f32
    %388 = vector.broadcast %cst_135 : f32 to vector<32x128xf32>
    %389 = arith.mulf %388, %387 : vector<32x128xf32>
    %cst_136 = arith.constant 5.000000e-01 : f32
    %390 = vector.broadcast %cst_136 : f32 to vector<32x128xf32>
    %391 = arith.addf %389, %390 : vector<32x128xf32>
    %392 = vector.extract_strided_slice %375 {offsets = [0, 256], sizes = [32, 128], strides = [1, 1]} : vector<32x512xf32> to vector<32x128xf32>
    %393 = math.tanh %392 : vector<32x128xf32>
    %394 = vector.extract_strided_slice %375 {offsets = [0, 384], sizes = [32, 128], strides = [1, 1]} : vector<32x512xf32> to vector<32x128xf32>
    %cst_137 = arith.constant 5.000000e-01 : f32
    %395 = vector.broadcast %cst_137 : f32 to vector<32x128xf32>
    %396 = arith.mulf %395, %394 : vector<32x128xf32>
    %397 = math.tanh %396 : vector<32x128xf32>
    %cst_138 = arith.constant 5.000000e-01 : f32
    %398 = vector.broadcast %cst_138 : f32 to vector<32x128xf32>
    %399 = arith.mulf %398, %397 : vector<32x128xf32>
    %cst_139 = arith.constant 5.000000e-01 : f32
    %400 = vector.broadcast %cst_139 : f32 to vector<32x128xf32>
    %401 = arith.addf %399, %400 : vector<32x128xf32>
    %402 = arith.mulf %391, %322 : vector<32x128xf32>
    %403 = arith.mulf %383, %393 : vector<32x128xf32>
    %404 = arith.addf %402, %403 : vector<32x128xf32>
    %405 = math.tanh %404 : vector<32x128xf32>
    %406 = arith.mulf %401, %405 : vector<32x128xf32>
    %407 = tpu.concatenate %369, %406 in 0 : vector<32x128xf32>, vector<32x128xf32> -> vector<64x128xf32>
    %408 = arith.index_cast %c4_i32 : i32 to index
    %c0_140 = arith.constant 0 : index
    %c0_141 = arith.constant 0 : index
    %409 = vector.load %arg9[%408, %c0_140, %c0_141] : memref<8x64x128xf32, #tpu.memory_space<vmem>>, vector<1x64x128xf32>
    %410 = vector.shape_cast %409 : vector<1x64x128xf32> to vector<64x128xf32>
    %411 = vector.shape_cast %407 : vector<64x128xf32> to vector<1x64x128xf32>
    tpu.vector_store %arg9[%408, %c0_140, %c0_141], %411 {strides = array<i32>} : memref<8x64x128xf32, #tpu.memory_space<vmem>>, vector<1x64x128xf32>,
    %c5_i32 = arith.constant 5 : i32
    %412 = arith.index_cast %c5_i32 : i32 to index
    %c0_142 = arith.constant 0 : index
    %c0_143 = arith.constant 0 : index
    %413 = vector.load %arg8[%412, %c0_142, %c0_143] : memref<8x64x512xbf16, #tpu.memory_space<vmem>>, vector<1x64x512xbf16>
    %414 = vector.shape_cast %413 : vector<1x64x512xbf16> to vector<64x512xbf16>
    %415 = vector.extract_strided_slice %414 {offsets = [0, 0], sizes = [32, 512], strides = [1, 1]} : vector<64x512xbf16> to vector<32x512xbf16>
    %416 = arith.extf %415 : vector<32x512xbf16> to vector<32x512xf32>
    %417 = arith.truncf %369 : vector<32x128xf32> to vector<32x128xbf16>
    %c0_144 = arith.constant 0 : index
    %c0_145 = arith.constant 0 : index
    %418 = vector.load %arg3[%c0_144, %c0_145] : memref<128x512xbf16, #tpu.memory_space<vmem>>, vector<128x512xbf16>
    %cst_146 = arith.constant dense<0.000000e+00> : vector<32x512xf32>
    %419 = tpu.matmul %417, %418, %cst_146 {dimension_numbers = #tpu.dot_dimension_numbers<[1], [0], [0], [1], [0, 0, 1, 1], [], []>} : vector<32x128xbf16>, vector<128x512xbf16>, vector<32x512xf32> -> vector<32x512xf32>
    %420 = arith.addf %416, %419 : vector<32x512xf32>
    %421 = vector.extract_strided_slice %420 {offsets = [0, 0], sizes = [32, 128], strides = [1, 1]} : vector<32x512xf32> to vector<32x128xf32>
    %cst_147 = arith.constant 5.000000e-01 : f32
    %422 = vector.broadcast %cst_147 : f32 to vector<32x128xf32>
    %423 = arith.mulf %422, %421 : vector<32x128xf32>
    %424 = math.tanh %423 : vector<32x128xf32>
    %cst_148 = arith.constant 5.000000e-01 : f32
    %425 = vector.broadcast %cst_148 : f32 to vector<32x128xf32>
    %426 = arith.mulf %425, %424 : vector<32x128xf32>
    %cst_149 = arith.constant 5.000000e-01 : f32
    %427 = vector.broadcast %cst_149 : f32 to vector<32x128xf32>
    %428 = arith.addf %426, %427 : vector<32x128xf32>
    %429 = vector.extract_strided_slice %420 {offsets = [0, 128], sizes = [32, 128], strides = [1, 1]} : vector<32x512xf32> to vector<32x128xf32>
    %cst_150 = arith.constant 5.000000e-01 : f32
    %430 = vector.broadcast %cst_150 : f32 to vector<32x128xf32>
    %431 = arith.mulf %430, %429 : vector<32x128xf32>
    %432 = math.tanh %431 : vector<32x128xf32>
    %cst_151 = arith.constant 5.000000e-01 : f32
    %433 = vector.broadcast %cst_151 : f32 to vector<32x128xf32>
    %434 = arith.mulf %433, %432 : vector<32x128xf32>
    %cst_152 = arith.constant 5.000000e-01 : f32
    %435 = vector.broadcast %cst_152 : f32 to vector<32x128xf32>
    %436 = arith.addf %434, %435 : vector<32x128xf32>
    %437 = vector.extract_strided_slice %420 {offsets = [0, 256], sizes = [32, 128], strides = [1, 1]} : vector<32x512xf32> to vector<32x128xf32>
    %438 = math.tanh %437 : vector<32x128xf32>
    %439 = vector.extract_strided_slice %420 {offsets = [0, 384], sizes = [32, 128], strides = [1, 1]} : vector<32x512xf32> to vector<32x128xf32>
    %cst_153 = arith.constant 5.000000e-01 : f32
    %440 = vector.broadcast %cst_153 : f32 to vector<32x128xf32>
    %441 = arith.mulf %440, %439 : vector<32x128xf32>
    %442 = math.tanh %441 : vector<32x128xf32>
    %cst_154 = arith.constant 5.000000e-01 : f32
    %443 = vector.broadcast %cst_154 : f32 to vector<32x128xf32>
    %444 = arith.mulf %443, %442 : vector<32x128xf32>
    %cst_155 = arith.constant 5.000000e-01 : f32
    %445 = vector.broadcast %cst_155 : f32 to vector<32x128xf32>
    %446 = arith.addf %444, %445 : vector<32x128xf32>
    %447 = arith.mulf %436, %367 : vector<32x128xf32>
    %448 = arith.mulf %428, %438 : vector<32x128xf32>
    %449 = arith.addf %447, %448 : vector<32x128xf32>
    %450 = math.tanh %449 : vector<32x128xf32>
    %451 = arith.mulf %446, %450 : vector<32x128xf32>
    %452 = vector.extract_strided_slice %414 {offsets = [32, 0], sizes = [32, 512], strides = [1, 1]} : vector<64x512xbf16> to vector<32x512xbf16>
    %453 = arith.extf %452 : vector<32x512xbf16> to vector<32x512xf32>
    %454 = arith.truncf %406 : vector<32x128xf32> to vector<32x128xbf16>
    %c0_156 = arith.constant 0 : index
    %c0_157 = arith.constant 0 : index
    %455 = vector.load %arg3[%c0_156, %c0_157] : memref<128x512xbf16, #tpu.memory_space<vmem>>, vector<128x512xbf16>
    %cst_158 = arith.constant dense<0.000000e+00> : vector<32x512xf32>
    %456 = tpu.matmul %454, %455, %cst_158 {dimension_numbers = #tpu.dot_dimension_numbers<[1], [0], [0], [1], [0, 0, 1, 1], [], []>} : vector<32x128xbf16>, vector<128x512xbf16>, vector<32x512xf32> -> vector<32x512xf32>
    %457 = arith.addf %453, %456 : vector<32x512xf32>
    %458 = vector.extract_strided_slice %457 {offsets = [0, 0], sizes = [32, 128], strides = [1, 1]} : vector<32x512xf32> to vector<32x128xf32>
    %cst_159 = arith.constant 5.000000e-01 : f32
    %459 = vector.broadcast %cst_159 : f32 to vector<32x128xf32>
    %460 = arith.mulf %459, %458 : vector<32x128xf32>
    %461 = math.tanh %460 : vector<32x128xf32>
    %cst_160 = arith.constant 5.000000e-01 : f32
    %462 = vector.broadcast %cst_160 : f32 to vector<32x128xf32>
    %463 = arith.mulf %462, %461 : vector<32x128xf32>
    %cst_161 = arith.constant 5.000000e-01 : f32
    %464 = vector.broadcast %cst_161 : f32 to vector<32x128xf32>
    %465 = arith.addf %463, %464 : vector<32x128xf32>
    %466 = vector.extract_strided_slice %457 {offsets = [0, 128], sizes = [32, 128], strides = [1, 1]} : vector<32x512xf32> to vector<32x128xf32>
    %cst_162 = arith.constant 5.000000e-01 : f32
    %467 = vector.broadcast %cst_162 : f32 to vector<32x128xf32>
    %468 = arith.mulf %467, %466 : vector<32x128xf32>
    %469 = math.tanh %468 : vector<32x128xf32>
    %cst_163 = arith.constant 5.000000e-01 : f32
    %470 = vector.broadcast %cst_163 : f32 to vector<32x128xf32>
    %471 = arith.mulf %470, %469 : vector<32x128xf32>
    %cst_164 = arith.constant 5.000000e-01 : f32
    %472 = vector.broadcast %cst_164 : f32 to vector<32x128xf32>
    %473 = arith.addf %471, %472 : vector<32x128xf32>
    %474 = vector.extract_strided_slice %457 {offsets = [0, 256], sizes = [32, 128], strides = [1, 1]} : vector<32x512xf32> to vector<32x128xf32>
    %475 = math.tanh %474 : vector<32x128xf32>
    %476 = vector.extract_strided_slice %457 {offsets = [0, 384], sizes = [32, 128], strides = [1, 1]} : vector<32x512xf32> to vector<32x128xf32>
    %cst_165 = arith.constant 5.000000e-01 : f32
    %477 = vector.broadcast %cst_165 : f32 to vector<32x128xf32>
    %478 = arith.mulf %477, %476 : vector<32x128xf32>
    %479 = math.tanh %478 : vector<32x128xf32>
    %cst_166 = arith.constant 5.000000e-01 : f32
    %480 = vector.broadcast %cst_166 : f32 to vector<32x128xf32>
    %481 = arith.mulf %480, %479 : vector<32x128xf32>
    %cst_167 = arith.constant 5.000000e-01 : f32
    %482 = vector.broadcast %cst_167 : f32 to vector<32x128xf32>
    %483 = arith.addf %481, %482 : vector<32x128xf32>
    %484 = arith.mulf %473, %404 : vector<32x128xf32>
    %485 = arith.mulf %465, %475 : vector<32x128xf32>
    %486 = arith.addf %484, %485 : vector<32x128xf32>
    %487 = math.tanh %486 : vector<32x128xf32>
    %488 = arith.mulf %483, %487 : vector<32x128xf32>
    %489 = tpu.concatenate %451, %488 in 0 : vector<32x128xf32>, vector<32x128xf32> -> vector<64x128xf32>
    %490 = arith.index_cast %c5_i32 : i32 to index
    %c0_168 = arith.constant 0 : index
    %c0_169 = arith.constant 0 : index
    %491 = vector.load %arg9[%490, %c0_168, %c0_169] : memref<8x64x128xf32, #tpu.memory_space<vmem>>, vector<1x64x128xf32>
    %492 = vector.shape_cast %491 : vector<1x64x128xf32> to vector<64x128xf32>
    %493 = vector.shape_cast %489 : vector<64x128xf32> to vector<1x64x128xf32>
    tpu.vector_store %arg9[%490, %c0_168, %c0_169], %493 {strides = array<i32>} : memref<8x64x128xf32, #tpu.memory_space<vmem>>, vector<1x64x128xf32>,
    %c6_i32 = arith.constant 6 : i32
    %494 = arith.index_cast %c6_i32 : i32 to index
    %c0_170 = arith.constant 0 : index
    %c0_171 = arith.constant 0 : index
    %495 = vector.load %arg8[%494, %c0_170, %c0_171] : memref<8x64x512xbf16, #tpu.memory_space<vmem>>, vector<1x64x512xbf16>
    %496 = vector.shape_cast %495 : vector<1x64x512xbf16> to vector<64x512xbf16>
    %497 = vector.extract_strided_slice %496 {offsets = [0, 0], sizes = [32, 512], strides = [1, 1]} : vector<64x512xbf16> to vector<32x512xbf16>
    %498 = arith.extf %497 : vector<32x512xbf16> to vector<32x512xf32>
    %499 = arith.truncf %451 : vector<32x128xf32> to vector<32x128xbf16>
    %c0_172 = arith.constant 0 : index
    %c0_173 = arith.constant 0 : index
    %500 = vector.load %arg3[%c0_172, %c0_173] : memref<128x512xbf16, #tpu.memory_space<vmem>>, vector<128x512xbf16>
    %cst_174 = arith.constant dense<0.000000e+00> : vector<32x512xf32>
    %501 = tpu.matmul %499, %500, %cst_174 {dimension_numbers = #tpu.dot_dimension_numbers<[1], [0], [0], [1], [0, 0, 1, 1], [], []>} : vector<32x128xbf16>, vector<128x512xbf16>, vector<32x512xf32> -> vector<32x512xf32>
    %502 = arith.addf %498, %501 : vector<32x512xf32>
    %503 = vector.extract_strided_slice %502 {offsets = [0, 0], sizes = [32, 128], strides = [1, 1]} : vector<32x512xf32> to vector<32x128xf32>
    %cst_175 = arith.constant 5.000000e-01 : f32
    %504 = vector.broadcast %cst_175 : f32 to vector<32x128xf32>
    %505 = arith.mulf %504, %503 : vector<32x128xf32>
    %506 = math.tanh %505 : vector<32x128xf32>
    %cst_176 = arith.constant 5.000000e-01 : f32
    %507 = vector.broadcast %cst_176 : f32 to vector<32x128xf32>
    %508 = arith.mulf %507, %506 : vector<32x128xf32>
    %cst_177 = arith.constant 5.000000e-01 : f32
    %509 = vector.broadcast %cst_177 : f32 to vector<32x128xf32>
    %510 = arith.addf %508, %509 : vector<32x128xf32>
    %511 = vector.extract_strided_slice %502 {offsets = [0, 128], sizes = [32, 128], strides = [1, 1]} : vector<32x512xf32> to vector<32x128xf32>
    %cst_178 = arith.constant 5.000000e-01 : f32
    %512 = vector.broadcast %cst_178 : f32 to vector<32x128xf32>
    %513 = arith.mulf %512, %511 : vector<32x128xf32>
    %514 = math.tanh %513 : vector<32x128xf32>
    %cst_179 = arith.constant 5.000000e-01 : f32
    %515 = vector.broadcast %cst_179 : f32 to vector<32x128xf32>
    %516 = arith.mulf %515, %514 : vector<32x128xf32>
    %cst_180 = arith.constant 5.000000e-01 : f32
    %517 = vector.broadcast %cst_180 : f32 to vector<32x128xf32>
    %518 = arith.addf %516, %517 : vector<32x128xf32>
    %519 = vector.extract_strided_slice %502 {offsets = [0, 256], sizes = [32, 128], strides = [1, 1]} : vector<32x512xf32> to vector<32x128xf32>
    %520 = math.tanh %519 : vector<32x128xf32>
    %521 = vector.extract_strided_slice %502 {offsets = [0, 384], sizes = [32, 128], strides = [1, 1]} : vector<32x512xf32> to vector<32x128xf32>
    %cst_181 = arith.constant 5.000000e-01 : f32
    %522 = vector.broadcast %cst_181 : f32 to vector<32x128xf32>
    %523 = arith.mulf %522, %521 : vector<32x128xf32>
    %524 = math.tanh %523 : vector<32x128xf32>
    %cst_182 = arith.constant 5.000000e-01 : f32
    %525 = vector.broadcast %cst_182 : f32 to vector<32x128xf32>
    %526 = arith.mulf %525, %524 : vector<32x128xf32>
    %cst_183 = arith.constant 5.000000e-01 : f32
    %527 = vector.broadcast %cst_183 : f32 to vector<32x128xf32>
    %528 = arith.addf %526, %527 : vector<32x128xf32>
    %529 = arith.mulf %518, %449 : vector<32x128xf32>
    %530 = arith.mulf %510, %520 : vector<32x128xf32>
    %531 = arith.addf %529, %530 : vector<32x128xf32>
    %532 = math.tanh %531 : vector<32x128xf32>
    %533 = arith.mulf %528, %532 : vector<32x128xf32>
    %534 = vector.extract_strided_slice %496 {offsets = [32, 0], sizes = [32, 512], strides = [1, 1]} : vector<64x512xbf16> to vector<32x512xbf16>
    %535 = arith.extf %534 : vector<32x512xbf16> to vector<32x512xf32>
    %536 = arith.truncf %488 : vector<32x128xf32> to vector<32x128xbf16>
    %c0_184 = arith.constant 0 : index
    %c0_185 = arith.constant 0 : index
    %537 = vector.load %arg3[%c0_184, %c0_185] : memref<128x512xbf16, #tpu.memory_space<vmem>>, vector<128x512xbf16>
    %cst_186 = arith.constant dense<0.000000e+00> : vector<32x512xf32>
    %538 = tpu.matmul %536, %537, %cst_186 {dimension_numbers = #tpu.dot_dimension_numbers<[1], [0], [0], [1], [0, 0, 1, 1], [], []>} : vector<32x128xbf16>, vector<128x512xbf16>, vector<32x512xf32> -> vector<32x512xf32>
    %539 = arith.addf %535, %538 : vector<32x512xf32>
    %540 = vector.extract_strided_slice %539 {offsets = [0, 0], sizes = [32, 128], strides = [1, 1]} : vector<32x512xf32> to vector<32x128xf32>
    %cst_187 = arith.constant 5.000000e-01 : f32
    %541 = vector.broadcast %cst_187 : f32 to vector<32x128xf32>
    %542 = arith.mulf %541, %540 : vector<32x128xf32>
    %543 = math.tanh %542 : vector<32x128xf32>
    %cst_188 = arith.constant 5.000000e-01 : f32
    %544 = vector.broadcast %cst_188 : f32 to vector<32x128xf32>
    %545 = arith.mulf %544, %543 : vector<32x128xf32>
    %cst_189 = arith.constant 5.000000e-01 : f32
    %546 = vector.broadcast %cst_189 : f32 to vector<32x128xf32>
    %547 = arith.addf %545, %546 : vector<32x128xf32>
    %548 = vector.extract_strided_slice %539 {offsets = [0, 128], sizes = [32, 128], strides = [1, 1]} : vector<32x512xf32> to vector<32x128xf32>
    %cst_190 = arith.constant 5.000000e-01 : f32
    %549 = vector.broadcast %cst_190 : f32 to vector<32x128xf32>
    %550 = arith.mulf %549, %548 : vector<32x128xf32>
    %551 = math.tanh %550 : vector<32x128xf32>
    %cst_191 = arith.constant 5.000000e-01 : f32
    %552 = vector.broadcast %cst_191 : f32 to vector<32x128xf32>
    %553 = arith.mulf %552, %551 : vector<32x128xf32>
    %cst_192 = arith.constant 5.000000e-01 : f32
    %554 = vector.broadcast %cst_192 : f32 to vector<32x128xf32>
    %555 = arith.addf %553, %554 : vector<32x128xf32>
    %556 = vector.extract_strided_slice %539 {offsets = [0, 256], sizes = [32, 128], strides = [1, 1]} : vector<32x512xf32> to vector<32x128xf32>
    %557 = math.tanh %556 : vector<32x128xf32>
    %558 = vector.extract_strided_slice %539 {offsets = [0, 384], sizes = [32, 128], strides = [1, 1]} : vector<32x512xf32> to vector<32x128xf32>
    %cst_193 = arith.constant 5.000000e-01 : f32
    %559 = vector.broadcast %cst_193 : f32 to vector<32x128xf32>
    %560 = arith.mulf %559, %558 : vector<32x128xf32>
    %561 = math.tanh %560 : vector<32x128xf32>
    %cst_194 = arith.constant 5.000000e-01 : f32
    %562 = vector.broadcast %cst_194 : f32 to vector<32x128xf32>
    %563 = arith.mulf %562, %561 : vector<32x128xf32>
    %cst_195 = arith.constant 5.000000e-01 : f32
    %564 = vector.broadcast %cst_195 : f32 to vector<32x128xf32>
    %565 = arith.addf %563, %564 : vector<32x128xf32>
    %566 = arith.mulf %555, %486 : vector<32x128xf32>
    %567 = arith.mulf %547, %557 : vector<32x128xf32>
    %568 = arith.addf %566, %567 : vector<32x128xf32>
    %569 = math.tanh %568 : vector<32x128xf32>
    %570 = arith.mulf %565, %569 : vector<32x128xf32>
    %571 = tpu.concatenate %533, %570 in 0 : vector<32x128xf32>, vector<32x128xf32> -> vector<64x128xf32>
    %572 = arith.index_cast %c6_i32 : i32 to index
    %c0_196 = arith.constant 0 : index
    %c0_197 = arith.constant 0 : index
    %573 = vector.load %arg9[%572, %c0_196, %c0_197] : memref<8x64x128xf32, #tpu.memory_space<vmem>>, vector<1x64x128xf32>
    %574 = vector.shape_cast %573 : vector<1x64x128xf32> to vector<64x128xf32>
    %575 = vector.shape_cast %571 : vector<64x128xf32> to vector<1x64x128xf32>
    tpu.vector_store %arg9[%572, %c0_196, %c0_197], %575 {strides = array<i32>} : memref<8x64x128xf32, #tpu.memory_space<vmem>>, vector<1x64x128xf32>,
    %c7_i32 = arith.constant 7 : i32
    %576 = arith.index_cast %c7_i32 : i32 to index
    %c0_198 = arith.constant 0 : index
    %c0_199 = arith.constant 0 : index
    %577 = vector.load %arg8[%576, %c0_198, %c0_199] : memref<8x64x512xbf16, #tpu.memory_space<vmem>>, vector<1x64x512xbf16>
    %578 = vector.shape_cast %577 : vector<1x64x512xbf16> to vector<64x512xbf16>
    %579 = vector.extract_strided_slice %578 {offsets = [0, 0], sizes = [32, 512], strides = [1, 1]} : vector<64x512xbf16> to vector<32x512xbf16>
    %580 = arith.extf %579 : vector<32x512xbf16> to vector<32x512xf32>
    %581 = arith.truncf %533 : vector<32x128xf32> to vector<32x128xbf16>
    %c0_200 = arith.constant 0 : index
    %c0_201 = arith.constant 0 : index
    %582 = vector.load %arg3[%c0_200, %c0_201] : memref<128x512xbf16, #tpu.memory_space<vmem>>, vector<128x512xbf16>
    %cst_202 = arith.constant dense<0.000000e+00> : vector<32x512xf32>
    %583 = tpu.matmul %581, %582, %cst_202 {dimension_numbers = #tpu.dot_dimension_numbers<[1], [0], [0], [1], [0, 0, 1, 1], [], []>} : vector<32x128xbf16>, vector<128x512xbf16>, vector<32x512xf32> -> vector<32x512xf32>
    %584 = arith.addf %580, %583 : vector<32x512xf32>
    %585 = vector.extract_strided_slice %584 {offsets = [0, 0], sizes = [32, 128], strides = [1, 1]} : vector<32x512xf32> to vector<32x128xf32>
    %cst_203 = arith.constant 5.000000e-01 : f32
    %586 = vector.broadcast %cst_203 : f32 to vector<32x128xf32>
    %587 = arith.mulf %586, %585 : vector<32x128xf32>
    %588 = math.tanh %587 : vector<32x128xf32>
    %cst_204 = arith.constant 5.000000e-01 : f32
    %589 = vector.broadcast %cst_204 : f32 to vector<32x128xf32>
    %590 = arith.mulf %589, %588 : vector<32x128xf32>
    %cst_205 = arith.constant 5.000000e-01 : f32
    %591 = vector.broadcast %cst_205 : f32 to vector<32x128xf32>
    %592 = arith.addf %590, %591 : vector<32x128xf32>
    %593 = vector.extract_strided_slice %584 {offsets = [0, 128], sizes = [32, 128], strides = [1, 1]} : vector<32x512xf32> to vector<32x128xf32>
    %cst_206 = arith.constant 5.000000e-01 : f32
    %594 = vector.broadcast %cst_206 : f32 to vector<32x128xf32>
    %595 = arith.mulf %594, %593 : vector<32x128xf32>
    %596 = math.tanh %595 : vector<32x128xf32>
    %cst_207 = arith.constant 5.000000e-01 : f32
    %597 = vector.broadcast %cst_207 : f32 to vector<32x128xf32>
    %598 = arith.mulf %597, %596 : vector<32x128xf32>
    %cst_208 = arith.constant 5.000000e-01 : f32
    %599 = vector.broadcast %cst_208 : f32 to vector<32x128xf32>
    %600 = arith.addf %598, %599 : vector<32x128xf32>
    %601 = vector.extract_strided_slice %584 {offsets = [0, 256], sizes = [32, 128], strides = [1, 1]} : vector<32x512xf32> to vector<32x128xf32>
    %602 = math.tanh %601 : vector<32x128xf32>
    %603 = vector.extract_strided_slice %584 {offsets = [0, 384], sizes = [32, 128], strides = [1, 1]} : vector<32x512xf32> to vector<32x128xf32>
    %cst_209 = arith.constant 5.000000e-01 : f32
    %604 = vector.broadcast %cst_209 : f32 to vector<32x128xf32>
    %605 = arith.mulf %604, %603 : vector<32x128xf32>
    %606 = math.tanh %605 : vector<32x128xf32>
    %cst_210 = arith.constant 5.000000e-01 : f32
    %607 = vector.broadcast %cst_210 : f32 to vector<32x128xf32>
    %608 = arith.mulf %607, %606 : vector<32x128xf32>
    %cst_211 = arith.constant 5.000000e-01 : f32
    %609 = vector.broadcast %cst_211 : f32 to vector<32x128xf32>
    %610 = arith.addf %608, %609 : vector<32x128xf32>
    %611 = arith.mulf %600, %531 : vector<32x128xf32>
    %612 = arith.mulf %592, %602 : vector<32x128xf32>
    %613 = arith.addf %611, %612 : vector<32x128xf32>
    %614 = math.tanh %613 : vector<32x128xf32>
    %615 = arith.mulf %610, %614 : vector<32x128xf32>
    %616 = vector.extract_strided_slice %578 {offsets = [32, 0], sizes = [32, 512], strides = [1, 1]} : vector<64x512xbf16> to vector<32x512xbf16>
    %617 = arith.extf %616 : vector<32x512xbf16> to vector<32x512xf32>
    %618 = arith.truncf %570 : vector<32x128xf32> to vector<32x128xbf16>
    %c0_212 = arith.constant 0 : index
    %c0_213 = arith.constant 0 : index
    %619 = vector.load %arg3[%c0_212, %c0_213] : memref<128x512xbf16, #tpu.memory_space<vmem>>, vector<128x512xbf16>
    %cst_214 = arith.constant dense<0.000000e+00> : vector<32x512xf32>
    %620 = tpu.matmul %618, %619, %cst_214 {dimension_numbers = #tpu.dot_dimension_numbers<[1], [0], [0], [1], [0, 0, 1, 1], [], []>} : vector<32x128xbf16>, vector<128x512xbf16>, vector<32x512xf32> -> vector<32x512xf32>
    %621 = arith.addf %617, %620 : vector<32x512xf32>
    %622 = vector.extract_strided_slice %621 {offsets = [0, 0], sizes = [32, 128], strides = [1, 1]} : vector<32x512xf32> to vector<32x128xf32>
    %cst_215 = arith.constant 5.000000e-01 : f32
    %623 = vector.broadcast %cst_215 : f32 to vector<32x128xf32>
    %624 = arith.mulf %623, %622 : vector<32x128xf32>
    %625 = math.tanh %624 : vector<32x128xf32>
    %cst_216 = arith.constant 5.000000e-01 : f32
    %626 = vector.broadcast %cst_216 : f32 to vector<32x128xf32>
    %627 = arith.mulf %626, %625 : vector<32x128xf32>
    %cst_217 = arith.constant 5.000000e-01 : f32
    %628 = vector.broadcast %cst_217 : f32 to vector<32x128xf32>
    %629 = arith.addf %627, %628 : vector<32x128xf32>
    %630 = vector.extract_strided_slice %621 {offsets = [0, 128], sizes = [32, 128], strides = [1, 1]} : vector<32x512xf32> to vector<32x128xf32>
    %cst_218 = arith.constant 5.000000e-01 : f32
    %631 = vector.broadcast %cst_218 : f32 to vector<32x128xf32>
    %632 = arith.mulf %631, %630 : vector<32x128xf32>
    %633 = math.tanh %632 : vector<32x128xf32>
    %cst_219 = arith.constant 5.000000e-01 : f32
    %634 = vector.broadcast %cst_219 : f32 to vector<32x128xf32>
    %635 = arith.mulf %634, %633 : vector<32x128xf32>
    %cst_220 = arith.constant 5.000000e-01 : f32
    %636 = vector.broadcast %cst_220 : f32 to vector<32x128xf32>
    %637 = arith.addf %635, %636 : vector<32x128xf32>
    %638 = vector.extract_strided_slice %621 {offsets = [0, 256], sizes = [32, 128], strides = [1, 1]} : vector<32x512xf32> to vector<32x128xf32>
    %639 = math.tanh %638 : vector<32x128xf32>
    %640 = vector.extract_strided_slice %621 {offsets = [0, 384], sizes = [32, 128], strides = [1, 1]} : vector<32x512xf32> to vector<32x128xf32>
    %cst_221 = arith.constant 5.000000e-01 : f32
    %641 = vector.broadcast %cst_221 : f32 to vector<32x128xf32>
    %642 = arith.mulf %641, %640 : vector<32x128xf32>
    %643 = math.tanh %642 : vector<32x128xf32>
    %cst_222 = arith.constant 5.000000e-01 : f32
    %644 = vector.broadcast %cst_222 : f32 to vector<32x128xf32>
    %645 = arith.mulf %644, %643 : vector<32x128xf32>
    %cst_223 = arith.constant 5.000000e-01 : f32
    %646 = vector.broadcast %cst_223 : f32 to vector<32x128xf32>
    %647 = arith.addf %645, %646 : vector<32x128xf32>
    %648 = arith.mulf %637, %568 : vector<32x128xf32>
    %649 = arith.mulf %629, %639 : vector<32x128xf32>
    %650 = arith.addf %648, %649 : vector<32x128xf32>
    %651 = math.tanh %650 : vector<32x128xf32>
    %652 = arith.mulf %647, %651 : vector<32x128xf32>
    %653 = tpu.concatenate %615, %652 in 0 : vector<32x128xf32>, vector<32x128xf32> -> vector<64x128xf32>
    %654 = arith.index_cast %c7_i32 : i32 to index
    %c0_224 = arith.constant 0 : index
    %c0_225 = arith.constant 0 : index
    %655 = vector.load %arg9[%654, %c0_224, %c0_225] : memref<8x64x128xf32, #tpu.memory_space<vmem>>, vector<1x64x128xf32>
    %656 = vector.shape_cast %655 : vector<1x64x128xf32> to vector<64x128xf32>
    %657 = vector.shape_cast %653 : vector<64x128xf32> to vector<1x64x128xf32>
    tpu.vector_store %arg9[%654, %c0_224, %c0_225], %657 {strides = array<i32>} : memref<8x64x128xf32, #tpu.memory_space<vmem>>, vector<1x64x128xf32>,
    %c8_i32_226 = arith.constant 8 : i32
    %658 = tpu.concatenate %615, %652 in 0 : vector<32x128xf32>, vector<32x128xf32> -> vector<64x128xf32>
    %cst_227 = arith.constant 0xFF800000 : f32
    %659 = vector.broadcast %cst_227 : f32 to vector<64x1xf32>
    %cst_228 = arith.constant 0.000000e+00 : f32
    %660 = vector.broadcast %cst_228 : f32 to vector<64x1xf32>
    %cst_229 = arith.constant 0.000000e+00 : f32
    %661 = vector.broadcast %cst_229 : f32 to vector<64x128xf32>
    %c0_i32_230 = arith.constant 0 : i32
    %662 = arith.index_cast %c0_i32_230 : i32 to index
    %c0_231 = arith.constant 0 : index
    %c0_232 = arith.constant 0 : index
    %663 = vector.load %arg9[%662, %c0_231, %c0_232] : memref<8x64x128xf32, #tpu.memory_space<vmem>>, vector<1x64x128xf32>
    %664 = vector.shape_cast %663 : vector<1x64x128xf32> to vector<64x128xf32>
    %665 = arith.mulf %664, %658 : vector<64x128xf32>
    %cst_233 = arith.constant dense<0.000000e+00> : vector<64xf32>
    %666 = vector.multi_reduction <add>, %665, %cst_233 [1] : vector<64x128xf32> to vector<64xf32>
    %667 = vector.shape_cast %666 : vector<64xf32> to vector<64x1xf32>
    %668 = arith.maximumf %659, %667 : vector<64x1xf32>
    %669 = arith.subf %659, %668 : vector<64x1xf32>
    %670 = math.exp %669 : vector<64x1xf32>
    %671 = arith.subf %667, %668 : vector<64x1xf32>
    %672 = math.exp %671 : vector<64x1xf32>
    %673 = arith.mulf %670, %660 : vector<64x1xf32>
    %674 = arith.addf %673, %672 : vector<64x1xf32>
    %675 = vector.broadcast %670 : vector<64x1xf32> to vector<64x128xf32>
    %676 = arith.mulf %675, %661 : vector<64x128xf32>
    %677 = vector.broadcast %672 : vector<64x1xf32> to vector<64x128xf32>
    %678 = arith.mulf %677, %664 : vector<64x128xf32>
    %679 = arith.addf %676, %678 : vector<64x128xf32>
    %c1_i32_234 = arith.constant 1 : i32
    %680 = arith.index_cast %c1_i32_234 : i32 to index
    %c0_235 = arith.constant 0 : index
    %c0_236 = arith.constant 0 : index
    %681 = vector.load %arg9[%680, %c0_235, %c0_236] : memref<8x64x128xf32, #tpu.memory_space<vmem>>, vector<1x64x128xf32>
    %682 = vector.shape_cast %681 : vector<1x64x128xf32> to vector<64x128xf32>
    %683 = arith.mulf %682, %658 : vector<64x128xf32>
    %cst_237 = arith.constant dense<0.000000e+00> : vector<64xf32>
    %684 = vector.multi_reduction <add>, %683, %cst_237 [1] : vector<64x128xf32> to vector<64xf32>
    %685 = vector.shape_cast %684 : vector<64xf32> to vector<64x1xf32>
    %686 = arith.maximumf %668, %685 : vector<64x1xf32>
    %687 = arith.subf %668, %686 : vector<64x1xf32>
    %688 = math.exp %687 : vector<64x1xf32>
    %689 = arith.subf %685, %686 : vector<64x1xf32>
    %690 = math.exp %689 : vector<64x1xf32>
    %691 = arith.mulf %688, %674 : vector<64x1xf32>
    %692 = arith.addf %691, %690 : vector<64x1xf32>
    %693 = vector.broadcast %688 : vector<64x1xf32> to vector<64x128xf32>
    %694 = arith.mulf %693, %679 : vector<64x128xf32>
    %695 = vector.broadcast %690 : vector<64x1xf32> to vector<64x128xf32>
    %696 = arith.mulf %695, %682 : vector<64x128xf32>
    %697 = arith.addf %694, %696 : vector<64x128xf32>
    %c2_i32_238 = arith.constant 2 : i32
    %698 = arith.index_cast %c2_i32_238 : i32 to index
    %c0_239 = arith.constant 0 : index
    %c0_240 = arith.constant 0 : index
    %699 = vector.load %arg9[%698, %c0_239, %c0_240] : memref<8x64x128xf32, #tpu.memory_space<vmem>>, vector<1x64x128xf32>
    %700 = vector.shape_cast %699 : vector<1x64x128xf32> to vector<64x128xf32>
    %701 = arith.mulf %700, %658 : vector<64x128xf32>
    %cst_241 = arith.constant dense<0.000000e+00> : vector<64xf32>
    %702 = vector.multi_reduction <add>, %701, %cst_241 [1] : vector<64x128xf32> to vector<64xf32>
    %703 = vector.shape_cast %702 : vector<64xf32> to vector<64x1xf32>
    %704 = arith.maximumf %686, %703 : vector<64x1xf32>
    %705 = arith.subf %686, %704 : vector<64x1xf32>
    %706 = math.exp %705 : vector<64x1xf32>
    %707 = arith.subf %703, %704 : vector<64x1xf32>
    %708 = math.exp %707 : vector<64x1xf32>
    %709 = arith.mulf %706, %692 : vector<64x1xf32>
    %710 = arith.addf %709, %708 : vector<64x1xf32>
    %711 = vector.broadcast %706 : vector<64x1xf32> to vector<64x128xf32>
    %712 = arith.mulf %711, %697 : vector<64x128xf32>
    %713 = vector.broadcast %708 : vector<64x1xf32> to vector<64x128xf32>
    %714 = arith.mulf %713, %700 : vector<64x128xf32>
    %715 = arith.addf %712, %714 : vector<64x128xf32>
    %c3_i32_242 = arith.constant 3 : i32
    %716 = arith.index_cast %c3_i32_242 : i32 to index
    %c0_243 = arith.constant 0 : index
    %c0_244 = arith.constant 0 : index
    %717 = vector.load %arg9[%716, %c0_243, %c0_244] : memref<8x64x128xf32, #tpu.memory_space<vmem>>, vector<1x64x128xf32>
    %718 = vector.shape_cast %717 : vector<1x64x128xf32> to vector<64x128xf32>
    %719 = arith.mulf %718, %658 : vector<64x128xf32>
    %cst_245 = arith.constant dense<0.000000e+00> : vector<64xf32>
    %720 = vector.multi_reduction <add>, %719, %cst_245 [1] : vector<64x128xf32> to vector<64xf32>
    %721 = vector.shape_cast %720 : vector<64xf32> to vector<64x1xf32>
    %722 = arith.maximumf %704, %721 : vector<64x1xf32>
    %723 = arith.subf %704, %722 : vector<64x1xf32>
    %724 = math.exp %723 : vector<64x1xf32>
    %725 = arith.subf %721, %722 : vector<64x1xf32>
    %726 = math.exp %725 : vector<64x1xf32>
    %727 = arith.mulf %724, %710 : vector<64x1xf32>
    %728 = arith.addf %727, %726 : vector<64x1xf32>
    %729 = vector.broadcast %724 : vector<64x1xf32> to vector<64x128xf32>
    %730 = arith.mulf %729, %715 : vector<64x128xf32>
    %731 = vector.broadcast %726 : vector<64x1xf32> to vector<64x128xf32>
    %732 = arith.mulf %731, %718 : vector<64x128xf32>
    %733 = arith.addf %730, %732 : vector<64x128xf32>
    %c4_i32_246 = arith.constant 4 : i32
    %734 = arith.index_cast %c4_i32_246 : i32 to index
    %c0_247 = arith.constant 0 : index
    %c0_248 = arith.constant 0 : index
    %735 = vector.load %arg9[%734, %c0_247, %c0_248] : memref<8x64x128xf32, #tpu.memory_space<vmem>>, vector<1x64x128xf32>
    %736 = vector.shape_cast %735 : vector<1x64x128xf32> to vector<64x128xf32>
    %737 = arith.mulf %736, %658 : vector<64x128xf32>
    %cst_249 = arith.constant dense<0.000000e+00> : vector<64xf32>
    %738 = vector.multi_reduction <add>, %737, %cst_249 [1] : vector<64x128xf32> to vector<64xf32>
    %739 = vector.shape_cast %738 : vector<64xf32> to vector<64x1xf32>
    %740 = arith.maximumf %722, %739 : vector<64x1xf32>
    %741 = arith.subf %722, %740 : vector<64x1xf32>
    %742 = math.exp %741 : vector<64x1xf32>
    %743 = arith.subf %739, %740 : vector<64x1xf32>
    %744 = math.exp %743 : vector<64x1xf32>
    %745 = arith.mulf %742, %728 : vector<64x1xf32>
    %746 = arith.addf %745, %744 : vector<64x1xf32>
    %747 = vector.broadcast %742 : vector<64x1xf32> to vector<64x128xf32>
    %748 = arith.mulf %747, %733 : vector<64x128xf32>
    %749 = vector.broadcast %744 : vector<64x1xf32> to vector<64x128xf32>
    %750 = arith.mulf %749, %736 : vector<64x128xf32>
    %751 = arith.addf %748, %750 : vector<64x128xf32>
    %c5_i32_250 = arith.constant 5 : i32
    %752 = arith.index_cast %c5_i32_250 : i32 to index
    %c0_251 = arith.constant 0 : index
    %c0_252 = arith.constant 0 : index
    %753 = vector.load %arg9[%752, %c0_251, %c0_252] : memref<8x64x128xf32, #tpu.memory_space<vmem>>, vector<1x64x128xf32>
    %754 = vector.shape_cast %753 : vector<1x64x128xf32> to vector<64x128xf32>
    %755 = arith.mulf %754, %658 : vector<64x128xf32>
    %cst_253 = arith.constant dense<0.000000e+00> : vector<64xf32>
    %756 = vector.multi_reduction <add>, %755, %cst_253 [1] : vector<64x128xf32> to vector<64xf32>
    %757 = vector.shape_cast %756 : vector<64xf32> to vector<64x1xf32>
    %758 = arith.maximumf %740, %757 : vector<64x1xf32>
    %759 = arith.subf %740, %758 : vector<64x1xf32>
    %760 = math.exp %759 : vector<64x1xf32>
    %761 = arith.subf %757, %758 : vector<64x1xf32>
    %762 = math.exp %761 : vector<64x1xf32>
    %763 = arith.mulf %760, %746 : vector<64x1xf32>
    %764 = arith.addf %763, %762 : vector<64x1xf32>
    %765 = vector.broadcast %760 : vector<64x1xf32> to vector<64x128xf32>
    %766 = arith.mulf %765, %751 : vector<64x128xf32>
    %767 = vector.broadcast %762 : vector<64x1xf32> to vector<64x128xf32>
    %768 = arith.mulf %767, %754 : vector<64x128xf32>
    %769 = arith.addf %766, %768 : vector<64x128xf32>
    %c6_i32_254 = arith.constant 6 : i32
    %770 = arith.index_cast %c6_i32_254 : i32 to index
    %c0_255 = arith.constant 0 : index
    %c0_256 = arith.constant 0 : index
    %771 = vector.load %arg9[%770, %c0_255, %c0_256] : memref<8x64x128xf32, #tpu.memory_space<vmem>>, vector<1x64x128xf32>
    %772 = vector.shape_cast %771 : vector<1x64x128xf32> to vector<64x128xf32>
    %773 = arith.mulf %772, %658 : vector<64x128xf32>
    %cst_257 = arith.constant dense<0.000000e+00> : vector<64xf32>
    %774 = vector.multi_reduction <add>, %773, %cst_257 [1] : vector<64x128xf32> to vector<64xf32>
    %775 = vector.shape_cast %774 : vector<64xf32> to vector<64x1xf32>
    %776 = arith.maximumf %758, %775 : vector<64x1xf32>
    %777 = arith.subf %758, %776 : vector<64x1xf32>
    %778 = math.exp %777 : vector<64x1xf32>
    %779 = arith.subf %775, %776 : vector<64x1xf32>
    %780 = math.exp %779 : vector<64x1xf32>
    %781 = arith.mulf %778, %764 : vector<64x1xf32>
    %782 = arith.addf %781, %780 : vector<64x1xf32>
    %783 = vector.broadcast %778 : vector<64x1xf32> to vector<64x128xf32>
    %784 = arith.mulf %783, %769 : vector<64x128xf32>
    %785 = vector.broadcast %780 : vector<64x1xf32> to vector<64x128xf32>
    %786 = arith.mulf %785, %772 : vector<64x128xf32>
    %787 = arith.addf %784, %786 : vector<64x128xf32>
    %c7_i32_258 = arith.constant 7 : i32
    %788 = arith.index_cast %c7_i32_258 : i32 to index
    %c0_259 = arith.constant 0 : index
    %c0_260 = arith.constant 0 : index
    %789 = vector.load %arg9[%788, %c0_259, %c0_260] : memref<8x64x128xf32, #tpu.memory_space<vmem>>, vector<1x64x128xf32>
    %790 = vector.shape_cast %789 : vector<1x64x128xf32> to vector<64x128xf32>
    %791 = arith.mulf %790, %658 : vector<64x128xf32>
    %cst_261 = arith.constant dense<0.000000e+00> : vector<64xf32>
    %792 = vector.multi_reduction <add>, %791, %cst_261 [1] : vector<64x128xf32> to vector<64xf32>
    %793 = vector.shape_cast %792 : vector<64xf32> to vector<64x1xf32>
    %794 = arith.maximumf %776, %793 : vector<64x1xf32>
    %795 = arith.subf %776, %794 : vector<64x1xf32>
    %796 = math.exp %795 : vector<64x1xf32>
    %797 = arith.subf %793, %794 : vector<64x1xf32>
    %798 = math.exp %797 : vector<64x1xf32>
    %799 = arith.mulf %796, %782 : vector<64x1xf32>
    %800 = arith.addf %799, %798 : vector<64x1xf32>
    %801 = vector.broadcast %796 : vector<64x1xf32> to vector<64x128xf32>
    %802 = arith.mulf %801, %787 : vector<64x128xf32>
    %803 = vector.broadcast %798 : vector<64x1xf32> to vector<64x128xf32>
    %804 = arith.mulf %803, %790 : vector<64x128xf32>
    %805 = arith.addf %802, %804 : vector<64x128xf32>
    %c8_i32_262 = arith.constant 8 : i32
    %806 = tpu.reciprocal %800 {approx = true} : vector<64x1xf32> -> vector<64x1xf32>
    %807 = vector.broadcast %806 : vector<64x1xf32> to vector<64x128xf32>
    %808 = arith.mulf %805, %807 : vector<64x128xf32>
    %809 = arith.truncf %808 : vector<64x128xf32> to vector<64x128xbf16>
    %c0_263 = arith.constant 0 : index
    %c0_264 = arith.constant 0 : index
    %810 = vector.load %arg5[%c0_263, %c0_264] : memref<128x128xbf16, #tpu.memory_space<vmem>>, vector<128x128xbf16>
    %cst_265 = arith.constant dense<0.000000e+00> : vector<64x128xf32>
    %811 = tpu.matmul %809, %810, %cst_265 {dimension_numbers = #tpu.dot_dimension_numbers<[1], [0], [0], [1], [0, 0, 1, 1], [], []>} : vector<64x128xbf16>, vector<128x128xbf16>, vector<64x128xf32> -> vector<64x128xf32>
    %c0_266 = arith.constant 0 : index
    %c0_267 = arith.constant 0 : index
    %812 = vector.load %arg6[%c0_266, %c0_267] : memref<1x128xf32, #tpu.memory_space<vmem>>, vector<1x128xf32>
    %813 = vector.broadcast %812 : vector<1x128xf32> to vector<64x128xf32>
    %814 = arith.addf %811, %813 : vector<64x128xf32>
    %c0_268 = arith.constant 0 : index
    %c0_269 = arith.constant 0 : index
    %815 = vector.load %arg7[%c0_268, %c0_269] : memref<64x128xf32, #tpu.memory_space<vmem>>, vector<64x128xf32>
    tpu.vector_store %arg7[%c0_268, %c0_269], %814 {strides = array<i32>} : memref<64x128xf32, #tpu.memory_space<vmem>>, vector<64x128xf32>,
    return
  }
  func.func @transform_0(%arg0: i32) -> (i32, i32, i32) {
    %c0_i32 = arith.constant 0 : i32
    %c0_i32_0 = arith.constant 0 : i32
    %c0_i32_1 = arith.constant 0 : i32
    return %c0_i32, %arg0, %c0_i32_0 : i32, i32, i32
  }
  func.func @transform_1(%arg0: i32) -> (i32, i32) {
    %c0_i32 = arith.constant 0 : i32
    %c0_i32_0 = arith.constant 0 : i32
    %c0_i32_1 = arith.constant 0 : i32
    return %c0_i32, %c0_i32_0 : i32, i32
  }
  func.func @transform_2(%arg0: i32) -> (i32, i32) {
    %c0_i32 = arith.constant 0 : i32
    %c0_i32_0 = arith.constant 0 : i32
    %c0_i32_1 = arith.constant 0 : i32
    return %c0_i32, %c0_i32_0 : i32, i32
  }
  func.func @transform_3(%arg0: i32) -> (i32, i32) {
    %c0_i32 = arith.constant 0 : i32
    %c0_i32_0 = arith.constant 0 : i32
    %c0_i32_1 = arith.constant 0 : i32
    return %c0_i32, %c0_i32_0 : i32, i32
  }
  func.func @transform_4(%arg0: i32) -> (i32, i32) {
    %c0_i32 = arith.constant 0 : i32
    %c0_i32_0 = arith.constant 0 : i32
    %c0_i32_1 = arith.constant 0 : i32
    return %c0_i32, %c0_i32_0 : i32, i32
  }
  func.func @transform_5(%arg0: i32) -> (i32, i32) {
    %c0_i32 = arith.constant 0 : i32
    %c0_i32_0 = arith.constant 0 : i32
    %c0_i32_1 = arith.constant 0 : i32
    return %c0_i32, %c0_i32_0 : i32, i32
  }
  func.func @transform_6(%arg0: i32) -> (i32, i32) {
    %c0_i32 = arith.constant 0 : i32
    %c0_i32_0 = arith.constant 0 : i32
    return %arg0, %c0_i32 : i32, i32
  }
}

</mosaic_0001>

<bundles_post_ra>
// kernel: tpu_custom_call.1
= control target key start
LH: loop header
LB: loop body
LE: loop exit
PB: predicated region body
PF: predicated region fallthrough
CT: control target
= control target key end

     0   :  { %s11174_s0 = inlined_call_operand.hbm [shape: bf16[8,128,128], index: 0, kind: input, shape index: {}]   ;;  %s11175_s1 = inlined_call_operand.hbm [shape: bf16[128,512], index: 1, kind: input, shape index: {}]   ;;  %s11176_s2 = inlined_call_operand.hbm [shape: bf16[128,512], index: 2, kind: input, shape index: {}]   ;;  %s11177_s3 = inlined_call_operand.vmem [shape: f32[1,512], index: 3, kind: input, shape index: {}]   ;;  %s11178_s4 = inlined_call_operand.hbm [shape: bf16[128,128], index: 4, kind: input, shape index: {}]   ;;  %s11179_s5 = inlined_call_operand.vmem [shape: f32[1,128], index: 5, kind: input, shape index: {}]   ;;  %s11180_s6 = inlined_call_operand.hbm [shape: f32[128,128], index: 6, kind: output, shape index: {}]  }
   0x1   :  { %11375 = sst [smem:[#allocation75_spill]] %s11175_s1 }
   0x2   :  { %11 = vsyncpa [#allocation5], 0 }
   0x3   :  { %13 = vsyncpa [#allocation5 + $0x1], 0 }
   0x4   :  { %14 = vsyncpa [#allocation8], 0 }
   0x5   :  { %15 = vsyncpa [#allocation11], 0 }
   0x6   :  { %16 = vsyncpa [#allocation6], 0 }
   0x7   :  { %18 = vsyncpa [#allocation6 + $0x1], 0  ;;  %s9058_s21 = smov 0   ;;  %s9060_s22 = smov 0  }
   0x8   :  { %s9062_s23 = smov 0   ;;  %s9064_s24 = smov 0  }
   0x9 LB: > { %s9079_s25 = sadd.s32 4294967295, %s8999_s24   ;;  %s7099_s26 = sadd.s32 4294967294, %s8999_s24   ;;  %s8999_s24 = sphi %s9064_s24, %s11640_s24   ;;  %s8995_s23 = sphi %s9062_s23, %s11644_s23   ;;  %s8991_s22 = sphi %s9060_s22, %s11643_s22   ;;  %s8987_s21 = sphi %s9058_s21, %s11642_s21  }
   0xa   : > { %s9083_s27 = sadd.s32 1, %s8999_s24   ;;  %s31_s28 = sadd.s32 1, %s8995_s23 }
   0xb   : > { %11376 = sst [smem:[#allocation20_spill]] %s9083_s27  ;;  %s28_s29 = ssub.s32 %s8999_s24, %s9083_s27 }
   0xc   : > { %p38_p0 = scmp.ne.s32.totalorder %s8995_s23, %s8991_s22  ;;  %p29_p1 = scmp.eq.s32.totalorder %s28_s29, 0 }
   0xd   : > { %p39_p2 = scmp.eq.s32.totalorder %s8999_s24, 0  ;;  %p44_p3 = scmp.ne.s32.totalorder %s8991_s22, %s8987_s21 }
   0xe   : > { %p11181_p4 = scmp.eq.s32.totalorder %s9079_s25, 0  ;;  %p173_p7 = scmp.eq.s32.totalorder %s9079_s25, 1 }
   0xf   : > { %s9095_s30 = scalar_select %p29_p1, %s8995_s23, %s31_s28  }
  0x10   : > { %p9097_p5 = por %p39_p2, %p38_p0  ;;  %p9103_p6 = por %p11181_p4, %p44_p3 }
  0x11   : > { %11377 = sst [smem:[#allocation21_spill]] %s9095_s30  ;;  %p179_p8 = scmp.eq.s32.totalorder %s7099_s26, 1 }
  0x12   : > { %s11378_s7 = scalar_select %p9097_p5, 1, 0 }
  0x13   : > { %s11379_s8 = scalar_select %p9103_p6, 1, 0 }
  0x14   : > { %p7100_p9 = scmp.ge.s32.totalorder %s8999_s24, 1  ;;  %p186_p10 = scmp.lt.s32.totalorder %s8999_s24, 3 }
  0x15   : > { %p9110_p11 = por %p173_p7, %p38_p0  ;;  %p9114_p12 = por %p179_p8, %p44_p3 }
  0x16   : > { %p9118_p13 = pnand %p7100_p9, %p186_p10  ;;  %s9005_s12 = smov [#allocation7]  }
  0x17   : > { %s11380_s9 = scalar_select %p9110_p11, 1, 0 }
  0x18   : > { %s11381_s10 = scalar_select %p9114_p12, 1, 0 }
  0x19   : > { %s11383_s11 = scalar_select %p9118_p13, 1, 0 }
  0x1a   : > { %11382 = sst [smem:[#allocation22_spill]] %s11381_s10  ;;  %p7505_p1 = pneg %p9118_p13 }
  0x1b   : > { %s198_s13 = sshll.u32 %s9005_s12, 4  ;;  %s9006_s15 = smov [#allocation9]   ;;  %s199_s13 = int_to_ptr.vmem [resolvable:$true] %s198_s13 }
  0x1c   : > { %p9126_p2 = pnand %p7505_p1, %p11181_p4  ;;  %s211_s16 = sshll.u32 %s9006_s15, 4  ;;  %s9130_s16 = int_to_ptr.vmem [resolvable:$true] %s211_s16 }
  0x1d   : > { %s11385_s1 = sld [smem:[#allocation75_spill]] }
  0x1e   : > { %p9140_p3 = pneg %p9126_p2 }
  0x23   : > { %s8837_s19 = scalar_lea.hbm %s11385_s1, 4096 }
  0x24   : > { %p8838_p0 = scmp.ne.s32.totalorder %s11385_s1, %s8837_s19  ;;  %p8844_p9 = scmp.lt.u32.totalorder %s8837_s19, %s11385_s1 }
  0x26   : > { %p8840_p7 = pnand %p9140_p3, %p8838_p0 }
  0x28   : > { %p8841_p8 = pneg %p8840_p7 }
  0x2a   : > { %p8846_p10 = pnand %p8844_p9, %p8841_p8 }
  0x2c   : > { %8849 = shalt.err (!%p8846_p10)
}
  0x2d   : > { %s8850_s15 = scalar_lea.vmem %s199_s13, 4096  ;;  %p8858_p11 = scmp.lt.s32.totalorder %s199_s13, %s199_s13 }
  0x2e   : > { %p8851_p1 = scmp.ne.s32.totalorder %s199_s13, %s8850_s15  ;;  %p8859_p6 = scmp.lt.s32.totalorder %s8850_s15, %s8850_s15 }
  0x30   : > { %p8853_p4 = pnand %p8851_p1, %p9140_p3  ;;  %p8860_p13 = por %p8859_p6, %p8858_p11 }
  0x32   : > { %p8854_p12 = pneg %p8853_p4 }
  0x34   : > { %p8861_p5 = pnand %p8860_p13, %p8854_p12 }
  0x36   : > { %8864 = shalt.err (!%p8861_p5)
}
  0x37   : > { %s9007_s17 = smov 256   ;;  %s9008_s18 = smov 16  }
  0x38   : > { %7508 = dma.hbm_to_vmem [thread:$0]  (!%p9126_p2), %s11385_s1, 4096, %s199_s13, [#allocation8], %s9007_s17, %s9007_s17, %s9008_s18  }
  0x39   : > { %s8865_s12 = scalar_lea.hbm %s11176_s2, 4096 }
  0x3a   : > { %p8866_p4 = scmp.ne.s32.totalorder %s11176_s2, %s8865_s12  ;;  %p8872_p11 = scmp.lt.u32.totalorder %s8865_s12, %s11176_s2 }
  0x3c   : > { %p8868_p6 = pnand %p8866_p4, %p9140_p3 }
  0x3e   : > { %p8869_p5 = pneg %p8868_p6 }
  0x40   : > { %p8874_p12 = pnand %p8872_p11, %p8869_p5 }
  0x42   : > { %8877 = shalt.err (!%p8874_p12)
}
  0x43   : > { %s8878_s13 = scalar_lea.vmem %s9130_s16, 4096  ;;  %p8886_p8 = scmp.lt.s32.totalorder %s9130_s16, %s9130_s16 }
  0x44   : > { %p8879_p13 = scmp.ne.s32.totalorder %s9130_s16, %s8878_s13  ;;  %p8887_p9 = scmp.lt.s32.totalorder %s8878_s13, %s8878_s13 }
  0x46   : > { %p8881_p0 = pnand %p8879_p13, %p9140_p3  ;;  %p8888_p10 = por %p8887_p9, %p8886_p8 }
  0x48   : > { %p8882_p7 = pneg %p8881_p0 }
  0x4a   : > { %p8889_p1 = pnand %p8888_p10, %p8882_p7 }
  0x4c   : > { %8892 = shalt.err (!%p8889_p1)
}
  0x4d   : > { %7511 = dma.hbm_to_vmem [thread:$0]  (!%p9126_p2), %s11176_s2, 4096, %s9130_s16, [#allocation8], %s9007_s17, %s9007_s17, %s9008_s18  }
  0x4e   : > { %s9009_s10 = smov [#allocation10]   ;;  %s8893_s29 = scalar_lea.hbm %s11178_s4, 1024 }
  0x4f   : > { %s227_s20 = sshll.u32 %s9009_s10, 4  ;;  %p8894_p4 = scmp.ne.s32.totalorder %s11178_s4, %s8893_s29  ;;  %s228_s20 = int_to_ptr.vmem [resolvable:$true] %s227_s20 }
  0x50   : > { %p8900_p11 = scmp.lt.u32.totalorder %s8893_s29, %s11178_s4 }
  0x51   : > { %p8896_p6 = pnand %p8894_p4, %p9140_p3 }
  0x53   : > { %p8897_p5 = pneg %p8896_p6 }
  0x55   : > { %p8902_p12 = pnand %p8900_p11, %p8897_p5 }
  0x57   : > { %8905 = shalt.err (!%p8902_p12)
}
  0x58   : > { %s8906_s16 = scalar_lea.vmem %s228_s20, 1024  ;;  %p8914_p8 = scmp.lt.s32.totalorder %s228_s20, %s228_s20 }
  0x59   : > { %p8907_p13 = scmp.ne.s32.totalorder %s228_s20, %s8906_s16  ;;  %p8915_p9 = scmp.lt.s32.totalorder %s8906_s16, %s8906_s16 }
  0x5b   : > { %p8909_p0 = pnand %p8907_p13, %p9140_p3  ;;  %p8916_p10 = por %p8915_p9, %p8914_p8 }
  0x5d   : > { %p8910_p7 = pneg %p8909_p0 }
  0x5f   : > { %p8917_p1 = pnand %p8916_p10, %p8910_p7 }
  0x61   : > { %8920 = shalt.err (!%p8917_p1)
}
  0x62   : > { %s9010_s17 = smov 64   ;;  %s9011_s18 = smov 4  }
  0x63   : > { %7514 = dma.hbm_to_vmem [thread:$0]  (!%p9126_p2), %s11178_s4, 1024, %s228_s20, [#allocation11], %s9010_s17, %s9010_s17, %s9011_s18  }
  0x64   : > { %p7104_p4 = scmp.ge.s32.totalorder %s8999_s24, 2 }
  0x66   : > { %240 = sbr.rel (%p7104_p4) target bundleno = 124 (0x7c), region = 36 }
  0x6d   : > { %s244_s28 = sand.u32 1, %s8995_s23   ;;  %s7426_s30 = sshll.u32 %s8999_s24, 9 }
  0x6e   : > { %s7105_s14 = sshll.u32 %s244_s28, 8  ;;  %s254_s20 = scalar_lea.hbm %s11174_s0, %s7426_s30 }
  0x6f   : > { %p11387_p2 = scmp.ne.s32.totalorder %s11378_s7, 0  ;;  %s248_s29 = scalar_lea.vmem [#allocation4], %s7105_s14 }
  0x70   : > { %s267_s12 = sshll.u32 %s248_s29, 4  ;;  %s9012_s13 = smov 1024   ;;  %s268_s12 = int_to_ptr.vmem [resolvable:$true] %s267_s12 }
  0x71   : > { %s7488_s26 = scalar_select %p11387_p2, [#allocation0], [#allocation15] }
  0x72   : > { %7489 = sst [smem:[#allocation14]] (%p11387_p2), %s9012_s13  ;;  %s9013_s16 = smov 512  }
  0x73   : > { %s259_s15 = sld [smem:[%s7488_s26]]   ;;  %s9014_s17 = smov 8  }
  0x74   : > { %7490 = sst [smem:[#allocation14 + $0x1]] (%p11387_p2), %s9013_s16  ;;  %s9015_s18 = smov 64  }
  0x75   : > { %7491 = sst [smem:[#allocation14 + $0x2]] (%p11387_p2), %s9014_s17  ;;  %s9016_s1 = smov 4  }
  0x76   : > { %7492 = sst [smem:[#allocation14 + $0x3]] (%p11387_p2), %s9015_s18  ;;  %s245_s14 = scalar_lea.sflag [#allocation5], %s244_s28 }
  0x77   : > { %7493 = sst [smem:[#allocation14 + $0x4]] (%p11387_p2), %s9015_s18  ;;  %s9017_s10 = smov [#allocation13]  }
  0x78   : > { %7494 = sst [smem:[#allocation14 + $0x5]] (%p11387_p2), %s9016_s1 }
  0x79   : > { %s7108_s27 = sshll.u32 %s259_s15, 26 }
  0x7a   : > { %s7109_s30 = sadd.s32 134217728, %s7108_s27 }
  0x7b   : > { %7495 = dma.general (%p11387_p2), %s254_s20, 4096, %s268_s12, %s245_s14, %s9017_s10, [#allocation14], %s7109_s30, 0  }
  0x7c PF: > { %p11388_p3 = scmp.ne.s32.totalorder %s11383_s11, 0 }
  0x7e   : > { %292 = sbr.rel (%p11388_p3) target bundleno = 3091 (0xc13), region = 44 }
  0x85   : > { %s9224_s19 = sand.u32 1, %s8991_s22   ;;  %p11389_p6 = scmp.ne.s32.totalorder %s11379_s8, 0 }
  0x86   : > { %s7111_s26 = sshll.u32 %s9224_s19, 8  ;;  %s295_s29 = scalar_lea.sflag [#allocation5], %s9224_s19 }
  0x87   : > { %s9228_s15 = scalar_lea.vmem [#allocation4], %s7111_s26 }
  0x88   : > { %8970 = dma.done.wait (%p11389_p6), %s295_s29, 4096  }
  0x89   : > { %8972 = vsyncadd (%p11389_p6), %s295_s29, 4294963200  ;;  %p11390_p5 = scmp.eq.s32.totalorder %s9079_s25, 0 }
  0x8b   : > { %8974 = dma.done.wait (%p11390_p5), [#allocation8], 8192   ;;  %p11391_p11 = pmov %p11390_p5 }
  0x8c   : > { %p11392_p12 = pmov %p11390_p5 }
  0x8d   : > { %8976 = vsyncadd (%p11391_p11), [#allocation8], 4294959104 }
  0x8e   : > { %8978 = dma.done.wait (%p11392_p12), [#allocation11], 1024   ;;  %p11393_p13 = pmov %p11390_p5 }
  0x8f   : > { %s7115_s7 = sshll.u32 %s9224_s19, 6  ;;  %s9245_s28 = smov 0  }
  0x90   : > { %8980 = vsyncadd (%p11393_p13), [#allocation11], 4294966272  ;;  %s9243_s11 = scalar_lea.vmem [#allocation12], %s7115_s7 }
  0x91 LB: >> { %v7583_v0 = vld [vmem:[#allocation7 + $0x4] ss:$16 sps:$4 sm:$0xff]   ;;  %v7585_v1 = vld [vmem:[#allocation7 + $0xc] ss:$16 sps:$4 sm:$0xff]   ;;  %v9018_v2 = vmov 0   ;;  %s7427_s8 = sshll.u32 %s9003_s28, 5  ;;  %v393_v37 = vlaneseq  ;;  %s9003_s28 = sphi %s9245_s28, %s347_s28  }
  0x92   : >> { %629 = vmatprep.mubr.bf16.mxu0 %v9018_v2  ;;  %702 = vmatprep.mubr.bf16.mxu1 %v9018_v2  ;;  %v7587_v3 = vld [vmem:[#allocation7] ss:$16 sps:$4 sm:$0xff]   ;;  %v7588_v4 = vld [vmem:[#allocation7 + $0x8] ss:$16 sps:$4 sm:$0xff]   ;;  %v7589_v5 = vld [vmem:[#allocation7 + $0x24] ss:$16 sps:$4 sm:$0xff]   ;;  %s9254_s20 = scalar_lea.vmem %s9228_s15, %s7427_s8 [#allocation4] }
  0x93   : >> { %597 = vmatprep.subr.bf16.mxu0 %v7583_v0  ;;  %670 = vmatprep.subr.bf16.mxu1 %v7585_v1  ;;  %v7591_v6 = vld [vmem:[#allocation7 + $0x2c] ss:$16 sps:$4 sm:$0xff]   ;;  %v7593_v7 = vld [vmem:[#allocation7 + $0x20] ss:$16 sps:$4 sm:$0xff]   ;;  %v7594_v8 = vld [vmem:[#allocation7 + $0x28] ss:$16 sps:$4 sm:$0xff]  }
  0x94   : >> { %598 = vmatpush1.bf16.msra.mxu0 %v7587_v3  ;;  %671 = vmatpush1.bf16.msra.mxu1 %v7588_v4  ;;  %v7595_v9 = vld [vmem:[#allocation7 + $0x44] ss:$16 sps:$4 sm:$0xff]   ;;  %v7597_v10 = vld [vmem:[#allocation7 + $0x4c] ss:$16 sps:$4 sm:$0xff]   ;;  %v7599_v11 = vld [vmem:[#allocation7 + $0x40] ss:$16 sps:$4 sm:$0xff]  }
  0x95   : >> { %599 = vmatprep.subr.bf16.mxu0 %v7589_v5  ;;  %672 = vmatprep.subr.bf16.mxu1 %v7591_v6  ;;  %v7600_v12 = vld [vmem:[#allocation7 + $0x48] ss:$16 sps:$4 sm:$0xff]   ;;  %v7601_v13 = vld [vmem:[#allocation7 + $0x64] ss:$16 sps:$4 sm:$0xff]   ;;  %v7603_v14 = vld [vmem:[#allocation7 + $0x6c] ss:$16 sps:$4 sm:$0xff]  }
  0x96   : >> { %v7605_v15 = vld [vmem:[#allocation7 + $0x60] ss:$16 sps:$4 sm:$0xff]   ;;  %v7606_v16 = vld [vmem:[#allocation7 + $0x68] ss:$16 sps:$4 sm:$0xff]   ;;  %v7607_v17 = vld [vmem:[#allocation7 + $0x84] ss:$16 sps:$4 sm:$0xff]  }
  0x97   : >> { %v7609_v18 = vld [vmem:[#allocation7 + $0x8c] ss:$16 sps:$4 sm:$0xff]   ;;  %v7611_v19 = vld [vmem:[#allocation7 + $0x80] ss:$16 sps:$4 sm:$0xff]   ;;  %v7612_v20 = vld [vmem:[#allocation7 + $0x88] ss:$16 sps:$4 sm:$0xff]  }
  0x98   : >> { %600 = vmatpush1.bf16.msra.mxu0 %v7593_v7  ;;  %673 = vmatpush1.bf16.msra.mxu1 %v7594_v8  ;;  %v7613_v21 = vld [vmem:[#allocation7 + $0xa4] ss:$16 sps:$4 sm:$0xff]   ;;  %v7615_v22 = vld [vmem:[#allocation7 + $0xac] ss:$16 sps:$4 sm:$0xff]   ;;  %v7617_v23 = vld [vmem:[#allocation7 + $0xa0] ss:$16 sps:$4 sm:$0xff]  }
  0x99   : >> { %601 = vmatprep.subr.bf16.mxu0 %v7595_v9  ;;  %674 = vmatprep.subr.bf16.mxu1 %v7597_v10  ;;  %v7618_v24 = vld [vmem:[#allocation7 + $0xa8] ss:$16 sps:$4 sm:$0xff]   ;;  %v7619_v25 = vld [vmem:[#allocation7 + $0xc4] ss:$16 sps:$4 sm:$0xff]   ;;  %v7621_v26 = vld [vmem:[#allocation7 + $0xcc] ss:$16 sps:$4 sm:$0xff]  }
  0x9a   : >> { %v7623_v27 = vld [vmem:[#allocation7 + $0xc0] ss:$16 sps:$4 sm:$0xff]   ;;  %v7624_v28 = vld [vmem:[#allocation7 + $0xc8] ss:$16 sps:$4 sm:$0xff]   ;;  %v7625_v29 = vld [vmem:[#allocation7 + $0xe4] ss:$16 sps:$4 sm:$0xff]  }
  0x9b   : >> { %v7627_v30 = vld [vmem:[#allocation7 + $0xec] ss:$16 sps:$4 sm:$0xff]   ;;  %v7629_v31 = vld [vmem:[#allocation7 + $0xe0] ss:$16 sps:$4 sm:$0xff]   ;;  %v7630_v32 = vld [vmem:[#allocation7 + $0xe8] ss:$16 sps:$4 sm:$0xff]  }
  0x9c   : >> { %602 = vmatpush1.bf16.msra.mxu0 %v7599_v11  ;;  %675 = vmatpush1.bf16.msra.mxu1 %v7600_v12  ;;  %v7631_v33 = vld [vmem:[%s9254_s20] sm:$0xff]   ;;  %v7632_v34 = vld [vmem:[%s9254_s20 + $0x8] sm:$0xff]   ;;  %v7633_v35 = vld [vmem:[%s9254_s20 + $0x10] sm:$0xff]   ;;  %v394_v38 = vshrl.u32 %v393_v37, 7  ;;  %s7428_s16 = sshll.u32 %s9003_s28, 7  ;;  %s347_s28 = sadd.s32 1, %s9003_s28  }
  0x9d   : >> { %603 = vmatprep.subr.bf16.mxu0 %v7601_v13  ;;  %676 = vmatprep.subr.bf16.mxu1 %v7603_v14  ;;  %v7634_v36 = vld [vmem:[%s9254_s20 + $0x18] sm:$0xff]   ;;  %v391_v41 = vld [vmem:[%s11177_s3] sm:$0xf]  ;;  %s9286_s17 = scalar_lea.vmem [#allocation2], %s7428_s16  ;;  %p344_p0 = scmp.ge.s32.totalorder %s347_s28, 8  }
  0x9e   : >> { %v395_v39 = vsub.s32 0, %v394_v38  ;;  %v403_v40 = vsub.s32 2, %v394_v38  ;;  %v399_v42 = vsub.s32 1, %v394_v38  ;;  %v407_v43 = vsub.s32 3, %v394_v38  ;;  %s7429_s1 = sshll.u32 (%p344_p0), %s9079_s25, 10  ;;  %s6988_s30 = sshll.u32 (%p344_p0), %s9243_s11, 4  ;;  %s11127_s30 = int_to_ptr.vmem [resolvable:$true] %s6988_s30 }
  0x9f   : > { %s11125_s26 = scalar_lea.hbm (%p344_p0), %s11180_s6, %s7429_s1  ;;  %s6975_s25 = scalar_lea.sflag (%p344_p0), [#allocation6], %s9224_s19 }
  0xa0   : >> { %604 = vmatpush1.bf16.msra.mxu0 %v7605_v15  ;;  %677 = vmatpush1.bf16.msra.mxu1 %v7606_v16  ;;  %v9269_v44 = vrot.slane %v391_v41, %v395_v39  ;;  %v9271_v45 = vrot.slane %v391_v41, %v403_v40  ;;  %v9273_v48 = vrot.slane %v391_v41, %v399_v42  ;;  %s8921_s29 = scalar_lea.vmem (%p344_p0), %s11127_s30, 1024  ;;  %p11637_p8 = scmp.ne.s32.totalorder (%p344_p0), %s11380_s9, 0 }
  0xa1   : >> { %605 = vmatprep.subr.bf16.mxu0 %v7607_v17  ;;  %678 = vmatprep.subr.bf16.mxu1 %v7609_v18  ;;  %v9275_v49 = vrot.slane %v391_v41, %v407_v43  ;;  %p8922_p7 = scmp.ne.s32.totalorder (%p344_p0), %s11127_s30, %s8921_s29  ;;  %s9020_s15 = smov (%p344_p0), [#allocation12]  }
  0xa2   : > { %s8925_s7 = sshll.u32 (%p344_p0), %s9020_s15, 4  ;;  %s8926_s7 = int_to_ptr.vmem [resolvable:$false] %s8925_s7 }
  0xa3   : > { %p8923_p9 = pnand (%p344_p0), %p8922_p7, %p11637_p8  ;;  %s8927_s28 = scalar_lea.vmem (%p344_p0), %s8926_s7, 2048 }
  0xa4   : >> { %606 = vmatpush1.bf16.msra.mxu0 %v7611_v19  ;;  %679 = vmatpush1.bf16.msra.mxu1 %v7612_v20  ;;  %p8928_p1 = scmp.lt.s32.totalorder (%p344_p0), %s11127_s30, %s8926_s7  ;;  %p8929_p2 = scmp.lt.s32.totalorder (%p344_p0), %s8927_s28, %s8921_s29 }
  0xa5   : >> { %607 = vmatprep.subr.bf16.mxu0 %v7613_v21  ;;  %680 = vmatprep.subr.bf16.mxu1 %v7615_v22  ;;  %p8924_p10 = pneg (%p344_p0), %p8923_p9 }
  0xa6   : > { %p8930_p3 = por (%p344_p0), %p8929_p2, %p8928_p1 }
  0xa8   : >> { %608 = vmatpush1.bf16.msra.mxu0 %v7617_v23  ;;  %681 = vmatpush1.bf16.msra.mxu1 %v7618_v24  ;;  %p8931_p6 = pnand (%p344_p0), %p8930_p3, %p8924_p10 }
  0xa9   : >> { %609 = vmatprep.subr.bf16.mxu0 %v7619_v25  ;;  %682 = vmatprep.subr.bf16.mxu1 %v7621_v26 }
  0xac   : >> { %610 = vmatpush1.bf16.msra.mxu0 %v7623_v27  ;;  %683 = vmatpush1.bf16.msra.mxu1 %v7624_v28 }
  0xad   : >> { %611 = vmatprep.subr.bf16.mxu0 %v7625_v29  ;;  %684 = vmatprep.subr.bf16.mxu1 %v7627_v30 }
  0xb0   : >> { %612 = vmatpush1.bf16.msra.mxu0 %v7629_v31  ;;  %685 = vmatpush1.bf16.msra.mxu1 %v7630_v32 }
  0xb3   : >> { %630 = vmatmul.mubr.bf16.vlgmr.msra.gmra.mrb[0].mxu0 %v7631_v33  ;;  %703 = vmatmul.mubr.bf16.vlgmr.msra.gmra.mrb[0].mxu1 %v7631_v33 }
  0xb4   : >> { %639 = vmatprep.mubr.bf16.mxu0 %v9018_v2  ;;  %712 = vmatprep.mubr.bf16.mxu1 %v9018_v2 }
  0xbb   : >> { %640 = vmatmul.mubr.bf16.gmra.mrb[4].mxu0 %v7632_v34  ;;  %713 = vmatmul.mubr.bf16.gmra.mrb[4].mxu1 %v7632_v34 }
  0xbc   : >> { %649 = vmatprep.mubr.bf16.mxu0 %v9018_v2  ;;  %722 = vmatprep.mubr.bf16.mxu1 %v9018_v2 }
  0xc3   : >> { %650 = vmatmul.mubr.bf16.gmra.mrb[8].mxu0 %v7633_v35  ;;  %723 = vmatmul.mubr.bf16.gmra.mrb[8].mxu1 %v7633_v35 }
  0xc4   : >> { %659 = vmatprep.mubr.bf16.mxu0 %v9018_v2  ;;  %732 = vmatprep.mubr.bf16.mxu1 %v9018_v2 }
  0xcb   : >> { %660 = vmatmul.mubr.bf16.gmra.mrb[12].mxu0 %v7634_v36  ;;  %733 = vmatmul.mubr.bf16.gmra.mrb[12].mxu1 %v7634_v36 }
 0x186   : >> { %v631_v46 = vpop.f32.mrb[0].mxu0  ;;  %v704_v47 = vpop.f32.mrb[0].mxu1 }
 0x187   : >> { %v633_v50 = vpop.f32.mrb[1].mxu0  ;;  %v706_v51 = vpop.f32.mrb[1].mxu1  ;;  %v632_v54 = vadd.f32 %v631_v46, %v9269_v44  ;;  %v705_v55 = vadd.f32 %v704_v47, %v9271_v45 }
 0x188   : >> { %v635_v52 = vpop.f32.mrb[2].mxu0  ;;  %v708_v53 = vpop.f32.mrb[2].mxu1  ;;  %v634_v60 = vadd.f32 %v633_v50, %v9273_v48  ;;  %v707_v61 = vadd.f32 %v706_v51, %v9275_v49 }
 0x189   : >> { %v636_v56 = vadd.f32 %v635_v52, %v9269_v44  ;;  %v709_v57 = vadd.f32 %v708_v53, %v9271_v45  ;;  %v637_v58 = vpop.f32.mrb[3].mxu0  ;;  %v710_v59 = vpop.f32.mrb[3].mxu1 }
 0x18a   : >> { %v638_v62 = vadd.f32 %v637_v58, %v9273_v48  ;;  %v711_v63 = vadd.f32 %v710_v59, %v9275_v49 }
 0x18b   : >> { %v743_v0 = vpack.c.bf16 %v636_v56, %v632_v54  ;;  %v745_v1 = vpack.c.bf16 %v709_v57, %v705_v55 }
 0x18c   : >> { %v744_v2 = vpack.c.bf16 %v638_v62, %v634_v60  ;;  %v746_v3 = vpack.c.bf16 %v711_v63, %v707_v61 }
 0x18d   : >> { %762 = vst [vmem:[%s9286_s17] sm:$0xff] %v743_v0  ;;  %764 = vst [vmem:[%s9286_s17 + $0x10] sm:$0xff] %v745_v1 }
 0x18e   : >> { %763 = vst [vmem:[%s9286_s17 + $0x8] sm:$0xff] %v744_v2  ;;  %765 = vst [vmem:[%s9286_s17 + $0x18] sm:$0xff] %v746_v3  ;;  %v641_v4 = vpop.f32.mrb[4].mxu0  ;;  %v714_v5 = vpop.f32.mrb[4].mxu1 }
 0x18f   : >> { %v643_v6 = vpop.f32.mrb[5].mxu0  ;;  %v716_v7 = vpop.f32.mrb[5].mxu1  ;;  %v642_v10 = vadd.f32 %v641_v4, %v9269_v44  ;;  %v715_v11 = vadd.f32 %v714_v5, %v9271_v45  ;;  %v9341_v4 = vld [vmem:[#allocation9 + $0xc] ss:$16 sps:$4 sm:$0xff] (%p344_p0)   ;;  %v9343_v5 = vld [vmem:[#allocation9 + $0x20] ss:$16 sps:$4 sm:$0xff] (%p344_p0)  }
 0x190   : >> { %v645_v8 = vpop.f32.mrb[6].mxu0  ;;  %v718_v9 = vpop.f32.mrb[6].mxu1  ;;  %v644_v16 = vadd.f32 %v643_v6, %v9273_v48  ;;  %v717_v17 = vadd.f32 %v716_v7, %v9275_v49  ;;  %v9345_v6 = vld [vmem:[#allocation9 + $0x8] ss:$16 sps:$4 sm:$0xff] (%p344_p0)   ;;  %v9348_v7 = vld [vmem:[#allocation9 + $0x44] ss:$16 sps:$4 sm:$0xff] (%p344_p0)   ;;  %1055 = vmatprep.subr.bf16.mxu1 (%p344_p0), %v9341_v4 }
 0x191   : >> { %v646_v12 = vadd.f32 %v645_v8, %v9269_v44  ;;  %v719_v13 = vadd.f32 %v718_v9, %v9271_v45  ;;  %v647_v14 = vpop.f32.mrb[7].mxu0  ;;  %v720_v15 = vpop.f32.mrb[7].mxu1  ;;  %v9351_v8 = vld [vmem:[#allocation9 + $0x2c] ss:$16 sps:$4 sm:$0xff] (%p344_p0)   ;;  %1056 = vmatpush1.bf16.msra.mxu1 (%p344_p0), %v9345_v6  ;;  %v9354_v9 = vld [vmem:[#allocation9 + $0x28] ss:$16 sps:$4 sm:$0xff] (%p344_p0)  }
 0x192   : >> { %v648_v18 = vadd.f32 %v647_v14, %v9273_v48  ;;  %v721_v19 = vadd.f32 %v720_v15, %v9275_v49  ;;  %1057 = vmatprep.subr.bf16.mxu1 (%p344_p0), %v9351_v8  ;;  %v9370_v14 = vld [vmem:[#allocation9 + $0x60] ss:$16 sps:$4 sm:$0xff] (%p344_p0)   ;;  %v9372_v15 = vld [vmem:[#allocation9 + $0x6c] ss:$16 sps:$4 sm:$0xff] (%p344_p0)  }
 0x193   : >> { %v747_v20 = vpack.c.bf16 %v646_v12, %v642_v10  ;;  %v749_v21 = vpack.c.bf16 %v719_v13, %v715_v11  ;;  %v9358_v10 = vld [vmem:[#allocation9 + $0x40] ss:$16 sps:$4 sm:$0xff] (%p344_p0)   ;;  %v9361_v11 = vld [vmem:[#allocation9 + $0x64] ss:$16 sps:$4 sm:$0xff] (%p344_p0)   ;;  %v9363_v12 = vld [vmem:[#allocation9 + $0x4c] ss:$16 sps:$4 sm:$0xff] (%p344_p0)  }
 0x194   : >> { %v748_v22 = vpack.c.bf16 %v648_v18, %v644_v16  ;;  %v750_v23 = vpack.c.bf16 %v721_v19, %v717_v17  ;;  %v9366_v13 = vld [vmem:[#allocation9 + $0x48] ss:$16 sps:$4 sm:$0xff] (%p344_p0)   ;;  %v9375_v16 = vld [vmem:[#allocation9 + $0x84] ss:$16 sps:$4 sm:$0xff] (%p344_p0)   ;;  %v9378_v17 = vld [vmem:[#allocation9 + $0x80] ss:$16 sps:$4 sm:$0xff] (%p344_p0)  }
 0x195   : >> { %766 = vst [vmem:[%s9286_s17 + $0x20] sm:$0xff] %v747_v20  ;;  %768 = vst [vmem:[%s9286_s17 + $0x30] sm:$0xff] %v749_v21  ;;  %1058 = vmatpush1.bf16.msra.mxu1 (%p344_p0), %v9354_v9  ;;  %v9380_v18 = vld [vmem:[#allocation9 + $0x68] ss:$16 sps:$4 sm:$0xff] (%p344_p0)   ;;  %v9384_v19 = vld [vmem:[#allocation9 + $0x8c] ss:$16 sps:$4 sm:$0xff] (%p344_p0)  }
 0x196   : >> { %767 = vst [vmem:[%s9286_s17 + $0x28] sm:$0xff] %v748_v22  ;;  %769 = vst [vmem:[%s9286_s17 + $0x38] sm:$0xff] %v750_v23  ;;  %v651_v24 = vpop.f32.mrb[8].mxu0  ;;  %v724_v25 = vpop.f32.mrb[8].mxu1  ;;  %1059 = vmatprep.subr.bf16.mxu1 (%p344_p0), %v9363_v12  ;;  %v9387_v20 = vld [vmem:[#allocation9 + $0xa4] ss:$16 sps:$4 sm:$0xff] (%p344_p0)  }
 0x197   : >> { %v653_v26 = vpop.f32.mrb[9].mxu0  ;;  %v726_v27 = vpop.f32.mrb[9].mxu1  ;;  %v652_v30 = vadd.f32 %v651_v24, %v9269_v44  ;;  %v725_v31 = vadd.f32 %v724_v25, %v9271_v45  ;;  %v9390_v21 = vld [vmem:[#allocation9 + $0x88] ss:$16 sps:$4 sm:$0xff] (%p344_p0)   ;;  %v9394_v22 = vld [vmem:[#allocation9 + $0xa0] ss:$16 sps:$4 sm:$0xff] (%p344_p0)  }
 0x198   : >> { %v655_v28 = vpop.f32.mrb[10].mxu0  ;;  %v728_v29 = vpop.f32.mrb[10].mxu1  ;;  %v654_v36 = vadd.f32 %v653_v26, %v9273_v48  ;;  %v727_v37 = vadd.f32 %v726_v27, %v9275_v49  ;;  %v9396_v23 = vld [vmem:[#allocation9 + $0xac] ss:$16 sps:$4 sm:$0xff] (%p344_p0)   ;;  %v9399_v24 = vld [vmem:[#allocation9 + $0xc4] ss:$16 sps:$4 sm:$0xff] (%p344_p0)  }
 0x199   : >> { %v656_v32 = vadd.f32 %v655_v28, %v9269_v44  ;;  %v729_v33 = vadd.f32 %v728_v29, %v9271_v45  ;;  %v657_v34 = vpop.f32.mrb[11].mxu0  ;;  %v730_v35 = vpop.f32.mrb[11].mxu1  ;;  %1060 = vmatpush1.bf16.msra.mxu1 (%p344_p0), %v9366_v13  ;;  %v9401_v25 = vld [vmem:[#allocation9 + $0xc0] ss:$16 sps:$4 sm:$0xff] (%p344_p0)   ;;  %v9403_v26 = vld [vmem:[#allocation9 + $0xa8] ss:$16 sps:$4 sm:$0xff] (%p344_p0)  }
 0x19a   : >> { %v658_v38 = vadd.f32 %v657_v34, %v9273_v48  ;;  %v731_v39 = vadd.f32 %v730_v35, %v9275_v49  ;;  %1061 = vmatprep.subr.bf16.mxu1 (%p344_p0), %v9372_v15  ;;  %11394 = vst [vmem:[#allocation23_spill] sm:$0xff] (%p344_p0), %v9401_v25  ;;  %v9405_v27 = vld [vmem:[#allocation9 + $0xcc] ss:$16 sps:$4 sm:$0xff] (%p344_p0)   ;;  %v9408_v28 = vld [vmem:[#allocation9 + $0xe4] ss:$16 sps:$4 sm:$0xff] (%p344_p0)  }
 0x19b   : >> { %v751_v40 = vpack.c.bf16 %v656_v32, %v652_v30  ;;  %v753_v41 = vpack.c.bf16 %v729_v33, %v725_v31  ;;  %11395 = vst [vmem:[#allocation24_spill] sm:$0xff] (%p344_p0), %v9405_v27  ;;  %11396 = vst [vmem:[#allocation25_spill] sm:$0xff] (%p344_p0), %v9408_v28  ;;  %v9413_v29 = vld [vmem:[#allocation9 + $0xc8] ss:$16 sps:$4 sm:$0xff] (%p344_p0)   ;;  %v9415_v30 = vld [vmem:[#allocation9 + $0xe0] ss:$16 sps:$4 sm:$0xff] (%p344_p0)  }
 0x19c   : >> { %v752_v42 = vpack.c.bf16 %v658_v38, %v654_v36  ;;  %v754_v43 = vpack.c.bf16 %v731_v39, %v727_v37  ;;  %11397 = vst [vmem:[#allocation26_spill] sm:$0xff] (%p344_p0), %v9413_v29  ;;  %11398 = vst [vmem:[#allocation27_spill] sm:$0xff] (%p344_p0), %v9415_v30  ;;  %v9417_v31 = vld [vmem:[#allocation9 + $0xec] ss:$16 sps:$4 sm:$0xff] (%p344_p0)   ;;  %v9423_v32 = vld [vmem:[#allocation9 + $0xe8] ss:$16 sps:$4 sm:$0xff] (%p344_p0)  }
 0x19d   : >> { %770 = vst [vmem:[%s9286_s17 + $0x40] sm:$0xff] %v751_v40  ;;  %772 = vst [vmem:[%s9286_s17 + $0x50] sm:$0xff] %v753_v41  ;;  %1062 = vmatpush1.bf16.msra.mxu1 (%p344_p0), %v9380_v18 }
 0x19e   : >> { %771 = vst [vmem:[%s9286_s17 + $0x48] sm:$0xff] %v752_v42  ;;  %773 = vst [vmem:[%s9286_s17 + $0x58] sm:$0xff] %v754_v43  ;;  %v661_v46 = vpop.f32.mrb[12].mxu0  ;;  %v734_v47 = vpop.f32.mrb[12].mxu1  ;;  %1063 = vmatprep.subr.bf16.mxu1 (%p344_p0), %v9384_v19 }
 0x19f   : >> { %v663_v50 = vpop.f32.mrb[13].mxu0  ;;  %v736_v51 = vpop.f32.mrb[13].mxu1  ;;  %v662_v54 = vadd.f32 %v661_v46, %v9269_v44  ;;  %v735_v55 = vadd.f32 %v734_v47, %v9271_v45  ;;  %11399 = vst [vmem:[#allocation28_spill] sm:$0xff] (%p344_p0), %v9417_v31  ;;  %11400 = vst [vmem:[#allocation29_spill] sm:$0xff] (%p344_p0), %v9423_v32 }
 0x1a0   : >> { %v665_v52 = vpop.f32.mrb[14].mxu0  ;;  %v738_v53 = vpop.f32.mrb[14].mxu1  ;;  %v664_v60 = vadd.f32 %v663_v50, %v9273_v48  ;;  %v737_v61 = vadd.f32 %v736_v51, %v9275_v49  ;;  %346 = sbr.rel (!%p344_p0) target bundleno = 145 (0x91), region = 129 }
 0x1a1   : >> { %v666_v56 = vadd.f32 %v665_v52, %v9269_v44  ;;  %v739_v57 = vadd.f32 %v738_v53, %v9271_v45  ;;  %v667_v58 = vpop.f32.mrb[15].mxu0  ;;  %v740_v59 = vpop.f32.mrb[15].mxu1  ;;  %v9331_v44 = vld [vmem:[#allocation9 + $0x4] ss:$16 sps:$4 sm:$0xff] (%p344_p0)   ;;  %v9333_v45 = vld [vmem:[#allocation9] ss:$16 sps:$4 sm:$0xff] (%p344_p0)   ;;  %1064 = vmatpush1.bf16.msra.mxu1 (%p344_p0), %v9390_v21 }
 0x1a2   : >> { %v668_v62 = vadd.f32 %v667_v58, %v9273_v48  ;;  %v741_v63 = vadd.f32 %v740_v59, %v9275_v49  ;;  %v11189_v48 = vmov (%p344_p0), 0   ;;  %1002 = vmatprep.subr.bf16.mxu0 (%p344_p0), %v9331_v44  ;;  %v9338_v49 = vld [vmem:[#allocation9 + $0x24] ss:$16 sps:$4 sm:$0xff] (%p344_p0)   ;;  %1065 = vmatprep.subr.bf16.mxu1 (%p344_p0), %v9396_v23 }
 0x1a3   : >> { %v755_v0 = vpack.c.bf16 %v666_v56, %v662_v54  ;;  %v757_v1 = vpack.c.bf16 %v739_v57, %v735_v55  ;;  %1034 = vmatprep.mubr.bf16.mxu0 (%p344_p0), %v11189_v48  ;;  %1087 = vmatprep.mubr.bf16.mxu1 (%p344_p0), %v11189_v48 }
 0x1a4   : >> { %v756_v2 = vpack.c.bf16 %v668_v62, %v664_v60  ;;  %v758_v3 = vpack.c.bf16 %v741_v63, %v737_v61  ;;  %1003 = vmatpush1.bf16.msra.mxu0 (%p344_p0), %v9333_v45 }
 0x1a5   : >> { %774 = vst [vmem:[%s9286_s17 + $0x60] sm:$0xff] %v755_v0  ;;  %776 = vst [vmem:[%s9286_s17 + $0x70] sm:$0xff] %v757_v1  ;;  %1004 = vmatprep.subr.bf16.mxu0 (%p344_p0), %v9338_v49  ;;  %1066 = vmatpush1.bf16.msra.mxu1 (%p344_p0), %v9403_v26 }
 0x1a6   : >> { %775 = vst [vmem:[%s9286_s17 + $0x68] sm:$0xff] %v756_v2  ;;  %777 = vst [vmem:[%s9286_s17 + $0x78] sm:$0xff] %v758_v3  ;;  %1067 = vmatprep.subr.bf16.mxu1 (%p344_p0), %v9405_v27 }
 0x1a8   : > { %1005 = vmatpush1.bf16.msra.mxu0 %v9343_v5 }
 0x1a9   : > { %1006 = vmatprep.subr.bf16.mxu0 %v9348_v7  ;;  %1068 = vmatpush1.bf16.msra.mxu1 %v9413_v29 }
 0x1aa   : > { %1069 = vmatprep.subr.bf16.mxu1 %v9417_v31 }
 0x1ac   : > { %1007 = vmatpush1.bf16.msra.mxu0 %v9358_v10 }
 0x1ad   : > { %1008 = vmatprep.subr.bf16.mxu0 %v9361_v11  ;;  %1070 = vmatpush1.bf16.msra.mxu1 %v9423_v32  ;;  %v778_v33 = vld [vmem:[#allocation2] sm:$0xff]  ;;  %v779_v35 = vld [vmem:[#allocation2 + $0x8] sm:$0xff]  ;;  %v780_v56 = vld [vmem:[#allocation2 + $0x10] sm:$0xff] }
 0x1ae   : > { %1588 = vmatprep.subr.bf16.mxu1 %v9341_v4  ;;  %v786_v34 = vld [vmem:[#allocation2 + $0x40] sm:$0xff]  ;;  %v787_v36 = vld [vmem:[#allocation2 + $0x48] sm:$0xff]  ;;  %v794_v37 = vunpack.c.l.bf16 %v778_v33  ;;  %v795_v39 = vunpack.c.l.bf16 %v779_v35  ;;  %v798_v41 = vunpack.c.h.bf16 %v778_v33  ;;  %v799_v46 = vunpack.c.h.bf16 %v779_v35  ;;  %v788_v62 = vld [vmem:[#allocation2 + $0x50] sm:$0xff] }
 0x1af   : > { %v1196_v38 = vunpack.c.l.bf16 %v786_v34  ;;  %v1197_v40 = vunpack.c.l.bf16 %v787_v36  ;;  %v1200_v42 = vunpack.c.h.bf16 %v786_v34  ;;  %v1201_v47 = vunpack.c.h.bf16 %v787_v36  ;;  %v782_v36 = vld [vmem:[#allocation2 + $0x20] sm:$0xff] }
 0x1b0   : > { %1009 = vmatpush1.bf16.msra.mxu0 %v9370_v14  ;;  %1088 = vmatmul.mubr.bf16.vlgmr.msra.gmra.mrb[0].mxu1 %v11189_v48  ;;  %v796_v34 = vunpack.c.l.bf16 %v780_v56 }
 0x1b1   : > { %1010 = vmatprep.subr.bf16.mxu0 %v9375_v16  ;;  %1097 = vmatprep.mubr.bf16.mxu1 %v11189_v48 }
 0x1b2   : > { %1589 = vmatpush1.bf16.msra.mxu1 %v9345_v6 }
 0x1b3   : > { %1590 = vmatprep.subr.bf16.mxu1 %v9351_v8 }
 0x1b4   : > { %1011 = vmatpush1.bf16.msra.mxu0 %v9378_v17 }
 0x1b5   : > { %1012 = vmatprep.subr.bf16.mxu0 %v9387_v20 }
 0x1b6   : > { %1591 = vmatpush1.bf16.msra.mxu1 %v9354_v9 }
 0x1b7   : > { %1592 = vmatprep.subr.bf16.mxu1 %v9363_v12 }
 0x1b8   : > { %1013 = vmatpush1.bf16.msra.mxu0 %v9394_v22  ;;  %1098 = vmatmul.mubr.bf16.gmra.mrb[4].mxu1 %v11189_v48 }
 0x1b9   : > { %1014 = vmatprep.subr.bf16.mxu0 %v9399_v24  ;;  %1620 = vmatprep.mubr.bf16.mxu1 %v11189_v48 }
 0x1ba   : > { %1593 = vmatpush1.bf16.msra.mxu1 %v9366_v13 }
 0x1bb   : > { %1594 = vmatprep.subr.bf16.mxu1 %v9372_v15 }
 0x1bc   : > { %1015 = vmatpush1.bf16.msra.mxu0 %v9401_v25 }
 0x1bd   : > { %1016 = vmatprep.subr.bf16.mxu0 %v9408_v28 }
 0x1be   : > { %1595 = vmatpush1.bf16.msra.mxu1 %v9380_v18 }
 0x1bf   : > { %1596 = vmatprep.subr.bf16.mxu1 %v9384_v19 }
 0x1c0   : > { %1017 = vmatpush1.bf16.msra.mxu0 %v9415_v30 }
 0x1c1   : > { %1535 = vmatprep.subr.bf16.mxu0 %v9331_v44 }
 0x1c2   : > { %1597 = vmatpush1.bf16.msra.mxu1 %v9390_v21 }
 0x1c3   : > { %1035 = vmatmul.mubr.bf16.vlgmr.msra.gmra.mrb[0].mxu0 %v11189_v48  ;;  %1598 = vmatprep.subr.bf16.mxu1 %v9396_v23 }
 0x1c4   : > { %1044 = vmatprep.mubr.bf16.mxu0 %v11189_v48  ;;  %1536 = vmatpush1.bf16.msra.mxu0 %v9333_v45 }
 0x1c5   : > { %1537 = vmatprep.subr.bf16.mxu0 %v9338_v49 }
 0x1c6   : > { %1599 = vmatpush1.bf16.msra.mxu1 %v9403_v26 }
 0x1c7   : > { %1600 = vmatprep.subr.bf16.mxu1 %v9405_v27  ;;  %v785_v27 = vld [vmem:[#allocation2 + $0x38] sm:$0xff] }
 0x1c8   : > { %1538 = vmatpush1.bf16.msra.mxu0 %v9343_v5 }
 0x1c9   : > { %1539 = vmatprep.subr.bf16.mxu0 %v9348_v7 }
 0x1ca   : > { %1601 = vmatpush1.bf16.msra.mxu1 %v9413_v29 }
 0x1cb   : > { %1045 = vmatmul.mubr.bf16.gmra.mrb[4].mxu0 %v11189_v48  ;;  %1602 = vmatprep.subr.bf16.mxu1 %v9417_v31 }
 0x1cc   : > { %1567 = vmatprep.mubr.bf16.mxu0 %v11189_v48  ;;  %1540 = vmatpush1.bf16.msra.mxu0 %v9358_v10  ;;  %v9482_v48 = vld [vmem:[#allocation2 + $0x30] sm:$0xff] }
 0x1cd   : > { %1541 = vmatprep.subr.bf16.mxu0 %v9361_v11  ;;  %v804_v31 = vunpack.c.l.bf16 %v9482_v48 }
 0x1ce   : > { %1603 = vmatpush1.bf16.msra.mxu1 %v9423_v32 }
 0x1cf   : > { %1800 = vmatprep.subr.bf16.mxu1 %v9341_v4 }
 0x1d0   : > { %1542 = vmatpush1.bf16.msra.mxu0 %v9370_v14 }
 0x1d1   : > { %1543 = vmatprep.subr.bf16.mxu0 %v9375_v16 }
 0x1d4   : > { %1544 = vmatpush1.bf16.msra.mxu0 %v9378_v17 }
 0x1d5   : > { %1545 = vmatprep.subr.bf16.mxu0 %v9387_v20 }
 0x1d8   : > { %1546 = vmatpush1.bf16.msra.mxu0 %v9394_v22 }
 0x1d9   : > { %1547 = vmatprep.subr.bf16.mxu0 %v9399_v24 }
 0x1dc   : > { %1548 = vmatpush1.bf16.msra.mxu0 %v9401_v25 }
 0x1dd   : > { %1549 = vmatprep.subr.bf16.mxu0 %v9408_v28 }
 0x1e0   : > { %1550 = vmatpush1.bf16.msra.mxu0 %v9415_v30 }
 0x1e1   : > { %1747 = vmatprep.subr.bf16.mxu0 %v9331_v44  ;;  %v781_v44 = vld [vmem:[#allocation2 + $0x18] sm:$0xff] }
 0x283   : > { %v1089_v63 = vpop.f32.mrb[0].mxu1 }
 0x284   : > { %v9471_v4 = vpop.f32.mrb[1].mxu1 }
 0x285   : > { %v1093_v35 = vpop.f32.mrb[2].mxu1 }
 0x296   : > { %v1036_v43 = vpop.f32.mrb[0].mxu0 }
 0x297   : > { %v1108_v50 = vadd.f32 %v1036_v43, %v794_v37  ;;  %v1212_v51 = vadd.f32 %v1196_v38, %v1036_v43  ;;  %v1038_v52 = vpop.f32.mrb[1].mxu0  ;;  %v1198_v38 = vunpack.c.l.bf16 %v788_v62  ;;  %v797_v43 = vunpack.c.l.bf16 %v781_v44 }
 0x298   : > { %v1109_v53 = vadd.f32 %v1038_v52, %v795_v39  ;;  %v1213_v54 = vadd.f32 %v1197_v40, %v1038_v52  ;;  %v1040_v55 = vpop.f32.mrb[2].mxu0  ;;  %v9473_v39 = vpop.f32.mrb[3].mxu1  ;;  %v790_v40 = vld [vmem:[#allocation2 + $0x60] sm:$0xff]  ;;  %v802_v52 = vunpack.c.l.bf16 %v782_v36 }
 0x299   : > { %v1124_v57 = vmul.f32 0.5, %v1108_v50  ;;  %v1228_v58 = vmul.f32 0.5, %v1212_v51  ;;  %v1112_v59 = vadd.f32 %v1040_v55, %v798_v41  ;;  %v1216_v60 = vadd.f32 %v1200_v42, %v1040_v55  ;;  %v1042_v61 = vpop.f32.mrb[3].mxu0  ;;  %v783_v41 = vld [vmem:[#allocation2 + $0x28] sm:$0xff] }
 0x29a   : > { %v1140_v0 = vmul.f32 0.5, %v1109_v53  ;;  %v1244_v1 = vmul.f32 0.5, %v1213_v54  ;;  %v1113_v2 = vadd.f32 %v1042_v61, %v799_v46  ;;  %v1217_v3 = vadd.f32 %v1201_v47, %v1042_v61  ;;  %v9475_v47 = vld [vmem:[#allocation2 + $0x68] sm:$0xff] }
 0x29b   : > { %7835 = vtanh.f32 %v1124_v57  ;;  %v1125_v33 = vmul.f32 0.5, %v1112_v59  ;;  %v1229_v37 = vmul.f32 0.5, %v1216_v60  ;;  %v800_v46 = vunpack.c.h.bf16 %v780_v56 }
 0x29c   : > { %7837 = vtanh.f32 %v1228_v58  ;;  %v1141_v42 = vmul.f32 0.5, %v1113_v2  ;;  %v1245_v50 = vmul.f32 0.5, %v1217_v3  ;;  %v801_v51 = vunpack.c.h.bf16 %v781_v44  ;;  %v9479_v44 = vpop.f32.mrb[4].mxu1 }
 0x29d   : > { %7839 = vtanh.f32 %v1140_v0  ;;  %v1110_v54 = vadd.f32 %v1089_v63, %v796_v34  ;;  %v1204_v55 = vunpack.c.l.bf16 %v790_v40  ;;  %v803_v57 = vunpack.c.l.bf16 %v783_v41 }
 0x29e   : > { %7841 = vtanh.f32 %v1244_v1  ;;  %v1046_v53 = vpop.f32.mrb[4].mxu0  ;;  %v1214_v59 = vadd.f32 %v1198_v38, %v1089_v63  ;;  %v1202_v60 = vunpack.c.h.bf16 %v788_v62  ;;  %v1205_v61 = vunpack.c.l.bf16 %v9475_v47 }
 0x29f   : > { %7843 = vtanh.f32 %v1125_v33  ;;  %v1048_v58 = vpop.f32.mrb[5].mxu0  ;;  %v1111_v56 = vadd.f32 %v9471_v4, %v797_v43  ;;  %v806_v2 = vunpack.c.h.bf16 %v782_v36  ;;  %v1208_v1 = vunpack.c.h.bf16 %v790_v40 }
 0x2a0   : > { %7845 = vtanh.f32 %v1229_v37  ;;  %v1050_v0 = vpop.f32.mrb[6].mxu0  ;;  %v1115_v33 = vadd.f32 %v9473_v39, %v801_v51  ;;  %v1116_v34 = vadd.f32 %v1046_v53, %v802_v52  ;;  %v9484_v37 = vpop.f32.mrb[5].mxu1  ;;  %v1114_v62 = vadd.f32 %v1093_v35, %v800_v46 }
 0x2a1   : > { %7847 = vtanh.f32 %v1141_v42  ;;  %v1052_v3 = vpop.f32.mrb[7].mxu0  ;;  %v1220_v63 = vadd.f32 %v1204_v55, %v1046_v53  ;;  %v1117_v38 = vadd.f32 %v1048_v58, %v803_v57  ;;  %v9486_v42 = vpop.f32.mrb[6].mxu1  ;;  %v1218_v36 = vadd.f32 %v1202_v60, %v1093_v35 }
 0x2a2   : > { %7849 = vtanh.f32 %v1245_v50  ;;  %v1221_v40 = vadd.f32 %v1205_v61, %v1048_v58  ;;  %v807_v43 = vunpack.c.h.bf16 %v783_v41  ;;  %v9488_v32 = vpop.f32.mrb[7].mxu1  ;;  %v1160_v30 = vmul.f32 0.5, %v1111_v56 }
 0x2a3   : > { %7851 = vtanh.f32 %v1110_v54  ;;  %v1120_v51 = vadd.f32 %v1050_v0, %v806_v2  ;;  %v1224_v52 = vadd.f32 %v1208_v1, %v1050_v0  ;;  %v1161_v54 = vmul.f32 0.5, %v1115_v33 }
 0x2a4   : > { %7853 = vtanh.f32 %v1214_v59  ;;  %v1126_v46 = vmul.f32 0.5, %v1116_v34  ;;  %v1209_v53 = vunpack.c.h.bf16 %v9475_v47  ;;  %v1230_v35 = vmul.f32 0.5, %v1220_v63 }
 0x2a5   : > { %v7836_v50 = vpop.eup %7835  ;;  %7855 = vtanh.f32 %v1114_v62  ;;  %v1142_v58 = vmul.f32 0.5, %v1117_v38  ;;  %v1246_v60 = vmul.f32 0.5, %v1221_v40  ;;  %v1121_v61 = vadd.f32 %v1052_v3, %v807_v43  ;;  %v792_v43 = vld [vmem:[#allocation2 + $0x70] sm:$0xff] }
 0x2a6   : > { %v7838_v28 = vpop.eup %7837  ;;  %v1132_v29 = vmul.f32 0.5, %v7836_v50  ;;  %7857 = vtanh.f32 %v1218_v36  ;;  %v1127_v2 = vmul.f32 0.5, %v1120_v51  ;;  %v1231_v1 = vmul.f32 0.5, %v1224_v52 }
 0x2a7   : > { %v7840_v55 = vpop.eup %7839  ;;  %v1236_v57 = vmul.f32 0.5, %v7838_v28  ;;  %7859 = vtanh.f32 %v1160_v30  ;;  %v1225_v40 = vadd.f32 %v1209_v53, %v1052_v3  ;;  %v1143_v52 = vmul.f32 0.5, %v1121_v61 }
 0x2a8   : > { %v7842_v41 = vpop.eup %7841  ;;  %v1148_v59 = vmul.f32 0.5, %v7840_v55  ;;  %v1136_v33 = vadd.f32 0.5, %v1132_v29  ;;  %7861 = vtanh.f32 %v1161_v54 }
 0x2a9   : > { %v7844_v56 = vpop.eup %7843  ;;  %v1252_v0 = vmul.f32 0.5, %v7842_v41  ;;  %v1240_v28 = vadd.f32 0.5, %v1236_v57  ;;  %7863 = vtanh.f32 %v1126_v46  ;;  %v1206_v46 = vunpack.c.l.bf16 %v792_v43 }
 0x2aa   : > { %v7846_v50 = vpop.eup %7845  ;;  %v1152_v34 = vadd.f32 0.5, %v1148_v59  ;;  %v1133_v25 = vmul.f32 0.5, %v7844_v56  ;;  %7865 = vtanh.f32 %v1230_v35  ;;  %v1247_v3 = vmul.f32 0.5, %v1225_v40 }
 0x2ab   : > { %v7848_v47 = vpop.eup %7847  ;;  %v1256_v62 = vadd.f32 0.5, %v1252_v0  ;;  %v1237_v63 = vmul.f32 0.5, %v7846_v50  ;;  %7867 = vtanh.f32 %v1142_v58  ;;  %v809_v40 = vunpack.c.h.bf16 %v785_v27 }
 0x2ac   : > { %v7850_v38 = vpop.eup %7849  ;;  %v1176_v55 = vmul.f32 0.0, %v1152_v34  ;;  %v1149_v36 = vmul.f32 0.5, %v7848_v47  ;;  %v1137_v59 = vadd.f32 0.5, %v1133_v25  ;;  %7869 = vtanh.f32 %v1246_v60 }
 0x2ad   : > { %v7852_v41 = vpop.eup %7851  ;;  %v1280_v30 = vmul.f32 0.0, %v1256_v62  ;;  %v1253_v51 = vmul.f32 0.5, %v7850_v38  ;;  %v1241_v57 = vadd.f32 0.5, %v1237_v63  ;;  %7871 = vtanh.f32 %v1127_v2 }
 0x2ae   : > { %v7854_v29 = vpop.eup %7853  ;;  %v1153_v56 = vadd.f32 0.5, %v1149_v36  ;;  %v1180_v54 = vmul.f32 %v7852_v41, %v1136_v33  ;;  %7873 = vtanh.f32 %v1143_v52  ;;  %v1118_v25 = vadd.f32 %v9479_v44, %v804_v31 }
 0x2af   : > { %v1257_v0 = vadd.f32 0.5, %v1253_v51  ;;  %v1284_v50 = vmul.f32 %v7854_v29, %v1240_v28  ;;  %v7856_v53 = vpop.eup %7855  ;;  %7875 = vtanh.f32 %v1231_v1  ;;  %v805_v60 = vunpack.c.l.bf16 %v785_v27 }
 0x2b0   : > { %v1177_v34 = vmul.f32 0.0, %v1153_v56  ;;  %v9492_v47 = vadd.f32 %v1180_v54, %v1176_v55  ;;  %v7858_v58 = vpop.eup %7857  ;;  %v1181_v61 = vmul.f32 %v7856_v53, %v1137_v59  ;;  %v808_v63 = vunpack.c.h.bf16 %v9482_v48 }
 0x2b1   : > { %v1281_v35 = vmul.f32 0.0, %v1257_v0  ;;  %v9494_v62 = vadd.f32 %v1284_v50, %v1280_v30  ;;  %v7860_v33 = vpop.eup %7859  ;;  %v1285_v28 = vmul.f32 %v7858_v58, %v1241_v57  ;;  %v1210_v38 = vunpack.c.h.bf16 %v792_v43  ;;  %v789_v58 = vld [vmem:[#allocation2 + $0x58] sm:$0xff] }
 0x2b2   : > { %7877 = vtanh.f32 %v9492_v47  ;;  %v7862_v2 = vpop.eup %7861  ;;  %v9499_v55 = vadd.f32 %v1181_v61, %v1177_v34  ;;  %v1222_v36 = vadd.f32 %v1206_v46, %v9479_v44  ;;  %v1119_v30 = vadd.f32 %v9484_v37, %v805_v60 }
 0x2b3   : > { %7879 = vtanh.f32 %v1247_v3  ;;  %v7864_v41 = vpop.eup %7863  ;;  %v9502_v31 = vadd.f32 %v1285_v28, %v1281_v35  ;;  %v1122_v48 = vadd.f32 %v9486_v42, %v808_v63  ;;  %v1226_v43 = vadd.f32 %v1210_v38, %v9486_v42 }
 0x2b4   : > { %7881 = vtanh.f32 %v1118_v25  ;;  %v7866_v1 = vpop.eup %7865  ;;  %v1134_v29 = vmul.f32 0.5, %v7864_v41  ;;  %v1123_v27 = vadd.f32 %v9488_v32, %v809_v40  ;;  %v1168_v54 = vmul.f32 0.5, %v7860_v33 }
 0x2b5   : > { %7883 = vtanh.f32 %v9499_v55  ;;  %v7868_v51 = vpop.eup %7867  ;;  %v1162_v0 = vmul.f32 0.5, %v1119_v30  ;;  %v1169_v46 = vmul.f32 0.5, %v7862_v2  ;;  %v1238_v34 = vmul.f32 0.5, %v7866_v1 }
 0x2b6   : > { %v7870_v52 = vpop.eup %7869  ;;  %v1150_v59 = vmul.f32 0.5, %v7868_v51  ;;  %7885 = vtanh.f32 %v1222_v36  ;;  %v1138_v53 = vadd.f32 0.5, %v1134_v29  ;;  %v1163_v42 = vmul.f32 0.5, %v1123_v27 }
 0x2b7   : > { %v1254_v44 = vmul.f32 0.5, %v7870_v52  ;;  %v7872_v56 = vpop.eup %7871  ;;  %7887 = vtanh.f32 %v1122_v48  ;;  %v1172_v28 = vadd.f32 0.5, %v1168_v54  ;;  %v1173_v36 = vadd.f32 0.5, %v1169_v46 }
 0x2b8   : > { %v1154_v57 = vadd.f32 0.5, %v1150_v59  ;;  %v7874_v50 = vpop.eup %7873  ;;  %7889 = vtanh.f32 %v1226_v43  ;;  %v1135_v38 = vmul.f32 0.5, %v7872_v56  ;;  %v1242_v40 = vadd.f32 0.5, %v1238_v34 }
 0x2b9   : > { %v7876_v3 = vpop.eup %7875  ;;  %v1151_v35 = vmul.f32 0.5, %v7874_v50  ;;  %v1258_v61 = vadd.f32 0.5, %v1254_v44  ;;  %7891 = vtanh.f32 %v1162_v0  ;;  %v1203_v30 = vunpack.c.h.bf16 %v789_v58 }
 0x2ba   : > { %v1178_v63 = vmul.f32 0.0, %v1154_v57  ;;  %v1239_v41 = vmul.f32 0.5, %v7876_v3  ;;  %7893 = vtanh.f32 %v1163_v42  ;;  %v1199_v44 = vunpack.c.l.bf16 %v789_v58  ;;  %v793_v57 = vld [vmem:[#allocation2 + $0x78] sm:$0xff] }
 0x2bb   : > { %v1155_v51 = vadd.f32 0.5, %v1151_v35  ;;  %v1282_v29 = vmul.f32 0.0, %v1258_v61  ;;  %v1139_v56 = vadd.f32 0.5, %v1135_v38  ;;  %v1219_v34 = vadd.f32 %v1203_v30, %v9473_v39  ;;  %v11410_v30 = vld [vmem:[#allocation26_spill] sm:$0xff] }
 0x2bc   : > { %v7878_v25 = vpop.eup %7877  ;;  %v1243_v0 = vadd.f32 0.5, %v1239_v41  ;;  %v1215_v61 = vadd.f32 %v1199_v44, %v9471_v4  ;;  %v11416_v44 = vld [vmem:[#allocation29_spill] sm:$0xff] }
 0x2bd   : > { %v7880_v60 = vpop.eup %7879  ;;  %v9509_v43 = vmul.f32 %v7878_v25, %v1172_v28  ;;  %v1179_v3 = vmul.f32 0.0, %v1155_v51  ;;  %v1207_v25 = vunpack.c.l.bf16 %v793_v57  ;;  %v1211_v28 = vunpack.c.h.bf16 %v793_v57 }
 0x2be   : > { %v7882_v33 = vpop.eup %7881  ;;  %v1255_v2 = vmul.f32 0.5, %v7880_v60  ;;  %v1265_v38 = vmul.f32 0.5, %v1219_v34  ;;  %v1264_v41 = vmul.f32 0.5, %v1215_v61  ;;  %v9595_v61 = vld [vmem:[#allocation9 + $0x8] ss:$16 sps:$4 sm:$0xff]  }
 0x2bf   : > { %v7884_v1 = vpop.eup %7883  ;;  %v1182_v48 = vmul.f32 %v7882_v33, %v1138_v53  ;;  %11401 = vst [vmem:[#allocation30_spill] sm:$0xff] %v9509_v43  ;;  %v1223_v4 = vadd.f32 %v1207_v25, %v9484_v37  ;;  %v9591_v25 = vld [vmem:[#allocation9 + $0xc] ss:$16 sps:$4 sm:$0xff]  }
 0x2c0   : > { %v9511_v52 = vmul.f32 %v7884_v1, %v1173_v36  ;;  %v1259_v59 = vadd.f32 0.5, %v1255_v2  ;;  %v7886_v27 = vpop.eup %7885  ;;  %v11404_v36 = vmov 0  }
 0x2c1   : > { %v9513_v54 = vadd.f32 %v1182_v48, %v1178_v63  ;;  %v1286_v50 = vmul.f32 %v7886_v27, %v1242_v40  ;;  %v7888_v53 = vpop.eup %7887  ;;  %v11415_v27 = vld [vmem:[#allocation27_spill] sm:$0xff] }
 0x2c2   : > { %11402 = vst [vmem:[#allocation31_spill] sm:$0xff] %v9511_v52  ;;  %v1341_v46 = vpack.c.bf16 %v9511_v52, %v9509_v43  ;;  %v1283_v35 = vmul.f32 0.0, %v1259_v59  ;;  %v7890_v58 = vpop.eup %7889  ;;  %v1183_v60 = vmul.f32 %v7888_v53, %v1139_v56  ;;  %11420 = vst [vmem:[#allocation27_spill] sm:$0xff] %v9591_v25 }
 0x2c3   : > { %v9518_v42 = vadd.f32 %v1286_v50, %v1282_v29  ;;  %7895 = vtanh.f32 %v9513_v54  ;;  %v1287_v39 = vmul.f32 %v7890_v58, %v1243_v0  ;;  %v7892_v63 = vpop.eup %7891  ;;  %v11412_v29 = vld [vmem:[#allocation25_spill] sm:$0xff] }
 0x2c4   : > { %1568 = vmatmul.mubr.bf16.vlgmr.msra.gmra.mrb[8].mxu0 %v1341_v46  ;;  %1621 = vmatmul.mubr.bf16.vlgmr.msra.gmra.mrb[8].mxu1 %v1341_v46  ;;  %v9526_v33 = vadd.f32 %v1183_v60, %v1179_v3  ;;  %v9593_v58 = vld [vmem:[#allocation9] ss:$16 sps:$4 sm:$0xff]   ;;  %v9601_v60 = vld [vmem:[#allocation9 + $0x24] ss:$16 sps:$4 sm:$0xff]  }
 0x2c5   : > { %11403 = vst [vmem:[#allocation32_spill] sm:$0xff] %v9518_v42  ;;  %1748 = vmatpush1.bf16.msra.mxu0 %v9333_v45  ;;  %1801 = vmatpush1.bf16.msra.mxu1 %v9345_v6  ;;  %v9531_v40 = vadd.f32 %v1287_v39, %v1283_v35  ;;  %v7894_v45 = vpop.eup %7893  ;;  %v1170_v6 = vmul.f32 0.5, %v7892_v63  ;;  %v9589_v35 = vld [vmem:[#allocation9 + $0x4] ss:$16 sps:$4 sm:$0xff]   ;;  %v9605_v39 = vld [vmem:[#allocation9 + $0x20] ss:$16 sps:$4 sm:$0xff]  }
 0x2c6   : > { %1749 = vmatprep.subr.bf16.mxu0 %v9338_v49  ;;  %1802 = vmatprep.subr.bf16.mxu1 %v9351_v8  ;;  %7897 = vtanh.f32 %v9526_v33  ;;  %v1227_v49 = vadd.f32 %v1211_v28, %v9488_v32  ;;  %v1266_v8 = vmul.f32 0.5, %v1223_v4  ;;  %v1171_v37 = vmul.f32 0.5, %v7894_v45  ;;  %v11409_v32 = vld [vmem:[#allocation23_spill] sm:$0xff]  ;;  %v9603_v28 = vld [vmem:[#allocation9 + $0x2c] ss:$16 sps:$4 sm:$0xff]  }
 0x2c7   : > { %1577 = vmatprep.mubr.bf16.mxu0 %v11404_v36  ;;  %1630 = vmatprep.mubr.bf16.mxu1 %v11404_v36  ;;  %11405 = vst [vmem:[#allocation33_spill] sm:$0xff] %v9531_v40  ;;  %7899 = vtanh.f32 %v1265_v38  ;;  %v1174_v1 = vadd.f32 0.5, %v1170_v6  ;;  %v9607_v63 = vld [vmem:[#allocation9 + $0x28] ss:$16 sps:$4 sm:$0xff]   ;;  %v9613_v38 = vld [vmem:[#allocation9 + $0x44] ss:$16 sps:$4 sm:$0xff]  }
 0x2c8   : > { %7901 = vtanh.f32 %v1264_v41  ;;  %v1267_v2 = vmul.f32 0.5, %v1227_v49  ;;  %v9615_v4 = vld [vmem:[#allocation9 + $0x4c] ss:$16 sps:$4 sm:$0xff]   ;;  %v9617_v45 = vld [vmem:[#allocation9 + $0x40] ss:$16 sps:$4 sm:$0xff]  }
 0x2c9   : > { %1750 = vmatpush1.bf16.msra.mxu0 %v9343_v5  ;;  %1803 = vmatpush1.bf16.msra.mxu1 %v9354_v9  ;;  %7903 = vtanh.f32 %v9502_v31  ;;  %v9619_v41 = vld [vmem:[#allocation9 + $0x48] ss:$16 sps:$4 sm:$0xff]   ;;  %v9625_v49 = vld [vmem:[#allocation9 + $0x64] ss:$16 sps:$4 sm:$0xff]   ;;  %v9627_v6 = vld [vmem:[#allocation9 + $0x6c] ss:$16 sps:$4 sm:$0xff]  }
 0x2ca   : > { %1751 = vmatprep.subr.bf16.mxu0 %v9348_v7  ;;  %1804 = vmatprep.subr.bf16.mxu1 %v9363_v12  ;;  %7905 = vtanh.f32 %v1266_v8  ;;  %v1175_v7 = vadd.f32 0.5, %v1171_v37  ;;  %v9629_v8 = vld [vmem:[#allocation9 + $0x60] ss:$16 sps:$4 sm:$0xff]   ;;  %v9631_v37 = vld [vmem:[#allocation9 + $0x68] ss:$16 sps:$4 sm:$0xff]  }
 0x2cb   : > { %7907 = vtanh.f32 %v1267_v2  ;;  %v9637_v2 = vld [vmem:[#allocation9 + $0x84] ss:$16 sps:$4 sm:$0xff]  }
 0x2cc   : > { %7909 = vtanh.f32 %v9494_v62 }
 0x2cd   : > { %1752 = vmatpush1.bf16.msra.mxu0 %v9358_v10  ;;  %1805 = vmatpush1.bf16.msra.mxu1 %v9366_v13  ;;  %v7896_v5 = vpop.eup %7895  ;;  %7911 = vtanh.f32 %v9518_v42 }
 0x2ce   : > { %1753 = vmatprep.subr.bf16.mxu0 %v9361_v11  ;;  %1806 = vmatprep.subr.bf16.mxu1 %v9372_v15  ;;  %v9546_v9 = vmul.f32 %v7896_v5, %v1174_v1  ;;  %7913 = vtanh.f32 %v9531_v40  ;;  %v9639_v1 = vld [vmem:[#allocation9 + $0x8c] ss:$16 sps:$4 sm:$0xff]   ;;  %v9641_v5 = vld [vmem:[#allocation9 + $0x80] ss:$16 sps:$4 sm:$0xff]  }
 0x2d0   : > { %11406 = vst [vmem:[#allocation34_spill] sm:$0xff] %v9546_v9  ;;  %v7898_v10 = vpop.eup %7897 }
 0x2d1   : > { %1754 = vmatpush1.bf16.msra.mxu0 %v9370_v14  ;;  %1807 = vmatpush1.bf16.msra.mxu1 %v9380_v18  ;;  %v9551_v11 = vmul.f32 %v7898_v10, %v1175_v7  ;;  %v7900_v12 = vpop.eup %7899  ;;  %v9643_v7 = vld [vmem:[#allocation9 + $0x88] ss:$16 sps:$4 sm:$0xff]   ;;  %v9649_v10 = vld [vmem:[#allocation9 + $0xa4] ss:$16 sps:$4 sm:$0xff]  }
 0x2d2   : > { %1755 = vmatprep.subr.bf16.mxu0 %v9375_v16  ;;  %1808 = vmatprep.subr.bf16.mxu1 %v9384_v19  ;;  %v7902_v14 = vpop.eup %7901  ;;  %v1273_v15 = vmul.f32 0.5, %v7900_v12  ;;  %v11408_v19 = vld [vmem:[#allocation24_spill] sm:$0xff]  ;;  %11421 = vst [vmem:[#allocation29_spill] sm:$0xff] %v9649_v10 }
 0x2d3   : > { %11407 = vst [vmem:[#allocation35_spill] sm:$0xff] %v9551_v11  ;;  %v1342_v13 = vpack.c.bf16 %v9551_v11, %v9546_v9  ;;  %v7904_v16 = vpop.eup %7903  ;;  %v1272_v18 = vmul.f32 0.5, %v7902_v14  ;;  %v9651_v12 = vld [vmem:[#allocation9 + $0xac] ss:$16 sps:$4 sm:$0xff]   ;;  %v9655_v14 = vld [vmem:[#allocation9 + $0xa8] ss:$16 sps:$4 sm:$0xff]  }
 0x2d4   : > { %11422 = vst [vmem:[#allocation36_spill] sm:$0xff] %v9651_v12  ;;  %11424 = vst [vmem:[#allocation38_spill] sm:$0xff] %v9655_v14  ;;  %v1312_v11 = vld [vmem:[#allocation2 + $0x98] sm:$0xff] }
 0x2d5   : > { %1756 = vmatpush1.bf16.msra.mxu0 %v9378_v17  ;;  %1809 = vmatpush1.bf16.msra.mxu1 %v9390_v21  ;;  %v7906_v17 = vpop.eup %7905  ;;  %v1277_v21 = vadd.f32 0.5, %v1273_v15  ;;  %v9661_v15 = vld [vmem:[#allocation9 + $0xc4] ss:$16 sps:$4 sm:$0xff]  }
 0x2d6   : > { %1757 = vmatprep.subr.bf16.mxu0 %v9387_v20  ;;  %1810 = vmatprep.subr.bf16.mxu1 %v9396_v23  ;;  %v7908_v20 = vpop.eup %7907  ;;  %11425 = vst [vmem:[#allocation39_spill] sm:$0xff] %v9661_v15 }
 0x2d7   : > { %1578 = vmatmul.mubr.bf16.gmra.mrb[12].mxu0 %v1342_v13  ;;  %1631 = vmatmul.mubr.bf16.gmra.mrb[12].mxu1 %v1342_v13  ;;  %v7910_v23 = vpop.eup %7909  ;;  %v9569_v51 = vmul.f32 %v7904_v16, %v1277_v21  ;;  %v1275_v48 = vmul.f32 0.5, %v7908_v20  ;;  %v9653_v13 = vld [vmem:[#allocation9 + $0xa0] ss:$16 sps:$4 sm:$0xff]   ;;  %v9663_v16 = vld [vmem:[#allocation9 + $0xcc] ss:$16 sps:$4 sm:$0xff]  }
 0x2d8   : > { %1779 = vmatprep.mubr.bf16.mxu0 %v11404_v36  ;;  %1832 = vmatprep.mubr.bf16.mxu1 %v11404_v36  ;;  %v7912_v56 = vpop.eup %7911  ;;  %11423 = vst [vmem:[#allocation37_spill] sm:$0xff] %v9653_v13  ;;  %11426 = vst [vmem:[#allocation40_spill] sm:$0xff] %v9663_v16  ;;  %v9675_v20 = vld [vmem:[#allocation9 + $0xec] ss:$16 sps:$4 sm:$0xff]   ;;  %v9677_v21 = vld [vmem:[#allocation9 + $0xe0] ss:$16 sps:$4 sm:$0xff]  }
 0x2d9   : > { %1758 = vmatpush1.bf16.msra.mxu0 %v9394_v22  ;;  %1811 = vmatpush1.bf16.msra.mxu1 %v9403_v26  ;;  %v1276_v22 = vadd.f32 0.5, %v1272_v18  ;;  %11411 = vst [vmem:[#allocation24_spill] sm:$0xff] %v9569_v51  ;;  %v1274_v26 = vmul.f32 0.5, %v7906_v17  ;;  %v1279_v0 = vadd.f32 0.5, %v1275_v48  ;;  %v7914_v46 = vpop.eup %7913  ;;  %v9665_v17 = vld [vmem:[#allocation9 + $0xc0] ss:$16 sps:$4 sm:$0xff]  }
 0x2da   : > { %1759 = vmatprep.subr.bf16.mxu0 %v9399_v24  ;;  %1812 = vmatprep.subr.bf16.mxu1 %v11408_v19  ;;  %v11413_v24 = vld [vmem:[#allocation28_spill] sm:$0xff]  ;;  %11427 = vst [vmem:[#allocation41_spill] sm:$0xff] %v9665_v17  ;;  %v9673_v19 = vld [vmem:[#allocation9 + $0xe4] ss:$16 sps:$4 sm:$0xff]   ;;  %11430 = vst [vmem:[#allocation44_spill] sm:$0xff] %v9675_v20 }
 0x2db   : > { %v9573_v59 = vmul.f32 %v7910_v23, %v1276_v22  ;;  %v1278_v57 = vadd.f32 0.5, %v1274_v26  ;;  %v9583_v3 = vmul.f32 %v7914_v46, %v1279_v0  ;;  %11419 = vst [vmem:[#allocation28_spill] sm:$0xff] %v9589_v35  ;;  %v9667_v18 = vld [vmem:[#allocation9 + $0xc8] ss:$16 sps:$4 sm:$0xff]   ;;  %11429 = vst [vmem:[#allocation43_spill] sm:$0xff] %v9673_v19  ;;  %v1311_v26 = vld [vmem:[#allocation2 + $0x90] sm:$0xff] }
 0x2dc   : > { %11428 = vst [vmem:[#allocation42_spill] sm:$0xff] %v9667_v18  ;;  %11431 = vst [vmem:[#allocation45_spill] sm:$0xff] %v9677_v21  ;;  %v9679_v23 = vld [vmem:[#allocation9 + $0xe8] ss:$16 sps:$4 sm:$0xff]   ;;  %v1331_v43 = vunpack.c.h.bf16 %v1311_v26 }
 0x2dd   : > { %1760 = vmatpush1.bf16.msra.mxu0 %v11409_v32  ;;  %1813 = vmatpush1.bf16.msra.mxu1 %v11410_v30  ;;  %11414 = vst [vmem:[#allocation23_spill] sm:$0xff] %v9573_v59  ;;  %v1745_v50 = vpack.c.bf16 %v9569_v51, %v9573_v59  ;;  %v9581_v34 = vmul.f32 %v7912_v56, %v1278_v57  ;;  %11418 = vst [vmem:[#allocation25_spill] sm:$0xff] %v9583_v3  ;;  %v1309_v32 = vld [vmem:[#allocation2 + $0x80] sm:$0xff]  ;;  %v1310_v30 = vld [vmem:[#allocation2 + $0x88] sm:$0xff]  ;;  %v1327_v57 = vunpack.c.l.bf16 %v1311_v26 }
 0x2de   : > { %1761 = vmatprep.subr.bf16.mxu0 %v11412_v29  ;;  %1814 = vmatprep.subr.bf16.mxu1 %v11413_v24  ;;  %11432 = vst [vmem:[#allocation46_spill] sm:$0xff] %v9679_v23  ;;  %v1325_v22 = vunpack.c.l.bf16 %v1309_v32  ;;  %v1326_v48 = vunpack.c.l.bf16 %v1310_v30  ;;  %v1329_v29 = vunpack.c.h.bf16 %v1309_v32 }
 0x2df   : > { %11417 = vst [vmem:[#allocation26_spill] sm:$0xff] %v9581_v34  ;;  %v1746_v53 = vpack.c.bf16 %v9583_v3, %v9581_v34 }
 0x2e1   : > { %1762 = vmatpush1.bf16.msra.mxu0 %v11415_v27  ;;  %1815 = vmatpush1.bf16.msra.mxu1 %v11416_v44  ;;  %v1330_v44 = vunpack.c.h.bf16 %v1310_v30 }
 0x2e2   : > { %2177 = vmatprep.subr.bf16.mxu0 %v9589_v35  ;;  %2230 = vmatprep.subr.bf16.mxu1 %v9591_v25 }
 0x2e4   : > { %1780 = vmatmul.mubr.bf16.vlgmr.msra.gmra.mrb[16].mxu0 %v1745_v50  ;;  %1833 = vmatmul.mubr.bf16.vlgmr.msra.gmra.mrb[16].mxu1 %v1745_v50 }
 0x2e5   : > { %1789 = vmatprep.mubr.bf16.mxu0 %v11404_v36  ;;  %1842 = vmatprep.mubr.bf16.mxu1 %v11404_v36 }
 0x2e6   : > { %2178 = vmatpush1.bf16.msra.mxu0 %v9593_v58  ;;  %2231 = vmatpush1.bf16.msra.mxu1 %v9595_v61 }
 0x2e7   : > { %2179 = vmatprep.subr.bf16.mxu0 %v9601_v60  ;;  %2232 = vmatprep.subr.bf16.mxu1 %v9603_v28 }
 0x2ea   : > { %2180 = vmatpush1.bf16.msra.mxu0 %v9605_v39  ;;  %2233 = vmatpush1.bf16.msra.mxu1 %v9607_v63 }
 0x2eb   : > { %2181 = vmatprep.subr.bf16.mxu0 %v9613_v38  ;;  %2234 = vmatprep.subr.bf16.mxu1 %v9615_v4 }
 0x2ec   : > { %1790 = vmatmul.mubr.bf16.gmra.mrb[20].mxu0 %v1746_v53  ;;  %1843 = vmatmul.mubr.bf16.gmra.mrb[20].mxu1 %v1746_v53 }
 0x2ed   : > { %2209 = vmatprep.mubr.bf16.mxu0 %v11404_v36  ;;  %2262 = vmatprep.mubr.bf16.mxu1 %v11404_v36 }
 0x2ee   : > { %2182 = vmatpush1.bf16.msra.mxu0 %v9617_v45  ;;  %2235 = vmatpush1.bf16.msra.mxu1 %v9619_v41 }
 0x2ef   : > { %2183 = vmatprep.subr.bf16.mxu0 %v9625_v49  ;;  %2236 = vmatprep.subr.bf16.mxu1 %v9627_v6 }
 0x2f2   : > { %2184 = vmatpush1.bf16.msra.mxu0 %v9629_v8  ;;  %2237 = vmatpush1.bf16.msra.mxu1 %v9631_v37 }
 0x2f3   : > { %2185 = vmatprep.subr.bf16.mxu0 %v9637_v2  ;;  %2238 = vmatprep.subr.bf16.mxu1 %v9639_v1 }
 0x2f6   : > { %2186 = vmatpush1.bf16.msra.mxu0 %v9641_v5  ;;  %2239 = vmatpush1.bf16.msra.mxu1 %v9643_v7 }
 0x2f7   : > { %2187 = vmatprep.subr.bf16.mxu0 %v9649_v10  ;;  %2240 = vmatprep.subr.bf16.mxu1 %v9651_v12 }
 0x2fa   : > { %2188 = vmatpush1.bf16.msra.mxu0 %v9653_v13  ;;  %2241 = vmatpush1.bf16.msra.mxu1 %v9655_v14 }
 0x2fb   : > { %2189 = vmatprep.subr.bf16.mxu0 %v9661_v15  ;;  %2242 = vmatprep.subr.bf16.mxu1 %v9663_v16 }
 0x2fe   : > { %2190 = vmatpush1.bf16.msra.mxu0 %v9665_v17  ;;  %2243 = vmatpush1.bf16.msra.mxu1 %v9667_v18 }
 0x2ff   : > { %2191 = vmatprep.subr.bf16.mxu0 %v9673_v19  ;;  %2244 = vmatprep.subr.bf16.mxu1 %v9675_v20 }
 0x302   : > { %2192 = vmatpush1.bf16.msra.mxu0 %v9677_v21  ;;  %2245 = vmatpush1.bf16.msra.mxu1 %v9679_v23  ;;  %v1332_v23 = vunpack.c.h.bf16 %v1312_v11 }
 0x303   : > { %2389 = vmatprep.subr.bf16.mxu0 %v9589_v35  ;;  %2442 = vmatprep.subr.bf16.mxu1 %v9591_v25 }
 0x397   : > { %v1569_v24 = vpop.f32.mrb[8].mxu0  ;;  %v1622_v27 = vpop.f32.mrb[8].mxu1 }
 0x398   : > { %v1641_v56 = vadd.f32 %v1569_v24, %v1325_v22  ;;  %v1571_v0 = vpop.f32.mrb[9].mxu0  ;;  %v1624_v50 = vpop.f32.mrb[9].mxu1  ;;  %v1643_v32 = vadd.f32 %v1622_v27, %v1327_v57  ;;  %v1328_v22 = vunpack.c.l.bf16 %v1312_v11  ;;  %v1316_v57 = vld [vmem:[#allocation2 + $0xb8] sm:$0xff] }
 0x399   : > { %v1642_v46 = vadd.f32 %v1571_v0, %v1326_v48  ;;  %v1573_v53 = vpop.f32.mrb[10].mxu0  ;;  %v1626_v3 = vpop.f32.mrb[10].mxu1  ;;  %v1336_v20 = vunpack.c.l.bf16 %v1316_v57 }
 0x39a   : > { %v1657_v34 = vmul.f32 0.5, %v1641_v56  ;;  %v1645_v51 = vadd.f32 %v1573_v53, %v1329_v29  ;;  %v1575_v59 = vpop.f32.mrb[11].mxu0  ;;  %v1628_v9 = vpop.f32.mrb[11].mxu1  ;;  %v1647_v24 = vadd.f32 %v1626_v3, %v1331_v43  ;;  %v1644_v48 = vadd.f32 %v1624_v50, %v1328_v22  ;;  %v1313_v56 = vld [vmem:[#allocation2 + $0xa0] sm:$0xff]  ;;  %v1314_v53 = vld [vmem:[#allocation2 + $0xa8] sm:$0xff]  ;;  %v1315_v3 = vld [vmem:[#allocation2 + $0xb0] sm:$0xff] }
 0x39b   : > { %v1673_v52 = vmul.f32 0.5, %v1642_v46  ;;  %v1646_v25 = vadd.f32 %v1575_v59, %v1330_v44  ;;  %v1648_v29 = vadd.f32 %v1628_v9, %v1332_v23  ;;  %v1334_v44 = vunpack.c.l.bf16 %v1314_v53 }
 0x39c   : > { %7915 = vtanh.f32 %v1657_v34  ;;  %v1658_v35 = vmul.f32 0.5, %v1645_v51  ;;  %v1693_v46 = vmul.f32 0.5, %v1644_v48  ;;  %v1333_v51 = vunpack.c.l.bf16 %v1313_v56 }
 0x39d   : > { %7917 = vtanh.f32 %v1673_v52  ;;  %v1674_v30 = vmul.f32 0.5, %v1646_v25  ;;  %v1694_v34 = vmul.f32 0.5, %v1648_v29 }
 0x39e   : > { %7919 = vtanh.f32 %v1658_v35 }
 0x39f   : > { %7921 = vtanh.f32 %v1643_v32  ;;  %v1337_v32 = vunpack.c.h.bf16 %v1313_v56 }
 0x3a0   : > { %7923 = vtanh.f32 %v1674_v30  ;;  %v1338_v30 = vunpack.c.h.bf16 %v1314_v53 }
 0x3a1   : > { %7925 = vtanh.f32 %v1647_v24 }
 0x3a2   : > { %7927 = vtanh.f32 %v1693_v46 }
 0x3a3   : > { %7929 = vtanh.f32 %v1694_v34 }
 0x3a6   : > { %v7916_v0 = vpop.eup %7915 }
 0x3a7   : > { %v7918_v26 = vpop.eup %7917  ;;  %v1665_v59 = vmul.f32 0.5, %v7916_v0 }
 0x3a8   : > { %v1681_v27 = vmul.f32 0.5, %v7918_v26  ;;  %v7920_v52 = vpop.eup %7919 }
 0x3a9   : > { %v1669_v25 = vadd.f32 0.5, %v1665_v59  ;;  %v7922_v35 = vpop.eup %7921  ;;  %v1666_v11 = vmul.f32 0.5, %v7920_v52  ;;  %v1335_v52 = vunpack.c.l.bf16 %v1315_v3 }
 0x3aa   : > { %v1685_v43 = vadd.f32 0.5, %v1681_v27  ;;  %v7924_v50 = vpop.eup %7923  ;;  %v1579_v23 = vpop.f32.mrb[12].mxu0 }
 0x3ab   : > { %v1713_v9 = vmul.f32 %v7922_v35, %v1669_v25  ;;  %v1632_v22 = vpop.f32.mrb[12].mxu1  ;;  %v1670_v48 = vadd.f32 0.5, %v1666_v11  ;;  %v1682_v29 = vmul.f32 0.5, %v7924_v50  ;;  %v1649_v0 = vadd.f32 %v1579_v23, %v1333_v51  ;;  %v1581_v26 = vpop.f32.mrb[13].mxu0 }
 0x3ac   : > { %v1709_v24 = vmul.f32 %v1685_v43, %v9492_v47  ;;  %v1634_v59 = vpop.f32.mrb[13].mxu1  ;;  %v7926_v21 = vpop.eup %7925  ;;  %v1650_v27 = vadd.f32 %v1581_v26, %v1334_v44  ;;  %v1340_v11 = vunpack.c.h.bf16 %v1316_v57  ;;  %v1339_v44 = vunpack.c.h.bf16 %v1315_v3  ;;  %v1317_v26 = vld [vmem:[#allocation2 + $0xc0] sm:$0xff]  ;;  %v9696_v57 = vld [vmem:[#allocation2 + $0xd8] sm:$0xff] }
 0x3ad   : > { %v1583_v46 = vpop.f32.mrb[14].mxu0  ;;  %v1636_v19 = vpop.f32.mrb[14].mxu1  ;;  %v1686_v34 = vadd.f32 0.5, %v1682_v29  ;;  %v1714_v25 = vmul.f32 %v7926_v21, %v1670_v48  ;;  %v1659_v56 = vmul.f32 0.5, %v1649_v0  ;;  %v1651_v21 = vadd.f32 %v1632_v22, %v1335_v52  ;;  %v9694_v48 = vld [vmem:[#allocation2 + $0xd0] sm:$0xff]  ;;  %v1318_v29 = vld [vmem:[#allocation2 + $0xc8] sm:$0xff] }
 0x3ae   : > { %v9688_v18 = vadd.f32 %v1713_v9, %v1709_v24  ;;  %v1585_v53 = vpop.f32.mrb[15].mxu0  ;;  %v1638_v35 = vpop.f32.mrb[15].mxu1  ;;  %v1675_v17 = vmul.f32 0.5, %v1650_v27  ;;  %v1653_v47 = vadd.f32 %v1583_v46, %v1337_v32  ;;  %v1652_v24 = vadd.f32 %v1634_v59, %v1336_v20  ;;  %v9703_v52 = vld [vmem:[#allocation2 + $0xf0] sm:$0xff] }
 0x3af   : > { %v1654_v43 = vadd.f32 %v1585_v53, %v1338_v30  ;;  %v1710_v51 = vmul.f32 %v1686_v34, %v9499_v55  ;;  %v1656_v32 = vadd.f32 %v1638_v35, %v1340_v11  ;;  %v7928_v30 = vpop.eup %7927  ;;  %v1655_v55 = vadd.f32 %v1636_v19, %v1339_v44  ;;  %v9705_v34 = vld [vmem:[#allocation2 + $0xe8] sm:$0xff] }
 0x3b0   : > { %11433 = vst [vmem:[#allocation47_spill] sm:$0xff] %v9688_v18  ;;  %7931 = vtanh.f32 %v9688_v18  ;;  %v1660_v50 = vmul.f32 0.5, %v1653_v47  ;;  %v1729_v3 = vunpack.c.l.bf16 %v1317_v26  ;;  %v7930_v0 = vpop.eup %7929  ;;  %v1731_v27 = vunpack.c.l.bf16 %v9694_v48 }
 0x3b1   : > { %7933 = vtanh.f32 %v1659_v56  ;;  %v1676_v23 = vmul.f32 0.5, %v1654_v43  ;;  %v9692_v9 = vadd.f32 %v1714_v25, %v1710_v51  ;;  %v1730_v46 = vunpack.c.l.bf16 %v1318_v29 }
 0x3b2   : > { %7935 = vtanh.f32 %v1675_v17  ;;  %v9700_v17 = vld [vmem:[#allocation2 + $0xe0] sm:$0xff]  ;;  %v1695_v20 = vmul.f32 0.5, %v1652_v24  ;;  %v1732_v22 = vunpack.c.l.bf16 %v9696_v57  ;;  %v1733_v59 = vunpack.c.h.bf16 %v1317_v26 }
 0x3b3   : > { %11434 = vst [vmem:[#allocation48_spill] sm:$0xff] %v9692_v9  ;;  %7937 = vtanh.f32 %v1660_v50  ;;  %v1701_v25 = vmul.f32 0.5, %v7928_v30  ;;  %v1696_v56 = vmul.f32 0.5, %v1656_v32  ;;  %v1735_v35 = vunpack.c.h.bf16 %v9694_v48 }
 0x3b4   : > { %7939 = vtanh.f32 %v9692_v9  ;;  %v1734_v47 = vunpack.c.h.bf16 %v1318_v29  ;;  %v1736_v44 = vunpack.c.h.bf16 %v9696_v57  ;;  %v1737_v50 = vunpack.c.l.bf16 %v9700_v17 }
 0x3b5   : > { %7941 = vtanh.f32 %v1676_v23  ;;  %v1702_v23 = vmul.f32 0.5, %v7930_v0  ;;  %v1739_v30 = vunpack.c.l.bf16 %v9703_v52  ;;  %v1738_v32 = vunpack.c.l.bf16 %v9705_v34 }
 0x3b6   : > { %7943 = vtanh.f32 %v1651_v21  ;;  %v1705_v57 = vadd.f32 0.5, %v1701_v25 }
 0x3b7   : > { %v1781_v19 = vpop.f32.mrb[16].mxu0  ;;  %v1834_v53 = vpop.f32.mrb[16].mxu1  ;;  %7945 = vtanh.f32 %v1655_v55  ;;  %v1706_v13 = vadd.f32 0.5, %v1702_v23 }
 0x3b8   : > { %v1853_v43 = vadd.f32 %v1781_v19, %v1729_v3  ;;  %v1783_v11 = vpop.f32.mrb[17].mxu0  ;;  %v1836_v51 = vpop.f32.mrb[17].mxu1  ;;  %7947 = vtanh.f32 %v1695_v20  ;;  %v1855_v16 = vadd.f32 %v1834_v53, %v1731_v27 }
 0x3b9   : > { %v1854_v26 = vadd.f32 %v1783_v11, %v1730_v46  ;;  %v1785_v21 = vpop.f32.mrb[18].mxu0  ;;  %v1838_v24 = vpop.f32.mrb[18].mxu1  ;;  %7949 = vtanh.f32 %v1696_v56  ;;  %v1856_v42 = vadd.f32 %v1836_v51, %v1732_v22 }
 0x3ba   : > { %v7932_v9 = vpop.eup %7931  ;;  %v1869_v48 = vmul.f32 0.5, %v1853_v43  ;;  %v1857_v29 = vadd.f32 %v1785_v21, %v1733_v59  ;;  %v1787_v55 = vpop.f32.mrb[19].mxu0  ;;  %v1859_v19 = vadd.f32 %v1838_v24, %v1735_v35 }
 0x3bb   : > { %v1840_v3 = vpop.f32.mrb[19].mxu1  ;;  %v7934_v18 = vpop.eup %7933  ;;  %v1885_v40 = vmul.f32 0.5, %v1854_v26  ;;  %v1858_v0 = vadd.f32 %v1787_v55, %v1734_v47  ;;  %v9713_v25 = vmul.f32 %v7932_v9, %v1705_v57 }
 0x3bc   : > { %v7936_v46 = vpop.eup %7935  ;;  %v1667_v11 = vmul.f32 0.5, %v7934_v18  ;;  %7951 = vtanh.f32 %v1869_v48  ;;  %v1870_v15 = vmul.f32 0.5, %v1857_v29  ;;  %v1860_v51 = vadd.f32 %v1840_v3, %v1736_v44 }
 0x3bd   : > { %v7938_v14 = vpop.eup %7937  ;;  %v1683_v12 = vmul.f32 0.5, %v7936_v46  ;;  %7953 = vtanh.f32 %v1885_v40  ;;  %v1886_v20 = vmul.f32 0.5, %v1858_v0  ;;  %11435 = vst [vmem:[#allocation49_spill] sm:$0xff] %v9713_v25  ;;  %v1905_v3 = vmul.f32 0.5, %v1856_v42 }
 0x3be   : > { %v7940_v59 = vpop.eup %7939  ;;  %v1671_v43 = vadd.f32 0.5, %v1667_v11  ;;  %v1668_v21 = vmul.f32 0.5, %v7938_v14  ;;  %7955 = vtanh.f32 %v1870_v15  ;;  %v1743_v11 = vunpack.c.h.bf16 %v9703_v52  ;;  %v1324_v52 = vld [vmem:[#allocation2 + $0xf8] sm:$0xff] }
 0x3bf   : > { %v7942_v10 = vpop.eup %7941  ;;  %v9715_v56 = vmul.f32 %v7940_v59, %v1706_v13  ;;  %v1687_v47 = vadd.f32 0.5, %v1683_v12  ;;  %v1791_v18 = vpop.f32.mrb[20].mxu0  ;;  %7957 = vtanh.f32 %v1855_v16  ;;  %v1906_v42 = vmul.f32 0.5, %v1860_v51 }
 0x3c0   : > { %v1844_v27 = vpop.f32.mrb[20].mxu1  ;;  %v7944_v53 = vpop.eup %7943  ;;  %v1672_v26 = vadd.f32 0.5, %v1668_v21  ;;  %v1684_v23 = vmul.f32 0.5, %v7942_v10  ;;  %v1861_v40 = vadd.f32 %v1791_v18, %v1737_v50  ;;  %7959 = vtanh.f32 %v1886_v20 }
 0x3c1   : > { %11436 = vst [vmem:[#allocation50_spill] sm:$0xff] %v9715_v56  ;;  %v1793_v48 = vpop.f32.mrb[21].mxu0  ;;  %v9717_v29 = vpop.f32.mrb[21].mxu1  ;;  %v1983_v14 = vpack.c.bf16 %v9715_v56, %v9713_v25  ;;  %v1711_v9 = vmul.f32 %v1687_v47, %v9513_v54  ;;  %v1715_v22 = vmul.f32 %v7944_v53, %v1671_v43  ;;  %7961 = vtanh.f32 %v1859_v19  ;;  %v2596_v25 = vld [vmem:[#allocation2 + $0x198] sm:$0xff] }
 0x3c2   : > { %v1795_v13 = vpop.f32.mrb[22].mxu0  ;;  %v1848_v12 = vpop.f32.mrb[22].mxu1  ;;  %v1688_v35 = vadd.f32 0.5, %v1684_v23  ;;  %v1871_v24 = vmul.f32 0.5, %v1861_v40  ;;  %v1863_v57 = vadd.f32 %v1844_v27, %v1739_v30  ;;  %v1862_v0 = vadd.f32 %v1793_v48, %v1738_v32 }
 0x3c3   : > { %v7946_v15 = vpop.eup %7945  ;;  %v1797_v10 = vpop.f32.mrb[23].mxu0  ;;  %v9724_v50 = vadd.f32 %v1715_v22, %v1711_v9  ;;  %2210 = vmatmul.mubr.bf16.vlgmr.msra.gmra.mrb[24].mxu0 %v1983_v14  ;;  %v1742_v20 = vunpack.c.h.bf16 %v9705_v34  ;;  %2263 = vmatmul.mubr.bf16.vlgmr.msra.gmra.mrb[24].mxu1 %v1983_v14  ;;  %v11437_v30 = vunpack.c.h.bf16 %v9700_v17  ;;  %v1740_v53 = vunpack.c.l.bf16 %v1324_v52 }
 0x3c4   : > { %v9722_v16 = vpop.f32.mrb[23].mxu1  ;;  %v1716_v55 = vmul.f32 %v7946_v15, %v1672_v26  ;;  %v7948_v46 = vpop.eup %7947  ;;  %v1712_v54 = vmul.f32 %v1688_v35, %v9526_v33  ;;  %7963 = vtanh.f32 %v1871_v24  ;;  %2390 = vmatpush1.bf16.msra.mxu0 %v9593_v58  ;;  %v1887_v19 = vmul.f32 0.5, %v1862_v0  ;;  %2443 = vmatpush1.bf16.msra.mxu1 %v9595_v61 }
 0x3c5   : > { %v7950_v44 = vpop.eup %7949  ;;  %7965 = vtanh.f32 %v9724_v50  ;;  %v1865_v32 = vadd.f32 %v1795_v13, %v11437_v30  ;;  %2391 = vmatprep.subr.bf16.mxu0 %v9601_v60  ;;  %2444 = vmatprep.subr.bf16.mxu1 %v9603_v28  ;;  %v1866_v47 = vadd.f32 %v1797_v10, %v1742_v20  ;;  %v1867_v26 = vadd.f32 %v1848_v12, %v1743_v11 }
 0x3c6   : > { %v7952_v33 = vpop.eup %7951  ;;  %v9735_v59 = vadd.f32 %v1716_v55, %v1712_v54  ;;  %7967 = vtanh.f32 %v1863_v57  ;;  %2219 = vmatprep.mubr.bf16.mxu0 %v11404_v36  ;;  %2272 = vmatprep.mubr.bf16.mxu1 %v11404_v36  ;;  %v1744_v13 = vunpack.c.h.bf16 %v1324_v52  ;;  %v1703_v24 = vmul.f32 0.5, %v7948_v46 }
 0x3c7   : > { %v7954_v34 = vpop.eup %7953  ;;  %v1877_v43 = vmul.f32 0.5, %v7952_v33  ;;  %7969 = vtanh.f32 %v1887_v19  ;;  %v1872_v21 = vmul.f32 0.5, %v1865_v32  ;;  %v1888_v14 = vmul.f32 0.5, %v1866_v47 }
 0x3c8   : > { %7971 = vtanh.f32 %v9735_v59  ;;  %v1893_v17 = vmul.f32 0.5, %v7954_v34  ;;  %2392 = vmatpush1.bf16.msra.mxu0 %v9605_v39  ;;  %v7956_v18 = vpop.eup %7955  ;;  %2445 = vmatpush1.bf16.msra.mxu1 %v9607_v63  ;;  %v1704_v10 = vmul.f32 0.5, %v7950_v44  ;;  %v1864_v55 = vadd.f32 %v9717_v29, %v1740_v53 }
 0x3c9   : > { %v1881_v27 = vadd.f32 0.5, %v1877_v43  ;;  %7973 = vtanh.f32 %v1905_v3  ;;  %2393 = vmatprep.subr.bf16.mxu0 %v9613_v38  ;;  %v7958_v23 = vpop.eup %7957  ;;  %v1878_v48 = vmul.f32 0.5, %v7956_v18  ;;  %2446 = vmatprep.subr.bf16.mxu1 %v9615_v4  ;;  %v1868_v3 = vadd.f32 %v9722_v16, %v1744_v13 }
 0x3ca   : > { %v1897_v40 = vadd.f32 0.5, %v1893_v17  ;;  %7975 = vtanh.f32 %v1872_v21  ;;  %v7960_v9 = vpop.eup %7959  ;;  %v1707_v19 = vadd.f32 0.5, %v1703_v24  ;;  %v1708_v30 = vadd.f32 0.5, %v1704_v10 }
 0x3cb   : > { %v1925_v22 = vmul.f32 %v7958_v23, %v1881_v27  ;;  %7977 = vtanh.f32 %v1906_v42  ;;  %v7962_v15 = vpop.eup %7961  ;;  %v1882_v51 = vadd.f32 0.5, %v1878_v48  ;;  %v1894_v12 = vmul.f32 0.5, %v7960_v9  ;;  %v11440_v23 = vld [vmem:[#allocation29_spill] sm:$0xff]  ;;  %v11441_v48 = vld [vmem:[#allocation32_spill] sm:$0xff] }
 0x3cc   : > { %v1921_v35 = vmul.f32 %v1897_v40, %v9494_v62  ;;  %7979 = vtanh.f32 %v1888_v14  ;;  %2394 = vmatpush1.bf16.msra.mxu0 %v9617_v45  ;;  %2447 = vmatpush1.bf16.msra.mxu1 %v9619_v41  ;;  %v1907_v16 = vmul.f32 0.5, %v1864_v55  ;;  %v1908_v17 = vmul.f32 0.5, %v1868_v3  ;;  %v11442_v9 = vld [vmem:[#allocation36_spill] sm:$0xff] }
 0x3cd   : > { %2395 = vmatprep.subr.bf16.mxu0 %v9625_v49  ;;  %v1898_v54 = vadd.f32 0.5, %v1894_v12  ;;  %v1926_v11 = vmul.f32 %v7962_v15, %v1882_v51  ;;  %7981 = vtanh.f32 %v1867_v26  ;;  %2448 = vmatprep.subr.bf16.mxu1 %v9627_v6  ;;  %v11443_v51 = vld [vmem:[#allocation37_spill] sm:$0xff] }
 0x3ce   : > { %v7964_v57 = vpop.eup %7963  ;;  %v9750_v0 = vadd.f32 %v1925_v22, %v1921_v35 }
 0x3cf   : > { %v7966_v62 = vpop.eup %7965  ;;  %v1879_v20 = vmul.f32 0.5, %v7964_v57  ;;  %v1922_v44 = vmul.f32 %v1898_v54, %v9502_v31  ;;  %v11444_v57 = vld [vmem:[#allocation38_spill] sm:$0xff]  ;;  %v11445_v54 = vld [vmem:[#allocation39_spill] sm:$0xff] }
 0x3d0   : > { %v7968_v46 = vpop.eup %7967  ;;  %2396 = vmatpush1.bf16.msra.mxu0 %v9629_v8  ;;  %2449 = vmatpush1.bf16.msra.mxu1 %v9631_v37  ;;  %7983 = vtanh.f32 %v9750_v0  ;;  %v9762_v43 = vmul.f32 %v7966_v62, %v1707_v19  ;;  %v11447_v62 = vld [vmem:[#allocation33_spill] sm:$0xff] }
 0x3d1   : > { %v7970_v29 = vpop.eup %7969  ;;  %v1883_v32 = vadd.f32 0.5, %v1879_v20  ;;  %2397 = vmatprep.subr.bf16.mxu0 %v9637_v2  ;;  %v9759_v52 = vadd.f32 %v1926_v11, %v1922_v44  ;;  %2450 = vmatprep.subr.bf16.mxu1 %v9639_v1  ;;  %v11446_v11 = vld [vmem:[#allocation40_spill] sm:$0xff] }
 0x3d2   : > { %v7972_v33 = vpop.eup %7971  ;;  %v1895_v34 = vmul.f32 0.5, %v7970_v29  ;;  %11438 = vst [vmem:[#allocation51_spill] sm:$0xff] %v9762_v43 }
 0x3d3   : > { %v7974_v31 = vpop.eup %7973  ;;  %v9764_v42 = vmul.f32 %v7972_v33, %v1708_v30  ;;  %v1927_v21 = vmul.f32 %v7968_v46, %v1883_v32  ;;  %7985 = vtanh.f32 %v9759_v52  ;;  %v11448_v46 = vld [vmem:[#allocation41_spill] sm:$0xff]  ;;  %v11449_v30 = vld [vmem:[#allocation42_spill] sm:$0xff]  ;;  %v11450_v32 = vld [vmem:[#allocation43_spill] sm:$0xff] }
 0x3d4   : > { %v7976_v47 = vpop.eup %7975  ;;  %v1899_v18 = vadd.f32 0.5, %v1895_v34  ;;  %2398 = vmatpush1.bf16.msra.mxu0 %v9641_v5  ;;  %2451 = vmatpush1.bf16.msra.mxu1 %v9643_v7  ;;  %7987 = vtanh.f32 %v1907_v16  ;;  %v1913_v12 = vmul.f32 0.5, %v7974_v31  ;;  %v11451_v34 = vld [vmem:[#allocation44_spill] sm:$0xff] }
 0x3d5   : > { %11439 = vst [vmem:[#allocation52_spill] sm:$0xff] %v9764_v42  ;;  %v7978_v27 = vpop.eup %7977  ;;  %v1880_v53 = vmul.f32 0.5, %v7976_v47  ;;  %v1984_v26 = vpack.c.bf16 %v9764_v42, %v9762_v43  ;;  %2399 = vmatprep.subr.bf16.mxu0 %v11440_v23  ;;  %2452 = vmatprep.subr.bf16.mxu1 %v11442_v9  ;;  %7989 = vtanh.f32 %v1908_v17  ;;  %v11454_v17 = vld [vmem:[#allocation45_spill] sm:$0xff] }
 0x3d6   : > { %v7980_v40 = vpop.eup %7979  ;;  %v1923_v14 = vmul.f32 %v1899_v18, %v11441_v48  ;;  %v1914_v24 = vmul.f32 0.5, %v7978_v27  ;;  %v1917_v44 = vadd.f32 0.5, %v1913_v12  ;;  %v11455_v27 = vld [vmem:[#allocation46_spill] sm:$0xff] }
 0x3d7   : > { %v1884_v22 = vadd.f32 0.5, %v1880_v53  ;;  %v1896_v13 = vmul.f32 0.5, %v7980_v40  ;;  %2220 = vmatmul.mubr.bf16.gmra.mrb[28].mxu0 %v1984_v26  ;;  %2273 = vmatmul.mubr.bf16.gmra.mrb[28].mxu1 %v1984_v26  ;;  %v7982_v15 = vpop.eup %7981  ;;  %v11456_v53 = vld [vmem:[#allocation28_spill] sm:$0xff]  ;;  %v11457_v26 = vld [vmem:[#allocation27_spill] sm:$0xff] }
 0x3d8   : > { %v9774_v35 = vadd.f32 %v1927_v21, %v1923_v14  ;;  %2400 = vmatpush1.bf16.msra.mxu0 %v11443_v51  ;;  %2421 = vmatprep.mubr.bf16.mxu0 %v11404_v36  ;;  %v1918_v29 = vadd.f32 0.5, %v1914_v24 }
 0x3d9   : > { %v1900_v10 = vadd.f32 0.5, %v1896_v13  ;;  %v1928_v55 = vmul.f32 %v7982_v15, %v1884_v22  ;;  %2453 = vmatpush1.bf16.msra.mxu1 %v11444_v57  ;;  %2401 = vmatprep.subr.bf16.mxu0 %v11445_v54 }
 0x3da   : > { %2454 = vmatprep.subr.bf16.mxu1 %v11446_v11  ;;  %2474 = vmatprep.mubr.bf16.mxu1 %v11404_v36  ;;  %v7984_v3 = vpop.eup %7983  ;;  %7991 = vtanh.f32 %v9774_v35 }
 0x3db   : > { %v1924_v20 = vmul.f32 %v1900_v10, %v11447_v62  ;;  %v9790_v16 = vmul.f32 %v7984_v3, %v1917_v44 }
 0x3dc   : > { %2402 = vmatpush1.bf16.msra.mxu0 %v11448_v46 }
 0x3dd   : > { %v9785_v19 = vadd.f32 %v1928_v55, %v1924_v20  ;;  %2455 = vmatpush1.bf16.msra.mxu1 %v11449_v30  ;;  %2403 = vmatprep.subr.bf16.mxu0 %v11450_v32  ;;  %v7986_v33 = vpop.eup %7985  ;;  %11452 = vst [vmem:[#allocation29_spill] sm:$0xff] %v9790_v16 }
 0x3de   : > { %2456 = vmatprep.subr.bf16.mxu1 %v11451_v34  ;;  %v9792_v31 = vmul.f32 %v7986_v33, %v1918_v29  ;;  %v7988_v21 = vpop.eup %7987  ;;  %v1955_v33 = vld [vmem:[#allocation2 + $0x120] sm:$0xff] }
 0x3df   : > { %7993 = vtanh.f32 %v9785_v19  ;;  %v7990_v47 = vpop.eup %7989  ;;  %v1915_v40 = vmul.f32 0.5, %v7988_v21 }
 0x3e0   : > { %11453 = vst [vmem:[#allocation32_spill] sm:$0xff] %v9792_v31  ;;  %2404 = vmatpush1.bf16.msra.mxu0 %v11454_v17  ;;  %v2387_v18 = vpack.c.bf16 %v9792_v31, %v9790_v16  ;;  %v1916_v48 = vmul.f32 0.5, %v7990_v47 }
 0x3e1   : > { %2457 = vmatpush1.bf16.msra.mxu1 %v11455_v27  ;;  %2819 = vmatprep.subr.bf16.mxu0 %v11456_v53  ;;  %v1919_v22 = vadd.f32 0.5, %v1915_v40 }
 0x3e2   : > { %2872 = vmatprep.subr.bf16.mxu1 %v11457_v26  ;;  %v1920_v13 = vadd.f32 0.5, %v1916_v48 }
 0x3e3   : > { %2422 = vmatmul.mubr.bf16.vlgmr.msra.gmra.mrb[32].mxu0 %v2387_v18 }
 0x3e4   : > { %2475 = vmatmul.mubr.bf16.vlgmr.msra.gmra.mrb[32].mxu1 %v2387_v18  ;;  %2431 = vmatprep.mubr.bf16.mxu0 %v11404_v36  ;;  %v7992_v14 = vpop.eup %7991 }
 0x3e5   : > { %2484 = vmatprep.mubr.bf16.mxu1 %v11404_v36  ;;  %2820 = vmatpush1.bf16.msra.mxu0 %v9593_v58  ;;  %v9808_v12 = vmul.f32 %v7992_v14, %v1919_v22 }
 0x3e6   : > { %2873 = vmatpush1.bf16.msra.mxu1 %v9595_v61  ;;  %2821 = vmatprep.subr.bf16.mxu0 %v9601_v60  ;;  %v1951_v61 = vld [vmem:[#allocation2 + $0x100] sm:$0xff]  ;;  %v1952_v60 = vld [vmem:[#allocation2 + $0x108] sm:$0xff] }
 0x3e7   : > { %2874 = vmatprep.subr.bf16.mxu1 %v9603_v28  ;;  %11458 = vst [vmem:[#allocation36_spill] sm:$0xff] %v9808_v12  ;;  %v1967_v28 = vunpack.c.l.bf16 %v1951_v61 }
 0x3e9   : > { %v7994_v15 = vpop.eup %7993  ;;  %2822 = vmatpush1.bf16.msra.mxu0 %v9605_v39  ;;  %v1953_v39 = vld [vmem:[#allocation2 + $0x110] sm:$0xff] }
 0x3ea   : > { %v9810_v24 = vmul.f32 %v7994_v15, %v1920_v13  ;;  %2875 = vmatpush1.bf16.msra.mxu1 %v9607_v63  ;;  %2823 = vmatprep.subr.bf16.mxu0 %v9613_v38  ;;  %v1968_v63 = vunpack.c.l.bf16 %v1952_v60  ;;  %v1971_v38 = vunpack.c.h.bf16 %v1951_v61  ;;  %v1973_v55 = vunpack.c.h.bf16 %v1953_v39 }
 0x3eb   : > { %2876 = vmatprep.subr.bf16.mxu1 %v9615_v4 }
 0x3ec   : > { %11459 = vst [vmem:[#allocation37_spill] sm:$0xff] %v9810_v24  ;;  %v2388_v58 = vpack.c.bf16 %v9810_v24, %v9808_v12 }
 0x3ed   : > { %2824 = vmatpush1.bf16.msra.mxu0 %v9617_v45  ;;  %v1972_v45 = vunpack.c.h.bf16 %v1952_v60 }
 0x3ee   : > { %2432 = vmatmul.mubr.bf16.gmra.mrb[36].mxu0 %v2388_v58  ;;  %2485 = vmatmul.mubr.bf16.gmra.mrb[36].mxu1 %v2388_v58 }
 0x3ef   : > { %2877 = vmatpush1.bf16.msra.mxu1 %v9619_v41  ;;  %2825 = vmatprep.subr.bf16.mxu0 %v9625_v49  ;;  %v1969_v49 = vunpack.c.l.bf16 %v1953_v39 }
 0x3f0   : > { %2878 = vmatprep.subr.bf16.mxu1 %v9627_v6  ;;  %2851 = vmatprep.mubr.bf16.mxu0 %v11404_v36 }
 0x3f1   : > { %2826 = vmatpush1.bf16.msra.mxu0 %v9629_v8  ;;  %2904 = vmatprep.mubr.bf16.mxu1 %v11404_v36 }
 0x3f2   : > { %2827 = vmatprep.subr.bf16.mxu0 %v9637_v2 }
 0x3f3   : > { %2879 = vmatpush1.bf16.msra.mxu1 %v9631_v37 }
 0x3f4   : > { %2880 = vmatprep.subr.bf16.mxu1 %v9639_v1 }
 0x3f5   : > { %2828 = vmatpush1.bf16.msra.mxu0 %v9641_v5 }
 0x3f6   : > { %2829 = vmatprep.subr.bf16.mxu0 %v11440_v23 }
 0x3f7   : > { %2881 = vmatpush1.bf16.msra.mxu1 %v9643_v7  ;;  %v1954_v7 = vld [vmem:[#allocation2 + $0x118] sm:$0xff] }
 0x3f8   : > { %2882 = vmatprep.subr.bf16.mxu1 %v11442_v9  ;;  %v1970_v20 = vunpack.c.l.bf16 %v1954_v7 }
 0x3f9   : > { %2830 = vmatpush1.bf16.msra.mxu0 %v11443_v51 }
 0x3fa   : > { %2831 = vmatprep.subr.bf16.mxu0 %v11445_v54 }
 0x3fb   : > { %2883 = vmatpush1.bf16.msra.mxu1 %v11444_v57 }
 0x3fc   : > { %2884 = vmatprep.subr.bf16.mxu1 %v11446_v11 }
 0x3fd   : > { %2832 = vmatpush1.bf16.msra.mxu0 %v11448_v46  ;;  %v1974_v46 = vunpack.c.h.bf16 %v1954_v7 }
 0x3fe   : > { %2833 = vmatprep.subr.bf16.mxu0 %v11450_v32 }
 0x3ff   : > { %2885 = vmatpush1.bf16.msra.mxu1 %v11449_v30 }
 0x400   : > { %2886 = vmatprep.subr.bf16.mxu1 %v11451_v34 }
 0x401   : > { %2834 = vmatpush1.bf16.msra.mxu0 %v11454_v17  ;;  %v1956_v17 = vld [vmem:[#allocation2 + $0x128] sm:$0xff] }
 0x402   : > { %3031 = vmatprep.subr.bf16.mxu0 %v11456_v53  ;;  %v1975_v53 = vunpack.c.l.bf16 %v1955_v33  ;;  %v1976_v14 = vunpack.c.l.bf16 %v1956_v17 }
 0x403   : > { %2887 = vmatpush1.bf16.msra.mxu1 %v11455_v27 }
 0x404   : > { %3084 = vmatprep.subr.bf16.mxu1 %v11457_v26  ;;  %v1957_v26 = vld [vmem:[#allocation2 + $0x130] sm:$0xff] }
 0x496   : > { %v2211_v4 = vpop.f32.mrb[24].mxu0  ;;  %v2264_v6 = vpop.f32.mrb[24].mxu1 }
 0x497   : > { %v2283_v41 = vadd.f32 %v2211_v4, %v1967_v28  ;;  %v2213_v8 = vpop.f32.mrb[25].mxu0  ;;  %v2266_v2 = vpop.f32.mrb[25].mxu1  ;;  %v2285_v11 = vadd.f32 %v2264_v6, %v1969_v49  ;;  %v1977_v28 = vunpack.c.l.bf16 %v1957_v26 }
 0x498   : > { %v2284_v37 = vadd.f32 %v2213_v8, %v1968_v63  ;;  %v2215_v1 = vpop.f32.mrb[26].mxu0  ;;  %v2268_v9 = vpop.f32.mrb[26].mxu1  ;;  %v2286_v29 = vadd.f32 %v2266_v2, %v1970_v20  ;;  %v1979_v63 = vunpack.c.h.bf16 %v1955_v33  ;;  %v9844_v8 = vld [vmem:[#allocation2 + $0x138] sm:$0xff] }
 0x499   : > { %v2299_v5 = vmul.f32 0.5, %v2283_v41  ;;  %v2287_v23 = vadd.f32 %v2215_v1, %v1971_v38  ;;  %v2217_v51 = vpop.f32.mrb[27].mxu0  ;;  %v2270_v54 = vpop.f32.mrb[27].mxu1  ;;  %v2289_v44 = vadd.f32 %v2268_v9, %v1973_v55  ;;  %v11460_v38 = vld [vmem:[#allocation47_spill] sm:$0xff]  ;;  %v1978_v20 = vunpack.c.l.bf16 %v9844_v8 }
 0x49a   : > { %v2315_v10 = vmul.f32 0.5, %v2284_v37  ;;  %v2288_v57 = vadd.f32 %v2217_v51, %v1972_v45  ;;  %v2290_v30 = vadd.f32 %v2270_v54, %v1974_v46  ;;  %v2335_v32 = vmul.f32 0.5, %v2286_v29 }
 0x49b   : > { %7995 = vtanh.f32 %v2299_v5  ;;  %v2300_v62 = vmul.f32 0.5, %v2287_v23  ;;  %v1980_v23 = vunpack.c.h.bf16 %v1956_v17  ;;  %v1981_v29 = vunpack.c.h.bf16 %v1957_v26  ;;  %v9854_v26 = vld [vmem:[#allocation2 + $0x158] sm:$0xff] }
 0x49c   : > { %7997 = vtanh.f32 %v2315_v10  ;;  %v2316_v3 = vmul.f32 0.5, %v2288_v57  ;;  %v2336_v21 = vmul.f32 0.5, %v2290_v30 }
 0x49d   : > { %7999 = vtanh.f32 %v2300_v62 }
 0x49e   : > { %8001 = vtanh.f32 %v2285_v11 }
 0x49f   : > { %8003 = vtanh.f32 %v2316_v3  ;;  %v11461_v3 = vld [vmem:[#allocation48_spill] sm:$0xff] }
 0x4a0   : > { %8005 = vtanh.f32 %v2289_v44 }
 0x4a1   : > { %8007 = vtanh.f32 %v2335_v32  ;;  %v1959_v32 = vld [vmem:[#allocation2 + $0x140] sm:$0xff] }
 0x4a2   : > { %8009 = vtanh.f32 %v2336_v21  ;;  %v1960_v21 = vld [vmem:[#allocation2 + $0x148] sm:$0xff] }
 0x4a5   : > { %v7996_v34 = vpop.eup %7995 }
 0x4a6   : > { %v7998_v47 = vpop.eup %7997  ;;  %v2307_v18 = vmul.f32 0.5, %v7996_v34 }
 0x4a7   : > { %v2323_v27 = vmul.f32 0.5, %v7998_v47  ;;  %v8000_v40 = vpop.eup %7999 }
 0x4a8   : > { %v2311_v48 = vadd.f32 0.5, %v2307_v18  ;;  %v8002_v22 = vpop.eup %8001  ;;  %v2308_v15 = vmul.f32 0.5, %v8000_v40  ;;  %v2371_v40 = vunpack.c.l.bf16 %v1959_v32 }
 0x4a9   : > { %v2327_v13 = vadd.f32 0.5, %v2323_v27  ;;  %v8004_v58 = vpop.eup %8003  ;;  %v1961_v27 = vld [vmem:[#allocation2 + $0x150] sm:$0xff] }
 0x4aa   : > { %v2355_v61 = vmul.f32 %v8002_v22, %v2311_v48  ;;  %v2221_v60 = vpop.f32.mrb[28].mxu0  ;;  %v2274_v39 = vpop.f32.mrb[28].mxu1  ;;  %v2312_v45 = vadd.f32 0.5, %v2308_v15  ;;  %v2324_v41 = vmul.f32 0.5, %v8004_v58  ;;  %v1982_v22 = vunpack.c.h.bf16 %v9844_v8  ;;  %v9857_v58 = vld [vmem:[#allocation2 + $0x160] sm:$0xff] }
 0x4ab   : > { %v2351_v4 = vmul.f32 %v2327_v13, %v11460_v38  ;;  %v2291_v49 = vadd.f32 %v2221_v60, %v1975_v53  ;;  %v2223_v6 = vpop.f32.mrb[29].mxu0  ;;  %v2276_v37 = vpop.f32.mrb[29].mxu1  ;;  %v2293_v11 = vadd.f32 %v2274_v39, %v1977_v28  ;;  %v2373_v13 = vunpack.c.l.bf16 %v1961_v27 }
 0x4ac   : > { %v8006_v2 = vpop.eup %8005  ;;  %v2292_v1 = vadd.f32 %v2223_v6, %v1976_v14  ;;  %v2225_v5 = vpop.f32.mrb[30].mxu0  ;;  %v2328_v51 = vadd.f32 0.5, %v2324_v41  ;;  %v2294_v47 = vadd.f32 %v2276_v37, %v1978_v20  ;;  %v2372_v14 = vunpack.c.l.bf16 %v1960_v21 }
 0x4ad   : > { %v2278_v7 = vpop.f32.mrb[30].mxu1  ;;  %v9846_v9 = vadd.f32 %v2355_v61, %v2351_v4  ;;  %v2356_v10 = vmul.f32 %v8006_v2, %v2312_v45  ;;  %v2301_v55 = vmul.f32 0.5, %v2291_v49  ;;  %v2227_v57 = vpop.f32.mrb[31].mxu0  ;;  %v2295_v44 = vadd.f32 %v2225_v5, %v1979_v63  ;;  %v9859_v63 = vld [vmem:[#allocation2 + $0x170] sm:$0xff] }
 0x4ae   : > { %v2280_v54 = vpop.f32.mrb[31].mxu1  ;;  %v2317_v62 = vmul.f32 0.5, %v2292_v1  ;;  %v2352_v46 = vmul.f32 %v2328_v51, %v11461_v3  ;;  %v2296_v30 = vadd.f32 %v2227_v57, %v1980_v23  ;;  %v8008_v17 = vpop.eup %8007  ;;  %v2297_v48 = vadd.f32 %v2278_v7, %v1981_v29 }
 0x4af   : > { %8011 = vtanh.f32 %v9846_v9  ;;  %v2302_v34 = vmul.f32 0.5, %v2295_v44  ;;  %v8010_v53 = vpop.eup %8009  ;;  %v2375_v15 = vunpack.c.h.bf16 %v1959_v32  ;;  %v2343_v61 = vmul.f32 0.5, %v8008_v17 }
 0x4b0   : > { %8013 = vtanh.f32 %v2301_v55  ;;  %v9851_v33 = vadd.f32 %v2356_v10, %v2352_v46  ;;  %v2318_v18 = vmul.f32 0.5, %v2296_v30  ;;  %v2344_v60 = vmul.f32 0.5, %v8010_v53 }
 0x4b1   : > { %8015 = vtanh.f32 %v2317_v62  ;;  %v2337_v28 = vmul.f32 0.5, %v2294_v47  ;;  %v2374_v41 = vunpack.c.l.bf16 %v9854_v26  ;;  %v2377_v49 = vunpack.c.h.bf16 %v1961_v27 }
 0x4b2   : > { %8017 = vtanh.f32 %v2293_v11  ;;  %v2376_v6 = vunpack.c.h.bf16 %v1960_v21  ;;  %v2378_v1 = vunpack.c.h.bf16 %v9854_v26  ;;  %v2379_v5 = vunpack.c.l.bf16 %v9857_v58 }
 0x4b3   : > { %8019 = vtanh.f32 %v9851_v33  ;;  %v2298_v23 = vadd.f32 %v2280_v54, %v1982_v22  ;;  %v2381_v11 = vunpack.c.l.bf16 %v9859_v63  ;;  %v2347_v20 = vadd.f32 0.5, %v2343_v61 }
 0x4b4   : > { %8021 = vtanh.f32 %v2302_v34  ;;  %v2348_v3 = vadd.f32 0.5, %v2344_v60 }
 0x4b5   : > { %8023 = vtanh.f32 %v2318_v18  ;;  %v9865_v18 = vld [vmem:[#allocation2 + $0x168] sm:$0xff] }
 0x4b6   : > { %v2423_v39 = vpop.f32.mrb[32].mxu0  ;;  %8025 = vtanh.f32 %v2297_v48  ;;  %v2338_v48 = vmul.f32 0.5, %v2298_v23 }
 0x4b7   : > { %v2495_v38 = vadd.f32 %v2423_v39, %v2371_v40  ;;  %v2476_v4 = vpop.f32.mrb[32].mxu1  ;;  %v2425_v45 = vpop.f32.mrb[33].mxu0  ;;  %8027 = vtanh.f32 %v2337_v28  ;;  %v2380_v28 = vunpack.c.l.bf16 %v9865_v18 }
 0x4b8   : > { %v2496_v8 = vadd.f32 %v2425_v45, %v2372_v14  ;;  %v2478_v37 = vpop.f32.mrb[33].mxu1  ;;  %v2427_v2 = vpop.f32.mrb[34].mxu0  ;;  %v2497_v32 = vadd.f32 %v2476_v4, %v2373_v13 }
 0x4b9   : > { %v8012_v7 = vpop.eup %8011  ;;  %v2511_v51 = vmul.f32 0.5, %v2495_v38  ;;  %v2499_v10 = vadd.f32 %v2427_v2, %v2375_v15  ;;  %v2480_v55 = vpop.f32.mrb[34].mxu1  ;;  %v2498_v54 = vadd.f32 %v2478_v37, %v2374_v41  ;;  %v2383_v37 = vunpack.c.h.bf16 %v9857_v58 }
 0x4ba   : > { %v2429_v57 = vpop.f32.mrb[35].mxu0  ;;  %v8014_v62 = vpop.eup %8013  ;;  %v2527_v46 = vmul.f32 0.5, %v2496_v8  ;;  %v9867_v53 = vmul.f32 %v8012_v7, %v2347_v20  ;;  %v2501_v14 = vadd.f32 %v2480_v55, %v2377_v49 }
 0x4bb   : > { %v2482_v44 = vpop.f32.mrb[35].mxu1  ;;  %v8016_v29 = vpop.eup %8015  ;;  %v2309_v30 = vmul.f32 0.5, %v8014_v62  ;;  %8029 = vtanh.f32 %v2511_v51  ;;  %v2512_v34 = vmul.f32 0.5, %v2499_v10  ;;  %v2500_v47 = vadd.f32 %v2429_v57, %v2376_v6 }
 0x4bc   : > { %v8018_v21 = vpop.eup %8017  ;;  %v2325_v17 = vmul.f32 0.5, %v8016_v29  ;;  %8031 = vtanh.f32 %v2527_v46  ;;  %11462 = vst [vmem:[#allocation38_spill] sm:$0xff] %v9867_v53  ;;  %v2547_v45 = vmul.f32 0.5, %v2498_v54  ;;  %v2502_v23 = vadd.f32 %v2482_v44, %v2378_v1  ;;  %v8747_v46 = vld [vmem:[#allocation9] ss:$16 sps:$4 sm:$0xff]  }
 0x4bd   : > { %v8020_v27 = vpop.eup %8019  ;;  %v2313_v40 = vadd.f32 0.5, %v2309_v30  ;;  %8033 = vtanh.f32 %v2512_v34  ;;  %v2528_v13 = vmul.f32 0.5, %v2500_v47  ;;  %v8748_v29 = vld [vmem:[#allocation9 + $0x8] ss:$16 sps:$4 sm:$0xff]   ;;  %v8749_v34 = vld [vmem:[#allocation9 + $0x24] ss:$16 sps:$4 sm:$0xff]  }
 0x4be   : > { %v8022_v26 = vpop.eup %8021  ;;  %v9869_v22 = vmul.f32 %v8020_v27, %v2348_v3  ;;  %v2329_v15 = vadd.f32 0.5, %v2325_v17  ;;  %8035 = vtanh.f32 %v2497_v32  ;;  %v1966_v27 = vld [vmem:[#allocation2 + $0x178] sm:$0xff] }
 0x4bf   : > { %v2357_v61 = vmul.f32 %v8018_v21, %v2313_v40  ;;  %v2310_v60 = vmul.f32 0.5, %v8022_v26  ;;  %v8024_v39 = vpop.eup %8023  ;;  %8037 = vtanh.f32 %v2528_v13  ;;  %v8750_v21 = vld [vmem:[#allocation9 + $0x2c] ss:$16 sps:$4 sm:$0xff]  }
 0x4c0   : > { %11463 = vst [vmem:[#allocation39_spill] sm:$0xff] %v9869_v22  ;;  %v2625_v38 = vpack.c.bf16 %v9869_v22, %v9867_v53  ;;  %v2353_v4 = vmul.f32 %v2329_v15, %v9724_v50  ;;  %v2326_v49 = vmul.f32 0.5, %v8024_v39  ;;  %8039 = vtanh.f32 %v2338_v48  ;;  %v8026_v2 = vpop.eup %8025 }
 0x4c1   : > { %v2314_v41 = vadd.f32 0.5, %v2310_v60  ;;  %v2433_v6 = vpop.f32.mrb[36].mxu0  ;;  %v2486_v8 = vpop.f32.mrb[36].mxu1  ;;  %8041 = vtanh.f32 %v2501_v14  ;;  %v2548_v48 = vmul.f32 0.5, %v2502_v23  ;;  %v2385_v14 = vunpack.c.h.bf16 %v9859_v63 }
 0x4c2   : > { %v9876_v7 = vadd.f32 %v2357_v61, %v2353_v4  ;;  %v2503_v51 = vadd.f32 %v2433_v6, %v2379_v5  ;;  %v2435_v10 = vpop.f32.mrb[37].mxu0  ;;  %v9878_v55 = vpop.f32.mrb[37].mxu1  ;;  %2852 = vmatmul.mubr.bf16.vlgmr.msra.gmra.mrb[40].mxu0 %v2625_v38  ;;  %2905 = vmatmul.mubr.bf16.vlgmr.msra.gmra.mrb[40].mxu1 %v2625_v38  ;;  %v2330_v50 = vadd.f32 0.5, %v2326_v49  ;;  %8043 = vtanh.f32 %v2547_v45  ;;  %v8751_v61 = vld [vmem:[#allocation9 + $0x20] ss:$16 sps:$4 sm:$0xff]  }
 0x4c3   : > { %v2358_v57 = vmul.f32 %v8026_v2, %v2314_v41  ;;  %v2504_v62 = vadd.f32 %v2435_v10, %v2380_v28  ;;  %v2437_v20 = vpop.f32.mrb[38].mxu0  ;;  %v2490_v3 = vpop.f32.mrb[38].mxu1  ;;  %3032 = vmatpush1.bf16.msra.mxu0 %v8747_v46  ;;  %3085 = vmatpush1.bf16.msra.mxu1 %v8748_v29  ;;  %v2505_v1 = vadd.f32 %v2486_v8, %v2381_v11  ;;  %v2384_v5 = vunpack.c.h.bf16 %v9865_v18  ;;  %v8753_v4 = vld [vmem:[#allocation9 + $0x44] ss:$16 sps:$4 sm:$0xff]   ;;  %v8754_v45 = vld [vmem:[#allocation9 + $0x4c] ss:$16 sps:$4 sm:$0xff]  }
 0x4c4   : > { %v9880_v58 = vpop.eup %8027  ;;  %v2513_v30 = vmul.f32 0.5, %v2503_v51  ;;  %v2439_v44 = vpop.f32.mrb[39].mxu0  ;;  %3033 = vmatprep.subr.bf16.mxu0 %v8749_v34  ;;  %3086 = vmatprep.subr.bf16.mxu1 %v8750_v21  ;;  %8045 = vtanh.f32 %v9876_v7  ;;  %v2354_v54 = vmul.f32 %v2330_v50, %v9735_v59  ;;  %v2507_v40 = vadd.f32 %v2437_v20, %v2383_v37  ;;  %v8752_v59 = vld [vmem:[#allocation9 + $0x28] ss:$16 sps:$4 sm:$0xff]   ;;  %v8757_v29 = vld [vmem:[#allocation9 + $0x64] ss:$16 sps:$4 sm:$0xff]  }
 0x4c5   : > { %v9885_v32 = vpop.f32.mrb[39].mxu1  ;;  %v8030_v17 = vpop.eup %8029  ;;  %v2529_v47 = vmul.f32 0.5, %v2504_v62  ;;  %2861 = vmatprep.mubr.bf16.mxu0 %v11404_v36  ;;  %2914 = vmatprep.mubr.bf16.mxu1 %v11404_v36  ;;  %v2382_v39 = vunpack.c.l.bf16 %v1966_v27  ;;  %v2508_v38 = vadd.f32 %v2439_v44, %v2384_v5  ;;  %v2386_v6 = vunpack.c.h.bf16 %v1966_v27  ;;  %v8755_v62 = vld [vmem:[#allocation9 + $0x40] ss:$16 sps:$4 sm:$0xff]   ;;  %v8756_v20 = vld [vmem:[#allocation9 + $0x48] ss:$16 sps:$4 sm:$0xff]  }
 0x4c6   : > { %v8032_v11 = vpop.eup %8031  ;;  %v2519_v18 = vmul.f32 0.5, %v8030_v17  ;;  %8047 = vtanh.f32 %v2513_v30  ;;  %v9892_v26 = vadd.f32 %v2358_v57, %v2354_v54  ;;  %v2514_v13 = vmul.f32 0.5, %v2507_v40  ;;  %v8758_v30 = vld [vmem:[#allocation9 + $0x6c] ss:$16 sps:$4 sm:$0xff]   ;;  %v8759_v27 = vld [vmem:[#allocation9 + $0x60] ss:$16 sps:$4 sm:$0xff]  }
 0x4c7   : > { %v2535_v15 = vmul.f32 0.5, %v8032_v11  ;;  %8049 = vtanh.f32 %v2529_v47  ;;  %3034 = vmatpush1.bf16.msra.mxu0 %v8751_v61  ;;  %3087 = vmatpush1.bf16.msra.mxu1 %v8752_v59  ;;  %v8034_v60 = vpop.eup %8033  ;;  %v2509_v2 = vadd.f32 %v2490_v3, %v2385_v14  ;;  %v2530_v23 = vmul.f32 0.5, %v2508_v38  ;;  %v8760_v40 = vld [vmem:[#allocation9 + $0x68] ss:$16 sps:$4 sm:$0xff]  }
 0x4c8   : > { %v2523_v28 = vadd.f32 0.5, %v2519_v18  ;;  %8051 = vtanh.f32 %v2505_v1  ;;  %3035 = vmatprep.subr.bf16.mxu0 %v8753_v4  ;;  %3088 = vmatprep.subr.bf16.mxu1 %v8754_v45  ;;  %v8036_v41 = vpop.eup %8035  ;;  %v2520_v49 = vmul.f32 0.5, %v8034_v60  ;;  %v2506_v21 = vadd.f32 %v9878_v55, %v2382_v39  ;;  %v8761_v18 = vld [vmem:[#allocation9 + $0x84] ss:$16 sps:$4 sm:$0xff]   ;;  %v8763_v39 = vld [vmem:[#allocation9 + $0x80] ss:$16 sps:$4 sm:$0xff]  }
 0x4c9   : > { %8053 = vtanh.f32 %v9892_v26  ;;  %v2539_v63 = vadd.f32 0.5, %v2535_v15  ;;  %v8038_v8 = vpop.eup %8037  ;;  %v2510_v47 = vadd.f32 %v9885_v32, %v2386_v6  ;;  %v8764_v38 = vld [vmem:[#allocation9 + $0x88] ss:$16 sps:$4 sm:$0xff]   ;;  %v8766_v6 = vld [vmem:[#allocation9 + $0xac] ss:$16 sps:$4 sm:$0xff]  }
 0x4ca   : > { %v2567_v37 = vmul.f32 %v8036_v41, %v2523_v28  ;;  %8055 = vtanh.f32 %v2514_v13  ;;  %v8040_v51 = vpop.eup %8039  ;;  %v2524_v50 = vadd.f32 0.5, %v2520_v49  ;;  %v2536_v57 = vmul.f32 0.5, %v8038_v8  ;;  %v8765_v49 = vld [vmem:[#allocation9 + $0xa4] ss:$16 sps:$4 sm:$0xff]  }
 0x4cb   : > { %v2563_v10 = vmul.f32 %v2539_v63, %v9750_v0  ;;  %8057 = vtanh.f32 %v2548_v48  ;;  %3036 = vmatpush1.bf16.msra.mxu0 %v8755_v62  ;;  %3089 = vmatpush1.bf16.msra.mxu1 %v8756_v20  ;;  %v8042_v46 = vpop.eup %8041  ;;  %v2345_v0 = vmul.f32 0.5, %v9880_v58  ;;  %v2346_v34 = vmul.f32 0.5, %v8040_v51  ;;  %v8762_v48 = vld [vmem:[#allocation9 + $0x8c] ss:$16 sps:$4 sm:$0xff]   ;;  %v8767_v62 = vld [vmem:[#allocation9 + $0xa0] ss:$16 sps:$4 sm:$0xff]  }
 0x4cc   : > { %8059 = vtanh.f32 %v2530_v23  ;;  %3037 = vmatprep.subr.bf16.mxu0 %v8757_v29  ;;  %3090 = vmatprep.subr.bf16.mxu1 %v8758_v30  ;;  %v2540_v3 = vadd.f32 0.5, %v2536_v57  ;;  %v2568_v5 = vmul.f32 %v8042_v46, %v2524_v50  ;;  %v8044_v44 = vpop.eup %8043  ;;  %v2549_v32 = vmul.f32 0.5, %v2506_v21  ;;  %v8768_v20 = vld [vmem:[#allocation9 + $0xa8] ss:$16 sps:$4 sm:$0xff]  }
 0x4cd   : > { %v9896_v1 = vadd.f32 %v2567_v37, %v2563_v10  ;;  %8061 = vtanh.f32 %v2509_v2  ;;  %v2349_v13 = vadd.f32 0.5, %v2345_v0  ;;  %v2550_v28 = vmul.f32 0.5, %v2510_v47  ;;  %v8769_v0 = vld [vmem:[#allocation9 + $0xc4] ss:$16 sps:$4 sm:$0xff]  }
 0x4ce   : > { %v8046_v17 = vpop.eup %8045  ;;  %v2564_v54 = vmul.f32 %v2540_v3, %v9759_v52  ;;  %v2350_v52 = vadd.f32 0.5, %v2346_v34  ;;  %v2555_v29 = vmul.f32 0.5, %v8044_v44  ;;  %v8770_v34 = vld [vmem:[#allocation9 + $0xcc] ss:$16 sps:$4 sm:$0xff]   ;;  %v8772_v44 = vld [vmem:[#allocation9 + $0xc8] ss:$16 sps:$4 sm:$0xff]  }
 0x4cf   : > { %3038 = vmatpush1.bf16.msra.mxu0 %v8759_v27  ;;  %3091 = vmatpush1.bf16.msra.mxu1 %v8760_v40  ;;  %8063 = vtanh.f32 %v9896_v1  ;;  %v9906_v45 = vmul.f32 %v8046_v17, %v2349_v13  ;;  %v8773_v40 = vld [vmem:[#allocation9 + $0xe4] ss:$16 sps:$4 sm:$0xff]  }
 0x4d0   : > { %v8048_v11 = vpop.eup %8047  ;;  %3039 = vmatprep.subr.bf16.mxu0 %v8761_v18  ;;  %3092 = vmatprep.subr.bf16.mxu1 %v8762_v48  ;;  %v9903_v58 = vadd.f32 %v2568_v5, %v2564_v54  ;;  %v8771_v54 = vld [vmem:[#allocation9 + $0xc0] ss:$16 sps:$4 sm:$0xff]   ;;  %v2559_v47 = vadd.f32 0.5, %v2555_v29  ;;  %v9974_v29 = vld [vmem:[#allocation9 + $0x64] ss:$16 sps:$4 sm:$0xff]  }
 0x4d1   : > { %v8050_v14 = vpop.eup %8049  ;;  %v2521_v55 = vmul.f32 0.5, %v8048_v11  ;;  %11464 = vst [vmem:[#allocation40_spill] sm:$0xff] %v9906_v45  ;;  %v8774_v11 = vld [vmem:[#allocation9 + $0xec] ss:$16 sps:$4 sm:$0xff]  }
 0x4d2   : > { %v8052_v15 = vpop.eup %8051  ;;  %v2537_v61 = vmul.f32 0.5, %v8050_v14  ;;  %8065 = vtanh.f32 %v9903_v58 }
 0x4d3   : > { %v8054_v59 = vpop.eup %8053  ;;  %v2525_v60 = vadd.f32 0.5, %v2521_v55  ;;  %3040 = vmatpush1.bf16.msra.mxu0 %v8763_v39  ;;  %3093 = vmatpush1.bf16.msra.mxu1 %v8764_v38  ;;  %8067 = vtanh.f32 %v2549_v32 }
 0x4d4   : > { %v8056_v4 = vpop.eup %8055  ;;  %v9908_v41 = vmul.f32 %v8054_v59, %v2350_v52  ;;  %v2541_v63 = vadd.f32 0.5, %v2537_v61  ;;  %3041 = vmatprep.subr.bf16.mxu0 %v8765_v49  ;;  %3094 = vmatprep.subr.bf16.mxu1 %v8766_v6  ;;  %8069 = vtanh.f32 %v2550_v28  ;;  %v9938_v6 = vld [vmem:[#allocation9 + $0x4] ss:$16 sps:$4 sm:$0xff]  }
 0x4d5   : > { %v8058_v8 = vpop.eup %8057  ;;  %v2569_v37 = vmul.f32 %v8052_v15, %v2525_v60  ;;  %v2522_v2 = vmul.f32 0.5, %v8056_v4  ;;  %v8776_v15 = vld [vmem:[#allocation9 + $0xe8] ss:$16 sps:$4 sm:$0xff]   ;;  %11471 = vst [vmem:[#allocation46_spill] sm:$0xff] %v9938_v6 }
 0x4d6   : > { %11465 = vst [vmem:[#allocation33_spill] sm:$0xff] %v9908_v41  ;;  %v8060_v23 = vpop.eup %8059  ;;  %v2565_v51 = vmul.f32 %v2541_v63, %v9774_v35  ;;  %v2626_v10 = vpack.c.bf16 %v9908_v41, %v9906_v45  ;;  %v2556_v30 = vmul.f32 0.5, %v8058_v8  ;;  %v9940_v8 = vld [vmem:[#allocation9] ss:$16 sps:$4 sm:$0xff]  }
 0x4d7   : > { %v2526_v50 = vadd.f32 0.5, %v2522_v2  ;;  %v2538_v57 = vmul.f32 0.5, %v8060_v23  ;;  %3042 = vmatpush1.bf16.msra.mxu0 %v8767_v62  ;;  %3095 = vmatpush1.bf16.msra.mxu1 %v8768_v20  ;;  %v8062_v46 = vpop.eup %8061  ;;  %v9944_v2 = vld [vmem:[#allocation9 + $0xc] ss:$16 sps:$4 sm:$0xff]   ;;  %v9950_v23 = vld [vmem:[#allocation9 + $0x24] ss:$16 sps:$4 sm:$0xff]  }
 0x4d8   : > { %v9913_v3 = vadd.f32 %v2569_v37, %v2565_v51  ;;  %2862 = vmatmul.mubr.bf16.gmra.mrb[44].mxu0 %v2626_v10  ;;  %2915 = vmatmul.mubr.bf16.gmra.mrb[44].mxu1 %v2626_v10  ;;  %v2560_v27 = vadd.f32 0.5, %v2556_v30  ;;  %v9942_v37 = vld [vmem:[#allocation9 + $0x8] ss:$16 sps:$4 sm:$0xff]   ;;  %11472 = vst [vmem:[#allocation28_spill] sm:$0xff] %v9944_v2  ;;  %v9952_v51 = vld [vmem:[#allocation9 + $0x2c] ss:$16 sps:$4 sm:$0xff]  }
 0x4d9   : > { %v2542_v5 = vadd.f32 0.5, %v2538_v57  ;;  %v2570_v35 = vmul.f32 %v8062_v46, %v2526_v50  ;;  %3043 = vmatprep.subr.bf16.mxu0 %v8769_v0  ;;  %3096 = vmatprep.subr.bf16.mxu1 %v8770_v34  ;;  %v8064_v21 = vpop.eup %8063  ;;  %v9954_v10 = vld [vmem:[#allocation9 + $0x20] ss:$16 sps:$4 sm:$0xff]   ;;  %v9956_v50 = vld [vmem:[#allocation9 + $0x28] ss:$16 sps:$4 sm:$0xff]  }
 0x4da   : > { %3063 = vmatprep.mubr.bf16.mxu0 %v11404_v36  ;;  %3116 = vmatprep.mubr.bf16.mxu1 %v11404_v36  ;;  %8071 = vtanh.f32 %v9913_v3  ;;  %v9921_v14 = vmul.f32 %v8064_v21, %v2559_v47  ;;  %v9962_v57 = vld [vmem:[#allocation9 + $0x44] ss:$16 sps:$4 sm:$0xff]   ;;  %v9964_v62 = vld [vmem:[#allocation9 + $0x4c] ss:$16 sps:$4 sm:$0xff]   ;;  %v9966_v20 = vld [vmem:[#allocation9 + $0x40] ss:$16 sps:$4 sm:$0xff]  }
 0x4db   : > { %v2566_v17 = vmul.f32 %v2542_v5, %v9785_v19  ;;  %3044 = vmatpush1.bf16.msra.mxu0 %v8771_v54  ;;  %3097 = vmatpush1.bf16.msra.mxu1 %v8772_v44  ;;  %v8775_v19 = vld [vmem:[#allocation9 + $0xe0] ss:$16 sps:$4 sm:$0xff]   ;;  %v9968_v46 = vld [vmem:[#allocation9 + $0x48] ss:$16 sps:$4 sm:$0xff]   ;;  %v9976_v30 = vld [vmem:[#allocation9 + $0x6c] ss:$16 sps:$4 sm:$0xff]  }
 0x4dc   : > { %3045 = vmatprep.subr.bf16.mxu0 %v8773_v40  ;;  %3098 = vmatprep.subr.bf16.mxu1 %v8774_v11  ;;  %v8066_v18 = vpop.eup %8065  ;;  %11467 = vst [vmem:[#allocation42_spill] sm:$0xff] %v9921_v14  ;;  %v9978_v5 = vld [vmem:[#allocation9 + $0x60] ss:$16 sps:$4 sm:$0xff]   ;;  %v9986_v0 = vld [vmem:[#allocation9 + $0x84] ss:$16 sps:$4 sm:$0xff]  }
 0x4dd   : > { %v9919_v48 = vadd.f32 %v2570_v35, %v2566_v17  ;;  %v9923_v55 = vmul.f32 %v8066_v18, %v2560_v27  ;;  %v8068_v13 = vpop.eup %8067  ;;  %v9980_v35 = vld [vmem:[#allocation9 + $0x68] ss:$16 sps:$4 sm:$0xff]   ;;  %v9988_v34 = vld [vmem:[#allocation9 + $0x8c] ss:$16 sps:$4 sm:$0xff]   ;;  %v9990_v21 = vld [vmem:[#allocation9 + $0x80] ss:$16 sps:$4 sm:$0xff]  }
 0x4de   : > { %v8070_v61 = vpop.eup %8069  ;;  %v2557_v32 = vmul.f32 0.5, %v8068_v13  ;;  %v9992_v17 = vld [vmem:[#allocation9 + $0x88] ss:$16 sps:$4 sm:$0xff]   ;;  %v9998_v54 = vld [vmem:[#allocation9 + $0xa4] ss:$16 sps:$4 sm:$0xff]  }
 0x4df   : > { %11466 = vst [vmem:[#allocation41_spill] sm:$0xff] %v9919_v48  ;;  %11468 = vst [vmem:[#allocation43_spill] sm:$0xff] %v9923_v55  ;;  %8073 = vtanh.f32 %v9919_v48  ;;  %3046 = vmatpush1.bf16.msra.mxu0 %v8775_v19  ;;  %3099 = vmatpush1.bf16.msra.mxu1 %v8776_v15  ;;  %v3029_v52 = vpack.c.bf16 %v9923_v55, %v9921_v14  ;;  %v2558_v59 = vmul.f32 0.5, %v8070_v61  ;;  %v10000_v44 = vld [vmem:[#allocation9 + $0xac] ss:$16 sps:$4 sm:$0xff]  }
 0x4e0   : > { %v2561_v28 = vadd.f32 0.5, %v2557_v32  ;;  %3461 = vmatprep.subr.bf16.mxu0 %v9938_v6  ;;  %3514 = vmatprep.subr.bf16.mxu1 %v9944_v2  ;;  %v10002_v47 = vld [vmem:[#allocation9 + $0xa0] ss:$16 sps:$4 sm:$0xff]   ;;  %v10004_v27 = vld [vmem:[#allocation9 + $0xa8] ss:$16 sps:$4 sm:$0xff]  }
 0x4e1   : > { %v2562_v39 = vadd.f32 0.5, %v2558_v59  ;;  %11473 = vst [vmem:[#allocation27_spill] sm:$0xff] %v10002_v47  ;;  %11474 = vst [vmem:[#allocation47_spill] sm:$0xff] %v10004_v27  ;;  %v10010_v40 = vld [vmem:[#allocation9 + $0xc4] ss:$16 sps:$4 sm:$0xff]   ;;  %v2594_v59 = vld [vmem:[#allocation2 + $0x188] sm:$0xff] }
 0x4e2   : > { %3064 = vmatmul.mubr.bf16.vlgmr.msra.gmra.mrb[48].mxu0 %v3029_v52  ;;  %3117 = vmatmul.mubr.bf16.vlgmr.msra.gmra.mrb[48].mxu1 %v3029_v52  ;;  %11475 = vst [vmem:[#allocation48_spill] sm:$0xff] %v10010_v40  ;;  %v10012_v11 = vld [vmem:[#allocation9 + $0xcc] ss:$16 sps:$4 sm:$0xff]   ;;  %v10014_v18 = vld [vmem:[#allocation9 + $0xc0] ss:$16 sps:$4 sm:$0xff]  }
 0x4e3   : > { %3073 = vmatprep.mubr.bf16.mxu0 %v11404_v36  ;;  %3126 = vmatprep.mubr.bf16.mxu1 %v11404_v36  ;;  %11476 = vst [vmem:[#allocation53_spill] sm:$0xff] %v10012_v11  ;;  %11477 = vst [vmem:[#allocation54_spill] sm:$0xff] %v10014_v18  ;;  %v10016_v19 = vld [vmem:[#allocation9 + $0xc8] ss:$16 sps:$4 sm:$0xff]   ;;  %v10022_v15 = vld [vmem:[#allocation9 + $0xe4] ss:$16 sps:$4 sm:$0xff]  }
 0x4e4   : > { %v8072_v60 = vpop.eup %8071  ;;  %3462 = vmatpush1.bf16.msra.mxu0 %v9940_v8  ;;  %3515 = vmatpush1.bf16.msra.mxu1 %v9942_v37  ;;  %11478 = vst [vmem:[#allocation55_spill] sm:$0xff] %v10016_v19  ;;  %11479 = vst [vmem:[#allocation56_spill] sm:$0xff] %v10022_v15  ;;  %v10024_v13 = vld [vmem:[#allocation9 + $0xec] ss:$16 sps:$4 sm:$0xff]   ;;  %v10026_v52 = vld [vmem:[#allocation9 + $0xe0] ss:$16 sps:$4 sm:$0xff]  }
 0x4e5   : > { %v9930_v4 = vmul.f32 %v8072_v60, %v2561_v28  ;;  %3463 = vmatprep.subr.bf16.mxu0 %v9950_v23  ;;  %3516 = vmatprep.subr.bf16.mxu1 %v9952_v51  ;;  %11480 = vst [vmem:[#allocation57_spill] sm:$0xff] %v10024_v13  ;;  %11481 = vst [vmem:[#allocation58_spill] sm:$0xff] %v10026_v52  ;;  %v10028_v61 = vld [vmem:[#allocation9 + $0xe8] ss:$16 sps:$4 sm:$0xff]   ;;  %v2593_v32 = vld [vmem:[#allocation2 + $0x180] sm:$0xff] }
 0x4e6   : > { %11482 = vst [vmem:[#allocation59_spill] sm:$0xff] %v10028_v61  ;;  %v2609_v60 = vunpack.c.l.bf16 %v2593_v32  ;;  %v2595_v28 = vld [vmem:[#allocation2 + $0x190] sm:$0xff] }
 0x4e7   : > { %11469 = vst [vmem:[#allocation44_spill] sm:$0xff] %v9930_v4  ;;  %v2611_v12 = vunpack.c.l.bf16 %v2595_v28  ;;  %v2615_v56 = vunpack.c.h.bf16 %v2595_v28  ;;  %v2597_v28 = vld [vmem:[#allocation2 + $0x1a0] sm:$0xff] }
 0x4e8   : > { %3464 = vmatpush1.bf16.msra.mxu0 %v9954_v10  ;;  %3517 = vmatpush1.bf16.msra.mxu1 %v9956_v50 }
 0x4e9   : > { %v8074_v38 = vpop.eup %8073  ;;  %3465 = vmatprep.subr.bf16.mxu0 %v9962_v57  ;;  %3518 = vmatprep.subr.bf16.mxu1 %v9964_v62 }
 0x4ea   : > { %v9932_v63 = vmul.f32 %v8074_v38, %v2562_v39  ;;  %v2610_v39 = vunpack.c.l.bf16 %v2594_v59  ;;  %v2613_v38 = vunpack.c.h.bf16 %v2593_v32 }
 0x4ec   : > { %11470 = vst [vmem:[#allocation45_spill] sm:$0xff] %v9932_v63  ;;  %v3030_v49 = vpack.c.bf16 %v9932_v63, %v9930_v4  ;;  %3466 = vmatpush1.bf16.msra.mxu0 %v9966_v20  ;;  %3519 = vmatpush1.bf16.msra.mxu1 %v9968_v46  ;;  %v2614_v4 = vunpack.c.h.bf16 %v2594_v59 }
 0x4ed   : > { %3467 = vmatprep.subr.bf16.mxu0 %v9974_v29  ;;  %3520 = vmatprep.subr.bf16.mxu1 %v9976_v30 }
 0x4ee   : > { %3074 = vmatmul.mubr.bf16.gmra.mrb[52].mxu0 %v3030_v49  ;;  %3127 = vmatmul.mubr.bf16.gmra.mrb[52].mxu1 %v3030_v49 }
 0x4ef   : > { %3493 = vmatprep.mubr.bf16.mxu0 %v11404_v36  ;;  %3546 = vmatprep.mubr.bf16.mxu1 %v11404_v36 }
 0x4f0   : > { %3468 = vmatpush1.bf16.msra.mxu0 %v9978_v5  ;;  %3521 = vmatpush1.bf16.msra.mxu1 %v9980_v35 }
 0x4f1   : > { %3469 = vmatprep.subr.bf16.mxu0 %v9986_v0  ;;  %3522 = vmatprep.subr.bf16.mxu1 %v9988_v34 }
 0x4f4   : > { %3470 = vmatpush1.bf16.msra.mxu0 %v9990_v21  ;;  %3523 = vmatpush1.bf16.msra.mxu1 %v9992_v17 }
 0x4f5   : > { %3471 = vmatprep.subr.bf16.mxu0 %v9998_v54  ;;  %3524 = vmatprep.subr.bf16.mxu1 %v10000_v44 }
 0x4f8   : > { %3472 = vmatpush1.bf16.msra.mxu0 %v10002_v47  ;;  %3525 = vmatpush1.bf16.msra.mxu1 %v10004_v27 }
 0x4f9   : > { %3473 = vmatprep.subr.bf16.mxu0 %v10010_v40  ;;  %3526 = vmatprep.subr.bf16.mxu1 %v10012_v11 }
 0x4fc   : > { %3474 = vmatpush1.bf16.msra.mxu0 %v10014_v18  ;;  %3527 = vmatpush1.bf16.msra.mxu1 %v10016_v19 }
 0x4fd   : > { %3475 = vmatprep.subr.bf16.mxu0 %v10022_v15  ;;  %3528 = vmatprep.subr.bf16.mxu1 %v10024_v13 }
 0x500   : > { %3476 = vmatpush1.bf16.msra.mxu0 %v10026_v52  ;;  %3529 = vmatpush1.bf16.msra.mxu1 %v10028_v61 }
 0x501   : > { %3673 = vmatprep.subr.bf16.mxu0 %v9938_v6  ;;  %3726 = vmatprep.subr.bf16.mxu1 %v9944_v2 }
 0x595   : > { %v2853_v49 = vpop.f32.mrb[40].mxu0  ;;  %v2906_v63 = vpop.f32.mrb[40].mxu1 }
 0x596   : > { %v2925_v24 = vadd.f32 %v2853_v49, %v2609_v60  ;;  %v2855_v55 = vpop.f32.mrb[41].mxu0  ;;  %v2908_v14 = vpop.f32.mrb[41].mxu1  ;;  %v2927_v32 = vadd.f32 %v2906_v63, %v2611_v12  ;;  %v2612_v60 = vunpack.c.l.bf16 %v2596_v25  ;;  %v2598_v12 = vld [vmem:[#allocation2 + $0x1a8] sm:$0xff] }
 0x597   : > { %v2926_v31 = vadd.f32 %v2855_v55, %v2610_v39  ;;  %v2857_v16 = vpop.f32.mrb[42].mxu0  ;;  %v2910_v45 = vpop.f32.mrb[42].mxu1  ;;  %v2616_v55 = vunpack.c.h.bf16 %v2596_v25  ;;  %v2599_v25 = vld [vmem:[#allocation2 + $0x1b0] sm:$0xff] }
 0x598   : > { %v2941_v43 = vmul.f32 0.5, %v2925_v24  ;;  %v2929_v41 = vadd.f32 %v2857_v16, %v2613_v38  ;;  %v2859_v42 = vpop.f32.mrb[43].mxu0  ;;  %v2912_v53 = vpop.f32.mrb[43].mxu1  ;;  %v2931_v49 = vadd.f32 %v2910_v45, %v2615_v56  ;;  %v2928_v39 = vadd.f32 %v2908_v14, %v2612_v60 }
 0x599   : > { %v2957_v22 = vmul.f32 0.5, %v2926_v31  ;;  %v2930_v2 = vadd.f32 %v2859_v42, %v2614_v4  ;;  %v2932_v16 = vadd.f32 %v2912_v53, %v2616_v55  ;;  %v2617_v45 = vunpack.c.l.bf16 %v2597_v28 }
 0x59a   : > { %8075 = vtanh.f32 %v2941_v43  ;;  %v2942_v6 = vmul.f32 0.5, %v2929_v41  ;;  %v2977_v38 = vmul.f32 0.5, %v2928_v39  ;;  %v2621_v53 = vunpack.c.h.bf16 %v2597_v28 }
 0x59b   : > { %8077 = vtanh.f32 %v2957_v22  ;;  %v2958_v59 = vmul.f32 0.5, %v2930_v2  ;;  %v2978_v43 = vmul.f32 0.5, %v2932_v16  ;;  %v2618_v2 = vunpack.c.l.bf16 %v2598_v12 }
 0x59c   : > { %8079 = vtanh.f32 %v2942_v6 }
 0x59d   : > { %8081 = vtanh.f32 %v2927_v32 }
 0x59e   : > { %8083 = vtanh.f32 %v2958_v59 }
 0x59f   : > { %8085 = vtanh.f32 %v2931_v49  ;;  %v10037_v49 = vld [vmem:[#allocation2 + $0x1b8] sm:$0xff] }
 0x5a0   : > { %8087 = vtanh.f32 %v2977_v38 }
 0x5a1   : > { %8089 = vtanh.f32 %v2978_v43 }
 0x5a4   : > { %v8076_v24 = vpop.eup %8075 }
 0x5a5   : > { %v8078_v31 = vpop.eup %8077  ;;  %v2949_v61 = vmul.f32 0.5, %v8076_v24  ;;  %v2622_v24 = vunpack.c.h.bf16 %v2598_v12 }
 0x5a6   : > { %v2965_v42 = vmul.f32 0.5, %v8078_v31  ;;  %v8080_v41 = vpop.eup %8079 }
 0x5a7   : > { %v2953_v22 = vadd.f32 0.5, %v2949_v61  ;;  %v8082_v4 = vpop.eup %8081  ;;  %v2950_v56 = vmul.f32 0.5, %v8080_v41  ;;  %v2619_v61 = vunpack.c.l.bf16 %v2599_v25 }
 0x5a8   : > { %v2969_v63 = vadd.f32 0.5, %v2965_v42  ;;  %v8084_v6 = vpop.eup %8083 }
 0x5a9   : > { %v2997_v14 = vmul.f32 %v8082_v4, %v2953_v22  ;;  %v2954_v59 = vadd.f32 0.5, %v2950_v56  ;;  %v2966_v60 = vmul.f32 0.5, %v8084_v6  ;;  %v8086_v55 = vpop.eup %8085 }
 0x5aa   : > { %v2993_v32 = vmul.f32 %v2969_v63, %v9846_v9  ;;  %v2620_v9 = vunpack.c.l.bf16 %v10037_v49 }
 0x5ab   : > { %v2863_v39 = vpop.f32.mrb[44].mxu0  ;;  %v2916_v16 = vpop.f32.mrb[44].mxu1  ;;  %v2970_v31 = vadd.f32 0.5, %v2966_v60  ;;  %v2998_v42 = vmul.f32 %v8086_v55, %v2954_v59  ;;  %v2601_v59 = vld [vmem:[#allocation2 + $0x1c0] sm:$0xff]  ;;  %v2602_v55 = vld [vmem:[#allocation2 + $0x1c8] sm:$0xff] }
 0x5ac   : > { %v10039_v38 = vadd.f32 %v2997_v14, %v2993_v32  ;;  %v2933_v41 = vadd.f32 %v2863_v39, %v2617_v45  ;;  %v2865_v22 = vpop.f32.mrb[45].mxu0  ;;  %v2918_v4 = vpop.f32.mrb[45].mxu1  ;;  %v2935_v12 = vadd.f32 %v2916_v16, %v2619_v61  ;;  %v2623_v32 = vunpack.c.h.bf16 %v2599_v25 }
 0x5ad   : > { %v2934_v28 = vadd.f32 %v2865_v22, %v2618_v2  ;;  %v2867_v63 = vpop.f32.mrb[46].mxu0  ;;  %v2920_v56 = vpop.f32.mrb[46].mxu1  ;;  %v2994_v43 = vmul.f32 %v2970_v31, %v9851_v33  ;;  %v2936_v39 = vadd.f32 %v2918_v4, %v2620_v9  ;;  %v2603_v22 = vld [vmem:[#allocation2 + $0x1d0] sm:$0xff]  ;;  %v3013_v31 = vunpack.c.l.bf16 %v2601_v59 }
 0x5ae   : > { %11483 = vst [vmem:[#allocation60_spill] sm:$0xff] %v10039_v38  ;;  %v2943_v6 = vmul.f32 0.5, %v2933_v41  ;;  %v2937_v52 = vadd.f32 %v2867_v63, %v2621_v53  ;;  %v2869_v48 = vpop.f32.mrb[47].mxu0  ;;  %v2922_v13 = vpop.f32.mrb[47].mxu1  ;;  %8091 = vtanh.f32 %v10039_v38  ;;  %v2604_v41 = vld [vmem:[#allocation2 + $0x1d8] sm:$0xff]  ;;  %v2624_v61 = vunpack.c.h.bf16 %v10037_v49 }
 0x5af   : > { %v2959_v14 = vmul.f32 0.5, %v2934_v28  ;;  %v10044_v45 = vadd.f32 %v2998_v42, %v2994_v43  ;;  %v2938_v60 = vadd.f32 %v2869_v48, %v2622_v24  ;;  %v8088_v33 = vpop.eup %8087  ;;  %v3014_v25 = vunpack.c.l.bf16 %v2602_v55  ;;  %v10048_v48 = vld [vmem:[#allocation2 + $0x1e0] sm:$0xff]  ;;  %v10050_v24 = vld [vmem:[#allocation2 + $0x1f0] sm:$0xff] }
 0x5b0   : > { %8093 = vtanh.f32 %v2943_v6  ;;  %v2944_v2 = vmul.f32 0.5, %v2937_v52  ;;  %v8090_v16 = vpop.eup %8089  ;;  %v2939_v42 = vadd.f32 %v2920_v56, %v2623_v32  ;;  %v3015_v28 = vunpack.c.l.bf16 %v2603_v22 }
 0x5b1   : > { %11484 = vst [vmem:[#allocation61_spill] sm:$0xff] %v10044_v45  ;;  %8095 = vtanh.f32 %v2959_v14  ;;  %v2960_v53 = vmul.f32 0.5, %v2938_v60  ;;  %v3017_v52 = vunpack.c.h.bf16 %v2601_v59  ;;  %v2985_v4 = vmul.f32 0.5, %v8088_v33 }
 0x5b2   : > { %8097 = vtanh.f32 %v10044_v45  ;;  %v2979_v9 = vmul.f32 0.5, %v2936_v39  ;;  %v3016_v6 = vunpack.c.l.bf16 %v2604_v41  ;;  %v3018_v14 = vunpack.c.h.bf16 %v2602_v55 }
 0x5b3   : > { %8099 = vtanh.f32 %v2935_v12  ;;  %v3019_v45 = vunpack.c.h.bf16 %v2603_v22  ;;  %v3020_v38 = vunpack.c.h.bf16 %v2604_v41  ;;  %v3021_v15 = vunpack.c.l.bf16 %v10048_v48 }
 0x5b4   : > { %8101 = vtanh.f32 %v2944_v2  ;;  %v2986_v2 = vmul.f32 0.5, %v8090_v16  ;;  %v3023_v19 = vunpack.c.l.bf16 %v10050_v24  ;;  %v2940_v39 = vadd.f32 %v2922_v13, %v2624_v61  ;;  %v10054_v13 = vld [vmem:[#allocation2 + $0x1e8] sm:$0xff] }
 0x5b5   : > { %v3065_v63 = vpop.f32.mrb[48].mxu0  ;;  %v3118_v43 = vpop.f32.mrb[48].mxu1  ;;  %8103 = vtanh.f32 %v2960_v53 }
 0x5b6   : > { %v3137_v12 = vadd.f32 %v3065_v63, %v3013_v31  ;;  %v3067_v60 = vpop.f32.mrb[49].mxu0  ;;  %v3120_v49 = vpop.f32.mrb[49].mxu1  ;;  %8105 = vtanh.f32 %v2939_v42  ;;  %v2989_v31 = vadd.f32 0.5, %v2985_v4  ;;  %v2990_v27 = vadd.f32 0.5, %v2986_v2 }
 0x5b7   : > { %v3138_v56 = vadd.f32 %v3067_v60, %v3014_v25  ;;  %v3069_v32 = vpop.f32.mrb[50].mxu0  ;;  %v3122_v59 = vpop.f32.mrb[50].mxu1  ;;  %8107 = vtanh.f32 %v2979_v9  ;;  %v3139_v25 = vadd.f32 %v3118_v43, %v3015_v28  ;;  %v3140_v16 = vadd.f32 %v3120_v49, %v3016_v6 }
 0x5b8   : > { %v3153_v33 = vmul.f32 0.5, %v3137_v12  ;;  %v3141_v18 = vadd.f32 %v3069_v32, %v3017_v52  ;;  %v3071_v11 = vpop.f32.mrb[51].mxu0  ;;  %v3124_v55 = vpop.f32.mrb[51].mxu1  ;;  %v2980_v12 = vmul.f32 0.5, %v2940_v39  ;;  %v3143_v32 = vadd.f32 %v3122_v59, %v3019_v45 }
 0x5b9   : > { %v8092_v53 = vpop.eup %8091  ;;  %v3169_v63 = vmul.f32 0.5, %v3138_v56  ;;  %v3142_v22 = vadd.f32 %v3071_v11, %v3018_v14  ;;  %v3144_v4 = vadd.f32 %v3124_v55, %v3020_v38  ;;  %v3189_v6 = vmul.f32 0.5, %v3140_v16 }
 0x5ba   : > { %v8094_v41 = vpop.eup %8093  ;;  %8109 = vtanh.f32 %v3153_v33  ;;  %v3154_v60 = vmul.f32 0.5, %v3141_v18  ;;  %v10056_v56 = vmul.f32 %v8092_v53, %v2989_v31  ;;  %v3022_v14 = vunpack.c.l.bf16 %v10054_v13 }
 0x5bb   : > { %v8096_v40 = vpop.eup %8095  ;;  %v2951_v47 = vmul.f32 0.5, %v8094_v41  ;;  %8111 = vtanh.f32 %v3169_v63  ;;  %v3170_v42 = vmul.f32 0.5, %v3142_v22 }
 0x5bc   : > { %v8098_v61 = vpop.eup %8097  ;;  %v2967_v52 = vmul.f32 0.5, %v8096_v40  ;;  %11485 = vst [vmem:[#allocation62_spill] sm:$0xff] %v10056_v56  ;;  %8113 = vtanh.f32 %v3154_v60 }
 0x5bd   : > { %v8100_v9 = vpop.eup %8099  ;;  %v10058_v11 = vmul.f32 %v8098_v61, %v2990_v27  ;;  %v2955_v28 = vadd.f32 0.5, %v2951_v47  ;;  %8115 = vtanh.f32 %v3139_v25  ;;  %v3190_v27 = vmul.f32 0.5, %v3144_v4 }
 0x5be   : > { %v8102_v18 = vpop.eup %8101  ;;  %v2971_v43 = vadd.f32 0.5, %v2967_v52  ;;  %8117 = vtanh.f32 %v3170_v42  ;;  %v3025_v47 = vunpack.c.h.bf16 %v10048_v48  ;;  %v3026_v25 = vunpack.c.h.bf16 %v10054_v13 }
 0x5bf   : > { %11486 = vst [vmem:[#allocation63_spill] sm:$0xff] %v10058_v11  ;;  %v3267_v49 = vpack.c.bf16 %v10058_v11, %v10056_v56  ;;  %v2999_v40 = vmul.f32 %v8100_v9, %v2955_v28  ;;  %v2952_v2 = vmul.f32 0.5, %v8102_v18  ;;  %v8104_v38 = vpop.eup %8103  ;;  %8119 = vtanh.f32 %v2980_v12 }
 0x5c0   : > { %v2995_v45 = vmul.f32 %v2971_v43, %v9876_v7  ;;  %v2968_v39 = vmul.f32 0.5, %v8104_v38  ;;  %8121 = vtanh.f32 %v3143_v32  ;;  %v8106_v53 = vpop.eup %8105  ;;  %v3027_v7 = vunpack.c.h.bf16 %v10050_v24 }
 0x5c1   : > { %v2956_v59 = vadd.f32 0.5, %v2952_v2  ;;  %v3075_v33 = vpop.f32.mrb[52].mxu0  ;;  %v3128_v55 = vpop.f32.mrb[52].mxu1  ;;  %3494 = vmatmul.mubr.bf16.vlgmr.msra.gmra.mrb[56].mxu0 %v3267_v49  ;;  %3547 = vmatmul.mubr.bf16.vlgmr.msra.gmra.mrb[56].mxu1 %v3267_v49  ;;  %8123 = vtanh.f32 %v3189_v6 }
 0x5c2   : > { %v10065_v31 = vadd.f32 %v2999_v40, %v2995_v45  ;;  %v3145_v63 = vadd.f32 %v3075_v33, %v3021_v15  ;;  %v3077_v22 = vpop.f32.mrb[53].mxu0  ;;  %v10067_v41 = vpop.f32.mrb[53].mxu1  ;;  %3674 = vmatpush1.bf16.msra.mxu0 %v9940_v8  ;;  %3727 = vmatpush1.bf16.msra.mxu1 %v9942_v37  ;;  %v2972_v16 = vadd.f32 0.5, %v2968_v39  ;;  %8125 = vtanh.f32 %v3190_v27  ;;  %v2608_v45 = vld [vmem:[#allocation2 + $0x1f8] sm:$0xff] }
 0x5c3   : > { %v8108_v48 = vpop.eup %8107  ;;  %v3000_v60 = vmul.f32 %v8106_v53, %v2956_v59  ;;  %v3146_v42 = vadd.f32 %v3077_v22, %v3022_v14  ;;  %v3079_v61 = vpop.f32.mrb[54].mxu0  ;;  %3675 = vmatprep.subr.bf16.mxu0 %v9950_v23  ;;  %3728 = vmatprep.subr.bf16.mxu1 %v9952_v51  ;;  %v3147_v13 = vadd.f32 %v3128_v55, %v3023_v19 }
 0x5c4   : > { %v3132_v52 = vpop.f32.mrb[54].mxu1  ;;  %v8110_v15 = vpop.eup %8109  ;;  %v3155_v12 = vmul.f32 0.5, %v3145_v63  ;;  %v3149_v32 = vadd.f32 %v3079_v61, %v3025_v47  ;;  %3503 = vmatprep.mubr.bf16.mxu0 %v11404_v36  ;;  %3556 = vmatprep.mubr.bf16.mxu1 %v11404_v36  ;;  %8127 = vtanh.f32 %v10065_v31  ;;  %v2996_v18 = vmul.f32 %v2972_v16, %v9892_v26 }
 0x5c5   : > { %v3081_v4 = vpop.f32.mrb[55].mxu0  ;;  %v3134_v9 = vpop.f32.mrb[55].mxu1  ;;  %v3161_v43 = vmul.f32 0.5, %v8110_v15  ;;  %v3171_v6 = vmul.f32 0.5, %v3146_v42  ;;  %v3151_v59 = vadd.f32 %v3132_v52, %v3027_v7  ;;  %v3024_v16 = vunpack.c.l.bf16 %v2608_v45 }
 0x5c6   : > { %v8112_v28 = vpop.eup %8111  ;;  %8129 = vtanh.f32 %v3155_v12  ;;  %v3156_v49 = vmul.f32 0.5, %v3149_v32  ;;  %3676 = vmatpush1.bf16.msra.mxu0 %v9954_v10  ;;  %3729 = vmatpush1.bf16.msra.mxu1 %v9956_v50  ;;  %v10083_v24 = vadd.f32 %v3000_v60, %v2996_v18  ;;  %v3150_v39 = vadd.f32 %v3081_v4, %v3026_v25 }
 0x5c7   : > { %v3177_v14 = vmul.f32 0.5, %v8112_v28  ;;  %v8114_v19 = vpop.eup %8113  ;;  %v3165_v40 = vadd.f32 0.5, %v3161_v43  ;;  %8131 = vtanh.f32 %v3171_v6  ;;  %3677 = vmatprep.subr.bf16.mxu0 %v9962_v57  ;;  %3730 = vmatprep.subr.bf16.mxu1 %v9964_v62  ;;  %v3028_v61 = vunpack.c.h.bf16 %v2608_v45 }
 0x5c8   : > { %v8116_v2 = vpop.eup %8115  ;;  %v3162_v38 = vmul.f32 0.5, %v8114_v19  ;;  %8133 = vtanh.f32 %v3147_v13  ;;  %v3172_v60 = vmul.f32 0.5, %v3150_v39  ;;  %v2987_v15 = vmul.f32 0.5, %v8108_v48 }
 0x5c9   : > { %v3181_v26 = vadd.f32 0.5, %v3177_v14  ;;  %v8118_v27 = vpop.eup %8117  ;;  %8135 = vtanh.f32 %v10083_v24  ;;  %v3209_v47 = vmul.f32 %v8116_v2, %v3165_v40  ;;  %v3148_v4 = vadd.f32 %v10067_v41, %v3024_v16 }
 0x5ca   : > { %v8120_v33 = vpop.eup %8119  ;;  %v3166_v53 = vadd.f32 0.5, %v3162_v38  ;;  %v3178_v63 = vmul.f32 0.5, %v8118_v27  ;;  %8137 = vtanh.f32 %v3156_v49  ;;  %3678 = vmatpush1.bf16.msra.mxu0 %v9966_v20  ;;  %3731 = vmatpush1.bf16.msra.mxu1 %v9968_v46  ;;  %v3152_v48 = vadd.f32 %v3134_v9, %v3028_v61 }
 0x5cb   : > { %v3205_v55 = vmul.f32 %v3181_v26, %v9896_v1  ;;  %v8122_v22 = vpop.eup %8121  ;;  %3679 = vmatprep.subr.bf16.mxu0 %v9974_v29  ;;  %3732 = vmatprep.subr.bf16.mxu1 %v9976_v30  ;;  %8139 = vtanh.f32 %v3172_v60  ;;  %v2988_v12 = vmul.f32 0.5, %v8120_v33  ;;  %v2991_v14 = vadd.f32 0.5, %v2987_v15 }
 0x5cc   : > { %v3182_v7 = vadd.f32 0.5, %v3178_v63  ;;  %v3210_v25 = vmul.f32 %v8122_v22, %v3166_v53  ;;  %v8124_v1 = vpop.eup %8123  ;;  %8141 = vtanh.f32 %v3151_v59  ;;  %v3191_v2 = vmul.f32 0.5, %v3148_v4  ;;  %v11490_v53 = vld [vmem:[#allocation47_spill] sm:$0xff] }
 0x5cd   : > { %v10093_v42 = vadd.f32 %v3209_v47, %v3205_v55  ;;  %v8126_v52 = vpop.eup %8125  ;;  %v2992_v49 = vadd.f32 0.5, %v2988_v12  ;;  %v3192_v27 = vmul.f32 0.5, %v3152_v48  ;;  %v11489_v55 = vld [vmem:[#allocation27_spill] sm:$0xff]  ;;  %v3197_v22 = vmul.f32 0.5, %v8124_v1  ;;  %v11495_v48 = vld [vmem:[#allocation56_spill] sm:$0xff] }
 0x5ce   : > { %v3206_v13 = vmul.f32 %v3182_v7, %v9903_v58  ;;  %3680 = vmatpush1.bf16.msra.mxu0 %v9978_v5  ;;  %3733 = vmatpush1.bf16.msra.mxu1 %v9980_v35  ;;  %v8128_v32 = vpop.eup %8127  ;;  %v3198_v16 = vmul.f32 0.5, %v8126_v52  ;;  %v11491_v7 = vld [vmem:[#allocation48_spill] sm:$0xff] }
 0x5cf   : > { %3681 = vmatprep.subr.bf16.mxu0 %v9986_v0  ;;  %3734 = vmatprep.subr.bf16.mxu1 %v9988_v34  ;;  %8143 = vtanh.f32 %v10093_v42  ;;  %v10109_v26 = vmul.f32 %v8128_v32, %v2991_v14  ;;  %v11494_v32 = vld [vmem:[#allocation55_spill] sm:$0xff]  ;;  %v3201_v4 = vadd.f32 0.5, %v3197_v22 }
 0x5d0   : > { %v8130_v28 = vpop.eup %8129  ;;  %v10102_v18 = vadd.f32 %v3210_v25, %v3206_v13  ;;  %v11492_v25 = vld [vmem:[#allocation53_spill] sm:$0xff]  ;;  %v11493_v13 = vld [vmem:[#allocation54_spill] sm:$0xff] }
 0x5d1   : > { %v8132_v43 = vpop.eup %8131  ;;  %v3163_v58 = vmul.f32 0.5, %v8130_v28  ;;  %11487 = vst [vmem:[#allocation64_spill] sm:$0xff] %v10109_v26  ;;  %v3202_v28 = vadd.f32 0.5, %v3198_v16 }
 0x5d2   : > { %v8134_v6 = vpop.eup %8133  ;;  %8145 = vtanh.f32 %v10102_v18  ;;  %v3179_v19 = vmul.f32 0.5, %v8132_v43  ;;  %3682 = vmatpush1.bf16.msra.mxu0 %v9990_v21  ;;  %3735 = vmatpush1.bf16.msra.mxu1 %v9992_v17  ;;  %v11496_v43 = vld [vmem:[#allocation57_spill] sm:$0xff] }
 0x5d3   : > { %v8136_v41 = vpop.eup %8135  ;;  %v3167_v40 = vadd.f32 0.5, %v3163_v58  ;;  %3683 = vmatprep.subr.bf16.mxu0 %v9998_v54  ;;  %3736 = vmatprep.subr.bf16.mxu1 %v10000_v44  ;;  %8147 = vtanh.f32 %v3191_v2  ;;  %v11501_v2 = vld [vmem:[#allocation59_spill] sm:$0xff] }
 0x5d4   : > { %v8138_v9 = vpop.eup %8137  ;;  %v10111_v38 = vmul.f32 %v8136_v41, %v2992_v49  ;;  %v3183_v45 = vadd.f32 0.5, %v3179_v19  ;;  %8149 = vtanh.f32 %v3192_v27  ;;  %v11503_v27 = vld [vmem:[#allocation28_spill] sm:$0xff] }
 0x5d5   : > { %v3211_v47 = vmul.f32 %v8134_v6, %v3167_v40  ;;  %v3164_v59 = vmul.f32 0.5, %v8138_v9  ;;  %v8140_v63 = vpop.eup %8139  ;;  %v11497_v6 = vld [vmem:[#allocation41_spill] sm:$0xff]  ;;  %v11500_v40 = vld [vmem:[#allocation58_spill] sm:$0xff] }
 0x5d6   : > { %11488 = vst [vmem:[#allocation65_spill] sm:$0xff] %v10111_v38  ;;  %v3207_v39 = vmul.f32 %v3183_v45, %v9913_v3  ;;  %v3268_v33 = vpack.c.bf16 %v10111_v38, %v10109_v26  ;;  %3684 = vmatpush1.bf16.msra.mxu0 %v11489_v55  ;;  %3737 = vmatpush1.bf16.msra.mxu1 %v11490_v53  ;;  %v8142_v61 = vpop.eup %8141  ;;  %v3180_v3 = vmul.f32 0.5, %v8140_v63  ;;  %v11502_v45 = vld [vmem:[#allocation46_spill] sm:$0xff] }
 0x5d7   : > { %v3168_v60 = vadd.f32 0.5, %v3164_v59  ;;  %3685 = vmatprep.subr.bf16.mxu0 %v11491_v7  ;;  %3738 = vmatprep.subr.bf16.mxu1 %v11492_v25 }
 0x5d8   : > { %v10120_v15 = vadd.f32 %v3211_v47, %v3207_v39  ;;  %3504 = vmatmul.mubr.bf16.gmra.mrb[60].mxu0 %v3268_v33  ;;  %3557 = vmatmul.mubr.bf16.gmra.mrb[60].mxu1 %v3268_v33  ;;  %v3184_v52 = vadd.f32 0.5, %v3180_v3 }
 0x5d9   : > { %v3212_v12 = vmul.f32 %v8142_v61, %v3168_v60  ;;  %3705 = vmatprep.mubr.bf16.mxu0 %v11404_v36  ;;  %3758 = vmatprep.mubr.bf16.mxu1 %v11404_v36  ;;  %v8144_v1 = vpop.eup %8143 }
 0x5da   : > { %3686 = vmatpush1.bf16.msra.mxu0 %v11493_v13  ;;  %3739 = vmatpush1.bf16.msra.mxu1 %v11494_v32  ;;  %v3208_v14 = vmul.f32 %v3184_v52, %v11497_v6  ;;  %v10129_v49 = vmul.f32 %v8144_v1, %v3201_v4  ;;  %8151 = vtanh.f32 %v10120_v15  ;;  %v3238_v1 = vld [vmem:[#allocation2 + $0x218] sm:$0xff] }
 0x5db   : > { %3687 = vmatprep.subr.bf16.mxu0 %v11495_v48  ;;  %3740 = vmatprep.subr.bf16.mxu1 %v11496_v43 }
 0x5dc   : > { %v8146_v58 = vpop.eup %8145  ;;  %11498 = vst [vmem:[#allocation27_spill] sm:$0xff] %v10129_v49  ;;  %v10134_v41 = vadd.f32 %v3212_v12, %v3208_v14 }
 0x5dd   : > { %v10131_v19 = vmul.f32 %v8146_v58, %v3202_v28  ;;  %v8148_v47 = vpop.eup %8147  ;;  %v3258_v28 = vunpack.c.h.bf16 %v3238_v1 }
 0x5de   : > { %3688 = vmatpush1.bf16.msra.mxu0 %v11500_v40  ;;  %3741 = vmatpush1.bf16.msra.mxu1 %v11501_v2  ;;  %8153 = vtanh.f32 %v10134_v41  ;;  %v8150_v59 = vpop.eup %8149  ;;  %v3199_v39 = vmul.f32 0.5, %v8148_v47 }
 0x5df   : > { %11499 = vst [vmem:[#allocation47_spill] sm:$0xff] %v10131_v19  ;;  %v3671_v9 = vpack.c.bf16 %v10131_v19, %v10129_v49  ;;  %4103 = vmatprep.subr.bf16.mxu0 %v11502_v45  ;;  %4156 = vmatprep.subr.bf16.mxu1 %v11503_v27  ;;  %v3200_v33 = vmul.f32 0.5, %v8150_v59 }
 0x5e0   : > { %v3203_v22 = vadd.f32 0.5, %v3199_v39 }
 0x5e1   : > { %3706 = vmatmul.mubr.bf16.vlgmr.msra.gmra.mrb[64].mxu0 %v3671_v9  ;;  %3759 = vmatmul.mubr.bf16.vlgmr.msra.gmra.mrb[64].mxu1 %v3671_v9  ;;  %v3204_v16 = vadd.f32 0.5, %v3200_v33 }
 0x5e2   : > { %3715 = vmatprep.mubr.bf16.mxu0 %v11404_v36  ;;  %3768 = vmatprep.mubr.bf16.mxu1 %v11404_v36 }
 0x5e3   : > { %4104 = vmatpush1.bf16.msra.mxu0 %v9940_v8  ;;  %4157 = vmatpush1.bf16.msra.mxu1 %v9942_v37 }
 0x5e4   : > { %4105 = vmatprep.subr.bf16.mxu0 %v9950_v23  ;;  %4158 = vmatprep.subr.bf16.mxu1 %v9952_v51  ;;  %v8152_v63 = vpop.eup %8151  ;;  %v3235_v51 = vld [vmem:[#allocation2 + $0x200] sm:$0xff] }
 0x5e5   : > { %v10153_v60 = vmul.f32 %v8152_v63, %v3203_v22  ;;  %v3241_v22 = vld [vmem:[#allocation2 + $0x230] sm:$0xff] }
 0x5e7   : > { %4106 = vmatpush1.bf16.msra.mxu0 %v9954_v10  ;;  %4159 = vmatpush1.bf16.msra.mxu1 %v9956_v50  ;;  %11504 = vst [vmem:[#allocation48_spill] sm:$0xff] %v10153_v60  ;;  %v3236_v10 = vld [vmem:[#allocation2 + $0x208] sm:$0xff]  ;;  %v3251_v50 = vunpack.c.l.bf16 %v3235_v51 }
 0x5e8   : > { %4107 = vmatprep.subr.bf16.mxu0 %v9962_v57  ;;  %4160 = vmatprep.subr.bf16.mxu1 %v9964_v62  ;;  %v8154_v8 = vpop.eup %8153  ;;  %v3237_v57 = vld [vmem:[#allocation2 + $0x210] sm:$0xff]  ;;  %v3252_v62 = vunpack.c.l.bf16 %v3236_v10 }
 0x5e9   : > { %v10155_v37 = vmul.f32 %v8154_v8, %v3204_v16  ;;  %v3257_v61 = vunpack.c.h.bf16 %v3237_v57 }
 0x5eb   : > { %11505 = vst [vmem:[#allocation53_spill] sm:$0xff] %v10155_v37  ;;  %4108 = vmatpush1.bf16.msra.mxu0 %v9966_v20  ;;  %4161 = vmatpush1.bf16.msra.mxu1 %v9968_v46  ;;  %v3672_v23 = vpack.c.bf16 %v10155_v37, %v10153_v60  ;;  %v3255_v20 = vunpack.c.h.bf16 %v3235_v51 }
 0x5ec   : > { %4109 = vmatprep.subr.bf16.mxu0 %v9974_v29  ;;  %4162 = vmatprep.subr.bf16.mxu1 %v9976_v30  ;;  %v3256_v30 = vunpack.c.h.bf16 %v3236_v10  ;;  %v11506_v10 = vld [vmem:[#allocation60_spill] sm:$0xff] }
 0x5ed   : > { %3716 = vmatmul.mubr.bf16.gmra.mrb[68].mxu0 %v3672_v23  ;;  %3769 = vmatmul.mubr.bf16.gmra.mrb[68].mxu1 %v3672_v23 }
 0x5ee   : > { %4135 = vmatprep.mubr.bf16.mxu0 %v11404_v36  ;;  %4188 = vmatprep.mubr.bf16.mxu1 %v11404_v36 }
 0x5ef   : > { %4110 = vmatpush1.bf16.msra.mxu0 %v9978_v5  ;;  %4163 = vmatpush1.bf16.msra.mxu1 %v9980_v35  ;;  %v3253_v35 = vunpack.c.l.bf16 %v3237_v57 }
 0x5f0   : > { %4111 = vmatprep.subr.bf16.mxu0 %v9986_v0  ;;  %4164 = vmatprep.subr.bf16.mxu1 %v9988_v34 }
 0x5f3   : > { %4112 = vmatpush1.bf16.msra.mxu0 %v9990_v21  ;;  %4165 = vmatpush1.bf16.msra.mxu1 %v9992_v17 }
 0x5f4   : > { %4113 = vmatprep.subr.bf16.mxu0 %v9998_v54  ;;  %4166 = vmatprep.subr.bf16.mxu1 %v10000_v44 }
 0x5f7   : > { %4114 = vmatpush1.bf16.msra.mxu0 %v11489_v55  ;;  %4167 = vmatpush1.bf16.msra.mxu1 %v11490_v53 }
 0x5f8   : > { %4115 = vmatprep.subr.bf16.mxu0 %v11491_v7  ;;  %4168 = vmatprep.subr.bf16.mxu1 %v11492_v25 }
 0x5fb   : > { %4116 = vmatpush1.bf16.msra.mxu0 %v11493_v13  ;;  %4169 = vmatpush1.bf16.msra.mxu1 %v11494_v32  ;;  %v3254_v32 = vunpack.c.l.bf16 %v3238_v1 }
 0x5fc   : > { %4117 = vmatprep.subr.bf16.mxu0 %v11495_v48  ;;  %4170 = vmatprep.subr.bf16.mxu1 %v11496_v43 }
 0x5ff   : > { %4118 = vmatpush1.bf16.msra.mxu0 %v11500_v40  ;;  %4171 = vmatpush1.bf16.msra.mxu1 %v11501_v2 }
 0x600   : > { %4315 = vmatprep.subr.bf16.mxu0 %v11502_v45  ;;  %4368 = vmatprep.subr.bf16.mxu1 %v11503_v27  ;;  %v3239_v45 = vld [vmem:[#allocation2 + $0x220] sm:$0xff]  ;;  %v3240_v27 = vld [vmem:[#allocation2 + $0x228] sm:$0xff] }
 0x601   : > { %v3259_v23 = vunpack.c.l.bf16 %v3239_v45  ;;  %v3260_v51 = vunpack.c.l.bf16 %v3240_v27 }
 0x694   : > { %v3495_v46 = vpop.f32.mrb[56].mxu0  ;;  %v3548_v29 = vpop.f32.mrb[56].mxu1 }
 0x695   : > { %v3567_v5 = vadd.f32 %v3495_v46, %v3251_v50  ;;  %v3497_v0 = vpop.f32.mrb[57].mxu0  ;;  %v3550_v34 = vpop.f32.mrb[57].mxu1  ;;  %v3569_v12 = vadd.f32 %v3548_v29, %v3253_v35  ;;  %v3261_v46 = vunpack.c.l.bf16 %v3241_v22  ;;  %v3263_v29 = vunpack.c.h.bf16 %v3239_v45 }
 0x696   : > { %v3568_v21 = vadd.f32 %v3497_v0, %v3252_v62  ;;  %v3499_v17 = vpop.f32.mrb[58].mxu0  ;;  %v3552_v54 = vpop.f32.mrb[58].mxu1  ;;  %v3570_v48 = vadd.f32 %v3550_v34, %v3254_v32 }
 0x697   : > { %v3583_v44 = vmul.f32 0.5, %v3567_v5  ;;  %v3571_v55 = vadd.f32 %v3499_v17, %v3255_v20  ;;  %v3501_v53 = vpop.f32.mrb[59].mxu0  ;;  %v3554_v7 = vpop.f32.mrb[59].mxu1  ;;  %v3573_v4 = vadd.f32 %v3552_v54, %v3257_v61  ;;  %v3264_v17 = vunpack.c.h.bf16 %v3240_v27 }
 0x698   : > { %v3599_v25 = vmul.f32 0.5, %v3568_v21  ;;  %v3572_v3 = vadd.f32 %v3501_v53, %v3256_v30  ;;  %v3574_v43 = vadd.f32 %v3554_v7, %v3258_v28  ;;  %v3619_v40 = vmul.f32 0.5, %v3570_v48  ;;  %v3242_v21 = vld [vmem:[#allocation2 + $0x238] sm:$0xff]  ;;  %v11507_v53 = vld [vmem:[#allocation61_spill] sm:$0xff]  ;;  %v3243_v28 = vld [vmem:[#allocation2 + $0x240] sm:$0xff] }
 0x699   : > { %8155 = vtanh.f32 %v3583_v44  ;;  %v3584_v52 = vmul.f32 0.5, %v3571_v55  ;;  %v3266_v27 = vunpack.c.h.bf16 %v3242_v21 }
 0x69a   : > { %8157 = vtanh.f32 %v3599_v25  ;;  %v3600_v13 = vmul.f32 0.5, %v3572_v3  ;;  %v3620_v9 = vmul.f32 0.5, %v3574_v43 }
 0x69b   : > { %8159 = vtanh.f32 %v3584_v52  ;;  %v3262_v52 = vunpack.c.l.bf16 %v3242_v21 }
 0x69c   : > { %8161 = vtanh.f32 %v3569_v12 }
 0x69d   : > { %8163 = vtanh.f32 %v3600_v13 }
 0x69e   : > { %8165 = vtanh.f32 %v3573_v4 }
 0x69f   : > { %8167 = vtanh.f32 %v3619_v40  ;;  %v3265_v40 = vunpack.c.h.bf16 %v3241_v22 }
 0x6a0   : > { %8169 = vtanh.f32 %v3620_v9 }
 0x6a3   : > { %v8156_v58 = vpop.eup %8155 }
 0x6a4   : > { %v8158_v6 = vpop.eup %8157  ;;  %v3591_v14 = vmul.f32 0.5, %v8156_v58 }
 0x6a5   : > { %v3607_v2 = vmul.f32 0.5, %v8158_v6  ;;  %v8160_v47 = vpop.eup %8159  ;;  %v3244_v6 = vld [vmem:[#allocation2 + $0x248] sm:$0xff] }
 0x6a6   : > { %v3595_v59 = vadd.f32 0.5, %v3591_v14  ;;  %v8162_v39 = vpop.eup %8161  ;;  %v3592_v63 = vmul.f32 0.5, %v8160_v47  ;;  %v3245_v47 = vld [vmem:[#allocation2 + $0x250] sm:$0xff] }
 0x6a7   : > { %v3611_v33 = vadd.f32 0.5, %v3607_v2  ;;  %v8164_v16 = vpop.eup %8163  ;;  %v3655_v2 = vunpack.c.l.bf16 %v3243_v28 }
 0x6a8   : > { %v3639_v8 = vmul.f32 %v8162_v39, %v3595_v59  ;;  %v3596_v57 = vadd.f32 0.5, %v3592_v63  ;;  %v3608_v62 = vmul.f32 0.5, %v8164_v16  ;;  %v8166_v20 = vpop.eup %8165  ;;  %v3656_v59 = vunpack.c.l.bf16 %v3244_v6 }
 0x6a9   : > { %v3635_v50 = vmul.f32 %v3611_v33, %v11506_v10  ;;  %v8168_v9 = vpop.eup %8167  ;;  %v3659_v63 = vunpack.c.h.bf16 %v3243_v28 }
 0x6aa   : > { %v3612_v5 = vadd.f32 0.5, %v3608_v62  ;;  %v3640_v35 = vmul.f32 %v8166_v20, %v3596_v57  ;;  %v8170_v39 = vpop.eup %8169  ;;  %v3627_v10 = vmul.f32 0.5, %v8168_v9  ;;  %v3660_v20 = vunpack.c.h.bf16 %v3244_v6 }
 0x6ab   : > { %v10186_v30 = vadd.f32 %v3639_v8, %v3635_v50  ;;  %v3505_v0 = vpop.f32.mrb[60].mxu0  ;;  %v3558_v34 = vpop.f32.mrb[60].mxu1  ;;  %v3657_v50 = vunpack.c.l.bf16 %v3245_v47 }
 0x6ac   : > { %v3575_v54 = vadd.f32 %v3505_v0, %v3259_v23  ;;  %v3507_v44 = vpop.f32.mrb[61].mxu0  ;;  %v3560_v55 = vpop.f32.mrb[61].mxu1  ;;  %v3636_v7 = vmul.f32 %v3612_v5, %v11507_v53  ;;  %v3577_v1 = vadd.f32 %v3558_v34, %v3261_v46  ;;  %v3628_v46 = vmul.f32 0.5, %v8170_v39 }
 0x6ad   : > { %v3576_v25 = vadd.f32 %v3507_v44, %v3260_v51  ;;  %v3509_v61 = vpop.f32.mrb[62].mxu0  ;;  %v3562_v3 = vpop.f32.mrb[62].mxu1  ;;  %8171 = vtanh.f32 %v10186_v30  ;;  %v3578_v33 = vadd.f32 %v3560_v55, %v3262_v52  ;;  %v3246_v51 = vld [vmem:[#allocation2 + $0x258] sm:$0xff] }
 0x6ae   : > { %v3585_v12 = vmul.f32 0.5, %v3575_v54  ;;  %v3579_v13 = vadd.f32 %v3509_v61, %v3263_v29  ;;  %v3511_v32 = vpop.f32.mrb[63].mxu0  ;;  %v3564_v4 = vpop.f32.mrb[63].mxu1  ;;  %v10190_v48 = vadd.f32 %v3640_v35, %v3636_v7  ;;  %v3581_v16 = vadd.f32 %v3562_v3, %v3265_v40 }
 0x6af   : > { %v3601_v43 = vmul.f32 0.5, %v3576_v25  ;;  %v3580_v58 = vadd.f32 %v3511_v32, %v3264_v17  ;;  %v3582_v29 = vadd.f32 %v3564_v4, %v3266_v27  ;;  %v3621_v34 = vmul.f32 0.5, %v3578_v33  ;;  %v10199_v33 = vld [vmem:[#allocation2 + $0x268] sm:$0xff] }
 0x6b0   : > { %8173 = vtanh.f32 %v3585_v12  ;;  %v3586_v14 = vmul.f32 0.5, %v3579_v13  ;;  %v3658_v17 = vunpack.c.l.bf16 %v3246_v51  ;;  %v3661_v7 = vunpack.c.h.bf16 %v3245_v47 }
 0x6b1   : > { %8175 = vtanh.f32 %v10190_v48  ;;  %v3602_v45 = vmul.f32 0.5, %v3580_v58  ;;  %v3662_v25 = vunpack.c.h.bf16 %v3246_v51  ;;  %v3631_v13 = vadd.f32 0.5, %v3627_v10 }
 0x6b2   : > { %8177 = vtanh.f32 %v3601_v43  ;;  %v3632_v32 = vadd.f32 0.5, %v3628_v46  ;;  %v3622_v4 = vmul.f32 0.5, %v3582_v29 }
 0x6b3   : > { %8179 = vtanh.f32 %v3577_v1 }
 0x6b4   : > { %8181 = vtanh.f32 %v3586_v14  ;;  %v3707_v8 = vpop.f32.mrb[64].mxu0  ;;  %v3760_v23 = vpop.f32.mrb[64].mxu1  ;;  %v10193_v14 = vld [vmem:[#allocation2 + $0x260] sm:$0xff] }
 0x6b5   : > { %v3779_v22 = vadd.f32 %v3707_v8, %v3655_v2  ;;  %v3709_v57 = vpop.f32.mrb[65].mxu0  ;;  %v3762_v62 = vpop.f32.mrb[65].mxu1  ;;  %8183 = vtanh.f32 %v3602_v45  ;;  %v3781_v3 = vadd.f32 %v3760_v23, %v3657_v50  ;;  %v3663_v8 = vunpack.c.l.bf16 %v10193_v14 }
 0x6b6   : > { %v3780_v5 = vadd.f32 %v3709_v57, %v3656_v59  ;;  %v3711_v35 = vpop.f32.mrb[66].mxu0  ;;  %v3764_v0 = vpop.f32.mrb[66].mxu1  ;;  %8185 = vtanh.f32 %v3581_v16  ;;  %v3782_v58 = vadd.f32 %v3762_v62, %v3658_v17  ;;  %v3664_v62 = vunpack.c.l.bf16 %v10199_v33 }
 0x6b7   : > { %v3795_v21 = vmul.f32 0.5, %v3779_v22  ;;  %v3783_v54 = vadd.f32 %v3711_v35, %v3659_v63  ;;  %v3713_v44 = vpop.f32.mrb[67].mxu0  ;;  %v3766_v55 = vpop.f32.mrb[67].mxu1  ;;  %v3785_v45 = vadd.f32 %v3764_v0, %v3661_v7  ;;  %v10204_v22 = vld [vmem:[#allocation2 + $0x270] sm:$0xff]  ;;  %v8778_v0 = vld [vmem:[#allocation9 + $0x8] ss:$16 sps:$4 sm:$0xff]  }
 0x6b8   : > { %v3811_v53 = vmul.f32 0.5, %v3780_v5  ;;  %v8172_v61 = vpop.eup %8171  ;;  %v3784_v1 = vadd.f32 %v3713_v44, %v3660_v20  ;;  %v3786_v39 = vadd.f32 %v3766_v55, %v3662_v25  ;;  %v3831_v57 = vmul.f32 0.5, %v3782_v58  ;;  %v8777_v35 = vld [vmem:[#allocation9] ss:$16 sps:$4 sm:$0xff]   ;;  %v8779_v55 = vld [vmem:[#allocation9 + $0x24] ss:$16 sps:$4 sm:$0xff]  }
 0x6b9   : > { %8187 = vtanh.f32 %v3795_v21  ;;  %v3796_v12 = vmul.f32 0.5, %v3783_v54  ;;  %v10195_v2 = vmul.f32 %v8172_v61, %v3631_v13  ;;  %v3665_v17 = vunpack.c.l.bf16 %v10204_v22 }
 0x6ba   : > { %v8174_v52 = vpop.eup %8173  ;;  %8189 = vtanh.f32 %v3811_v53  ;;  %v3812_v6 = vmul.f32 0.5, %v3784_v1  ;;  %v3832_v5 = vmul.f32 0.5, %v3786_v39  ;;  %v3667_v44 = vunpack.c.h.bf16 %v10193_v14  ;;  %v8780_v53 = vld [vmem:[#allocation9 + $0x2c] ss:$16 sps:$4 sm:$0xff]  }
 0x6bb   : > { %v8176_v28 = vpop.eup %8175  ;;  %v3593_v43 = vmul.f32 0.5, %v8174_v52  ;;  %8191 = vtanh.f32 %v3621_v34  ;;  %11508 = vst [vmem:[#allocation54_spill] sm:$0xff] %v10195_v2 }
 0x6bc   : > { %v8178_v40 = vpop.eup %8177  ;;  %v10197_v9 = vmul.f32 %v8176_v28, %v3632_v32  ;;  %8193 = vtanh.f32 %v3796_v12 }
 0x6bd   : > { %v8180_v27 = vpop.eup %8179  ;;  %v3597_v47 = vadd.f32 0.5, %v3593_v43  ;;  %v3609_v59 = vmul.f32 0.5, %v8178_v40  ;;  %8195 = vtanh.f32 %v3781_v3  ;;  %v3668_v43 = vunpack.c.h.bf16 %v10199_v33  ;;  %v8783_v33 = vld [vmem:[#allocation9 + $0x44] ss:$16 sps:$4 sm:$0xff]  }
 0x6be   : > { %11509 = vst [vmem:[#allocation55_spill] sm:$0xff] %v10197_v9  ;;  %v8182_v63 = vpop.eup %8181  ;;  %v3909_v16 = vpack.c.bf16 %v10197_v9, %v10195_v2  ;;  %8197 = vtanh.f32 %v3812_v6 }
 0x6bf   : > { %v3613_v23 = vadd.f32 0.5, %v3609_v59  ;;  %v3641_v51 = vmul.f32 %v8180_v27, %v3597_v47  ;;  %v3594_v10 = vmul.f32 0.5, %v8182_v63  ;;  %8199 = vtanh.f32 %v3622_v4  ;;  %v8184_v50 = vpop.eup %8183  ;;  %v8781_v47 = vld [vmem:[#allocation9 + $0x20] ss:$16 sps:$4 sm:$0xff]   ;;  %v8782_v59 = vld [vmem:[#allocation9 + $0x28] ss:$16 sps:$4 sm:$0xff]  }
 0x6c0   : > { %8201 = vtanh.f32 %v3785_v45  ;;  %4136 = vmatmul.mubr.bf16.vlgmr.msra.gmra.mrb[72].mxu0 %v3909_v16  ;;  %4189 = vmatmul.mubr.bf16.vlgmr.msra.gmra.mrb[72].mxu1 %v3909_v16  ;;  %v3610_v29 = vmul.f32 0.5, %v8184_v50  ;;  %v8186_v34 = vpop.eup %8185  ;;  %v3717_v21 = vpop.f32.mrb[68].mxu0 }
 0x6c1   : > { %v3637_v20 = vmul.f32 %v3613_v23, %v10065_v31  ;;  %v3598_v46 = vadd.f32 0.5, %v3594_v10  ;;  %4316 = vmatpush1.bf16.msra.mxu0 %v8777_v35  ;;  %4369 = vmatpush1.bf16.msra.mxu1 %v8778_v0  ;;  %v3770_v54 = vpop.f32.mrb[68].mxu1  ;;  %v3787_v3 = vadd.f32 %v3717_v21, %v3663_v8  ;;  %v3719_v12 = vpop.f32.mrb[69].mxu0  ;;  %8203 = vtanh.f32 %v3831_v57  ;;  %v8784_v23 = vld [vmem:[#allocation9 + $0x4c] ss:$16 sps:$4 sm:$0xff]  }
 0x6c2   : > { %4317 = vmatprep.subr.bf16.mxu0 %v8779_v55  ;;  %4370 = vmatprep.subr.bf16.mxu1 %v8780_v53  ;;  %v3614_v25 = vadd.f32 0.5, %v3610_v29  ;;  %v10212_v1 = vpop.f32.mrb[69].mxu1  ;;  %v3788_v32 = vadd.f32 %v3719_v12, %v3664_v62  ;;  %v3721_v4 = vpop.f32.mrb[70].mxu0  ;;  %8205 = vtanh.f32 %v3832_v5  ;;  %v3789_v16 = vadd.f32 %v3770_v54, %v3665_v17  ;;  %v8785_v35 = vld [vmem:[#allocation9 + $0x40] ss:$16 sps:$4 sm:$0xff]  }
 0x6c3   : > { %v8188_v7 = vpop.eup %8187  ;;  %v10210_v31 = vadd.f32 %v3641_v51, %v3637_v20  ;;  %v3642_v61 = vmul.f32 %v8186_v34, %v3598_v46  ;;  %4145 = vmatprep.mubr.bf16.mxu0 %v11404_v36  ;;  %4198 = vmatprep.mubr.bf16.mxu1 %v11404_v36  ;;  %v10216_v28 = vpop.f32.mrb[70].mxu1  ;;  %v3797_v40 = vmul.f32 0.5, %v3787_v3  ;;  %v8786_v0 = vld [vmem:[#allocation9 + $0x48] ss:$16 sps:$4 sm:$0xff]   ;;  %v3791_v21 = vadd.f32 %v3721_v4, %v3667_v44  ;;  %v8787_v54 = vld [vmem:[#allocation9 + $0x64] ss:$16 sps:$4 sm:$0xff]  }
 0x6c4   : > { %v8190_v52 = vpop.eup %8189  ;;  %v3803_v13 = vmul.f32 0.5, %v8188_v7  ;;  %v3638_v6 = vmul.f32 %v3614_v25, %v10083_v24  ;;  %v3723_v45 = vpop.f32.mrb[71].mxu0  ;;  %v3813_v8 = vmul.f32 0.5, %v3788_v32  ;;  %v3669_v17 = vunpack.c.h.bf16 %v10204_v22  ;;  %v8788_v55 = vld [vmem:[#allocation9 + $0x6c] ss:$16 sps:$4 sm:$0xff]  }
 0x6c5   : > { %v8192_v58 = vpop.eup %8191  ;;  %v3819_v14 = vmul.f32 0.5, %v8190_v52  ;;  %v10220_v27 = vpop.f32.mrb[71].mxu1  ;;  %4318 = vmatpush1.bf16.msra.mxu0 %v8781_v47  ;;  %4371 = vmatpush1.bf16.msra.mxu1 %v8782_v59  ;;  %8207 = vtanh.f32 %v10210_v31  ;;  %v3798_v3 = vmul.f32 0.5, %v3791_v21  ;;  %v8789_v32 = vld [vmem:[#allocation9 + $0x60] ss:$16 sps:$4 sm:$0xff]  }
 0x6c6   : > { %v8194_v39 = vpop.eup %8193  ;;  %v3807_v63 = vadd.f32 0.5, %v3803_v13  ;;  %4319 = vmatprep.subr.bf16.mxu0 %v8783_v33  ;;  %4372 = vmatprep.subr.bf16.mxu1 %v8784_v23  ;;  %v10223_v51 = vadd.f32 %v3642_v61, %v3638_v6  ;;  %8209 = vtanh.f32 %v3797_v40  ;;  %v3792_v61 = vadd.f32 %v3723_v45, %v3668_v43  ;;  %v8790_v44 = vld [vmem:[#allocation9 + $0x68] ss:$16 sps:$4 sm:$0xff]   ;;  %v8791_v40 = vld [vmem:[#allocation9 + $0x84] ss:$16 sps:$4 sm:$0xff]  }
 0x6c7   : > { %v8196_v24 = vpop.eup %8195  ;;  %v3823_v10 = vadd.f32 0.5, %v3819_v14  ;;  %v3804_v50 = vmul.f32 0.5, %v8194_v39  ;;  %8211 = vtanh.f32 %v3813_v8  ;;  %v3629_v12 = vmul.f32 0.5, %v8192_v58  ;;  %v8792_v47 = vld [vmem:[#allocation9 + $0x8c] ss:$16 sps:$4 sm:$0xff]  }
 0x6c8   : > { %v8198_v57 = vpop.eup %8197  ;;  %v3851_v62 = vmul.f32 %v8196_v24, %v3807_v63  ;;  %8213 = vtanh.f32 %v10223_v51  ;;  %v3814_v13 = vmul.f32 0.5, %v3792_v61  ;;  %v3793_v14 = vadd.f32 %v10216_v28, %v3669_v17  ;;  %v8793_v63 = vld [vmem:[#allocation9 + $0x80] ss:$16 sps:$4 sm:$0xff]   ;;  %v8795_v24 = vld [vmem:[#allocation9 + $0xa4] ss:$16 sps:$4 sm:$0xff]  }
 0x6c9   : > { %v8200_v20 = vpop.eup %8199  ;;  %v3847_v46 = vmul.f32 %v3823_v10, %v10093_v42  ;;  %v3808_v29 = vadd.f32 0.5, %v3804_v50  ;;  %v3820_v5 = vmul.f32 0.5, %v8198_v57  ;;  %4320 = vmatpush1.bf16.msra.mxu0 %v8785_v35  ;;  %4373 = vmatpush1.bf16.msra.mxu1 %v8786_v0  ;;  %8215 = vtanh.f32 %v3789_v16  ;;  %v3250_v42 = vld [vmem:[#allocation2 + $0x278] sm:$0xff] }
 0x6ca   : > { %v8202_v34 = vpop.eup %8201  ;;  %4321 = vmatprep.subr.bf16.mxu0 %v8787_v54  ;;  %4374 = vmatprep.subr.bf16.mxu1 %v8788_v55  ;;  %v3630_v4 = vmul.f32 0.5, %v8200_v20  ;;  %v3666_v6 = vunpack.c.l.bf16 %v3250_v42  ;;  %8217 = vtanh.f32 %v3798_v3  ;;  %v3633_v39 = vadd.f32 0.5, %v3629_v12  ;;  %v8794_v16 = vld [vmem:[#allocation9 + $0x88] ss:$16 sps:$4 sm:$0xff]   ;;  %v8796_v10 = vld [vmem:[#allocation9 + $0xac] ss:$16 sps:$4 sm:$0xff]  }
 0x6cb   : > { %v10228_v53 = vadd.f32 %v3851_v62, %v3847_v46  ;;  %v3824_v7 = vadd.f32 0.5, %v3820_v5  ;;  %v3852_v25 = vmul.f32 %v8202_v34, %v3808_v29  ;;  %v8204_v22 = vpop.eup %8203  ;;  %v8797_v34 = vld [vmem:[#allocation9 + $0xa0] ss:$16 sps:$4 sm:$0xff]  }
 0x6cc   : > { %v8206_v43 = vpop.eup %8205  ;;  %v3634_v8 = vadd.f32 0.5, %v3630_v4  ;;  %v3790_v23 = vadd.f32 %v10212_v1, %v3666_v6  ;;  %v3839_v35 = vmul.f32 0.5, %v8204_v22  ;;  %v8798_v1 = vld [vmem:[#allocation9 + $0xa8] ss:$16 sps:$4 sm:$0xff]   ;;  %v8803_v6 = vld [vmem:[#allocation9 + $0xe4] ss:$16 sps:$4 sm:$0xff]  }
 0x6cd   : > { %v3848_v52 = vmul.f32 %v3824_v7, %v10102_v18  ;;  %4322 = vmatpush1.bf16.msra.mxu0 %v8789_v32  ;;  %4375 = vmatpush1.bf16.msra.mxu1 %v8790_v44  ;;  %8219 = vtanh.f32 %v10228_v53  ;;  %v3670_v18 = vunpack.c.h.bf16 %v3250_v42  ;;  %v3840_v21 = vmul.f32 0.5, %v8206_v43  ;;  %v8799_v7 = vld [vmem:[#allocation9 + $0xc4] ss:$16 sps:$4 sm:$0xff]   ;;  %v8802_v32 = vld [vmem:[#allocation9 + $0xc8] ss:$16 sps:$4 sm:$0xff]  }
 0x6ce   : > { %4323 = vmatprep.subr.bf16.mxu0 %v8791_v40  ;;  %4376 = vmatprep.subr.bf16.mxu1 %v8792_v47  ;;  %8221 = vtanh.f32 %v3814_v13  ;;  %v3833_v54 = vmul.f32 0.5, %v3790_v23  ;;  %v8801_v13 = vld [vmem:[#allocation9 + $0xc0] ss:$16 sps:$4 sm:$0xff]   ;;  %v3843_v22 = vadd.f32 0.5, %v3839_v35 }
 0x6cf   : > { %v10233_v58 = vadd.f32 %v3852_v25, %v3848_v52  ;;  %v8208_v45 = vpop.eup %8207  ;;  %v3794_v62 = vadd.f32 %v10220_v27, %v3670_v18  ;;  %v8800_v27 = vld [vmem:[#allocation9 + $0xcc] ss:$16 sps:$4 sm:$0xff]   ;;  %v3844_v4 = vadd.f32 0.5, %v3840_v21  ;;  %v10274_v21 = vld [vmem:[#allocation9 + $0x8] ss:$16 sps:$4 sm:$0xff]  }
 0x6d0   : > { %v8210_v59 = vpop.eup %8209  ;;  %v10238_v46 = vmul.f32 %v8208_v45, %v3633_v39 }
 0x6d1   : > { %8223 = vtanh.f32 %v10233_v58  ;;  %4324 = vmatpush1.bf16.msra.mxu0 %v8793_v63  ;;  %4377 = vmatpush1.bf16.msra.mxu1 %v8794_v16  ;;  %v8212_v28 = vpop.eup %8211  ;;  %v3805_v33 = vmul.f32 0.5, %v8210_v59  ;;  %v3834_v42 = vmul.f32 0.5, %v3794_v62  ;;  %v8805_v63 = vld [vmem:[#allocation9 + $0xe0] ss:$16 sps:$4 sm:$0xff]   ;;  %v8806_v16 = vld [vmem:[#allocation9 + $0xe8] ss:$16 sps:$4 sm:$0xff]  }
 0x6d2   : > { %8225 = vtanh.f32 %v3793_v14  ;;  %4325 = vmatprep.subr.bf16.mxu0 %v8795_v24  ;;  %4378 = vmatprep.subr.bf16.mxu1 %v8796_v10  ;;  %v8214_v50 = vpop.eup %8213  ;;  %v3821_v57 = vmul.f32 0.5, %v8212_v28  ;;  %11510 = vst [vmem:[#allocation56_spill] sm:$0xff] %v10238_v46  ;;  %v8804_v14 = vld [vmem:[#allocation9 + $0xec] ss:$16 sps:$4 sm:$0xff]  }
 0x6d3   : > { %v8216_v20 = vpop.eup %8215  ;;  %v10240_v29 = vmul.f32 %v8214_v50, %v3634_v8  ;;  %v3809_v5 = vadd.f32 0.5, %v3805_v33  ;;  %8227 = vtanh.f32 %v3833_v54  ;;  %v10282_v54 = vld [vmem:[#allocation9 + $0x24] ss:$16 sps:$4 sm:$0xff]  }
 0x6d4   : > { %v3825_v0 = vadd.f32 0.5, %v3821_v57  ;;  %v8218_v61 = vpop.eup %8217  ;;  %8229 = vtanh.f32 %v3834_v42  ;;  %v10296_v42 = vld [vmem:[#allocation9 + $0x4c] ss:$16 sps:$4 sm:$0xff]  }
 0x6d5   : > { %11511 = vst [vmem:[#allocation57_spill] sm:$0xff] %v10240_v29  ;;  %4326 = vmatpush1.bf16.msra.mxu0 %v8797_v34  ;;  %4379 = vmatpush1.bf16.msra.mxu1 %v8798_v1  ;;  %v3853_v17 = vmul.f32 %v8216_v20, %v3809_v5  ;;  %v3910_v55 = vpack.c.bf16 %v10240_v29, %v10238_v46  ;;  %v3806_v52 = vmul.f32 0.5, %v8218_v61  ;;  %v10270_v34 = vld [vmem:[#allocation9 + $0x4] ss:$16 sps:$4 sm:$0xff]   ;;  %v10272_v1 = vld [vmem:[#allocation9] ss:$16 sps:$4 sm:$0xff]  }
 0x6d6   : > { %4327 = vmatprep.subr.bf16.mxu0 %v8799_v7  ;;  %4380 = vmatprep.subr.bf16.mxu1 %v8800_v27  ;;  %v3849_v25 = vmul.f32 %v3825_v0, %v10120_v15  ;;  %11518 = vst [vmem:[#allocation61_spill] sm:$0xff] %v10270_v34  ;;  %v10286_v7 = vld [vmem:[#allocation9 + $0x20] ss:$16 sps:$4 sm:$0xff]   ;;  %v10288_v27 = vld [vmem:[#allocation9 + $0x28] ss:$16 sps:$4 sm:$0xff]  }
 0x6d7   : > { %4146 = vmatmul.mubr.bf16.gmra.mrb[76].mxu0 %v3910_v55  ;;  %4199 = vmatmul.mubr.bf16.gmra.mrb[76].mxu1 %v3910_v55  ;;  %v8220_v3 = vpop.eup %8219  ;;  %v3810_v40 = vadd.f32 0.5, %v3806_v52  ;;  %v10284_v55 = vld [vmem:[#allocation9 + $0x2c] ss:$16 sps:$4 sm:$0xff]   ;;  %v10298_v61 = vld [vmem:[#allocation9 + $0x40] ss:$16 sps:$4 sm:$0xff]  }
 0x6d8   : > { %v10245_v12 = vadd.f32 %v3853_v17, %v3849_v25  ;;  %v8222_v44 = vpop.eup %8221  ;;  %4347 = vmatprep.mubr.bf16.mxu0 %v11404_v36  ;;  %4400 = vmatprep.mubr.bf16.mxu1 %v11404_v36  ;;  %v10249_v18 = vmul.f32 %v8220_v3, %v3843_v22  ;;  %v10276_v17 = vld [vmem:[#allocation9 + $0xc] ss:$16 sps:$4 sm:$0xff]   ;;  %v10294_v25 = vld [vmem:[#allocation9 + $0x44] ss:$16 sps:$4 sm:$0xff]   ;;  %v10300_v3 = vld [vmem:[#allocation9 + $0x48] ss:$16 sps:$4 sm:$0xff]  }
 0x6d9   : > { %4328 = vmatpush1.bf16.msra.mxu0 %v8801_v13  ;;  %4381 = vmatpush1.bf16.msra.mxu1 %v8802_v32  ;;  %v3822_v47 = vmul.f32 0.5, %v8222_v44  ;;  %11519 = vst [vmem:[#allocation66_spill] sm:$0xff] %v10276_v17  ;;  %v10306_v52 = vld [vmem:[#allocation9 + $0x64] ss:$16 sps:$4 sm:$0xff]   ;;  %v10308_v13 = vld [vmem:[#allocation9 + $0x6c] ss:$16 sps:$4 sm:$0xff]  }
 0x6da   : > { %11512 = vst [vmem:[#allocation41_spill] sm:$0xff] %v10245_v12  ;;  %4329 = vmatprep.subr.bf16.mxu0 %v8803_v6  ;;  %4382 = vmatprep.subr.bf16.mxu1 %v8804_v14  ;;  %11513 = vst [vmem:[#allocation58_spill] sm:$0xff] %v10249_v18  ;;  %8231 = vtanh.f32 %v10245_v12  ;;  %v10310_v32 = vld [vmem:[#allocation9 + $0x60] ss:$16 sps:$4 sm:$0xff]   ;;  %v10312_v44 = vld [vmem:[#allocation9 + $0x68] ss:$16 sps:$4 sm:$0xff]  }
 0x6db   : > { %v8224_v15 = vpop.eup %8223  ;;  %v3826_v59 = vadd.f32 0.5, %v3822_v47  ;;  %v10318_v22 = vld [vmem:[#allocation9 + $0x84] ss:$16 sps:$4 sm:$0xff]   ;;  %v10322_v6 = vld [vmem:[#allocation9 + $0x80] ss:$16 sps:$4 sm:$0xff]  }
 0x6dc   : > { %v8226_v43 = vpop.eup %8225  ;;  %v10251_v45 = vmul.f32 %v8224_v15, %v3844_v4  ;;  %v10320_v4 = vld [vmem:[#allocation9 + $0x8c] ss:$16 sps:$4 sm:$0xff]   ;;  %v10324_v14 = vld [vmem:[#allocation9 + $0x88] ss:$16 sps:$4 sm:$0xff]   ;;  %v10330_v15 = vld [vmem:[#allocation9 + $0xa4] ss:$16 sps:$4 sm:$0xff]  }
 0x6dd   : > { %v3854_v39 = vmul.f32 %v8226_v43, %v3810_v40  ;;  %4330 = vmatpush1.bf16.msra.mxu0 %v8805_v63  ;;  %4383 = vmatpush1.bf16.msra.mxu1 %v8806_v16  ;;  %v3850_v8 = vmul.f32 %v3826_v59, %v10134_v41  ;;  %v8228_v23 = vpop.eup %8227  ;;  %v10332_v40 = vld [vmem:[#allocation9 + $0xac] ss:$16 sps:$4 sm:$0xff]   ;;  %v10334_v47 = vld [vmem:[#allocation9 + $0xa0] ss:$16 sps:$4 sm:$0xff]   ;;  %v10336_v43 = vld [vmem:[#allocation9 + $0xa8] ss:$16 sps:$4 sm:$0xff]  }
 0x6de   : > { %11514 = vst [vmem:[#allocation59_spill] sm:$0xff] %v10251_v45  ;;  %v4313_v28 = vpack.c.bf16 %v10251_v45, %v10249_v18  ;;  %v8230_v24 = vpop.eup %8229  ;;  %v3841_v10 = vmul.f32 0.5, %v8228_v23  ;;  %4745 = vmatprep.subr.bf16.mxu0 %v10270_v34  ;;  %4798 = vmatprep.subr.bf16.mxu1 %v10276_v17  ;;  %v10342_v59 = vld [vmem:[#allocation9 + $0xc4] ss:$16 sps:$4 sm:$0xff]   ;;  %v10346_v63 = vld [vmem:[#allocation9 + $0xc0] ss:$16 sps:$4 sm:$0xff]  }
 0x6df   : > { %v10257_v33 = vadd.f32 %v3854_v39, %v3850_v8  ;;  %v3842_v50 = vmul.f32 0.5, %v8230_v24  ;;  %v10344_v39 = vld [vmem:[#allocation9 + $0xcc] ss:$16 sps:$4 sm:$0xff]   ;;  %v10348_v16 = vld [vmem:[#allocation9 + $0xc8] ss:$16 sps:$4 sm:$0xff]  }
 0x6e0   : > { %4348 = vmatmul.mubr.bf16.vlgmr.msra.gmra.mrb[80].mxu0 %v4313_v28  ;;  %4401 = vmatmul.mubr.bf16.vlgmr.msra.gmra.mrb[80].mxu1 %v4313_v28  ;;  %v3845_v62 = vadd.f32 0.5, %v3841_v10  ;;  %11520 = vst [vmem:[#allocation67_spill] sm:$0xff] %v10348_v16  ;;  %v10354_v28 = vld [vmem:[#allocation9 + $0xe4] ss:$16 sps:$4 sm:$0xff]   ;;  %v10356_v8 = vld [vmem:[#allocation9 + $0xec] ss:$16 sps:$4 sm:$0xff]  }
 0x6e1   : > { %11515 = vst [vmem:[#allocation46_spill] sm:$0xff] %v10257_v33  ;;  %4357 = vmatprep.mubr.bf16.mxu0 %v11404_v36  ;;  %4410 = vmatprep.mubr.bf16.mxu1 %v11404_v36  ;;  %8233 = vtanh.f32 %v10257_v33  ;;  %v3846_v20 = vadd.f32 0.5, %v3842_v50  ;;  %11521 = vst [vmem:[#allocation68_spill] sm:$0xff] %v10354_v28  ;;  %v10358_v23 = vld [vmem:[#allocation9 + $0xe0] ss:$16 sps:$4 sm:$0xff]   ;;  %v3878_v50 = vld [vmem:[#allocation2 + $0x288] sm:$0xff] }
 0x6e2   : > { %4746 = vmatpush1.bf16.msra.mxu0 %v10272_v1  ;;  %4799 = vmatpush1.bf16.msra.mxu1 %v10274_v21  ;;  %11522 = vst [vmem:[#allocation69_spill] sm:$0xff] %v10356_v8  ;;  %11523 = vst [vmem:[#allocation70_spill] sm:$0xff] %v10358_v23  ;;  %v10360_v24 = vld [vmem:[#allocation9 + $0xe8] ss:$16 sps:$4 sm:$0xff]   ;;  %v3877_v10 = vld [vmem:[#allocation2 + $0x280] sm:$0xff] }
 0x6e3   : > { %4747 = vmatprep.subr.bf16.mxu0 %v10282_v54  ;;  %4800 = vmatprep.subr.bf16.mxu1 %v10284_v55  ;;  %11524 = vst [vmem:[#allocation71_spill] sm:$0xff] %v10360_v24 }
 0x6e4   : > { %v8232_v57 = vpop.eup %8231 }
 0x6e5   : > { %v10262_v5 = vmul.f32 %v8232_v57, %v3845_v62  ;;  %v3893_v57 = vunpack.c.l.bf16 %v3877_v10  ;;  %v3879_v62 = vld [vmem:[#allocation2 + $0x290] sm:$0xff] }
 0x6e6   : > { %4748 = vmatpush1.bf16.msra.mxu0 %v10286_v7  ;;  %4801 = vmatpush1.bf16.msra.mxu1 %v10288_v27  ;;  %v3895_v60 = vunpack.c.l.bf16 %v3879_v62  ;;  %v3899_v56 = vunpack.c.h.bf16 %v3879_v62 }
 0x6e7   : > { %11516 = vst [vmem:[#allocation28_spill] sm:$0xff] %v10262_v5  ;;  %4749 = vmatprep.subr.bf16.mxu0 %v10294_v25  ;;  %4802 = vmatprep.subr.bf16.mxu1 %v10296_v42 }
 0x6ea   : > { %4750 = vmatpush1.bf16.msra.mxu0 %v10298_v61  ;;  %4803 = vmatpush1.bf16.msra.mxu1 %v10300_v3 }
 0x6eb   : > { %v8234_v41 = vpop.eup %8233  ;;  %4751 = vmatprep.subr.bf16.mxu0 %v10306_v52  ;;  %4804 = vmatprep.subr.bf16.mxu1 %v10308_v13 }
 0x6ec   : > { %v10264_v35 = vmul.f32 %v8234_v41, %v3846_v20  ;;  %v3894_v20 = vunpack.c.l.bf16 %v3878_v50  ;;  %v3897_v41 = vunpack.c.h.bf16 %v3877_v10  ;;  %v3880_v10 = vld [vmem:[#allocation2 + $0x298] sm:$0xff] }
 0x6ee   : > { %11517 = vst [vmem:[#allocation60_spill] sm:$0xff] %v10264_v35  ;;  %v4314_v0 = vpack.c.bf16 %v10264_v35, %v10262_v5  ;;  %4752 = vmatpush1.bf16.msra.mxu0 %v10310_v32  ;;  %4805 = vmatpush1.bf16.msra.mxu1 %v10312_v44  ;;  %v3898_v5 = vunpack.c.h.bf16 %v3878_v50 }
 0x6ef   : > { %4753 = vmatprep.subr.bf16.mxu0 %v10318_v22  ;;  %4806 = vmatprep.subr.bf16.mxu1 %v10320_v4 }
 0x6f0   : > { %4358 = vmatmul.mubr.bf16.gmra.mrb[84].mxu0 %v4314_v0  ;;  %4411 = vmatmul.mubr.bf16.gmra.mrb[84].mxu1 %v4314_v0 }
 0x6f1   : > { %4777 = vmatprep.mubr.bf16.mxu0 %v11404_v36  ;;  %4830 = vmatprep.mubr.bf16.mxu1 %v11404_v36 }
 0x6f2   : > { %4754 = vmatpush1.bf16.msra.mxu0 %v10322_v6  ;;  %4807 = vmatpush1.bf16.msra.mxu1 %v10324_v14 }
 0x6f3   : > { %4755 = vmatprep.subr.bf16.mxu0 %v10330_v15  ;;  %4808 = vmatprep.subr.bf16.mxu1 %v10332_v40 }
 0x6f6   : > { %4756 = vmatpush1.bf16.msra.mxu0 %v10334_v47  ;;  %4809 = vmatpush1.bf16.msra.mxu1 %v10336_v43 }
 0x6f7   : > { %4757 = vmatprep.subr.bf16.mxu0 %v10342_v59  ;;  %4810 = vmatprep.subr.bf16.mxu1 %v10344_v39 }
 0x6fa   : > { %4758 = vmatpush1.bf16.msra.mxu0 %v10346_v63  ;;  %4811 = vmatpush1.bf16.msra.mxu1 %v10348_v16 }
 0x6fb   : > { %4759 = vmatprep.subr.bf16.mxu0 %v10354_v28  ;;  %4812 = vmatprep.subr.bf16.mxu1 %v10356_v8 }
 0x6fe   : > { %4760 = vmatpush1.bf16.msra.mxu0 %v10358_v23  ;;  %4813 = vmatpush1.bf16.msra.mxu1 %v10360_v24 }
 0x6ff   : > { %4957 = vmatprep.subr.bf16.mxu0 %v10270_v34  ;;  %5010 = vmatprep.subr.bf16.mxu1 %v10276_v17 }
 0x793   : > { %v4137_v0 = vpop.f32.mrb[72].mxu0  ;;  %v4190_v35 = vpop.f32.mrb[72].mxu1 }
 0x794   : > { %v4209_v37 = vadd.f32 %v4137_v0, %v3893_v57  ;;  %v4139_v45 = vpop.f32.mrb[73].mxu0  ;;  %v4192_v18 = vpop.f32.mrb[73].mxu1  ;;  %v4211_v33 = vadd.f32 %v4190_v35, %v3895_v60  ;;  %v3896_v57 = vunpack.c.l.bf16 %v3880_v10  ;;  %v3881_v60 = vld [vmem:[#allocation2 + $0x2a0] sm:$0xff] }
 0x795   : > { %v4210_v19 = vadd.f32 %v4139_v45, %v3894_v20  ;;  %v4141_v49 = vpop.f32.mrb[74].mxu0  ;;  %v4194_v46 = vpop.f32.mrb[74].mxu1  ;;  %v3900_v45 = vunpack.c.h.bf16 %v3880_v10 }
 0x796   : > { %v4225_v26 = vmul.f32 0.5, %v4209_v37  ;;  %v4213_v29 = vadd.f32 %v4141_v49, %v3897_v41  ;;  %v4143_v38 = vpop.f32.mrb[75].mxu0  ;;  %v4196_v2 = vpop.f32.mrb[75].mxu1  ;;  %v4215_v0 = vadd.f32 %v4194_v46, %v3899_v56  ;;  %v4212_v20 = vadd.f32 %v4192_v18, %v3896_v57 }
 0x797   : > { %v4241_v9 = vmul.f32 0.5, %v4210_v19  ;;  %v4214_v11 = vadd.f32 %v4143_v38, %v3898_v5  ;;  %v4216_v49 = vadd.f32 %v4196_v2, %v3900_v45 }
 0x798   : > { %8235 = vtanh.f32 %v4225_v26  ;;  %v4226_v17 = vmul.f32 0.5, %v4213_v29  ;;  %v4261_v62 = vmul.f32 0.5, %v4212_v20 }
 0x799   : > { %8237 = vtanh.f32 %v4241_v9  ;;  %v4242_v50 = vmul.f32 0.5, %v4214_v11  ;;  %v4262_v26 = vmul.f32 0.5, %v4216_v49  ;;  %v3883_v49 = vld [vmem:[#allocation2 + $0x2b0] sm:$0xff] }
 0x79a   : > { %8239 = vtanh.f32 %v4226_v17  ;;  %v3882_v17 = vld [vmem:[#allocation2 + $0x2a8] sm:$0xff] }
 0x79b   : > { %8241 = vtanh.f32 %v4211_v33  ;;  %v3901_v33 = vunpack.c.l.bf16 %v3881_v60  ;;  %v3902_v57 = vunpack.c.l.bf16 %v3882_v17 }
 0x79c   : > { %8243 = vtanh.f32 %v4242_v50 }
 0x79d   : > { %8245 = vtanh.f32 %v4215_v0 }
 0x79e   : > { %8247 = vtanh.f32 %v4261_v62 }
 0x79f   : > { %8249 = vtanh.f32 %v4262_v26 }
 0x7a2   : > { %v8236_v37 = vpop.eup %8235 }
 0x7a3   : > { %v8238_v41 = vpop.eup %8237  ;;  %v4233_v19 = vmul.f32 0.5, %v8236_v37  ;;  %v3905_v37 = vunpack.c.h.bf16 %v3881_v60 }
 0x7a4   : > { %v4249_v38 = vmul.f32 0.5, %v8238_v41  ;;  %v8240_v5 = vpop.eup %8239 }
 0x7a5   : > { %v4237_v29 = vadd.f32 0.5, %v4233_v19  ;;  %v8242_v9 = vpop.eup %8241  ;;  %v4234_v35 = vmul.f32 0.5, %v8240_v5 }
 0x7a6   : > { %v4253_v11 = vadd.f32 0.5, %v4249_v38  ;;  %v8244_v56 = vpop.eup %8243  ;;  %v3906_v38 = vunpack.c.h.bf16 %v3882_v17  ;;  %v3886_v17 = vld [vmem:[#allocation2 + $0x2c8] sm:$0xff] }
 0x7a7   : > { %v4281_v46 = vmul.f32 %v8242_v9, %v4237_v29  ;;  %v4238_v2 = vadd.f32 0.5, %v4234_v35  ;;  %v4250_v10 = vmul.f32 0.5, %v8244_v56  ;;  %v8246_v50 = vpop.eup %8245  ;;  %v3885_v56 = vld [vmem:[#allocation2 + $0x2c0] sm:$0xff]  ;;  %v4302_v8 = vunpack.c.h.bf16 %v3886_v17 }
 0x7a8   : > { %v4277_v18 = vmul.f32 %v4253_v11, %v10186_v30  ;;  %v3903_v30 = vunpack.c.l.bf16 %v3883_v49 }
 0x7a9   : > { %v4254_v45 = vadd.f32 0.5, %v4250_v10  ;;  %v4282_v20 = vmul.f32 %v8246_v50, %v4238_v2  ;;  %v3884_v2 = vld [vmem:[#allocation2 + $0x2b8] sm:$0xff] }
 0x7aa   : > { %v10369_v0 = vadd.f32 %v4281_v46, %v4277_v18  ;;  %v4147_v41 = vpop.f32.mrb[76].mxu0  ;;  %v4200_v19 = vpop.f32.mrb[76].mxu1  ;;  %v3908_v23 = vunpack.c.h.bf16 %v3884_v2 }
 0x7ab   : > { %v4278_v5 = vmul.f32 %v4254_v45, %v10190_v48  ;;  %v4217_v62 = vadd.f32 %v4147_v41, %v3901_v33  ;;  %v4149_v29 = vpop.f32.mrb[77].mxu0  ;;  %v4202_v9 = vpop.f32.mrb[77].mxu1  ;;  %v3907_v48 = vunpack.c.h.bf16 %v3883_v49  ;;  %v3887_v41 = vld [vmem:[#allocation2 + $0x2d0] sm:$0xff]  ;;  %v4219_v24 = vadd.f32 %v4200_v19, %v3903_v30 }
 0x7ac   : > { %11525 = vst [vmem:[#allocation72_spill] sm:$0xff] %v10369_v0  ;;  %v4218_v11 = vadd.f32 %v4149_v29, %v3902_v57  ;;  %v4151_v35 = vpop.f32.mrb[78].mxu0  ;;  %v4204_v26 = vpop.f32.mrb[78].mxu1  ;;  %8251 = vtanh.f32 %v10369_v0  ;;  %v4297_v57 = vunpack.c.l.bf16 %v3885_v56  ;;  %v3904_v0 = vunpack.c.l.bf16 %v3884_v2 }
 0x7ad   : > { %v10373_v46 = vadd.f32 %v4282_v20, %v4278_v5  ;;  %v4227_v18 = vmul.f32 0.5, %v4217_v62  ;;  %v4221_v60 = vadd.f32 %v4151_v35, %v3905_v37  ;;  %v4153_v10 = vpop.f32.mrb[79].mxu0  ;;  %v4206_v50 = vpop.f32.mrb[79].mxu1  ;;  %v4298_v20 = vunpack.c.l.bf16 %v3886_v17 }
 0x7ae   : > { %v4243_v34 = vmul.f32 0.5, %v4218_v11  ;;  %v4222_v33 = vadd.f32 %v4153_v10, %v3906_v38  ;;  %v8248_v29 = vpop.eup %8247  ;;  %v4301_v37 = vunpack.c.h.bf16 %v3885_v56  ;;  %v4223_v35 = vadd.f32 %v4204_v26, %v3907_v48  ;;  %v3888_v56 = vld [vmem:[#allocation2 + $0x2d8] sm:$0xff] }
 0x7af   : > { %11526 = vst [vmem:[#allocation73_spill] sm:$0xff] %v10373_v46  ;;  %8253 = vtanh.f32 %v10373_v46  ;;  %v4228_v45 = vmul.f32 0.5, %v4221_v60  ;;  %v8250_v5 = vpop.eup %8249  ;;  %v4299_v11 = vunpack.c.l.bf16 %v3887_v41  ;;  %v4269_v38 = vmul.f32 0.5, %v8248_v29 }
 0x7b0   : > { %8255 = vtanh.f32 %v4227_v18  ;;  %v4244_v62 = vmul.f32 0.5, %v4222_v33  ;;  %v4270_v28 = vmul.f32 0.5, %v8250_v5  ;;  %v4220_v19 = vadd.f32 %v4202_v9, %v3904_v0 }
 0x7b1   : > { %8257 = vtanh.f32 %v4243_v34  ;;  %v4224_v33 = vadd.f32 %v4206_v50, %v3908_v23  ;;  %v4303_v17 = vunpack.c.h.bf16 %v3887_v41  ;;  %v4304_v41 = vunpack.c.h.bf16 %v3888_v56 }
 0x7b2   : > { %8259 = vtanh.f32 %v4228_v45  ;;  %v4274_v0 = vadd.f32 0.5, %v4270_v28  ;;  %v4263_v9 = vmul.f32 0.5, %v4220_v19 }
 0x7b3   : > { %v4349_v12 = vpop.f32.mrb[80].mxu0  ;;  %v4402_v49 = vpop.f32.mrb[80].mxu1  ;;  %8261 = vtanh.f32 %v4219_v24  ;;  %v4273_v24 = vadd.f32 0.5, %v4269_v38  ;;  %v4264_v23 = vmul.f32 0.5, %v4224_v33 }
 0x7b4   : > { %v4421_v10 = vadd.f32 %v4349_v12, %v4297_v57  ;;  %v4351_v60 = vpop.f32.mrb[81].mxu0  ;;  %v4404_v46 = vpop.f32.mrb[81].mxu1  ;;  %8263 = vtanh.f32 %v4244_v62  ;;  %v4423_v29 = vadd.f32 %v4402_v49, %v4299_v11 }
 0x7b5   : > { %v4422_v30 = vadd.f32 %v4351_v60, %v4298_v20  ;;  %v4353_v18 = vpop.f32.mrb[82].mxu0  ;;  %v4406_v16 = vpop.f32.mrb[82].mxu1  ;;  %8265 = vtanh.f32 %v4223_v35  ;;  %v4300_v20 = vunpack.c.l.bf16 %v3888_v56 }
 0x7b6   : > { %v4437_v34 = vmul.f32 0.5, %v4421_v10  ;;  %v4425_v26 = vadd.f32 %v4353_v18, %v4301_v37  ;;  %v4355_v2 = vpop.f32.mrb[83].mxu0  ;;  %v4408_v48 = vpop.f32.mrb[83].mxu1  ;;  %v4427_v11 = vadd.f32 %v4406_v16, %v4303_v17  ;;  %v10387_v17 = vld [vmem:[#allocation2 + $0x2f0] sm:$0xff] }
 0x7b7   : > { %v4453_v45 = vmul.f32 0.5, %v4422_v30  ;;  %v8252_v12 = vpop.eup %8251  ;;  %v4426_v5 = vadd.f32 %v4355_v2, %v4302_v8  ;;  %v4424_v49 = vadd.f32 %v4404_v46, %v4300_v20  ;;  %v10382_v2 = vld [vmem:[#allocation2 + $0x2e0] sm:$0xff]  ;;  %v4428_v56 = vadd.f32 %v4408_v48, %v4304_v41 }
 0x7b8   : > { %8267 = vtanh.f32 %v4437_v34  ;;  %v4438_v57 = vmul.f32 0.5, %v4425_v26  ;;  %v10376_v37 = vmul.f32 %v8252_v12, %v4273_v24  ;;  %v4305_v48 = vunpack.c.l.bf16 %v10382_v2 }
 0x7b9   : > { %v8254_v60 = vpop.eup %8253  ;;  %8269 = vtanh.f32 %v4453_v45  ;;  %v4454_v62 = vmul.f32 0.5, %v4426_v5  ;;  %v10389_v5 = vld [vmem:[#allocation2 + $0x2e8] sm:$0xff] }
 0x7ba   : > { %v8256_v10 = vpop.eup %8255  ;;  %v10378_v18 = vmul.f32 %v8254_v60, %v4274_v0  ;;  %8271 = vtanh.f32 %v4423_v29 }
 0x7bb   : > { %v8258_v50 = vpop.eup %8257  ;;  %v4235_v35 = vmul.f32 0.5, %v8256_v10  ;;  %8273 = vtanh.f32 %v4438_v57  ;;  %v4473_v57 = vmul.f32 0.5, %v4424_v49  ;;  %v4307_v10 = vunpack.c.l.bf16 %v10387_v17 }
 0x7bc   : > { %11527 = vst [vmem:[#allocation74_spill] sm:$0xff] %v10378_v18  ;;  %v4551_v28 = vpack.c.bf16 %v10378_v18, %v10376_v37  ;;  %v4251_v8 = vmul.f32 0.5, %v8258_v50  ;;  %8275 = vtanh.f32 %v4263_v9  ;;  %v8260_v38 = vpop.eup %8259 }
 0x7bd   : > { %v4239_v19 = vadd.f32 0.5, %v4235_v35  ;;  %8277 = vtanh.f32 %v4454_v62  ;;  %v8262_v30 = vpop.eup %8261  ;;  %v4236_v26 = vmul.f32 0.5, %v8260_v38  ;;  %v4474_v62 = vmul.f32 0.5, %v4428_v56 }
 0x7be   : > { %v4255_v34 = vadd.f32 0.5, %v4251_v8  ;;  %8279 = vtanh.f32 %v4264_v23  ;;  %4778 = vmatmul.mubr.bf16.vlgmr.msra.gmra.mrb[88].mxu0 %v4551_v28  ;;  %4831 = vmatmul.mubr.bf16.vlgmr.msra.gmra.mrb[88].mxu1 %v4551_v28  ;;  %v8264_v33 = vpop.eup %8263  ;;  %v4306_v23 = vunpack.c.l.bf16 %v10389_v5 }
 0x7bf   : > { %v4283_v16 = vmul.f32 %v8262_v30, %v4239_v19  ;;  %8281 = vtanh.f32 %v4427_v11  ;;  %4958 = vmatpush1.bf16.msra.mxu0 %v10272_v1  ;;  %5011 = vmatpush1.bf16.msra.mxu1 %v10274_v21  ;;  %v8266_v46 = vpop.eup %8265  ;;  %v4240_v45 = vadd.f32 0.5, %v4236_v26  ;;  %v4252_v12 = vmul.f32 0.5, %v8264_v33 }
 0x7c0   : > { %v4279_v29 = vmul.f32 %v4255_v34, %v10210_v31  ;;  %4959 = vmatprep.subr.bf16.mxu0 %v10282_v54  ;;  %5012 = vmatprep.subr.bf16.mxu1 %v10284_v55  ;;  %8283 = vtanh.f32 %v4473_v57  ;;  %v4309_v34 = vunpack.c.h.bf16 %v10382_v2 }
 0x7c1   : > { %4787 = vmatprep.mubr.bf16.mxu0 %v11404_v36  ;;  %4840 = vmatprep.mubr.bf16.mxu1 %v11404_v36  ;;  %v4256_v31 = vadd.f32 0.5, %v4252_v12  ;;  %v4284_v9 = vmul.f32 %v8266_v46, %v4240_v45 }
 0x7c2   : > { %v8268_v24 = vpop.eup %8267  ;;  %v10396_v0 = vadd.f32 %v4283_v16, %v4279_v29 }
 0x7c3   : > { %v4445_v20 = vmul.f32 0.5, %v8268_v24  ;;  %v8270_v60 = vpop.eup %8269  ;;  %4960 = vmatpush1.bf16.msra.mxu0 %v10286_v7  ;;  %5013 = vmatpush1.bf16.msra.mxu1 %v10288_v27  ;;  %v4280_v35 = vmul.f32 %v4256_v31, %v10223_v51  ;;  %v4359_v28 = vpop.f32.mrb[84].mxu0  ;;  %v4310_v51 = vunpack.c.h.bf16 %v10389_v5 }
 0x7c4   : > { %v8272_v50 = vpop.eup %8271  ;;  %v4461_v41 = vmul.f32 0.5, %v8270_v60  ;;  %v4412_v8 = vpop.f32.mrb[84].mxu1  ;;  %4961 = vmatprep.subr.bf16.mxu0 %v10294_v25  ;;  %5014 = vmatprep.subr.bf16.mxu1 %v10296_v42  ;;  %8285 = vtanh.f32 %v10396_v0  ;;  %v4429_v38 = vadd.f32 %v4359_v28, %v4305_v48  ;;  %v3892_v28 = vld [vmem:[#allocation2 + $0x2f8] sm:$0xff] }
 0x7c5   : > { %v4449_v11 = vadd.f32 0.5, %v4445_v20  ;;  %v8274_v49 = vpop.eup %8273  ;;  %v4361_v19 = vpop.f32.mrb[85].mxu0  ;;  %v10410_v33 = vadd.f32 %v4284_v9, %v4280_v35  ;;  %8287 = vtanh.f32 %v4474_v62  ;;  %v4431_v24 = vadd.f32 %v4412_v8, %v4307_v10 }
 0x7c6   : > { %v10406_v30 = vpop.f32.mrb[85].mxu1  ;;  %v8276_v26 = vpop.eup %8275  ;;  %v4465_v16 = vadd.f32 0.5, %v4461_v41  ;;  %v4446_v46 = vmul.f32 0.5, %v8274_v49  ;;  %v4439_v57 = vmul.f32 0.5, %v4429_v38  ;;  %v4430_v48 = vadd.f32 %v4361_v19, %v4306_v23 }
 0x7c7   : > { %v4493_v56 = vmul.f32 %v8272_v50, %v4449_v11  ;;  %v4363_v29 = vpop.f32.mrb[86].mxu0  ;;  %v4416_v45 = vpop.f32.mrb[86].mxu1  ;;  %4962 = vmatpush1.bf16.msra.mxu0 %v10298_v61  ;;  %5015 = vmatpush1.bf16.msra.mxu1 %v10300_v3  ;;  %8289 = vtanh.f32 %v10410_v33  ;;  %v4311_v23 = vunpack.c.h.bf16 %v10387_v17  ;;  %v4271_v17 = vmul.f32 0.5, %v8276_v26 }
 0x7c8   : > { %v8278_v12 = vpop.eup %8277  ;;  %v4365_v31 = vpop.f32.mrb[87].mxu0  ;;  %v4489_v5 = vmul.f32 %v4465_v16, %v10228_v53  ;;  %v4450_v9 = vadd.f32 0.5, %v4446_v46  ;;  %4963 = vmatprep.subr.bf16.mxu0 %v10306_v52  ;;  %5016 = vmatprep.subr.bf16.mxu1 %v10308_v13  ;;  %8291 = vtanh.f32 %v4439_v57  ;;  %v4455_v10 = vmul.f32 0.5, %v4430_v48 }
 0x7c9   : > { %v4418_v20 = vpop.f32.mrb[87].mxu1  ;;  %v8280_v2 = vpop.eup %8279  ;;  %v4462_v60 = vmul.f32 0.5, %v8278_v12  ;;  %v4433_v41 = vadd.f32 %v4363_v29, %v4309_v34  ;;  %v4434_v49 = vadd.f32 %v4365_v31, %v4310_v51  ;;  %v4435_v16 = vadd.f32 %v4416_v45, %v4311_v23 }
 0x7ca   : > { %v8282_v62 = vpop.eup %8281  ;;  %v10419_v50 = vadd.f32 %v4493_v56, %v4489_v5  ;;  %8293 = vtanh.f32 %v4455_v10  ;;  %v4272_v38 = vmul.f32 0.5, %v8280_v2  ;;  %v4312_v51 = vunpack.c.h.bf16 %v3892_v28 }
 0x7cb   : > { %v4466_v35 = vadd.f32 0.5, %v4462_v60  ;;  %v4494_v11 = vmul.f32 %v8282_v62, %v4450_v9  ;;  %4964 = vmatpush1.bf16.msra.mxu0 %v10310_v32  ;;  %5017 = vmatpush1.bf16.msra.mxu1 %v10312_v44  ;;  %8295 = vtanh.f32 %v4431_v24  ;;  %v4440_v8 = vmul.f32 0.5, %v4433_v41  ;;  %v8284_v19 = vpop.eup %8283 }
 0x7cc   : > { %4965 = vmatprep.subr.bf16.mxu0 %v10318_v22  ;;  %5018 = vmatprep.subr.bf16.mxu1 %v10320_v4  ;;  %8297 = vtanh.f32 %v10419_v50  ;;  %v4456_v56 = vmul.f32 0.5, %v4434_v49  ;;  %v4275_v29 = vadd.f32 0.5, %v4271_v17  ;;  %v4276_v12 = vadd.f32 0.5, %v4272_v38  ;;  %v11528_v49 = vld [vmem:[#allocation67_spill] sm:$0xff] }
 0x7cd   : > { %v4490_v53 = vmul.f32 %v4466_v35, %v10233_v58  ;;  %8299 = vtanh.f32 %v4440_v8  ;;  %v4308_v58 = vunpack.c.l.bf16 %v3892_v28  ;;  %v4436_v5 = vadd.f32 %v4418_v20, %v4312_v51 }
 0x7ce   : > { %v8286_v46 = vpop.eup %8285  ;;  %v4481_v60 = vmul.f32 0.5, %v8284_v19 }
 0x7cf   : > { %v10427_v34 = vadd.f32 %v4494_v11, %v4490_v53  ;;  %4966 = vmatpush1.bf16.msra.mxu0 %v10322_v6  ;;  %5019 = vmatpush1.bf16.msra.mxu1 %v10324_v14  ;;  %v8288_v26 = vpop.eup %8287  ;;  %v10434_v24 = vmul.f32 %v8286_v46, %v4275_v29  ;;  %v4432_v31 = vadd.f32 %v10406_v30, %v4308_v58  ;;  %v4476_v8 = vmul.f32 0.5, %v4436_v5  ;;  %v11531_v58 = vld [vmem:[#allocation41_spill] sm:$0xff]  ;;  %v11534_v5 = vld [vmem:[#allocation70_spill] sm:$0xff] }
 0x7d0   : > { %4967 = vmatprep.subr.bf16.mxu0 %v10330_v15  ;;  %5020 = vmatprep.subr.bf16.mxu1 %v10332_v40  ;;  %v4482_v62 = vmul.f32 0.5, %v8288_v26  ;;  %v4485_v17 = vadd.f32 0.5, %v4481_v60 }
 0x7d1   : > { %8301 = vtanh.f32 %v10427_v34  ;;  %v8290_v57 = vpop.eup %8289  ;;  %v4475_v41 = vmul.f32 0.5, %v4432_v31 }
 0x7d2   : > { %8303 = vtanh.f32 %v4456_v56  ;;  %v8292_v45 = vpop.eup %8291  ;;  %v10436_v48 = vmul.f32 %v8290_v57, %v4276_v12  ;;  %v4486_v38 = vadd.f32 0.5, %v4482_v62  ;;  %v11530_v56 = vld [vmem:[#allocation69_spill] sm:$0xff] }
 0x7d3   : > { %8305 = vtanh.f32 %v4435_v16  ;;  %4968 = vmatpush1.bf16.msra.mxu0 %v10334_v47  ;;  %5021 = vmatpush1.bf16.msra.mxu1 %v10336_v43  ;;  %v4447_v2 = vmul.f32 0.5, %v8292_v45  ;;  %v11529_v16 = vld [vmem:[#allocation68_spill] sm:$0xff] }
 0x7d4   : > { %4969 = vmatprep.subr.bf16.mxu0 %v10342_v59  ;;  %5022 = vmatprep.subr.bf16.mxu1 %v10344_v39  ;;  %v8294_v9 = vpop.eup %8293  ;;  %v4552_v10 = vpack.c.bf16 %v10436_v48, %v10434_v24  ;;  %8307 = vtanh.f32 %v4475_v41 }
 0x7d5   : > { %v8296_v23 = vpop.eup %8295  ;;  %v4451_v35 = vadd.f32 0.5, %v4447_v2  ;;  %v4463_v11 = vmul.f32 0.5, %v8294_v9  ;;  %8309 = vtanh.f32 %v4476_v8  ;;  %v11535_v9 = vld [vmem:[#allocation71_spill] sm:$0xff] }
 0x7d6   : > { %v8298_v30 = vpop.eup %8297  ;;  %4788 = vmatmul.mubr.bf16.gmra.mrb[92].mxu0 %v4552_v10  ;;  %4841 = vmatmul.mubr.bf16.gmra.mrb[92].mxu1 %v4552_v10  ;;  %v11536_v10 = vld [vmem:[#allocation61_spill] sm:$0xff] }
 0x7d7   : > { %v8300_v53 = vpop.eup %8299  ;;  %v4467_v28 = vadd.f32 0.5, %v4463_v11  ;;  %v4495_v20 = vmul.f32 %v8296_v23, %v4451_v35  ;;  %4970 = vmatpush1.bf16.msra.mxu0 %v10346_v63  ;;  %5023 = vmatpush1.bf16.msra.mxu1 %v11528_v49  ;;  %v10452_v29 = vmul.f32 %v8298_v30, %v4485_v17  ;;  %v11537_v23 = vld [vmem:[#allocation66_spill] sm:$0xff] }
 0x7d8   : > { %v4448_v19 = vmul.f32 0.5, %v8300_v53  ;;  %4971 = vmatprep.subr.bf16.mxu0 %v11529_v16  ;;  %5024 = vmatprep.subr.bf16.mxu1 %v11530_v56  ;;  %v11538_v11 = vld [vmem:[#allocation46_spill] sm:$0xff] }
 0x7d9   : > { %v4491_v51 = vmul.f32 %v4467_v28, %v11531_v58  ;;  %4989 = vmatprep.mubr.bf16.mxu0 %v11404_v36  ;;  %5042 = vmatprep.mubr.bf16.mxu1 %v11404_v36  ;;  %11532 = vst [vmem:[#allocation67_spill] sm:$0xff] %v10452_v29 }
 0x7da   : > { %v4452_v57 = vadd.f32 0.5, %v4448_v19  ;;  %v4522_v19 = vld [vmem:[#allocation2 + $0x318] sm:$0xff] }
 0x7db   : > { %v8302_v46 = vpop.eup %8301  ;;  %v10456_v31 = vadd.f32 %v4495_v20, %v4491_v51  ;;  %4972 = vmatpush1.bf16.msra.mxu0 %v11534_v5  ;;  %5025 = vmatpush1.bf16.msra.mxu1 %v11535_v9 }
 0x7dc   : > { %v8304_v26 = vpop.eup %8303  ;;  %v10454_v12 = vmul.f32 %v8302_v46, %v4486_v38  ;;  %5387 = vmatprep.subr.bf16.mxu0 %v11536_v10  ;;  %5440 = vmatprep.subr.bf16.mxu1 %v11537_v23 }
 0x7dd   : > { %v8306_v45 = vpop.eup %8305  ;;  %v4464_v2 = vmul.f32 0.5, %v8304_v26  ;;  %8311 = vtanh.f32 %v10456_v31  ;;  %v4538_v26 = vunpack.c.l.bf16 %v4522_v19 }
 0x7de   : > { %11533 = vst [vmem:[#allocation68_spill] sm:$0xff] %v10454_v12  ;;  %v4955_v60 = vpack.c.bf16 %v10454_v12, %v10452_v29  ;;  %v4496_v62 = vmul.f32 %v8306_v45, %v4452_v57  ;;  %v8308_v53 = vpop.eup %8307  ;;  %v4542_v45 = vunpack.c.h.bf16 %v4522_v19 }
 0x7df   : > { %v4468_v35 = vadd.f32 0.5, %v4464_v2  ;;  %v8310_v28 = vpop.eup %8309 }
 0x7e0   : > { %4990 = vmatmul.mubr.bf16.vlgmr.msra.gmra.mrb[96].mxu0 %v4955_v60  ;;  %5043 = vmatmul.mubr.bf16.vlgmr.msra.gmra.mrb[96].mxu1 %v4955_v60 }
 0x7e1   : > { %v4492_v30 = vmul.f32 %v4468_v35, %v11538_v11  ;;  %4999 = vmatprep.mubr.bf16.mxu0 %v11404_v36  ;;  %5052 = vmatprep.mubr.bf16.mxu1 %v11404_v36 }
 0x7e2   : > { %5388 = vmatpush1.bf16.msra.mxu0 %v10272_v1  ;;  %5441 = vmatpush1.bf16.msra.mxu1 %v10274_v21  ;;  %v4483_v1 = vmul.f32 0.5, %v8308_v53  ;;  %v4484_v21 = vmul.f32 0.5, %v8310_v28 }
 0x7e3   : > { %v10470_v41 = vadd.f32 %v4496_v62, %v4492_v30  ;;  %5389 = vmatprep.subr.bf16.mxu0 %v10282_v54  ;;  %5442 = vmatprep.subr.bf16.mxu1 %v10284_v55 }
 0x7e4   : > { %v4487_v55 = vadd.f32 0.5, %v4483_v1 }
 0x7e5   : > { %8313 = vtanh.f32 %v10470_v41 }
 0x7e6   : > { %5390 = vmatpush1.bf16.msra.mxu0 %v10286_v7  ;;  %5443 = vmatpush1.bf16.msra.mxu1 %v10288_v27  ;;  %v4488_v7 = vadd.f32 0.5, %v4484_v21  ;;  %v4523_v21 = vld [vmem:[#allocation2 + $0x320] sm:$0xff] }
 0x7e7   : > { %5391 = vmatprep.subr.bf16.mxu0 %v10294_v25  ;;  %5444 = vmatprep.subr.bf16.mxu1 %v10296_v42  ;;  %v8312_v54 = vpop.eup %8311 }
 0x7e8   : > { %v10487_v25 = vmul.f32 %v8312_v54, %v4487_v55 }
 0x7ea   : > { %5392 = vmatpush1.bf16.msra.mxu0 %v10298_v61  ;;  %5445 = vmatpush1.bf16.msra.mxu1 %v10300_v3  ;;  %11539 = vst [vmem:[#allocation69_spill] sm:$0xff] %v10487_v25  ;;  %v4519_v3 = vld [vmem:[#allocation2 + $0x300] sm:$0xff] }
 0x7eb   : > { %5393 = vmatprep.subr.bf16.mxu0 %v10306_v52  ;;  %5446 = vmatprep.subr.bf16.mxu1 %v10308_v13  ;;  %v4520_v52 = vld [vmem:[#allocation2 + $0x308] sm:$0xff]  ;;  %v4535_v13 = vunpack.c.l.bf16 %v4519_v3 }
 0x7ee   : > { %5394 = vmatpush1.bf16.msra.mxu0 %v10310_v32  ;;  %5447 = vmatpush1.bf16.msra.mxu1 %v10312_v44  ;;  %v4521_v32 = vld [vmem:[#allocation2 + $0x310] sm:$0xff]  ;;  %v4536_v44 = vunpack.c.l.bf16 %v4520_v52 }
 0x7ef   : > { %v8314_v27 = vpop.eup %8313  ;;  %5395 = vmatprep.subr.bf16.mxu0 %v10318_v22  ;;  %5448 = vmatprep.subr.bf16.mxu1 %v10320_v4  ;;  %v4539_v22 = vunpack.c.h.bf16 %v4519_v3 }
 0x7f0   : > { %v10489_v42 = vmul.f32 %v8314_v27, %v4488_v7  ;;  %v4524_v7 = vld [vmem:[#allocation2 + $0x328] sm:$0xff] }
 0x7f1   : > { %v11541_v27 = vld [vmem:[#allocation72_spill] sm:$0xff] }
 0x7f2   : > { %11540 = vst [vmem:[#allocation41_spill] sm:$0xff] %v10489_v42  ;;  %v4956_v61 = vpack.c.bf16 %v10489_v42, %v10487_v25  ;;  %5396 = vmatpush1.bf16.msra.mxu0 %v10322_v6  ;;  %5449 = vmatpush1.bf16.msra.mxu1 %v10324_v14  ;;  %v4540_v14 = vunpack.c.h.bf16 %v4520_v52 }
 0x7f3   : > { %5397 = vmatprep.subr.bf16.mxu0 %v10330_v15  ;;  %5450 = vmatprep.subr.bf16.mxu1 %v10332_v40  ;;  %v4537_v40 = vunpack.c.l.bf16 %v4521_v32 }
 0x7f4   : > { %5000 = vmatmul.mubr.bf16.gmra.mrb[100].mxu0 %v4956_v61  ;;  %5053 = vmatmul.mubr.bf16.gmra.mrb[100].mxu1 %v4956_v61 }
 0x7f5   : > { %5419 = vmatprep.mubr.bf16.mxu0 %v11404_v36  ;;  %5472 = vmatprep.mubr.bf16.mxu1 %v11404_v36 }
 0x7f6   : > { %5398 = vmatpush1.bf16.msra.mxu0 %v10334_v47  ;;  %5451 = vmatpush1.bf16.msra.mxu1 %v10336_v43 }
 0x7f7   : > { %5399 = vmatprep.subr.bf16.mxu0 %v10342_v59  ;;  %5452 = vmatprep.subr.bf16.mxu1 %v10344_v39 }
 0x7fa   : > { %5400 = vmatpush1.bf16.msra.mxu0 %v10346_v63  ;;  %5453 = vmatpush1.bf16.msra.mxu1 %v11528_v49 }
 0x7fb   : > { %5401 = vmatprep.subr.bf16.mxu0 %v11529_v16  ;;  %5454 = vmatprep.subr.bf16.mxu1 %v11530_v56  ;;  %v4541_v16 = vunpack.c.h.bf16 %v4521_v32  ;;  %v4543_v32 = vunpack.c.l.bf16 %v4523_v21 }
 0x7fe   : > { %5402 = vmatpush1.bf16.msra.mxu0 %v11534_v5  ;;  %5455 = vmatpush1.bf16.msra.mxu1 %v11535_v9 }
 0x7ff   : > { %5599 = vmatprep.subr.bf16.mxu0 %v11536_v10  ;;  %5652 = vmatprep.subr.bf16.mxu1 %v11537_v23 }
 0x891   : > { %v4779_v4 = vpop.f32.mrb[88].mxu0  ;;  %v4832_v6 = vpop.f32.mrb[88].mxu1 }
 0x892   : > { %v4851_v15 = vadd.f32 %v4779_v4, %v4535_v13  ;;  %v4781_v47 = vpop.f32.mrb[89].mxu0  ;;  %v4834_v43 = vpop.f32.mrb[89].mxu1  ;;  %v4853_v46 = vadd.f32 %v4832_v6, %v4537_v40  ;;  %v4525_v6 = vld [vmem:[#allocation2 + $0x330] sm:$0xff] }
 0x893   : > { %v4852_v59 = vadd.f32 %v4781_v47, %v4536_v44  ;;  %v4783_v39 = vpop.f32.mrb[90].mxu0  ;;  %v4836_v63 = vpop.f32.mrb[90].mxu1  ;;  %v4854_v2 = vadd.f32 %v4834_v43, %v4538_v26  ;;  %v11542_v40 = vld [vmem:[#allocation73_spill] sm:$0xff] }
 0x894   : > { %v4867_v20 = vmul.f32 0.5, %v4851_v15  ;;  %v4855_v8 = vadd.f32 %v4783_v39, %v4539_v22  ;;  %v4785_v49 = vpop.f32.mrb[91].mxu0  ;;  %v4838_v17 = vpop.f32.mrb[91].mxu1  ;;  %v4857_v57 = vadd.f32 %v4836_v63, %v4541_v16  ;;  %v4547_v15 = vunpack.c.h.bf16 %v4523_v21 }
 0x895   : > { %v4883_v38 = vmul.f32 0.5, %v4852_v59  ;;  %v4856_v56 = vadd.f32 %v4785_v49, %v4540_v14  ;;  %v4858_v5 = vadd.f32 %v4838_v17, %v4542_v45  ;;  %v4903_v60 = vmul.f32 0.5, %v4854_v2 }
 0x896   : > { %8315 = vtanh.f32 %v4867_v20  ;;  %v4868_v58 = vmul.f32 0.5, %v4855_v8  ;;  %v4544_v14 = vunpack.c.l.bf16 %v4524_v7  ;;  %v4548_v39 = vunpack.c.h.bf16 %v4524_v7 }
 0x897   : > { %8317 = vtanh.f32 %v4883_v38  ;;  %v4884_v51 = vmul.f32 0.5, %v4856_v56  ;;  %v4904_v23 = vmul.f32 0.5, %v4858_v5  ;;  %v4545_v20 = vunpack.c.l.bf16 %v4525_v6  ;;  %v4527_v56 = vld [vmem:[#allocation2 + $0x340] sm:$0xff]  ;;  %v4526_v5 = vld [vmem:[#allocation2 + $0x338] sm:$0xff] }
 0x898   : > { %8319 = vtanh.f32 %v4868_v58  ;;  %v4943_v21 = vunpack.c.h.bf16 %v4527_v56  ;;  %v4550_v7 = vunpack.c.h.bf16 %v4526_v5 }
 0x899   : > { %8321 = vtanh.f32 %v4853_v46 }
 0x89a   : > { %8323 = vtanh.f32 %v4884_v51 }
 0x89b   : > { %8325 = vtanh.f32 %v4857_v57  ;;  %v4528_v57 = vld [vmem:[#allocation2 + $0x348] sm:$0xff] }
 0x89c   : > { %8327 = vtanh.f32 %v4903_v60 }
 0x89d   : > { %8329 = vtanh.f32 %v4904_v23 }
 0x8a0   : > { %v8316_v9 = vpop.eup %8315 }
 0x8a1   : > { %v8318_v62 = vpop.eup %8317  ;;  %v4875_v10 = vmul.f32 0.5, %v8316_v9  ;;  %v4549_v9 = vunpack.c.h.bf16 %v4525_v6 }
 0x8a2   : > { %v4891_v35 = vmul.f32 0.5, %v8318_v62  ;;  %v8320_v11 = vpop.eup %8319 }
 0x8a3   : > { %v4879_v30 = vadd.f32 0.5, %v4875_v10  ;;  %v8322_v53 = vpop.eup %8321  ;;  %v4876_v1 = vmul.f32 0.5, %v8320_v11 }
 0x8a4   : > { %v4895_v28 = vadd.f32 0.5, %v4891_v35  ;;  %v8324_v54 = vpop.eup %8323  ;;  %v4939_v35 = vunpack.c.l.bf16 %v4527_v56 }
 0x8a5   : > { %v4923_v55 = vmul.f32 %v8322_v53, %v4879_v30  ;;  %v4880_v3 = vadd.f32 0.5, %v4876_v1  ;;  %v4892_v52 = vmul.f32 0.5, %v8324_v54  ;;  %v8326_v13 = vpop.eup %8325  ;;  %v4529_v30 = vld [vmem:[#allocation2 + $0x350] sm:$0xff]  ;;  %v4940_v53 = vunpack.c.l.bf16 %v4528_v57 }
 0x8a6   : > { %v4919_v61 = vmul.f32 %v4895_v28, %v11541_v27  ;;  %v8328_v45 = vpop.eup %8327  ;;  %v4546_v1 = vunpack.c.l.bf16 %v4526_v5 }
 0x8a7   : > { %v4896_v22 = vadd.f32 0.5, %v4892_v52  ;;  %v4924_v4 = vmul.f32 %v8326_v13, %v4880_v3  ;;  %v8330_v62 = vpop.eup %8329  ;;  %v4911_v28 = vmul.f32 0.5, %v8328_v45  ;;  %v4941_v52 = vunpack.c.l.bf16 %v4529_v30 }
 0x8a8   : > { %v10512_v44 = vadd.f32 %v4923_v55, %v4919_v61  ;;  %v4912_v54 = vmul.f32 0.5, %v8330_v62 }
 0x8a9   : > { %v4920_v47 = vmul.f32 %v4896_v22, %v11542_v40  ;;  %v4789_v43 = vpop.f32.mrb[92].mxu0  ;;  %v4842_v59 = vpop.f32.mrb[92].mxu1  ;;  %v4944_v22 = vunpack.c.h.bf16 %v4528_v57  ;;  %v4915_v40 = vadd.f32 0.5, %v4911_v28 }
 0x8aa   : > { %v4859_v63 = vadd.f32 %v4789_v43, %v4543_v32  ;;  %v4791_v8 = vpop.f32.mrb[93].mxu0  ;;  %v4844_v49 = vpop.f32.mrb[93].mxu1  ;;  %8331 = vtanh.f32 %v10512_v44  ;;  %v4861_v10 = vadd.f32 %v4842_v59, %v4545_v20  ;;  %v4530_v59 = vld [vmem:[#allocation2 + $0x358] sm:$0xff] }
 0x8ab   : > { %v10516_v17 = vadd.f32 %v4924_v4, %v4920_v47  ;;  %v4860_v38 = vadd.f32 %v4791_v8, %v4544_v14  ;;  %v4793_v19 = vpop.f32.mrb[94].mxu0  ;;  %v4846_v16 = vpop.f32.mrb[94].mxu1  ;;  %v4945_v14 = vunpack.c.h.bf16 %v4529_v30  ;;  %v4862_v47 = vadd.f32 %v4844_v49, %v4546_v1 }
 0x8ac   : > { %v4869_v46 = vmul.f32 0.5, %v4859_v63  ;;  %v4863_v58 = vadd.f32 %v4793_v19, %v4547_v15  ;;  %v4795_v51 = vpop.f32.mrb[95].mxu0  ;;  %v4848_v26 = vpop.f32.mrb[95].mxu1  ;;  %v4865_v55 = vadd.f32 %v4846_v16, %v4549_v9  ;;  %v4942_v57 = vunpack.c.l.bf16 %v4530_v59 }
 0x8ad   : > { %8333 = vtanh.f32 %v10516_v17  ;;  %v4885_v2 = vmul.f32 0.5, %v4860_v38  ;;  %v4864_v60 = vadd.f32 %v4795_v51, %v4548_v39  ;;  %v4916_v38 = vadd.f32 0.5, %v4912_v54 }
 0x8ae   : > { %8335 = vtanh.f32 %v4869_v46  ;;  %v4870_v23 = vmul.f32 0.5, %v4863_v58  ;;  %v4866_v19 = vadd.f32 %v4848_v26, %v4550_v7  ;;  %v4905_v5 = vmul.f32 0.5, %v4862_v47 }
 0x8af   : > { %8337 = vtanh.f32 %v4885_v2  ;;  %v4886_v11 = vmul.f32 0.5, %v4864_v60  ;;  %v4946_v26 = vunpack.c.h.bf16 %v4530_v59  ;;  %v10530_v59 = vld [vmem:[#allocation2 + $0x360] sm:$0xff] }
 0x8b0   : > { %8339 = vtanh.f32 %v4870_v23 }
 0x8b1   : > { %8341 = vtanh.f32 %v4861_v10 }
 0x8b2   : > { %8343 = vtanh.f32 %v4886_v11  ;;  %v4906_v11 = vmul.f32 0.5, %v4866_v19 }
 0x8b3   : > { %v4991_v27 = vpop.f32.mrb[96].mxu0  ;;  %v5044_v61 = vpop.f32.mrb[96].mxu1  ;;  %8345 = vtanh.f32 %v4865_v55 }
 0x8b4   : > { %v5063_v3 = vadd.f32 %v4991_v27, %v4939_v35  ;;  %v4993_v13 = vpop.f32.mrb[97].mxu0  ;;  %v5046_v32 = vpop.f32.mrb[97].mxu1  ;;  %v5065_v56 = vadd.f32 %v5044_v61, %v4941_v52  ;;  %v8807_v61 = vld [vmem:[#allocation9] ss:$16 sps:$4 sm:$0xff]  }
 0x8b5   : > { %v5064_v4 = vadd.f32 %v4993_v13, %v4940_v53  ;;  %v4995_v6 = vpop.f32.mrb[98].mxu0  ;;  %v5048_v15 = vpop.f32.mrb[98].mxu1  ;;  %v5066_v28 = vadd.f32 %v5046_v32, %v4942_v57  ;;  %v8809_v32 = vld [vmem:[#allocation9 + $0x24] ss:$16 sps:$4 sm:$0xff]  }
 0x8b6   : > { %v5079_v43 = vmul.f32 0.5, %v5063_v3  ;;  %v5067_v39 = vadd.f32 %v4995_v6, %v4943_v21  ;;  %v4997_v63 = vpop.f32.mrb[99].mxu0  ;;  %v5050_v20 = vpop.f32.mrb[99].mxu1  ;;  %v5069_v10 = vadd.f32 %v5048_v15, %v4945_v14  ;;  %v8808_v3 = vld [vmem:[#allocation9 + $0x8] ss:$16 sps:$4 sm:$0xff]  }
 0x8b7   : > { %v8332_v8 = vpop.eup %8331  ;;  %v5095_v16 = vmul.f32 0.5, %v5064_v4  ;;  %v5068_v58 = vadd.f32 %v4997_v63, %v4944_v22  ;;  %v5070_v27 = vadd.f32 %v5050_v20, %v4946_v26  ;;  %v8810_v4 = vld [vmem:[#allocation9 + $0x2c] ss:$16 sps:$4 sm:$0xff]   ;;  %v5115_v14 = vmul.f32 0.5, %v5066_v28  ;;  %v8816_v28 = vld [vmem:[#allocation9 + $0x48] ss:$16 sps:$4 sm:$0xff]  }
 0x8b8   : > { %8347 = vtanh.f32 %v5079_v43  ;;  %v5080_v46 = vmul.f32 0.5, %v5067_v39  ;;  %v8334_v51 = vpop.eup %8333  ;;  %v10519_v2 = vmul.f32 %v8332_v8, %v4915_v40  ;;  %v8811_v8 = vld [vmem:[#allocation9 + $0x20] ss:$16 sps:$4 sm:$0xff]  }
 0x8b9   : > { %8349 = vtanh.f32 %v5095_v16  ;;  %v8336_v45 = vpop.eup %8335  ;;  %v10521_v49 = vmul.f32 %v8334_v51, %v4916_v38  ;;  %v5096_v9 = vmul.f32 0.5, %v5068_v58  ;;  %v5116_v20 = vmul.f32 0.5, %v5070_v27  ;;  %v8812_v38 = vld [vmem:[#allocation9 + $0x28] ss:$16 sps:$4 sm:$0xff]   ;;  %v8814_v58 = vld [vmem:[#allocation9 + $0x4c] ss:$16 sps:$4 sm:$0xff]  }
 0x8ba   : > { %v8338_v60 = vpop.eup %8337  ;;  %v4877_v62 = vmul.f32 0.5, %v8336_v45  ;;  %8351 = vtanh.f32 %v5080_v46  ;;  %v8813_v46 = vld [vmem:[#allocation9 + $0x44] ss:$16 sps:$4 sm:$0xff]   ;;  %v4947_v45 = vunpack.c.l.bf16 %v10530_v59 }
 0x8bb   : > { %11543 = vst [vmem:[#allocation70_spill] sm:$0xff] %v10521_v49  ;;  %v5193_v23 = vpack.c.bf16 %v10521_v49, %v10519_v2  ;;  %v4893_v35 = vmul.f32 0.5, %v8338_v60  ;;  %8353 = vtanh.f32 %v5065_v56  ;;  %v8340_v30 = vpop.eup %8339  ;;  %v10535_v56 = vld [vmem:[#allocation2 + $0x370] sm:$0xff] }
 0x8bc   : > { %v4881_v53 = vadd.f32 0.5, %v4877_v62  ;;  %8355 = vtanh.f32 %v5096_v9  ;;  %v8342_v1 = vpop.eup %8341  ;;  %v4878_v54 = vmul.f32 0.5, %v8340_v30  ;;  %v4951_v30 = vunpack.c.h.bf16 %v10530_v59 }
 0x8bd   : > { %v4897_v21 = vadd.f32 0.5, %v4893_v35  ;;  %8357 = vtanh.f32 %v4905_v5  ;;  %5420 = vmatmul.mubr.bf16.vlgmr.msra.gmra.mrb[104].mxu0 %v5193_v23  ;;  %5473 = vmatmul.mubr.bf16.vlgmr.msra.gmra.mrb[104].mxu1 %v5193_v23  ;;  %v8344_v55 = vpop.eup %8343  ;;  %v4949_v35 = vunpack.c.l.bf16 %v10535_v56 }
 0x8be   : > { %v4925_v7 = vmul.f32 %v8342_v1, %v4881_v53  ;;  %8359 = vtanh.f32 %v5069_v10  ;;  %5600 = vmatpush1.bf16.msra.mxu0 %v8807_v61  ;;  %5653 = vmatpush1.bf16.msra.mxu1 %v8808_v3  ;;  %v4882_v13 = vadd.f32 0.5, %v4878_v54  ;;  %v4894_v22 = vmul.f32 0.5, %v8344_v55  ;;  %v8346_v6 = vpop.eup %8345  ;;  %v8815_v53 = vld [vmem:[#allocation9 + $0x40] ss:$16 sps:$4 sm:$0xff]   ;;  %v8817_v61 = vld [vmem:[#allocation9 + $0x64] ss:$16 sps:$4 sm:$0xff]  }
 0x8bf   : > { %v4921_v52 = vmul.f32 %v4897_v21, %v10396_v0  ;;  %8361 = vtanh.f32 %v4906_v11  ;;  %5601 = vmatprep.subr.bf16.mxu0 %v8809_v32  ;;  %5654 = vmatprep.subr.bf16.mxu1 %v8810_v4  ;;  %v10532_v0 = vld [vmem:[#allocation2 + $0x368] sm:$0xff] }
 0x8c0   : > { %5429 = vmatprep.mubr.bf16.mxu0 %v11404_v36  ;;  %5482 = vmatprep.mubr.bf16.mxu1 %v11404_v36  ;;  %v4898_v47 = vadd.f32 0.5, %v4894_v22  ;;  %v4926_v43 = vmul.f32 %v8346_v6, %v4882_v13  ;;  %8363 = vtanh.f32 %v5115_v14  ;;  %v4948_v5 = vunpack.c.l.bf16 %v10532_v0  ;;  %v8818_v3 = vld [vmem:[#allocation9 + $0x6c] ss:$16 sps:$4 sm:$0xff]  }
 0x8c1   : > { %v10528_v40 = vadd.f32 %v4925_v7, %v4921_v52  ;;  %v4952_v6 = vunpack.c.h.bf16 %v10532_v0  ;;  %v4953_v0 = vunpack.c.h.bf16 %v10535_v56 }
 0x8c2   : > { %v8348_v15 = vpop.eup %8347  ;;  %5602 = vmatpush1.bf16.msra.mxu0 %v8811_v8  ;;  %5655 = vmatpush1.bf16.msra.mxu1 %v8812_v38  ;;  %v4922_v19 = vmul.f32 %v4898_v47, %v10410_v33  ;;  %v8819_v8 = vld [vmem:[#allocation9 + $0x60] ss:$16 sps:$4 sm:$0xff]   ;;  %v8820_v38 = vld [vmem:[#allocation9 + $0x68] ss:$16 sps:$4 sm:$0xff]  }
 0x8c3   : > { %v8350_v39 = vpop.eup %8349  ;;  %v5087_v63 = vmul.f32 0.5, %v8348_v15  ;;  %5603 = vmatprep.subr.bf16.mxu0 %v8813_v46  ;;  %5656 = vmatprep.subr.bf16.mxu1 %v8814_v58  ;;  %8365 = vtanh.f32 %v10528_v40  ;;  %v8821_v46 = vld [vmem:[#allocation9 + $0x84] ss:$16 sps:$4 sm:$0xff]   ;;  %v8822_v58 = vld [vmem:[#allocation9 + $0x8c] ss:$16 sps:$4 sm:$0xff]  }
 0x8c4   : > { %v5103_v16 = vmul.f32 0.5, %v8350_v39  ;;  %v8352_v51 = vpop.eup %8351  ;;  %v10540_v60 = vadd.f32 %v4926_v43, %v4922_v19  ;;  %8367 = vtanh.f32 %v5116_v20 }
 0x8c5   : > { %v5091_v57 = vadd.f32 0.5, %v5087_v63  ;;  %v8354_v9 = vpop.eup %8353  ;;  %v5088_v62 = vmul.f32 0.5, %v8352_v51 }
 0x8c6   : > { %v5107_v33 = vadd.f32 0.5, %v5103_v16  ;;  %v8356_v10 = vpop.eup %8355  ;;  %5604 = vmatpush1.bf16.msra.mxu0 %v8815_v53  ;;  %5657 = vmatpush1.bf16.msra.mxu1 %v8816_v28  ;;  %8369 = vtanh.f32 %v10540_v60 }
 0x8c7   : > { %v5135_v26 = vmul.f32 %v8354_v9, %v5091_v57  ;;  %v5001_v23 = vpop.f32.mrb[100].mxu0  ;;  %v5054_v11 = vpop.f32.mrb[100].mxu1  ;;  %v5092_v54 = vadd.f32 0.5, %v5088_v62  ;;  %v5104_v55 = vmul.f32 0.5, %v8356_v10  ;;  %5605 = vmatprep.subr.bf16.mxu0 %v8817_v61  ;;  %5658 = vmatprep.subr.bf16.mxu1 %v8818_v3  ;;  %v8827_v61 = vld [vmem:[#allocation9 + $0xa0] ss:$16 sps:$4 sm:$0xff]  }
 0x8c8   : > { %v8358_v1 = vpop.eup %8357  ;;  %v5131_v21 = vmul.f32 %v5107_v33, %v10419_v50  ;;  %v5003_v7 = vpop.f32.mrb[101].mxu0  ;;  %v5071_v13 = vadd.f32 %v5001_v23, %v4947_v45  ;;  %v5073_v63 = vadd.f32 %v5054_v11, %v4949_v35  ;;  %v4534_v45 = vld [vmem:[#allocation2 + $0x378] sm:$0xff]  ;;  %v8825_v35 = vld [vmem:[#allocation9 + $0xa4] ss:$16 sps:$4 sm:$0xff]  }
 0x8c9   : > { %v10546_v27 = vpop.f32.mrb[101].mxu1  ;;  %v8360_v52 = vpop.eup %8359  ;;  %v5072_v22 = vadd.f32 %v5003_v7, %v4948_v5  ;;  %v5108_v50 = vadd.f32 0.5, %v5104_v55  ;;  %v4913_v51 = vmul.f32 0.5, %v8358_v1  ;;  %v4950_v23 = vunpack.c.l.bf16 %v4534_v45  ;;  %v8826_v11 = vld [vmem:[#allocation9 + $0xac] ss:$16 sps:$4 sm:$0xff]  }
 0x8ca   : > { %v5005_v32 = vpop.f32.mrb[102].mxu0  ;;  %v5058_v4 = vpop.f32.mrb[102].mxu1  ;;  %v10549_v15 = vadd.f32 %v5135_v26, %v5131_v21  ;;  %v5136_v47 = vmul.f32 %v8360_v52, %v5092_v54  ;;  %v5081_v39 = vmul.f32 0.5, %v5071_v13  ;;  %5606 = vmatpush1.bf16.msra.mxu0 %v8819_v8  ;;  %5659 = vmatpush1.bf16.msra.mxu1 %v8820_v38  ;;  %v8824_v26 = vld [vmem:[#allocation9 + $0x88] ss:$16 sps:$4 sm:$0xff]   ;;  %v4954_v54 = vunpack.c.h.bf16 %v4534_v45 }
 0x8cb   : > { %v8362_v14 = vpop.eup %8361  ;;  %v5007_v43 = vpop.f32.mrb[103].mxu0  ;;  %v5097_v20 = vmul.f32 0.5, %v5072_v22  ;;  %v5132_v19 = vmul.f32 %v5108_v50, %v10427_v34  ;;  %v5075_v16 = vadd.f32 %v5005_v32, %v4951_v30  ;;  %5607 = vmatprep.subr.bf16.mxu0 %v8821_v46  ;;  %5660 = vmatprep.subr.bf16.mxu1 %v8822_v58  ;;  %v8823_v34 = vld [vmem:[#allocation9 + $0x80] ss:$16 sps:$4 sm:$0xff]   ;;  %v4917_v53 = vadd.f32 0.5, %v4913_v51 }
 0x8cc   : > { %v5060_v59 = vpop.f32.mrb[103].mxu1  ;;  %8371 = vtanh.f32 %v10549_v15  ;;  %v4914_v57 = vmul.f32 0.5, %v8362_v14  ;;  %v5076_v5 = vadd.f32 %v5007_v43, %v4952_v6  ;;  %v8364_v62 = vpop.eup %8363  ;;  %v5077_v1 = vadd.f32 %v5058_v4, %v4953_v0  ;;  %v8828_v3 = vld [vmem:[#allocation9 + $0xa8] ss:$16 sps:$4 sm:$0xff]   ;;  %v8829_v13 = vld [vmem:[#allocation9 + $0xc4] ss:$16 sps:$4 sm:$0xff]  }
 0x8cd   : > { %8373 = vtanh.f32 %v5081_v39  ;;  %v10554_v9 = vadd.f32 %v5136_v47, %v5132_v19  ;;  %v5082_v33 = vmul.f32 0.5, %v5075_v16  ;;  %v8366_v56 = vpop.eup %8365  ;;  %v5123_v52 = vmul.f32 0.5, %v8364_v62  ;;  %v8830_v22 = vld [vmem:[#allocation9 + $0xcc] ss:$16 sps:$4 sm:$0xff]   ;;  %v8833_v0 = vld [vmem:[#allocation9 + $0xe4] ss:$16 sps:$4 sm:$0xff]  }
 0x8ce   : > { %8375 = vtanh.f32 %v5097_v20  ;;  %v5098_v10 = vmul.f32 0.5, %v5076_v5  ;;  %5608 = vmatpush1.bf16.msra.mxu0 %v8823_v34  ;;  %5661 = vmatpush1.bf16.msra.mxu1 %v8824_v26  ;;  %v8368_v30 = vpop.eup %8367  ;;  %v4918_v28 = vadd.f32 0.5, %v4914_v57  ;;  %v10557_v55 = vmul.f32 %v8366_v56, %v4917_v53  ;;  %v8832_v20 = vld [vmem:[#allocation9 + $0xc8] ss:$16 sps:$4 sm:$0xff]   ;;  %v8834_v46 = vld [vmem:[#allocation9 + $0xec] ss:$16 sps:$4 sm:$0xff]  }
 0x8cf   : > { %8377 = vtanh.f32 %v5073_v63  ;;  %5609 = vmatprep.subr.bf16.mxu0 %v8825_v35  ;;  %5662 = vmatprep.subr.bf16.mxu1 %v8826_v11  ;;  %v5124_v32 = vmul.f32 0.5, %v8368_v30  ;;  %v5074_v6 = vadd.f32 %v10546_v27, %v4950_v23  ;;  %v5078_v50 = vadd.f32 %v5060_v59, %v4954_v54  ;;  %v8831_v63 = vld [vmem:[#allocation9 + $0xc0] ss:$16 sps:$4 sm:$0xff]   ;;  %v8836_v26 = vld [vmem:[#allocation9 + $0xe8] ss:$16 sps:$4 sm:$0xff]  }
 0x8d0   : > { %8379 = vtanh.f32 %v10554_v9  ;;  %v8370_v21 = vpop.eup %8369  ;;  %v5127_v38 = vadd.f32 0.5, %v5123_v52  ;;  %v8835_v34 = vld [vmem:[#allocation9 + $0xe0] ss:$16 sps:$4 sm:$0xff]  }
 0x8d1   : > { %8381 = vtanh.f32 %v5082_v33  ;;  %v10559_v7 = vmul.f32 %v8370_v21, %v4918_v28  ;;  %v5128_v19 = vadd.f32 0.5, %v5124_v32  ;;  %v5117_v27 = vmul.f32 0.5, %v5074_v6 }
 0x8d2   : > { %8383 = vtanh.f32 %v5098_v10  ;;  %5610 = vmatpush1.bf16.msra.mxu0 %v8827_v61  ;;  %5663 = vmatpush1.bf16.msra.mxu1 %v8828_v3  ;;  %v5118_v51 = vmul.f32 0.5, %v5078_v50 }
 0x8d3   : > { %5611 = vmatprep.subr.bf16.mxu0 %v8829_v13  ;;  %5664 = vmatprep.subr.bf16.mxu1 %v8830_v22  ;;  %8385 = vtanh.f32 %v5077_v1  ;;  %v5194_v4 = vpack.c.bf16 %v10559_v7, %v10557_v55 }
 0x8d4   : > { %8387 = vtanh.f32 %v5117_v27 }
 0x8d5   : > { %5430 = vmatmul.mubr.bf16.gmra.mrb[108].mxu0 %v5194_v4  ;;  %5483 = vmatmul.mubr.bf16.gmra.mrb[108].mxu1 %v5194_v4  ;;  %8389 = vtanh.f32 %v5118_v51 }
 0x8d6   : > { %v8372_v14 = vpop.eup %8371  ;;  %5612 = vmatpush1.bf16.msra.mxu0 %v8831_v63  ;;  %5665 = vmatpush1.bf16.msra.mxu1 %v8832_v20 }
 0x8d7   : > { %v8374_v47 = vpop.eup %8373  ;;  %5613 = vmatprep.subr.bf16.mxu0 %v8833_v0  ;;  %5666 = vmatprep.subr.bf16.mxu1 %v8834_v46  ;;  %v10566_v45 = vmul.f32 %v8372_v14, %v5127_v38 }
 0x8d8   : > { %v8376_v43 = vpop.eup %8375  ;;  %v5089_v39 = vmul.f32 0.5, %v8374_v47  ;;  %5631 = vmatprep.mubr.bf16.mxu0 %v11404_v36  ;;  %5684 = vmatprep.mubr.bf16.mxu1 %v11404_v36  ;;  %v5162_v47 = vld [vmem:[#allocation2 + $0x388] sm:$0xff] }
 0x8d9   : > { %v8378_v8 = vpop.eup %8377  ;;  %v5105_v16 = vmul.f32 0.5, %v8376_v43  ;;  %11544 = vst [vmem:[#allocation71_spill] sm:$0xff] %v10566_v45  ;;  %v5178_v63 = vunpack.c.l.bf16 %v5162_v47 }
 0x8da   : > { %v8380_v58 = vpop.eup %8379  ;;  %v5093_v59 = vadd.f32 0.5, %v5089_v39  ;;  %5614 = vmatpush1.bf16.msra.mxu0 %v8835_v34  ;;  %5667 = vmatpush1.bf16.msra.mxu1 %v8836_v26  ;;  %v5163_v39 = vld [vmem:[#allocation2 + $0x390] sm:$0xff] }
 0x8db   : > { %v8382_v57 = vpop.eup %8381  ;;  %v10568_v5 = vmul.f32 %v8380_v58, %v5128_v19  ;;  %v5109_v33 = vadd.f32 0.5, %v5105_v16  ;;  %v5182_v19 = vunpack.c.h.bf16 %v5162_v47  ;;  %v5179_v27 = vunpack.c.l.bf16 %v5163_v39 }
 0x8dc   : > { %v5137_v62 = vmul.f32 %v8378_v8, %v5093_v59  ;;  %v5090_v10 = vmul.f32 0.5, %v8382_v57  ;;  %v8384_v56 = vpop.eup %8383  ;;  %v5164_v59 = vld [vmem:[#allocation2 + $0x398] sm:$0xff] }
 0x8dd   : > { %11545 = vst [vmem:[#allocation61_spill] sm:$0xff] %v10568_v5  ;;  %v5597_v23 = vpack.c.bf16 %v10568_v5, %v10566_v45  ;;  %v5133_v35 = vmul.f32 %v5109_v33, %v10456_v31  ;;  %v5106_v30 = vmul.f32 0.5, %v8384_v56  ;;  %v8386_v53 = vpop.eup %8385  ;;  %v5183_v56 = vunpack.c.h.bf16 %v5163_v39  ;;  %v5165_v39 = vld [vmem:[#allocation2 + $0x3a0] sm:$0xff] }
 0x8de   : > { %v5094_v11 = vadd.f32 0.5, %v5090_v10  ;;  %v8388_v61 = vpop.eup %8387 }
 0x8df   : > { %v10573_v28 = vadd.f32 %v5137_v62, %v5133_v35  ;;  %5632 = vmatmul.mubr.bf16.vlgmr.msra.gmra.mrb[112].mxu0 %v5597_v23  ;;  %5685 = vmatmul.mubr.bf16.vlgmr.msra.gmra.mrb[112].mxu1 %v5597_v23  ;;  %v5110_v1 = vadd.f32 0.5, %v5106_v30  ;;  %v8390_v3 = vpop.eup %8389  ;;  %v5125_v52 = vmul.f32 0.5, %v8388_v61 }
 0x8e0   : > { %v5138_v21 = vmul.f32 %v8386_v53, %v5094_v11  ;;  %5641 = vmatprep.mubr.bf16.mxu0 %v11404_v36  ;;  %5694 = vmatprep.mubr.bf16.mxu1 %v11404_v36  ;;  %v5126_v13 = vmul.f32 0.5, %v8390_v3  ;;  %v5180_v11 = vunpack.c.l.bf16 %v5164_v59 }
 0x8e1   : > { %v5134_v54 = vmul.f32 %v5110_v1, %v10470_v41  ;;  %8391 = vtanh.f32 %v10573_v28  ;;  %v5129_v32 = vadd.f32 0.5, %v5125_v52  ;;  %v5161_v41 = vld [vmem:[#allocation2 + $0x380] sm:$0xff] }
 0x8e2   : > { %v5130_v6 = vadd.f32 0.5, %v5126_v13  ;;  %v5177_v43 = vunpack.c.l.bf16 %v5161_v41  ;;  %v5181_v20 = vunpack.c.h.bf16 %v5161_v41 }
 0x8e3   : > { %v10579_v31 = vadd.f32 %v5138_v21, %v5134_v54  ;;  %v5184_v21 = vunpack.c.h.bf16 %v5164_v59 }
 0x8e5   : > { %8393 = vtanh.f32 %v10579_v31 }
 0x8eb   : > { %v8392_v22 = vpop.eup %8391 }
 0x8ec   : > { %v10582_v14 = vmul.f32 %v8392_v22, %v5129_v32 }
 0x8ee   : > { %11546 = vst [vmem:[#allocation66_spill] sm:$0xff] %v10582_v14 }
 0x8ef   : > { %v8394_v4 = vpop.eup %8393 }
 0x8f0   : > { %v10584_v50 = vmul.f32 %v8394_v4, %v5130_v6 }
 0x8f2   : > { %11547 = vst [vmem:[#allocation46_spill] sm:$0xff] %v10584_v50  ;;  %v5598_v36 = vpack.c.bf16 %v10584_v50, %v10582_v14 }
 0x8f4   : > { %5642 = vmatmul.mubr.bf16.gmra.mrb[116].mxu0 %v5598_v36  ;;  %5695 = vmatmul.mubr.bf16.gmra.mrb[116].mxu1 %v5598_v36 }
 0x990   : > { %v5421_v8 = vpop.f32.mrb[104].mxu0  ;;  %v5474_v38 = vpop.f32.mrb[104].mxu1 }
 0x991   : > { %v5493_v16 = vadd.f32 %v5421_v8, %v5177_v43  ;;  %v5423_v0 = vpop.f32.mrb[105].mxu0  ;;  %v5476_v46 = vpop.f32.mrb[105].mxu1  ;;  %v5495_v35 = vadd.f32 %v5474_v38, %v5179_v27  ;;  %v5166_v8 = vld [vmem:[#allocation2 + $0x3a8] sm:$0xff] }
 0x992   : > { %v5494_v58 = vadd.f32 %v5423_v0, %v5178_v63  ;;  %v5425_v51 = vpop.f32.mrb[106].mxu0  ;;  %v5478_v57 = vpop.f32.mrb[106].mxu1  ;;  %v5496_v54 = vadd.f32 %v5476_v46, %v5180_v11  ;;  %v5185_v0 = vunpack.c.l.bf16 %v5165_v39 }
 0x993   : > { %v5509_v33 = vmul.f32 0.5, %v5493_v16  ;;  %v5497_v62 = vadd.f32 %v5425_v51, %v5181_v20  ;;  %v5427_v10 = vpop.f32.mrb[107].mxu0  ;;  %v5480_v34 = vpop.f32.mrb[107].mxu1  ;;  %v5499_v1 = vadd.f32 %v5478_v57, %v5183_v56  ;;  %v5167_v51 = vld [vmem:[#allocation2 + $0x3b0] sm:$0xff]  ;;  %v5186_v57 = vunpack.c.l.bf16 %v5166_v8 }
 0x994   : > { %v5525_v26 = vmul.f32 0.5, %v5494_v58  ;;  %v5498_v23 = vadd.f32 %v5427_v10, %v5182_v19  ;;  %v5500_v61 = vadd.f32 %v5480_v34, %v5184_v21  ;;  %v5545_v3 = vmul.f32 0.5, %v5496_v54 }
 0x995   : > { %8395 = vtanh.f32 %v5509_v33  ;;  %v5510_v30 = vmul.f32 0.5, %v5497_v62  ;;  %v5168_v33 = vld [vmem:[#allocation2 + $0x3b8] sm:$0xff]  ;;  %v5189_v62 = vunpack.c.h.bf16 %v5165_v39  ;;  %v5190_v56 = vunpack.c.h.bf16 %v5166_v8 }
 0x996   : > { %8397 = vtanh.f32 %v5525_v26  ;;  %v5526_v53 = vmul.f32 0.5, %v5498_v23  ;;  %v5546_v32 = vmul.f32 0.5, %v5500_v61  ;;  %v5188_v54 = vunpack.c.l.bf16 %v5168_v33 }
 0x997   : > { %8399 = vtanh.f32 %v5510_v30  ;;  %v5169_v30 = vld [vmem:[#allocation2 + $0x3c0] sm:$0xff] }
 0x998   : > { %8401 = vtanh.f32 %v5495_v35  ;;  %v5187_v35 = vunpack.c.l.bf16 %v5167_v51 }
 0x999   : > { %8403 = vtanh.f32 %v5526_v53 }
 0x99a   : > { %8405 = vtanh.f32 %v5499_v1 }
 0x99b   : > { %8407 = vtanh.f32 %v5545_v3 }
 0x99c   : > { %8409 = vtanh.f32 %v5546_v32 }
 0x99f   : > { %v8396_v52 = vpop.eup %8395 }
 0x9a0   : > { %v8398_v13 = vpop.eup %8397  ;;  %v5517_v22 = vmul.f32 0.5, %v8396_v52 }
 0x9a1   : > { %v5533_v6 = vmul.f32 0.5, %v8398_v13  ;;  %v8400_v4 = vpop.eup %8399 }
 0x9a2   : > { %v5521_v36 = vadd.f32 0.5, %v5517_v22  ;;  %v8402_v41 = vpop.eup %8401  ;;  %v5518_v43 = vmul.f32 0.5, %v8400_v4  ;;  %v5191_v22 = vunpack.c.h.bf16 %v5167_v51 }
 0x9a3   : > { %v5537_v47 = vadd.f32 0.5, %v5533_v6  ;;  %v8404_v63 = vpop.eup %8403 }
 0x9a4   : > { %v5565_v20 = vmul.f32 %v8402_v41, %v5521_v36  ;;  %v5522_v19 = vadd.f32 0.5, %v5518_v43  ;;  %v5534_v16 = vmul.f32 0.5, %v8404_v63  ;;  %v8406_v27 = vpop.eup %8405  ;;  %v5581_v41 = vunpack.c.l.bf16 %v5169_v30 }
 0x9a5   : > { %v5561_v38 = vmul.f32 %v5537_v47, %v10512_v44  ;;  %v8408_v53 = vpop.eup %8407 }
 0x9a6   : > { %v5538_v58 = vadd.f32 0.5, %v5534_v16  ;;  %v5566_v59 = vmul.f32 %v8406_v27, %v5522_v19  ;;  %v8410_v47 = vpop.eup %8409  ;;  %v5553_v43 = vmul.f32 0.5, %v8408_v53  ;;  %v5192_v16 = vunpack.c.h.bf16 %v5168_v33  ;;  %v10590_v27 = vld [vmem:[#allocation2 + $0x3d8] sm:$0xff] }
 0x9a7   : > { %v5569_v46 = vadd.f32 %v5565_v20, %v5561_v38  ;;  %v5171_v20 = vld [vmem:[#allocation2 + $0x3d0] sm:$0xff]  ;;  %v5584_v33 = vunpack.c.l.bf16 %v10590_v27 }
 0x9a8   : > { %v5562_v10 = vmul.f32 %v5538_v58, %v10516_v17  ;;  %v5431_v34 = vpop.f32.mrb[108].mxu0  ;;  %v5484_v26 = vpop.f32.mrb[108].mxu1  ;;  %v5170_v17 = vld [vmem:[#allocation2 + $0x3c8] sm:$0xff]  ;;  %v5583_v51 = vunpack.c.l.bf16 %v5171_v20 }
 0x9a9   : > { %8411 = vtanh.f32 %v5569_v46  ;;  %v5501_v23 = vadd.f32 %v5431_v34, %v5185_v0  ;;  %v5433_v44 = vpop.f32.mrb[109].mxu0  ;;  %v5486_v11 = vpop.f32.mrb[109].mxu1  ;;  %v5503_v39 = vadd.f32 %v5484_v26, %v5187_v35  ;;  %v5582_v19 = vunpack.c.l.bf16 %v5170_v17 }
 0x9aa   : > { %v5570_v1 = vadd.f32 %v5566_v59, %v5562_v10  ;;  %v5502_v21 = vadd.f32 %v5433_v44, %v5186_v57  ;;  %v5435_v61 = vpop.f32.mrb[110].mxu0  ;;  %v5488_v3 = vpop.f32.mrb[110].mxu1  ;;  %v5504_v8 = vadd.f32 %v5486_v11, %v5188_v54  ;;  %v5585_v0 = vunpack.c.h.bf16 %v5169_v30 }
 0x9ab   : > { %v5511_v52 = vmul.f32 0.5, %v5501_v23  ;;  %v5505_v13 = vadd.f32 %v5435_v61, %v5189_v62  ;;  %v5437_v32 = vpop.f32.mrb[111].mxu0  ;;  %v5490_v6 = vpop.f32.mrb[111].mxu1  ;;  %v5554_v46 = vmul.f32 0.5, %v8410_v47  ;;  %v5507_v58 = vadd.f32 %v5488_v3, %v5191_v22  ;;  %v11549_v47 = vld [vmem:[#allocation30_spill] sm:$0xff] }
 0x9ac   : > { %8413 = vtanh.f32 %v5570_v1  ;;  %v5527_v4 = vmul.f32 0.5, %v5502_v21  ;;  %v5506_v36 = vadd.f32 %v5437_v32, %v5190_v56  ;;  %v5557_v62 = vadd.f32 0.5, %v5553_v43 }
 0x9ad   : > { %8415 = vtanh.f32 %v5511_v52  ;;  %v5512_v63 = vmul.f32 0.5, %v5505_v13  ;;  %v5586_v56 = vunpack.c.h.bf16 %v5170_v17  ;;  %v5547_v35 = vmul.f32 0.5, %v5504_v8 }
 0x9ae   : > { %8417 = vtanh.f32 %v5527_v4  ;;  %v5528_v38 = vmul.f32 0.5, %v5506_v36  ;;  %v5508_v1 = vadd.f32 %v5490_v6, %v5192_v16  ;;  %v5558_v52 = vadd.f32 0.5, %v5554_v46  ;;  %v11551_v46 = vld [vmem:[#allocation50_spill] sm:$0xff] }
 0x9af   : > { %8419 = vtanh.f32 %v5512_v63  ;;  %v5587_v22 = vunpack.c.h.bf16 %v5171_v20 }
 0x9b0   : > { %8421 = vtanh.f32 %v5503_v39  ;;  %v5548_v63 = vmul.f32 0.5, %v5508_v1 }
 0x9b1   : > { %8423 = vtanh.f32 %v5528_v38 }
 0x9b2   : > { %v5633_v59 = vpop.f32.mrb[112].mxu0  ;;  %v5686_v57 = vpop.f32.mrb[112].mxu1  ;;  %8425 = vtanh.f32 %v5507_v58 }
 0x9b3   : > { %v5705_v10 = vadd.f32 %v5633_v59, %v5581_v41  ;;  %v5635_v34 = vpop.f32.mrb[113].mxu0  ;;  %v5688_v26 = vpop.f32.mrb[113].mxu1  ;;  %v5707_v32 = vadd.f32 %v5686_v57, %v5583_v51  ;;  %v5588_v41 = vunpack.c.h.bf16 %v10590_v27  ;;  %v11552_v51 = vld [vmem:[#allocation49_spill] sm:$0xff] }
 0x9b4   : > { %v8412_v23 = vpop.eup %8411  ;;  %v5706_v44 = vadd.f32 %v5635_v34, %v5582_v19  ;;  %v5637_v11 = vpop.f32.mrb[114].mxu0  ;;  %v5708_v20 = vadd.f32 %v5688_v26, %v5584_v33 }
 0x9b5   : > { %v5690_v30 = vpop.f32.mrb[114].mxu1  ;;  %v10593_v53 = vmul.f32 %v8412_v23, %v5557_v62  ;;  %v5721_v21 = vmul.f32 0.5, %v5705_v10  ;;  %v5709_v54 = vadd.f32 %v5637_v11, %v5585_v0  ;;  %v5639_v61 = vpop.f32.mrb[115].mxu0 }
 0x9b6   : > { %v5692_v3 = vpop.f32.mrb[115].mxu1  ;;  %v5737_v13 = vmul.f32 0.5, %v5706_v44  ;;  %v5710_v4 = vadd.f32 %v5639_v61, %v5586_v56  ;;  %v8414_v36 = vpop.eup %8413  ;;  %v5711_v16 = vadd.f32 %v5690_v30, %v5587_v22  ;;  %v5757_v23 = vmul.f32 0.5, %v5708_v20  ;;  %v11553_v30 = vld [vmem:[#allocation39_spill] sm:$0xff] }
 0x9b7   : > { %11548 = vst [vmem:[#allocation72_spill] sm:$0xff] %v10593_v53  ;;  %8427 = vtanh.f32 %v5721_v21  ;;  %v5722_v17 = vmul.f32 0.5, %v5709_v54  ;;  %v5810_v43 = vmul.f32 %v10593_v53, %v11549_v47  ;;  %v8416_v6 = vpop.eup %8415  ;;  %v10598_v39 = vmul.f32 %v8414_v36, %v5558_v52  ;;  %v11554_v54 = vld [vmem:[#allocation38_spill] sm:$0xff] }
 0x9b8   : > { %8429 = vtanh.f32 %v5737_v13  ;;  %v5738_v8 = vmul.f32 0.5, %v5710_v4  ;;  %v8418_v38 = vpop.eup %8417  ;;  %v5519_v19 = vmul.f32 0.5, %v8416_v6  ;;  %v5922_v57 = vmul.f32 %v10593_v53, %v11552_v51  ;;  %v10609_v4 = vld [vmem:[#allocation2 + $0x3e8] sm:$0xff] }
 0x9b9   : > { %11550 = vst [vmem:[#allocation73_spill] sm:$0xff] %v10598_v39  ;;  %8431 = vtanh.f32 %v5547_v35  ;;  %5818 = vadd.xlane.f32.xlu0 %v5810_v43  ;;  %v5535_v0 = vmul.f32 0.5, %v8418_v38  ;;  %v5923_v27 = vmul.f32 %v10598_v39, %v11551_v46  ;;  %v8420_v58 = vpop.eup %8419  ;;  %v5712_v35 = vadd.f32 %v5692_v3, %v5588_v41 }
 0x9ba   : > { %8433 = vtanh.f32 %v5722_v17  ;;  %v5523_v59 = vadd.f32 0.5, %v5519_v19  ;;  %v8422_v62 = vpop.eup %8421  ;;  %v5520_v34 = vmul.f32 0.5, %v8420_v58  ;;  %v6051_v1 = vmul.f32 %v10598_v39, %v11553_v30  ;;  %v5173_v17 = vld [vmem:[#allocation2 + $0x3e0] sm:$0xff] }
 0x9bb   : > { %8435 = vtanh.f32 %v5707_v32  ;;  %v5539_v10 = vadd.f32 0.5, %v5535_v0  ;;  %5932 = vadd.xlane.f32.xlu1 %v5923_v27  ;;  %v8424_v26 = vpop.eup %8423  ;;  %v6050_v61 = vmul.f32 %v10593_v53, %v11554_v54  ;;  %v5589_v20 = vunpack.c.l.bf16 %v5173_v17  ;;  %v11556_v0 = vld [vmem:[#allocation62_spill] sm:$0xff] }
 0x9bc   : > { %8437 = vtanh.f32 %v5738_v8  ;;  %v5567_v56 = vmul.f32 %v8422_v62, %v5523_v59  ;;  %v5524_v33 = vadd.f32 0.5, %v5520_v34  ;;  %v5536_v11 = vmul.f32 0.5, %v8424_v26  ;;  %v8426_v21 = vpop.eup %8425  ;;  %v10619_v34 = vld [vmem:[#allocation2 + $0x3f8] sm:$0xff] }
 0x9bd   : > { %8439 = vtanh.f32 %v5548_v63  ;;  %5930 = vadd.xlane.f32.xlu0 %v5922_v57  ;;  %v5563_v44 = vmul.f32 %v5539_v10, %v10528_v40  ;;  %v5758_v40 = vmul.f32 0.5, %v5712_v35  ;;  %v11555_v63 = vld [vmem:[#allocation63_spill] sm:$0xff]  ;;  %v6178_v27 = vmul.f32 %v10593_v53, %v11556_v0  ;;  %v10617_v10 = vld [vmem:[#allocation2 + $0x3f0] sm:$0xff] }
 0x9be   : > { %8441 = vtanh.f32 %v5711_v16  ;;  %v5540_v22 = vadd.f32 0.5, %v5536_v11  ;;  %v5568_v32 = vmul.f32 %v8426_v21, %v5524_v33  ;;  %v6179_v8 = vmul.f32 %v10598_v39, %v11555_v63  ;;  %v11557_v35 = vld [vmem:[#allocation55_spill] sm:$0xff] }
 0x9bf   : > { %v5571_v13 = vadd.f32 %v5567_v56, %v5563_v44  ;;  %6060 = vadd.xlane.f32.xlu1 %v6051_v1  ;;  %8443 = vtanh.f32 %v5757_v23  ;;  %v5590_v16 = vunpack.c.l.bf16 %v10609_v4  ;;  %v6307_v44 = vmul.f32 %v10598_v39, %v11557_v35 }
 0x9c0   : > { %v5564_v43 = vmul.f32 %v5540_v22, %v10540_v60  ;;  %v5593_v60 = vunpack.c.h.bf16 %v5173_v17  ;;  %v5594_v17 = vunpack.c.h.bf16 %v10609_v4  ;;  %v6435_v4 = vmul.f32 %v10598_v39, %v10378_v18 }
 0x9c1   : > { %v8428_v52 = vpop.eup %8427  ;;  %6058 = vadd.xlane.f32.xlu0 %v6050_v61  ;;  %8445 = vtanh.f32 %v5571_v13  ;;  %v5591_v13 = vunpack.c.l.bf16 %v10617_v10 }
 0x9c2   : > { %v8430_v3 = vpop.eup %8429  ;;  %v5729_v36 = vmul.f32 0.5, %v8428_v52  ;;  %v5572_v59 = vadd.f32 %v5568_v32, %v5564_v43  ;;  %8447 = vtanh.f32 %v5758_v40  ;;  %v5592_v32 = vunpack.c.l.bf16 %v10619_v34 }
 0x9c3   : > { %v8432_v41 = vpop.eup %8431  ;;  %v5745_v6 = vmul.f32 0.5, %v8430_v3  ;;  %6188 = vadd.xlane.f32.xlu1 %v6179_v8  ;;  %v11558_v3 = vld [vmem:[#allocation54_spill] sm:$0xff] }
 0x9c4   : > { %v8434_v38 = vpop.eup %8433  ;;  %v5733_v19 = vadd.f32 0.5, %v5729_v36  ;;  %v5555_v56 = vmul.f32 0.5, %v8432_v41  ;;  %8449 = vtanh.f32 %v5572_v59  ;;  %v6306_v36 = vmul.f32 %v10593_v53, %v11558_v3 }
 0x9c5   : > { %v8436_v58 = vpop.eup %8435  ;;  %v5749_v57 = vadd.f32 0.5, %v5745_v6  ;;  %v5730_v62 = vmul.f32 0.5, %v8434_v38  ;;  %6186 = vadd.xlane.f32.xlu0 %v6178_v27 }
 0x9c6   : > { %v8438_v26 = vpop.eup %8437  ;;  %v5777_v23 = vmul.f32 %v8436_v58, %v5733_v19  ;;  %v5559_v38 = vadd.f32 0.5, %v5555_v56  ;;  %v5595_v58 = vunpack.c.h.bf16 %v10617_v10 }
 0x9c7   : > { %v8440_v33 = vpop.eup %8439  ;;  %v5773_v11 = vmul.f32 %v5749_v57, %v10549_v15  ;;  %v5734_v1 = vadd.f32 0.5, %v5730_v62  ;;  %v5746_v21 = vmul.f32 0.5, %v8438_v26  ;;  %v5643_v52 = vpop.f32.mrb[116].mxu0  ;;  %6316 = vadd.xlane.f32.xlu1 %v6307_v44 }
 0x9c8   : > { %v8442_v61 = vpop.eup %8441  ;;  %v5696_v22 = vpop.f32.mrb[116].mxu1  ;;  %v5713_v6 = vadd.f32 %v5643_v52, %v5589_v20 }
 0x9c9   : > { %v5781_v40 = vadd.f32 %v5777_v23, %v5773_v11  ;;  %v5750_v41 = vadd.f32 0.5, %v5746_v21  ;;  %v5778_v43 = vmul.f32 %v8442_v61, %v5734_v1  ;;  %v5645_v8 = vpop.f32.mrb[117].mxu0  ;;  %v5698_v15 = vpop.f32.mrb[117].mxu1  ;;  %6314 = vadd.xlane.f32.xlu0 %v6306_v36  ;;  %v5556_v1 = vmul.f32 0.5, %v8440_v33 }
 0x9ca   : > { %v5714_v19 = vadd.f32 %v5645_v8, %v5590_v16  ;;  %v5647_v27 = vpop.f32.mrb[118].mxu0  ;;  %v5700_v59 = vpop.f32.mrb[118].mxu1  ;;  %v5723_v62 = vmul.f32 0.5, %v5713_v6  ;;  %v5715_v44 = vadd.f32 %v5696_v22, %v5591_v13  ;;  %v6434_v16 = vmul.f32 %v10593_v53, %v10376_v37 }
 0x9cb   : > { %8451 = vtanh.f32 %v5781_v40  ;;  %v5774_v57 = vmul.f32 %v5750_v41, %v10554_v9  ;;  %v5717_v26 = vadd.f32 %v5647_v27, %v5593_v60  ;;  %v5649_v23 = vpop.f32.mrb[119].mxu0  ;;  %v5702_v20 = vpop.f32.mrb[119].mxu1  ;;  %6444 = vadd.xlane.f32.xlu1 %v6435_v4  ;;  %v6563_v60 = vmul.f32 %v10598_v39, %v10521_v49 }
 0x9cc   : > { %v8444_v11 = vpop.eup %8443  ;;  %v5739_v56 = vmul.f32 0.5, %v5714_v19  ;;  %8453 = vtanh.f32 %v5723_v62  ;;  %v5718_v52 = vadd.f32 %v5649_v23, %v5594_v17  ;;  %v5560_v13 = vadd.f32 0.5, %v5556_v1  ;;  %v11561_v1 = vld [vmem:[#allocation31_spill] sm:$0xff] }
 0x9cd   : > { %v8446_v10 = vpop.eup %8445  ;;  %v5782_v21 = vadd.f32 %v5778_v43, %v5774_v57  ;;  %v5724_v61 = vmul.f32 0.5, %v5717_v26  ;;  %6442 = vadd.xlane.f32.xlu0 %v6434_v16  ;;  %v5765_v22 = vmul.f32 0.5, %v8444_v11  ;;  %v6562_v40 = vmul.f32 %v10593_v53, %v10519_v2 }
 0x9ce   : > { %v10635_v36 = vmul.f32 %v8446_v10, %v5559_v38  ;;  %8455 = vtanh.f32 %v5739_v56  ;;  %v5740_v9 = vmul.f32 0.5, %v5718_v52  ;;  %v8448_v33 = vpop.eup %8447  ;;  %v5716_v43 = vadd.f32 %v5698_v15, %v5592_v32 }
 0x9cf   : > { %8457 = vtanh.f32 %v5782_v21  ;;  %v8450_v41 = vpop.eup %8449  ;;  %v5719_v17 = vadd.f32 %v5700_v59, %v5595_v58  ;;  %6572 = vadd.xlane.f32.xlu1 %v6563_v60  ;;  %v5596_v8 = vunpack.c.h.bf16 %v10619_v34  ;;  %v6691_v38 = vmul.f32 %v10598_v39, %v10598_v39  ;;  %v11560_v34 = vld [vmem:[#allocation35_spill] sm:$0xff]  ;;  %v11563_v60 = vld [vmem:[#allocation52_spill] sm:$0xff] }
 0x9d0   : > { %8459 = vtanh.f32 %v5715_v44  ;;  %v10641_v6 = vmul.f32 %v8450_v41, %v5560_v13  ;;  %v5769_v19 = vadd.f32 0.5, %v5765_v22  ;;  %v5766_v27 = vmul.f32 0.5, %v8448_v33 }
 0x9d1   : > { %8461 = vtanh.f32 %v5724_v61  ;;  %6570 = vadd.xlane.f32.xlu0 %v6562_v40  ;;  %v6690_v4 = vmul.f32 %v10593_v53, %v10593_v53  ;;  %v5759_v62 = vmul.f32 0.5, %v5716_v43  ;;  %v5720_v15 = vadd.f32 %v5702_v20, %v5596_v8  ;;  %v11564_v40 = vld [vmem:[#allocation34_spill] sm:$0xff] }
 0x9d2   : > { %8463 = vtanh.f32 %v5740_v9  ;;  %v5813_v59 = vmul.f32 %v10641_v6, %v11560_v34  ;;  %v5770_v23 = vadd.f32 0.5, %v5766_v27  ;;  %v5811_v44 = vmul.f32 %v10598_v39, %v11561_v1 }
 0x9d3   : > { %8465 = vtanh.f32 %v5719_v17  ;;  %6700 = vadd.xlane.f32.xlu1 %v6691_v38  ;;  %v5760_v20 = vmul.f32 0.5, %v5720_v15  ;;  %v5925_v33 = vmul.f32 %v10641_v6, %v11563_v60  ;;  %v5812_v41 = vmul.f32 %v10635_v36, %v11564_v40 }
 0x9d4   : > { %8467 = vtanh.f32 %v5759_v62 }
 0x9d5   : > { %v8452_v57 = vpop.eup %8451  ;;  %6698 = vadd.xlane.f32.xlu0 %v6690_v4  ;;  %8469 = vtanh.f32 %v5760_v20  ;;  %v11565_v4 = vld [vmem:[#allocation33_spill] sm:$0xff] }
 0x9d6   : > { %v10648_v32 = vmul.f32 %v8452_v57, %v5769_v19  ;;  %v8454_v58 = vpop.eup %8453  ;;  %v6053_v57 = vmul.f32 %v10641_v6, %v11565_v4 }
 0x9d7   : > { %v5731_v11 = vmul.f32 0.5, %v8454_v58  ;;  %5824 = vadd.xlane.f32.xlu1 %v5813_v59  ;;  %v11566_v58 = vld [vmem:[#allocation51_spill] sm:$0xff] }
 0x9d8   : > { %11559 = vst [vmem:[#allocation30_spill] sm:$0xff] %v10648_v32  ;;  %v8456_v26 = vpop.eup %8455  ;;  %v5924_v59 = vmul.f32 %v10635_v36, %v11566_v58 }
 0x9d9   : > { %v8458_v56 = vpop.eup %8457  ;;  %v5747_v16 = vmul.f32 0.5, %v8456_v26  ;;  %v5735_v61 = vadd.f32 0.5, %v5731_v11  ;;  %5820 = vadd.xlane.f32.xlu0 %v5811_v44 }
 0x9da   : > { %v8460_v10 = vpop.eup %8459  ;;  %v10654_v21 = vmul.f32 %v8458_v56, %v5770_v23  ;;  %v11567_v23 = vld [vmem:[#allocation65_spill] sm:$0xff]  ;;  %v11568_v56 = vld [vmem:[#allocation40_spill] sm:$0xff] }
 0x9db   : > { %v8462_v52 = vpop.eup %8461  ;;  %v5751_v9 = vadd.f32 0.5, %v5747_v16  ;;  %v5779_v13 = vmul.f32 %v8460_v10, %v5735_v61  ;;  %5936 = vadd.xlane.f32.xlu1 %v5925_v33  ;;  %v6181_v11 = vmul.f32 %v10641_v6, %v11567_v23  ;;  %v6052_v16 = vmul.f32 %v10635_v36, %v11568_v56  ;;  %v11569_v61 = vld [vmem:[#allocation57_spill] sm:$0xff] }
 0x9dc   : > { %11562 = vst [vmem:[#allocation50_spill] sm:$0xff] %v10654_v21  ;;  %v5732_v22 = vmul.f32 0.5, %v8462_v52  ;;  %v8464_v43 = vpop.eup %8463  ;;  %v6309_v20 = vmul.f32 %v10641_v6, %v11569_v61 }
 0x9dd   : > { %v5775_v17 = vmul.f32 %v5751_v9, %v10573_v28  ;;  %v5748_v38 = vmul.f32 0.5, %v8464_v43  ;;  %5822 = vadd.xlane.f32.xlu0 %v5812_v41  ;;  %v8466_v19 = vpop.eup %8465  ;;  %v11570_v9 = vld [vmem:[#allocation64_spill] sm:$0xff]  ;;  %v6437_v41 = vmul.f32 %v10641_v6, %v10436_v48 }
 0x9de   : > { %v5736_v8 = vadd.f32 0.5, %v5732_v22  ;;  %v8468_v28 = vpop.eup %8467 }
 0x9df   : > { %v5783_v27 = vadd.f32 %v5779_v13, %v5775_v17  ;;  %v5752_v62 = vadd.f32 0.5, %v5748_v38  ;;  %6064 = vadd.xlane.f32.xlu1 %v6053_v57  ;;  %v5767_v10 = vmul.f32 0.5, %v8468_v28  ;;  %v8470_v52 = vpop.eup %8469  ;;  %v11572_v17 = vld [vmem:[#allocation56_spill] sm:$0xff]  ;;  %v6436_v57 = vmul.f32 %v10635_v36, %v10434_v24 }
 0x9e0   : > { %v5780_v15 = vmul.f32 %v8466_v19, %v5736_v8  ;;  %v5768_v22 = vmul.f32 0.5, %v8470_v52  ;;  %v6308_v8 = vmul.f32 %v10635_v36, %v11572_v17  ;;  %v6565_v19 = vmul.f32 %v10641_v6, %v10559_v7  ;;  %v11577_v52 = vld [vmem:[#allocation32_spill] sm:$0xff] }
 0x9e1   : > { %8471 = vtanh.f32 %v5783_v27  ;;  %v5776_v26 = vmul.f32 %v5752_v62, %v10579_v31  ;;  %5934 = vadd.xlane.f32.xlu0 %v5924_v59  ;;  %v6180_v31 = vmul.f32 %v10635_v36, %v11570_v9  ;;  %v5771_v33 = vadd.f32 0.5, %v5767_v10  ;;  %v11576_v10 = vld [vmem:[#allocation29_spill] sm:$0xff] }
 0x9e2   : > { %v5772_v38 = vadd.f32 0.5, %v5768_v22  ;;  %v6564_v59 = vmul.f32 %v10635_v36, %v10557_v55  ;;  %v11579_v22 = vld [vmem:[#allocation43_spill] sm:$0xff] }
 0x9e3   : > { %v5784_v44 = vadd.f32 %v5780_v15, %v5776_v26  ;;  %6192 = vadd.xlane.f32.xlu1 %v6181_v11  ;;  %v6693_v15 = vmul.f32 %v10641_v6, %v10641_v6  ;;  %v11574_v26 = vld [vmem:[#allocation23_spill] sm:$0xff]  ;;  %v6692_v11 = vmul.f32 %v10635_v36, %v10635_v36 }
 0x9e4   : > { %v5814_v28 = vmul.f32 %v10648_v32, %v11574_v26 }
 0x9e5   : > { %8473 = vtanh.f32 %v5784_v44  ;;  %6062 = vadd.xlane.f32.xlu0 %v6052_v16  ;;  %v11575_v44 = vld [vmem:[#allocation24_spill] sm:$0xff] }
 0x9e6   : > { %v5815_v16 = vmul.f32 %v10654_v21, %v11575_v44 }
 0x9e7   : > { %6320 = vadd.xlane.f32.xlu1 %v6309_v20  ;;  %v5926_v20 = vmul.f32 %v10648_v32, %v11576_v10 }
 0x9e9   : > { %6190 = vadd.xlane.f32.xlu0 %v6180_v31  ;;  %v5927_v31 = vmul.f32 %v10654_v21, %v11577_v52 }
 0x9eb   : > { %v8472_v13 = vpop.eup %8471  ;;  %6448 = vadd.xlane.f32.xlu1 %v6437_v41  ;;  %v6055_v41 = vmul.f32 %v10654_v21, %v11579_v22 }
 0x9ec   : > { %v10676_v43 = vmul.f32 %v8472_v13, %v5771_v33  ;;  %v11578_v33 = vld [vmem:[#allocation42_spill] sm:$0xff] }
 0x9ed   : > { %6318 = vadd.xlane.f32.xlu0 %v6308_v8  ;;  %v6054_v13 = vmul.f32 %v10648_v32, %v11578_v33  ;;  %v11580_v8 = vld [vmem:[#allocation27_spill] sm:$0xff] }
 0x9ee   : > { %11571 = vst [vmem:[#allocation49_spill] sm:$0xff] %v10676_v43 }
 0x9ef   : > { %v8474_v27 = vpop.eup %8473  ;;  %6576 = vadd.xlane.f32.xlu1 %v6565_v19  ;;  %v11581_v19 = vld [vmem:[#allocation47_spill] sm:$0xff] }
 0x9f0   : > { %v10684_v62 = vmul.f32 %v8474_v27, %v5772_v38  ;;  %v6182_v38 = vmul.f32 %v10648_v32, %v11580_v8  ;;  %v6183_v27 = vmul.f32 %v10654_v21, %v11581_v19 }
 0x9f1   : > { %6446 = vadd.xlane.f32.xlu0 %v6436_v57  ;;  %v11582_v57 = vld [vmem:[#allocation58_spill] sm:$0xff] }
 0x9f2   : > { %11573 = vst [vmem:[#allocation39_spill] sm:$0xff] %v10684_v62 }
 0x9f3   : > { %6704 = vadd.xlane.f32.xlu1 %v6693_v15  ;;  %v6310_v15 = vmul.f32 %v10648_v32, %v11582_v57 }
 0x9f5   : > { %6574 = vadd.xlane.f32.xlu0 %v6564_v59  ;;  %v11583_v59 = vld [vmem:[#allocation59_spill] sm:$0xff] }
 0x9f7   : > { %5826 = vadd.xlane.f32.xlu1 %v5814_v28  ;;  %v6311_v28 = vmul.f32 %v10654_v21, %v11583_v59 }
 0x9f9   : > { %6702 = vadd.xlane.f32.xlu0 %v6692_v11  ;;  %v6438_v11 = vmul.f32 %v10648_v32, %v10452_v29 }
 0x9fb   : > { %5828 = vadd.xlane.f32.xlu1 %v5815_v16  ;;  %v6439_v16 = vmul.f32 %v10654_v21, %v10454_v12 }
 0x9fd   : > { %5938 = vadd.xlane.f32.xlu0 %v5926_v20  ;;  %v6566_v20 = vmul.f32 %v10648_v32, %v10566_v45  ;;  %v11591_v45 = vld [vmem:[#allocation53_spill] sm:$0xff] }
 0x9ff   : > { %5940 = vadd.xlane.f32.xlu1 %v5927_v31  ;;  %v6567_v31 = vmul.f32 %v10654_v21, %v10568_v5 }
 0xa01   : > { %6066 = vadd.xlane.f32.xlu0 %v6054_v13  ;;  %v6694_v13 = vmul.f32 %v10648_v32, %v10648_v32 }
 0xa03   : > { %6068 = vadd.xlane.f32.xlu1 %v6055_v41  ;;  %v6695_v41 = vmul.f32 %v10654_v21, %v10654_v21  ;;  %v11589_v21 = vld [vmem:[#allocation45_spill] sm:$0xff] }
 0xa05   : > { %6194 = vadd.xlane.f32.xlu0 %v6182_v38  ;;  %v11584_v38 = vld [vmem:[#allocation26_spill] sm:$0xff] }
 0xa07   : > { %6196 = vadd.xlane.f32.xlu1 %v6183_v27  ;;  %v5816_v27 = vmul.f32 %v10676_v43, %v11584_v38 }
 0xa09   : > { %6322 = vadd.xlane.f32.xlu0 %v6310_v15  ;;  %v11585_v15 = vld [vmem:[#allocation25_spill] sm:$0xff] }
 0xa0b   : > { %6324 = vadd.xlane.f32.xlu1 %v6311_v28  ;;  %v5817_v28 = vmul.f32 %v10684_v62, %v11585_v15 }
 0xa0d   : > { %6450 = vadd.xlane.f32.xlu0 %v6438_v11  ;;  %v11586_v11 = vld [vmem:[#allocation36_spill] sm:$0xff] }
 0xa0f   : > { %6452 = vadd.xlane.f32.xlu1 %v6439_v16  ;;  %v5928_v16 = vmul.f32 %v10676_v43, %v11586_v11 }
 0xa11   : > { %6578 = vadd.xlane.f32.xlu0 %v6566_v20  ;;  %v11587_v20 = vld [vmem:[#allocation37_spill] sm:$0xff] }
 0xa13   : > { %6580 = vadd.xlane.f32.xlu1 %v6567_v31  ;;  %v5929_v31 = vmul.f32 %v10684_v62, %v11587_v20  ;;  %v7827_v20 = vld [vmem:[#allocation10] sm:$0xff]  }
 0xa14   : > { %7442 = vmatprep.subr.bf16.mxu0 %v7827_v20  ;;  %7466 = vmatprep.subr.bf16.mxu1 %v7827_v20 }
 0xa15   : > { %6706 = vadd.xlane.f32.xlu0 %v6694_v13  ;;  %v11588_v13 = vld [vmem:[#allocation44_spill] sm:$0xff]  ;;  %7443 = vmatpush3.bf16.msra.mxu0 %v7827_v20 }
 0xa16   : > { %v6056_v32 = vmul.f32 %v10676_v43, %v11588_v13  ;;  %7474 = vmatpush3.bf16.msra.mxu1 %v7827_v20  ;;  %v6696_v20 = vmul.f32 %v10676_v43, %v10676_v43 }
 0xa17   : > { %6708 = vadd.xlane.f32.xlu1 %v6695_v41  ;;  %v6057_v41 = vmul.f32 %v10684_v62, %v11589_v21 }
 0xa19   : > { %5830 = vadd.xlane.f32.xlu0 %v5816_v27  ;;  %v11590_v27 = vld [vmem:[#allocation48_spill] sm:$0xff] }
 0xa1a   : > { %v6184_v5 = vmul.f32 %v10676_v43, %v11590_v27  ;;  %v6440_v27 = vmul.f32 %v10676_v43, %v10487_v25  ;;  %v7829_v25 = vld [vmem:[#allocation10 + $0x10] sm:$0xff]  }
 0xa1b   : > { %5832 = vadd.xlane.f32.xlu1 %v5817_v28  ;;  %v6185_v28 = vmul.f32 %v10684_v62, %v11591_v45 }
 0xa1d   : > { %5942 = vadd.xlane.f32.xlu0 %v5928_v16  ;;  %v11592_v16 = vld [vmem:[#allocation28_spill] sm:$0xff] }
 0xa1e   : > { %v6312_v11 = vmul.f32 %v10676_v43, %v11592_v16 }
 0xa1f   : > { %5944 = vadd.xlane.f32.xlu1 %v5929_v31  ;;  %v11593_v31 = vld [vmem:[#allocation60_spill] sm:$0xff] }
 0xa21   : > { %6070 = vadd.xlane.f32.xlu0 %v6056_v32  ;;  %v6313_v32 = vmul.f32 %v10684_v62, %v11593_v31 }
 0xa23   : > { %6072 = vadd.xlane.f32.xlu1 %v6057_v41  ;;  %v6441_v41 = vmul.f32 %v10684_v62, %v10489_v42 }
 0xa25   : > { %6198 = vadd.xlane.f32.xlu0 %v6184_v5  ;;  %v7828_v5 = vld [vmem:[#allocation10 + $0x8] sm:$0xff]  }
 0xa26   : > { %7444 = vmatprep.subr.bf16.mxu0 %v7828_v5  ;;  %7467 = vmatprep.subr.bf16.mxu1 %v7828_v5 }
 0xa27   : > { %6200 = vadd.xlane.f32.xlu1 %v6185_v28  ;;  %7445 = vmatpush3.bf16.msra.mxu0 %v7828_v5  ;;  %v6569_v28 = vmul.f32 %v10684_v62, %v10584_v50  ;;  %v7833_v50 = vld [vmem:[#allocation10 + $0x30] sm:$0xff]  }
 0xa28   : > { %7475 = vmatpush3.bf16.msra.mxu1 %v7828_v5  ;;  %7446 = vmatprep.subr.bf16.mxu0 %v7829_v25  ;;  %v7831_v5 = vld [vmem:[#allocation10 + $0x20] sm:$0xff]  }
 0xa29   : > { %6326 = vadd.xlane.f32.xlu0 %v6312_v11  ;;  %v6568_v11 = vmul.f32 %v10676_v43, %v10582_v14  ;;  %7468 = vmatprep.subr.bf16.mxu1 %v7829_v25 }
 0xa2b   : > { %6328 = vadd.xlane.f32.xlu1 %v6313_v32  ;;  %7447 = vmatpush3.bf16.msra.mxu0 %v7829_v25  ;;  %v7830_v32 = vld [vmem:[#allocation10 + $0x18] sm:$0xff]  }
 0xa2c   : > { %7476 = vmatpush3.bf16.msra.mxu1 %v7829_v25  ;;  %7448 = vmatprep.subr.bf16.mxu0 %v7830_v32 }
 0xa2d   : > { %6454 = vadd.xlane.f32.xlu0 %v6440_v27  ;;  %v6697_v27 = vmul.f32 %v10684_v62, %v10684_v62  ;;  %7469 = vmatprep.subr.bf16.mxu1 %v7830_v32 }
 0xa2f   : > { %6456 = vadd.xlane.f32.xlu1 %v6441_v41  ;;  %7449 = vmatpush3.bf16.msra.mxu0 %v7830_v32  ;;  %v7832_v41 = vld [vmem:[#allocation10 + $0x28] sm:$0xff]  }
 0xa30   : > { %7477 = vmatpush3.bf16.msra.mxu1 %v7830_v32  ;;  %7450 = vmatprep.subr.bf16.mxu0 %v7831_v5 }
 0xa31   : > { %6582 = vadd.xlane.f32.xlu0 %v6568_v11  ;;  %7470 = vmatprep.subr.bf16.mxu1 %v7831_v5 }
 0xa33   : > { %6584 = vadd.xlane.f32.xlu1 %v6569_v28  ;;  %7451 = vmatpush3.bf16.msra.mxu0 %v7831_v5 }
 0xa34   : > { %7478 = vmatpush3.bf16.msra.mxu1 %v7831_v5  ;;  %7452 = vmatprep.subr.bf16.mxu0 %v7832_v41 }
 0xa35   : > { %6710 = vadd.xlane.f32.xlu0 %v6696_v20  ;;  %7471 = vmatprep.subr.bf16.mxu1 %v7832_v41 }
 0xa37   : > { %6712 = vadd.xlane.f32.xlu1 %v6697_v27  ;;  %7453 = vmatpush3.bf16.msra.mxu0 %v7832_v41 }
 0xa38   : > { %7479 = vmatpush3.bf16.msra.mxu1 %v7832_v41  ;;  %7454 = vmatprep.subr.bf16.mxu0 %v7833_v50 }
 0xa39   : > { %7472 = vmatprep.subr.bf16.mxu1 %v7833_v50 }
 0xa3b   : > { %7455 = vmatpush3.bf16.msra.mxu0 %v7833_v50 }
 0xa3c   : > { %7480 = vmatpush3.bf16.msra.mxu1 %v7833_v50 }
 0xa46   : > { %v5819_v11 = vpop.xlane.xlu0 %5818 }
 0xa47   : > { %v5834_v28 = vsub.f32 -inf, %v5819_v11  ;;  %v5858_v20 = vsub.f32 %v5819_v11, %v5819_v11 }
 0xa48   : > { %v10756_v27 = vpop.xlane.xlu1 %5932 }
 0xa49   : > { %v5842_v62 = vmul.f32 1.442695, %v5834_v28  ;;  %v5866_v25 = vmul.f32 1.442695, %v5858_v20 }
 0xa4a   : > { %v5931_v43 = vpop.xlane.xlu0 %5930 }
 0xa4b   : > { %8475 = vpow2.f32 %v5842_v62  ;;  %v5946_v32 = vmax.f32 %v5819_v11, %v5931_v43 }
 0xa4c   : > { %8477 = vpow2.f32 %v5866_v25  ;;  %v10758_v5 = vpop.xlane.xlu1 %6060 }
 0xa4d   : > { %v5954_v14 = vsub.f32 %v5819_v11, %v5946_v32  ;;  %v5978_v42 = vsub.f32 %v5931_v43, %v5946_v32 }
 0xa4e   : > { %v6059_v31 = vpop.xlane.xlu0 %6058 }
 0xa4f   : > { %v5962_v16 = vmul.f32 1.442695, %v5954_v14  ;;  %v5986_v41 = vmul.f32 1.442695, %v5978_v42  ;;  %v6074_v28 = vmax.f32 %v5946_v32, %v6059_v31 }
 0xa50   : > { %v10760_v21 = vpop.xlane.xlu1 %6188 }
 0xa51   : > { %8479 = vpow2.f32 %v5962_v16  ;;  %v6082_v20 = vsub.f32 %v5946_v32, %v6074_v28  ;;  %v6106_v45 = vsub.f32 %v6059_v31, %v6074_v28 }
 0xa52   : > { %8481 = vpow2.f32 %v5986_v41  ;;  %v6187_v62 = vpop.xlane.xlu0 %6186 }
 0xa53   : > { %v6090_v25 = vmul.f32 1.442695, %v6082_v20  ;;  %v6114_v11 = vmul.f32 1.442695, %v6106_v45  ;;  %v6202_v43 = vmax.f32 %v6074_v28, %v6187_v62 }
 0xa54   : > { %v10762_v39 = vpop.xlane.xlu1 %6316 }
 0xa55   : > { %v8476_v13 = vpop.eup %8475  ;;  %8483 = vpow2.f32 %v6090_v25  ;;  %v6210_v15 = vsub.f32 %v6074_v28, %v6202_v43  ;;  %v6234_v38 = vsub.f32 %v6187_v62, %v6202_v43 }
 0xa56   : > { %v8478_v50 = vpop.eup %8477  ;;  %v5882_v14 = vmul.f32 0.0, %v8476_v13  ;;  %8485 = vpow2.f32 %v6114_v11  ;;  %v6315_v42 = vpop.xlane.xlu0 %6314 }
 0xa57   : > { %v5898_v16 = vmul.f32 %v8478_v50, %v11549_v47  ;;  %v6218_v31 = vmul.f32 1.442695, %v6210_v15  ;;  %v6242_v32 = vmul.f32 1.442695, %v6234_v38  ;;  %v6330_v49 = vmax.f32 %v6202_v43, %v6315_v42 }
 0xa58   : > { %v10765_v45 = vpop.xlane.xlu1 %6444  ;;  %v5890_v18 = vadd.f32 %v8478_v50, %v5882_v14 }
 0xa59   : > { %8487 = vpow2.f32 %v6218_v31  ;;  %v6338_v41 = vsub.f32 %v6202_v43, %v6330_v49  ;;  %v6362_v20 = vsub.f32 %v6315_v42, %v6330_v49  ;;  %v5906_v25 = vadd.f32 %v5898_v16, %v5882_v14 }
 0xa5a   : > { %8489 = vpow2.f32 %v6242_v32  ;;  %v6443_v28 = vpop.xlane.xlu0 %6442 }
 0xa5b   : > { %v8480_v62 = vpop.eup %8479  ;;  %v6346_v53 = vmul.f32 1.442695, %v6338_v41  ;;  %v6370_v12 = vmul.f32 1.442695, %v6362_v20  ;;  %v6458_v13 = vmax.f32 %v6330_v49, %v6443_v28 }
 0xa5c   : > { %v8482_v11 = vpop.eup %8481  ;;  %v6002_v29 = vmul.f32 %v8480_v62, %v5890_v18  ;;  %v6018_v59 = vmul.f32 %v8480_v62, %v5906_v25  ;;  %v10768_v43 = vpop.xlane.xlu1 %6572 }
 0xa5d   : > { %v6026_v47 = vmul.f32 %v8482_v11, %v11552_v51  ;;  %8491 = vpow2.f32 %v6346_v53  ;;  %v6466_v38 = vsub.f32 %v6330_v49, %v6458_v13  ;;  %v6490_v15 = vsub.f32 %v6443_v28, %v6458_v13 }
 0xa5e   : > { %v6010_v42 = vadd.f32 %v8482_v11, %v6002_v29  ;;  %8493 = vpow2.f32 %v6370_v12  ;;  %v6571_v50 = vpop.xlane.xlu0 %6570 }
 0xa5f   : > { %v8484_v14 = vpop.eup %8483  ;;  %v6034_v16 = vadd.f32 %v6026_v47, %v6018_v59  ;;  %v6474_v31 = vmul.f32 1.442695, %v6466_v38  ;;  %v6498_v32 = vmul.f32 1.442695, %v6490_v15  ;;  %v6586_v41 = vmax.f32 %v6458_v13, %v6571_v50 }
 0xa60   : > { %v8486_v20 = vpop.eup %8485  ;;  %v6130_v57 = vmul.f32 %v8484_v14, %v6010_v42  ;;  %v10771_v53 = vpop.xlane.xlu1 %6700 }
 0xa61   : > { %v6146_v19 = vmul.f32 %v8484_v14, %v6034_v16  ;;  %v6154_v18 = vmul.f32 %v8486_v20, %v11554_v54  ;;  %8495 = vpow2.f32 %v6474_v31  ;;  %v6594_v51 = vsub.f32 %v6458_v13, %v6586_v41  ;;  %11594 = vst [vmem:[#allocation38_spill] sm:$0xff] %v10771_v53 }
 0xa62   : > { %v6138_v49 = vadd.f32 %v8486_v20, %v6130_v57  ;;  %v6618_v25 = vsub.f32 %v6571_v50, %v6586_v41  ;;  %v6699_v28 = vpop.xlane.xlu0 %6698  ;;  %8497 = vpow2.f32 %v6498_v32 }
 0xa63   : > { %v8488_v29 = vpop.eup %8487  ;;  %v6162_v12 = vadd.f32 %v6154_v18, %v6146_v19  ;;  %v6602_v62 = vmul.f32 1.442695, %v6594_v51  ;;  %v6714_v59 = vmax.f32 %v6586_v41, %v6699_v28 }
 0xa64   : > { %v8490_v11 = vpop.eup %8489  ;;  %v6258_v47 = vmul.f32 %v8488_v29, %v6138_v49  ;;  %v6626_v38 = vmul.f32 1.442695, %v6618_v25  ;;  %v5825_v14 = vpop.xlane.xlu1 %5824 }
 0xa65   : > { %v6274_v15 = vmul.f32 %v8488_v29, %v6162_v12  ;;  %v6282_v42 = vmul.f32 %v8490_v11, %v11556_v0  ;;  %8499 = vpow2.f32 %v6602_v62  ;;  %v6722_v54 = vsub.f32 %v6586_v41, %v6714_v59 }
 0xa66   : > { %v6266_v13 = vadd.f32 %v8490_v11, %v6258_v47  ;;  %8501 = vpow2.f32 %v6626_v38  ;;  %v6746_v16 = vsub.f32 %v6699_v28, %v6714_v59  ;;  %v5837_v57 = vsub.f32 -inf, %v5825_v14  ;;  %v5821_v50 = vpop.xlane.xlu0 %5820 }
 0xa67   : > { %v8492_v31 = vpop.eup %8491  ;;  %v6290_v20 = vadd.f32 %v6282_v42, %v6274_v15  ;;  %v6730_v19 = vmul.f32 1.442695, %v6722_v54  ;;  %v5861_v32 = vsub.f32 %v5825_v14, %v5825_v14  ;;  %v5835_v18 = vsub.f32 -inf, %v5821_v50 }
 0xa68   : > { %v8494_v51 = vpop.eup %8493  ;;  %v6386_v53 = vmul.f32 %v8492_v31, %v6266_v13  ;;  %v6754_v49 = vmul.f32 1.442695, %v6746_v16  ;;  %v5848_v25 = vmul.f32 1.442695, %v5837_v57  ;;  %v5859_v29 = vsub.f32 %v5821_v50, %v5821_v50  ;;  %v5937_v62 = vpop.xlane.xlu1 %5936 }
 0xa69   : > { %v6402_v12 = vmul.f32 %v8492_v31, %v6290_v20  ;;  %v6410_v0 = vmul.f32 %v8494_v51, %v11558_v3  ;;  %8503 = vpow2.f32 %v6730_v19  ;;  %v5872_v41 = vmul.f32 1.442695, %v5861_v32 }
 0xa6a   : > { %v6394_v11 = vadd.f32 %v8494_v51, %v6386_v53  ;;  %8505 = vpow2.f32 %v6754_v49  ;;  %v5844_v28 = vmul.f32 1.442695, %v5835_v18  ;;  %v5868_v59 = vmul.f32 1.442695, %v5859_v29  ;;  %v10775_v47 = vpop.xlane.xlu0 %5822 }
 0xa6b   : > { %v8496_v38 = vpop.eup %8495  ;;  %v6418_v15 = vadd.f32 %v6410_v0, %v6402_v12  ;;  %8507 = vpow2.f32 %v5848_v25  ;;  %v5947_v42 = vmax.f32 %v5821_v50, %v10756_v27  ;;  %v10778_v54 = vmax.f32 %v5825_v14, %v5937_v62 }
 0xa6c   : > { %v6514_v13 = vmul.f32 %v8496_v38, %v6394_v11  ;;  %8509 = vpow2.f32 %v5872_v41  ;;  %v8498_v16 = vpop.eup %8497  ;;  %v5836_v57 = vsub.f32 -inf, %v10775_v47  ;;  %v10781_v53 = vpop.xlane.xlu1 %6064 }
 0xa6d   : > { %8511 = vpow2.f32 %v5844_v28  ;;  %v5955_v3 = vsub.f32 %v5821_v50, %v5947_v42  ;;  %v5979_v20 = vsub.f32 %v10756_v27, %v5947_v42  ;;  %v6075_v19 = vmax.f32 %v5947_v42, %v10758_v5 }
 0xa6e   : > { %v6522_v31 = vadd.f32 %v8498_v16, %v6514_v13  ;;  %8513 = vpow2.f32 %v5868_v59  ;;  %v6530_v18 = vmul.f32 %v8496_v38, %v6418_v15  ;;  %v5957_v49 = vsub.f32 %v5825_v14, %v10778_v54 }
 0xa6f   : > { %v10785_v32 = vpop.eup %8499  ;;  %v5964_v51 = vmul.f32 1.442695, %v5955_v3  ;;  %v5981_v25 = vsub.f32 %v5937_v62, %v10778_v54  ;;  %v5988_v12 = vmul.f32 1.442695, %v5979_v20  ;;  %v6083_v0 = vsub.f32 %v5947_v42, %v6075_v19 }
 0xa70   : > { %11595 = vst [vmem:[#allocation63_spill] sm:$0xff] %v10785_v32  ;;  %v8502_v29 = vpop.eup %8501  ;;  %v6642_v50 = vmul.f32 %v10785_v32, %v6522_v31  ;;  %v6107_v41 = vsub.f32 %v10758_v5, %v6075_v19  ;;  %v6538_v11 = vmul.f32 %v8498_v16, %v10376_v37  ;;  %v6203_v27 = vmax.f32 %v6075_v19, %v10760_v21  ;;  %v10793_v59 = vpop.xlane.xlu1 %6192 }
 0xa71   : > { %8515 = vpow2.f32 %v5964_v51  ;;  %v5968_v28 = vmul.f32 1.442695, %v5957_v49  ;;  %v6092_v14 = vmul.f32 1.442695, %v6083_v0  ;;  %v5992_v16 = vmul.f32 1.442695, %v5981_v25  ;;  %v5935_v25 = vpop.xlane.xlu0 %5934 }
 0xa72   : > { %v6650_v38 = vadd.f32 %v8502_v29, %v6642_v50  ;;  %8517 = vpow2.f32 %v5988_v12  ;;  %v6116_v15 = vmul.f32 1.442695, %v6107_v41  ;;  %v6211_v13 = vsub.f32 %v6075_v19, %v6203_v27 }
 0xa73   : > { %v10795_v62 = vpop.eup %8503  ;;  %v6235_v3 = vsub.f32 %v10760_v21, %v6203_v27  ;;  %v10799_v42 = vmax.f32 %v6203_v27, %v10762_v39  ;;  %8519 = vpow2.f32 %v5968_v28  ;;  %v5860_v31 = vsub.f32 %v10775_v47, %v10775_v47 }
 0xa74   : > { %11596 = vst [vmem:[#allocation62_spill] sm:$0xff] %v10795_v62  ;;  %v10801_v37 = vpop.eup %8505  ;;  %v6770_v5 = vmul.f32 %v10795_v62, %v6650_v38  ;;  %8521 = vpow2.f32 %v6092_v14  ;;  %v10806_v51 = vadd.f32 %v6538_v11, %v6530_v18  ;;  %v6220_v19 = vmul.f32 1.442695, %v6211_v13  ;;  %v10809_v49 = vpop.xlane.xlu1 %6320 }
 0xa75   : > { %11597 = vst [vmem:[#allocation55_spill] sm:$0xff] %v10801_v37  ;;  %v8508_v20 = vpop.eup %8507  ;;  %8523 = vpow2.f32 %v6116_v15  ;;  %v6339_v21 = vsub.f32 %v6203_v27, %v10799_v42  ;;  %v6363_v41 = vsub.f32 %v10762_v39, %v10799_v42  ;;  %v10815_v38 = vmul.f32 %v8502_v29, %v10519_v2 }
 0xa76   : > { %11598 = vst [vmem:[#allocation54_spill] sm:$0xff] %v10806_v51  ;;  %v8510_v50 = vpop.eup %8509  ;;  %v6778_v12 = vadd.f32 %v10801_v37, %v6770_v5  ;;  %v5885_v0 = vmul.f32 0.0, %v8508_v20  ;;  %8525 = vpow2.f32 %v5992_v16  ;;  %v6244_v11 = vmul.f32 1.442695, %v6235_v3 }
 0xa77   : > { %v8512_v28 = vpop.eup %8511  ;;  %11599 = vst [vmem:[#allocation35_spill] sm:$0xff] %v10815_v38  ;;  %v5901_v18 = vmul.f32 %v8510_v50, %v11560_v34  ;;  %v5846_v14 = vmul.f32 1.442695, %v5836_v57  ;;  %8527 = vpow2.f32 %v6220_v19  ;;  %v6348_v13 = vmul.f32 1.442695, %v6339_v21 }
 0xa78   : > { %v8514_v27 = vpop.eup %8513  ;;  %v5883_v15 = vmul.f32 0.0, %v8512_v28  ;;  %v5870_v62 = vmul.f32 1.442695, %v5860_v31  ;;  %8529 = vrcp.f32 %v6778_v12  ;;  %v5893_v5 = vadd.f32 %v8510_v50, %v5885_v0  ;;  %v10824_v34 = vpop.xlane.xlu1 %6448 }
 0xa79   : > { %v5899_v20 = vmul.f32 %v8514_v27, %v11561_v1  ;;  %v6077_v39 = vmax.f32 %v10778_v54, %v10781_v53  ;;  %v5909_v16 = vadd.f32 %v5901_v18, %v5885_v0  ;;  %v6372_v2 = vmul.f32 1.442695, %v6363_v41  ;;  %v10831_v0 = vpop.xlane.xlu0 %6062  ;;  %v7834_v41 = vld [vmem:[#allocation10 + $0x38] sm:$0xff]  }
 0xa7a   : > { %v5891_v37 = vadd.f32 %v8514_v27, %v5883_v15  ;;  %v10822_v29 = vmax.f32 %v10775_v47, %v5935_v25  ;;  %8531 = vpow2.f32 %v6244_v11  ;;  %7456 = vmatprep.subr.bf16.mxu0 %v7834_v41  ;;  %7473 = vmatprep.subr.bf16.mxu1 %v7834_v41 }
 0xa7b   : > { %v8516_v57 = vpop.eup %8515  ;;  %v5907_v3 = vadd.f32 %v5899_v20, %v5883_v15  ;;  %v6085_v31 = vsub.f32 %v10778_v54, %v6077_v39  ;;  %v6109_v19 = vsub.f32 %v10781_v53, %v6077_v39  ;;  %8533 = vpow2.f32 %v5846_v14  ;;  %7457 = vmatpush3.bf16.msra.mxu0 %v7834_v41  ;;  %7481 = vmatpush3.bf16.msra.mxu1 %v7834_v41 }
 0xa7c   : > { %v8518_v21 = vpop.eup %8517  ;;  %v6003_v1 = vmul.f32 %v8516_v57, %v5891_v37  ;;  %v5956_v50 = vsub.f32 %v10775_v47, %v10822_v29  ;;  %v5980_v12 = vsub.f32 %v5935_v25, %v10822_v29  ;;  %8535 = vpow2.f32 %v5870_v62  ;;  %v10835_v62 = vpop.xlane.xlu1 %6576 }
 0xa7d   : > { %v8520_v28 = vpop.eup %8519  ;;  %v6019_v18 = vmul.f32 %v8516_v57, %v5907_v3  ;;  %v6027_v27 = vmul.f32 %v8518_v21, %v11551_v46  ;;  %v6096_v11 = vmul.f32 1.442695, %v6085_v31  ;;  %8537 = vpow2.f32 %v6348_v13 }
 0xa7e   : > { %v8522_v54 = vpop.eup %8521  ;;  %v6011_v15 = vadd.f32 %v8518_v21, %v6003_v1  ;;  %v6005_v53 = vmul.f32 %v8520_v28, %v5893_v5  ;;  %v6120_v37 = vmul.f32 1.442695, %v6109_v19  ;;  %v5966_v25 = vmul.f32 1.442695, %v5956_v50 }
 0xa7f   : > { %v8524_v14 = vpop.eup %8523  ;;  %v6035_v47 = vadd.f32 %v6027_v27, %v6019_v18  ;;  %8539 = vpow2.f32 %v6096_v11  ;;  %v5990_v20 = vmul.f32 1.442695, %v5980_v12  ;;  %v6021_v3 = vmul.f32 %v8520_v28, %v5909_v16  ;;  %v6191_v12 = vpop.xlane.xlu0 %6190 }
 0xa80   : > { %v8526_v38 = vpop.eup %8525  ;;  %v6131_v57 = vmul.f32 %v8522_v54, %v6011_v15  ;;  %8541 = vpow2.f32 %v6120_v37  ;;  %v6205_v46 = vmax.f32 %v6077_v39, %v10793_v59  ;;  %v6155_v5 = vmul.f32 %v8524_v14, %v11553_v30 }
 0xa81   : > { %v6147_v13 = vmul.f32 %v8522_v54, %v6035_v47  ;;  %v6029_v31 = vmul.f32 %v8526_v38, %v11563_v60  ;;  %8543 = vpow2.f32 %v5966_v25  ;;  %v8528_v19 = vpop.eup %8527  ;;  %v6013_v16 = vadd.f32 %v8526_v38, %v6005_v53  ;;  %v10855_v47 = vpop.xlane.xlu1 %6704 }
 0xa82   : > { %v6139_v21 = vadd.f32 %v8524_v14, %v6131_v57  ;;  %8545 = vpow2.f32 %v5990_v20  ;;  %v6213_v1 = vsub.f32 %v6077_v39, %v6205_v46  ;;  %v6237_v50 = vsub.f32 %v10793_v59, %v6205_v46  ;;  %v10840_v41 = vpop.eup %8529 }
 0xa83   : > { %11600 = vst [vmem:[#allocation31_spill] sm:$0xff] %v10840_v41  ;;  %8547 = vpow2.f32 %v6372_v2  ;;  %v6076_v28 = vmax.f32 %v10822_v29, %v10831_v0  ;;  %v10845_v18 = vmax.f32 %v6205_v46, %v10809_v49  ;;  %v6163_v30 = vadd.f32 %v6155_v5, %v6147_v13 }
 0xa84   : > { %v6259_v60 = vmul.f32 %v8528_v19, %v6139_v21  ;;  %v6224_v27 = vmul.f32 1.442695, %v6213_v1  ;;  %v6248_v11 = vmul.f32 1.442695, %v6237_v50  ;;  %v10847_v54 = vpop.eup %8531  ;;  %v6037_v39 = vadd.f32 %v6029_v31, %v6021_v3 }
 0xa85   : > { %v6084_v59 = vsub.f32 %v10822_v29, %v6076_v28  ;;  %v6108_v15 = vsub.f32 %v10831_v0, %v6076_v28  ;;  %v6341_v2 = vsub.f32 %v6205_v46, %v10845_v18  ;;  %v8534_v38 = vpop.eup %8533  ;;  %v6365_v37 = vsub.f32 %v10809_v49, %v10845_v18  ;;  %v6319_v49 = vpop.xlane.xlu0 %6318 }
 0xa86   : > { %v6267_v53 = vadd.f32 %v10847_v54, %v6259_v60  ;;  %8549 = vpow2.f32 %v6224_v27  ;;  %v6204_v14 = vmax.f32 %v6076_v28, %v6191_v12  ;;  %v8536_v25 = vpop.eup %8535  ;;  %v5884_v20 = vmul.f32 0.0, %v8534_v38 }
 0xa87   : > { %8551 = vpow2.f32 %v6248_v11  ;;  %v6094_v57 = vmul.f32 1.442695, %v6084_v59  ;;  %v10859_v29 = vmax.f32 %v10799_v42, %v10765_v45  ;;  %v10861_v0 = vpop.eup %8537  ;;  %v10863_v3 = vmul.f32 %v8528_v19, %v6163_v30 }
 0xa88   : > { %v5900_v46 = vmul.f32 %v8536_v25, %v11564_v40  ;;  %v6118_v13 = vmul.f32 1.442695, %v6108_v15  ;;  %v6352_v5 = vmul.f32 1.442695, %v6341_v2  ;;  %v10867_v21 = vmul.f32 %v10861_v0, %v6267_v53  ;;  %v10870_v53 = vpop.xlane.xlu1 %5826 }
 0xa89   : > { %v8540_v31 = vpop.eup %8539  ;;  %8553 = vpow2.f32 %v6094_v57  ;;  %v6376_v1 = vmul.f32 1.442695, %v6365_v37  ;;  %v6212_v50 = vsub.f32 %v6076_v28, %v6204_v14  ;;  %v5892_v27 = vadd.f32 %v8536_v25, %v5884_v20 }
 0xa8a   : > { %v8542_v60 = vpop.eup %8541  ;;  %v5908_v11 = vadd.f32 %v5900_v46, %v5884_v20  ;;  %v6133_v59 = vmul.f32 %v8540_v31, %v6013_v16  ;;  %v6149_v38 = vmul.f32 %v8540_v31, %v6037_v39  ;;  %8555 = vpow2.f32 %v6118_v13  ;;  %v6447_v20 = vpop.xlane.xlu0 %6446 }
 0xa8b   : > { %v8544_v41 = vpop.eup %8543  ;;  %v6157_v19 = vmul.f32 %v8542_v60, %v11565_v4  ;;  %v6222_v40 = vmul.f32 1.442695, %v6212_v50  ;;  %v6236_v30 = vsub.f32 %v6191_v12, %v6204_v14  ;;  %8557 = vpow2.f32 %v6352_v5 }
 0xa8c   : > { %v8546_v15 = vpop.eup %8545  ;;  %v6141_v2 = vadd.f32 %v8542_v60, %v6133_v59  ;;  %v6004_v32 = vmul.f32 %v8544_v41, %v5892_v27  ;;  %v6020_v51 = vmul.f32 %v8544_v41, %v5908_v11  ;;  %8559 = vpow2.f32 %v6376_v1 }
 0xa8d   : > { %v10872_v37 = vpop.eup %8547  ;;  %v6165_v28 = vadd.f32 %v6157_v19, %v6149_v38  ;;  %v6028_v25 = vmul.f32 %v8546_v15, %v11566_v58  ;;  %v6246_v16 = vmul.f32 1.442695, %v6236_v30  ;;  %8561 = vpow2.f32 %v6222_v40 }
 0xa8e   : > { %v6012_v39 = vadd.f32 %v8546_v15, %v6004_v32  ;;  %v6461_v4 = vmax.f32 %v10845_v18, %v10824_v34  ;;  %v6332_v12 = vmax.f32 %v6204_v14, %v6319_v49  ;;  %v5838_v41 = vsub.f32 -inf, %v10870_v53 }
 0xa8f   : > { %v6036_v57 = vadd.f32 %v6028_v25, %v6020_v51  ;;  %8563 = vpow2.f32 %v6246_v16  ;;  %v5862_v46 = vsub.f32 %v10870_v53, %v10870_v53 }
 0xa90   : > { %v8550_v13 = vpop.eup %8549  ;;  %v6469_v5 = vsub.f32 %v10845_v18, %v6461_v4  ;;  %v6493_v58 = vsub.f32 %v10824_v34, %v6461_v4  ;;  %v6340_v31 = vsub.f32 %v6204_v14, %v6332_v12  ;;  %v6364_v32 = vsub.f32 %v6319_v49, %v6332_v12 }
 0xa91   : > { %v8552_v1 = vpop.eup %8551  ;;  %v6261_v50 = vmul.f32 %v8550_v13, %v6141_v2  ;;  %v6277_v60 = vmul.f32 %v8550_v13, %v6165_v28  ;;  %v6589_v27 = vmax.f32 %v6461_v4, %v10835_v62  ;;  %v10883_v11 = vmax.f32 %v6332_v12, %v6447_v20 }
 0xa92   : > { %v6285_v51 = vmul.f32 %v8552_v1, %v11567_v23  ;;  %v6480_v59 = vmul.f32 1.442695, %v6469_v5  ;;  %v6504_v38 = vmul.f32 1.442695, %v6493_v58  ;;  %v6350_v19 = vmul.f32 1.442695, %v6340_v31  ;;  %v6575_v23 = vpop.xlane.xlu0 %6574 }
 0xa93   : > { %v8554_v40 = vpop.eup %8553  ;;  %v6269_v30 = vadd.f32 %v8552_v1, %v6261_v50  ;;  %v6374_v15 = vmul.f32 1.442695, %v6364_v32  ;;  %v6597_v18 = vsub.f32 %v6461_v4, %v6589_v27  ;;  %v6621_v34 = vsub.f32 %v10835_v62, %v6589_v27 }
 0xa94   : > { %v6293_v14 = vadd.f32 %v6285_v51, %v6277_v60  ;;  %v6132_v49 = vmul.f32 %v8554_v40, %v6012_v39  ;;  %v6148_v25 = vmul.f32 %v8554_v40, %v6036_v57  ;;  %8565 = vpow2.f32 %v6480_v59  ;;  %v8556_v2 = vpop.eup %8555 }
 0xa95   : > { %8567 = vpow2.f32 %v6504_v38  ;;  %v6608_v28 = vmul.f32 1.442695, %v6597_v18  ;;  %v6632_v16 = vmul.f32 1.442695, %v6621_v34  ;;  %v6468_v13 = vsub.f32 %v6332_v12, %v10883_v11  ;;  %v8558_v5 = vpop.eup %8557 }
 0xa96   : > { %v6140_v58 = vadd.f32 %v8556_v2, %v6132_v49  ;;  %v6156_v31 = vmul.f32 %v8556_v2, %v11568_v56  ;;  %8569 = vpow2.f32 %v6350_v19  ;;  %v6492_v4 = vsub.f32 %v6447_v20, %v10883_v11  ;;  %v8560_v32 = vpop.eup %8559  ;;  %v6703_v34 = vpop.xlane.xlu0 %6702 }
 0xa97   : > { %v6389_v62 = vmul.f32 %v8558_v5, %v6269_v30  ;;  %v6405_v1 = vmul.f32 %v8558_v5, %v6293_v14  ;;  %8571 = vpow2.f32 %v6374_v15  ;;  %v6478_v39 = vmul.f32 1.442695, %v6468_v13  ;;  %v8562_v57 = vpop.eup %8561  ;;  %v10893_v30 = vpop.xlane.xlu1 %5828 }
 0xa98   : > { %v6164_v50 = vadd.f32 %v6156_v31, %v6148_v25  ;;  %v6413_v60 = vmul.f32 %v8560_v32, %v11569_v61  ;;  %8573 = vpow2.f32 %v6608_v28  ;;  %v6502_v51 = vmul.f32 1.442695, %v6492_v4 }
 0xa99   : > { %v8564_v12 = vpop.eup %8563  ;;  %v6397_v59 = vadd.f32 %v8560_v32, %v6389_v62  ;;  %v6260_v38 = vmul.f32 %v8562_v57, %v6140_v58  ;;  %8575 = vpow2.f32 %v6632_v16  ;;  %v6717_v56 = vmax.f32 %v6589_v27, %v10855_v47 }
 0xa9a   : > { %v6421_v19 = vadd.f32 %v6413_v60, %v6405_v1  ;;  %v6276_v40 = vmul.f32 %v8562_v57, %v6164_v50  ;;  %v6284_v20 = vmul.f32 %v8564_v12, %v11570_v9  ;;  %8577 = vpow2.f32 %v6478_v39 }
 0xa9b   : > { %v6268_v15 = vadd.f32 %v8564_v12, %v6260_v38  ;;  %8579 = vpow2.f32 %v6502_v51  ;;  %v6725_v18 = vsub.f32 %v6589_v27, %v6717_v56  ;;  %v6749_v61 = vsub.f32 %v10855_v47, %v6717_v56  ;;  %v5939_v38 = vpop.xlane.xlu0 %5938  ;;  %v5941_v56 = vpop.xlane.xlu1 %5940 }
 0xa9c   : > { %v6292_v14 = vadd.f32 %v6284_v20, %v6276_v40  ;;  %v6588_v49 = vmax.f32 %v10883_v11, %v6575_v23  ;;  %v5850_v25 = vmul.f32 1.442695, %v5838_v41  ;;  %v5874_v2 = vmul.f32 1.442695, %v5862_v46 }
 0xa9d   : > { %v6736_v28 = vmul.f32 1.442695, %v6725_v18  ;;  %v6760_v16 = vmul.f32 1.442695, %v6749_v61  ;;  %v5839_v9 = vsub.f32 -inf, %v10893_v30  ;;  %v5863_v13 = vsub.f32 %v10893_v30, %v10893_v30 }
 0xa9e   : > { %v8566_v5 = vpop.eup %8565  ;;  %v6596_v27 = vsub.f32 %v10883_v11, %v6588_v49  ;;  %v6620_v58 = vsub.f32 %v6575_v23, %v6588_v49  ;;  %8581 = vpow2.f32 %v5850_v25  ;;  %v6716_v47 = vmax.f32 %v6588_v49, %v6703_v34 }
 0xa9f   : > { %v8568_v31 = vpop.eup %8567  ;;  %v6517_v4 = vmul.f32 %v8566_v5, %v6397_v59  ;;  %v6533_v32 = vmul.f32 %v8566_v5, %v6421_v19  ;;  %8583 = vpow2.f32 %v6736_v28  ;;  %v5852_v62 = vmul.f32 1.442695, %v5839_v9 }
 0xaa0   : > { %v8570_v41 = vpop.eup %8569  ;;  %v6541_v46 = vmul.f32 %v8568_v31, %v10436_v48  ;;  %8585 = vpow2.f32 %v6760_v16  ;;  %v6606_v1 = vmul.f32 1.442695, %v6596_v27  ;;  %v6630_v39 = vmul.f32 1.442695, %v6620_v58 }
 0xaa1   : > { %v8572_v57 = vpop.eup %8571  ;;  %v6525_v50 = vadd.f32 %v8568_v31, %v6517_v4  ;;  %v6388_v60 = vmul.f32 %v8570_v41, %v6268_v15  ;;  %v6404_v51 = vmul.f32 %v8570_v41, %v6292_v14  ;;  %8587 = vpow2.f32 %v5874_v2  ;;  %v6067_v4 = vpop.xlane.xlu0 %6066 }
 0xaa2   : > { %v8574_v11 = vpop.eup %8573  ;;  %v6549_v23 = vadd.f32 %v6541_v46, %v6533_v32  ;;  %v6412_v12 = vmul.f32 %v8572_v57, %v11572_v17  ;;  %8589 = vpow2.f32 %v6606_v1  ;;  %v6724_v59 = vsub.f32 %v6588_v49, %v6716_v47  ;;  %v10918_v32 = vpop.xlane.xlu1 %6068 }
 0xaa3   : > { %v8576_v19 = vpop.eup %8575  ;;  %v6396_v40 = vadd.f32 %v8572_v57, %v6388_v60  ;;  %v6645_v20 = vmul.f32 %v8574_v11, %v6525_v50  ;;  %8591 = vpow2.f32 %v6630_v39  ;;  %v6748_v48 = vsub.f32 %v6703_v34, %v6716_v47 }
 0xaa4   : > { %v8578_v18 = vpop.eup %8577  ;;  %v6420_v61 = vadd.f32 %v6412_v12, %v6404_v51  ;;  %v6661_v25 = vmul.f32 %v8574_v11, %v6549_v23  ;;  %v6669_v15 = vmul.f32 %v8576_v19, %v10559_v7  ;;  %v6734_v14 = vmul.f32 1.442695, %v6724_v59 }
 0xaa5   : > { %v8580_v2 = vpop.eup %8579  ;;  %v6283_v28 = vmul.f32 %v10847_v54, %v11555_v63  ;;  %v6516_v17 = vmul.f32 %v8578_v18, %v6396_v40  ;;  %v6758_v16 = vmul.f32 1.442695, %v6748_v48  ;;  %8593 = vpow2.f32 %v5852_v62 }
 0xaa6   : > { %v6653_v49 = vadd.f32 %v8576_v19, %v6645_v20  ;;  %v6532_v9 = vmul.f32 %v8578_v18, %v6420_v61  ;;  %v6540_v5 = vmul.f32 %v8580_v2, %v10434_v24  ;;  %8595 = vpow2.f32 %v6734_v14  ;;  %v6195_v61 = vpop.xlane.xlu0 %6194 }
 0xaa7   : > { %v6291_v34 = vadd.f32 %v6283_v28, %v10863_v3  ;;  %8597 = vpow2.f32 %v6758_v16  ;;  %v5876_v27 = vmul.f32 1.442695, %v5863_v13  ;;  %v5950_v58 = vmax.f32 %v10870_v53, %v5939_v38 }
 0xaa8   : > { %v8582_v7 = vpop.eup %8581  ;;  %v10913_v47 = vadd.f32 %v10872_v37, %v10867_v21  ;;  %v6677_v63 = vadd.f32 %v6669_v15, %v6661_v25  ;;  %v6524_v54 = vadd.f32 %v8580_v2, %v6516_v17  ;;  %v10916_v31 = vmax.f32 %v10893_v30, %v5941_v56  ;;  %v6197_v25 = vpop.xlane.xlu1 %6196 }
 0xaa9   : > { %v8584_v24 = vpop.eup %8583  ;;  %v6548_v62 = vadd.f32 %v6540_v5, %v6532_v9  ;;  %8599 = vpow2.f32 %v5876_v27  ;;  %v5958_v3 = vsub.f32 %v10870_v53, %v5950_v58  ;;  %v5982_v13 = vsub.f32 %v5939_v38, %v5950_v58 }
 0xaaa   : > { %v8586_v41 = vpop.eup %8585  ;;  %v6773_v46 = vmul.f32 %v8584_v24, %v6653_v49  ;;  %v5886_v1 = vmul.f32 0.0, %v8582_v7  ;;  %v5959_v21 = vsub.f32 %v10893_v30, %v10916_v31  ;;  %v5983_v39 = vsub.f32 %v5941_v56, %v10916_v31 }
 0xaab   : > { %v8588_v57 = vpop.eup %8587  ;;  %v5970_v50 = vmul.f32 1.442695, %v5958_v3  ;;  %v5994_v60 = vmul.f32 1.442695, %v5982_v13  ;;  %v6078_v51 = vmax.f32 %v5950_v58, %v6067_v4  ;;  %v10925_v11 = vmul.f32 %v10861_v0, %v6291_v34 }
 0xaac   : > { %v8590_v23 = vpop.eup %8589  ;;  %v6789_v12 = vmul.f32 %v8584_v24, %v6677_v63  ;;  %v6797_v53 = vmul.f32 %v8586_v41, %v10641_v6  ;;  %v5972_v59 = vmul.f32 1.442695, %v5959_v21  ;;  %v10930_v38 = vmul.f32 %v10872_v37, %v11557_v35  ;;  %v6325_v3 = vpop.xlane.xlu1 %6324 }
 0xaad   : > { %v8592_v19 = vpop.eup %8591  ;;  %v6781_v30 = vadd.f32 %v8586_v41, %v6773_v46  ;;  %v6644_v40 = vmul.f32 %v8590_v23, %v6524_v54  ;;  %v6660_v56 = vmul.f32 %v8590_v23, %v6548_v62  ;;  %8601 = vpow2.f32 %v5970_v50  ;;  %v6323_v62 = vpop.xlane.xlu0 %6322 }
 0xaae   : > { %v6668_v20 = vmul.f32 %v8592_v19, %v10557_v55  ;;  %v5894_v48 = vadd.f32 %v8588_v57, %v5886_v1  ;;  %v5902_v0 = vmul.f32 %v8588_v57, %v11574_v26  ;;  %v5996_v18 = vmul.f32 1.442695, %v5983_v39 }
 0xaaf   : > { %v8594_v15 = vpop.eup %8593  ;;  %v6652_v6 = vadd.f32 %v8592_v19, %v6644_v40  ;;  %8603 = vpow2.f32 %v5994_v60  ;;  %v6086_v14 = vsub.f32 %v5950_v58, %v6078_v51  ;;  %v6110_v2 = vsub.f32 %v6067_v4, %v6078_v51 }
 0xab0   : > { %v8596_v35 = vpop.eup %8595  ;;  %v10934_v37 = vadd.f32 %v6797_v53, %v6789_v12  ;;  %v6676_v28 = vadd.f32 %v6668_v20, %v6660_v56  ;;  %8605 = vpow2.f32 %v5972_v59  ;;  %v6079_v17 = vmax.f32 %v10916_v31, %v10918_v32 }
 0xab1   : > { %v10938_v55 = vpop.eup %8597  ;;  %v5887_v16 = vmul.f32 0.0, %v8594_v15  ;;  %8607 = vpow2.f32 %v5996_v18  ;;  %v6098_v26 = vmul.f32 1.442695, %v6086_v14  ;;  %v6122_v49 = vmul.f32 1.442695, %v6110_v2 }
 0xab2   : > { %8609 = vrcp.f32 %v6781_v30  ;;  %v5910_v9 = vadd.f32 %v5902_v0, %v5886_v1  ;;  %v6087_v5 = vsub.f32 %v10916_v31, %v6079_v17  ;;  %v6111_v34 = vsub.f32 %v10918_v32, %v6079_v17 }
 0xab3   : > { %v8600_v27 = vpop.eup %8599  ;;  %v10942_v58 = vmul.f32 %v8596_v35, %v6652_v6  ;;  %8611 = vpow2.f32 %v6098_v26  ;;  %v6206_v7 = vmax.f32 %v6078_v51, %v6195_v61  ;;  %v6207_v63 = vmax.f32 %v6079_v17, %v6197_v25 }
 0xab4   : > { %v10944_v54 = vmul.f32 %v8596_v35, %v6676_v28  ;;  %v10948_v4 = vmul.f32 %v10938_v55, %v10635_v36  ;;  %v5903_v24 = vmul.f32 %v8600_v27, %v11575_v44  ;;  %8613 = vpow2.f32 %v6122_v49 }
 0xab5   : > { %v5895_v31 = vadd.f32 %v8600_v27, %v5887_v16  ;;  %v6100_v13 = vmul.f32 1.442695, %v6087_v5  ;;  %v6124_v32 = vmul.f32 1.442695, %v6111_v34  ;;  %v6214_v41 = vsub.f32 %v6078_v51, %v6206_v7 }
 0xab6   : > { %v5911_v46 = vadd.f32 %v5903_v24, %v5887_v16  ;;  %v6238_v1 = vsub.f32 %v6195_v61, %v6206_v7  ;;  %v6215_v21 = vsub.f32 %v6079_v17, %v6207_v63  ;;  %v6239_v39 = vsub.f32 %v6197_v25, %v6207_v63  ;;  %v6453_v16 = vpop.xlane.xlu1 %6452 }
 0xab7   : > { %v8602_v57 = vpop.eup %8601  ;;  %8615 = vpow2.f32 %v6100_v13  ;;  %v6226_v50 = vmul.f32 1.442695, %v6214_v41  ;;  %v6334_v60 = vmax.f32 %v6206_v7, %v6323_v62  ;;  %v10951_v23 = vmax.f32 %v6207_v63, %v6325_v3 }
 0xab8   : > { %v6006_v36 = vmul.f32 %v8602_v57, %v5894_v48  ;;  %v6022_v12 = vmul.f32 %v8602_v57, %v5910_v9  ;;  %8617 = vpow2.f32 %v6124_v32  ;;  %v6250_v44 = vmul.f32 1.442695, %v6238_v1  ;;  %v6451_v48 = vpop.xlane.xlu0 %6450 }
 0xab9   : > { %v8604_v53 = vpop.eup %8603  ;;  %8619 = vpow2.f32 %v6226_v50  ;;  %v6228_v59 = vmul.f32 1.442695, %v6215_v21  ;;  %v6252_v19 = vmul.f32 1.442695, %v6239_v39  ;;  %v6342_v30 = vsub.f32 %v6206_v7, %v6334_v60 }
 0xaba   : > { %v8606_v51 = vpop.eup %8605  ;;  %v6014_v40 = vadd.f32 %v8604_v53, %v6006_v36  ;;  %v6030_v56 = vmul.f32 %v8604_v53, %v11576_v10  ;;  %8621 = vpow2.f32 %v6250_v44  ;;  %v6366_v20 = vsub.f32 %v6323_v62, %v6334_v60 }
 0xabb   : > { %v8608_v0 = vpop.eup %8607  ;;  %v6007_v18 = vmul.f32 %v8606_v51, %v5895_v31  ;;  %v6023_v61 = vmul.f32 %v8606_v51, %v5911_v46  ;;  %8623 = vpow2.f32 %v6228_v59  ;;  %v6354_v25 = vmul.f32 1.442695, %v6342_v30 }
 0xabc   : > { %v10954_v15 = vpop.eup %8609  ;;  %v6038_v6 = vadd.f32 %v6030_v56, %v6022_v12  ;;  %v6031_v14 = vmul.f32 %v8608_v0, %v11577_v52  ;;  %8625 = vpow2.f32 %v6252_v19  ;;  %v6378_v2 = vmul.f32 1.442695, %v6366_v20  ;;  %v6579_v46 = vpop.xlane.xlu0 %6578 }
 0xabd   : > { %v8612_v35 = vpop.eup %8611  ;;  %v6015_v28 = vadd.f32 %v8608_v0, %v6007_v18  ;;  %8627 = vpow2.f32 %v6354_v25  ;;  %v6343_v10 = vsub.f32 %v6207_v63, %v10951_v23  ;;  %v6367_v17 = vsub.f32 %v6325_v3, %v10951_v23  ;;  %v11601_v25 = vld [vmem:[#allocation47_spill] sm:$0xff] }
 0xabe   : > { %v8614_v26 = vpop.eup %8613  ;;  %v6039_v49 = vadd.f32 %v6031_v14, %v6023_v61  ;;  %v6134_v9 = vmul.f32 %v8612_v35, %v6014_v40  ;;  %v6150_v5 = vmul.f32 %v8612_v35, %v6038_v6  ;;  %8629 = vpow2.f32 %v6378_v2  ;;  %v6581_v40 = vpop.xlane.xlu1 %6580 }
 0xabf   : > { %v6158_v34 = vmul.f32 %v8614_v26, %v11578_v33  ;;  %v6356_v27 = vmul.f32 1.442695, %v6343_v10  ;;  %v6380_v7 = vmul.f32 1.442695, %v6367_v17  ;;  %v6462_v52 = vmax.f32 %v6334_v60, %v6451_v48  ;;  %v11602_v17 = vld [vmem:[#allocation58_spill] sm:$0xff] }
 0xac0   : > { %v6780_v24 = vadd.f32 %v10938_v55, %v10942_v58  ;;  %v6142_v62 = vadd.f32 %v8614_v26, %v6134_v9  ;;  %v10963_v31 = vmax.f32 %v10951_v23, %v6453_v16  ;;  %v6467_v63 = vsub.f32 %v10799_v42, %v10859_v29  ;;  %v6707_v6 = vpop.xlane.xlu0 %6706 }
 0xac1   : > { %v8616_v3 = vpop.eup %8615  ;;  %v6166_v13 = vadd.f32 %v6158_v34, %v6150_v5  ;;  %8631 = vpow2.f32 %v6356_v27  ;;  %v6470_v32 = vsub.f32 %v6334_v60, %v6462_v52  ;;  %v6494_v41 = vsub.f32 %v6451_v48, %v6462_v52 }
 0xac2   : > { %v8618_v33 = vpop.eup %8617  ;;  %v6135_v1 = vmul.f32 %v8616_v3, %v6015_v28  ;;  %v6151_v21 = vmul.f32 %v8616_v3, %v6039_v49  ;;  %8633 = vpow2.f32 %v6380_v7  ;;  %v6471_v55 = vsub.f32 %v10951_v23, %v10963_v31  ;;  %v6709_v3 = vpop.xlane.xlu1 %6708 }
 0xac3   : > { %v8620_v58 = vpop.eup %8619  ;;  %v6159_v39 = vmul.f32 %v8618_v33, %v11579_v22  ;;  %v6482_v57 = vmul.f32 1.442695, %v6470_v32  ;;  %v6506_v50 = vmul.f32 1.442695, %v6494_v41  ;;  %v6495_v42 = vsub.f32 %v6453_v16, %v10963_v31 }
 0xac4   : > { %v8622_v36 = vpop.eup %8621  ;;  %v6143_v12 = vadd.f32 %v8618_v33, %v6135_v1  ;;  %v6262_v44 = vmul.f32 %v8620_v58, %v6142_v62  ;;  %v6278_v60 = vmul.f32 %v8620_v58, %v6166_v13  ;;  %v6484_v53 = vmul.f32 1.442695, %v6471_v55  ;;  %v11603_v1 = vld [vmem:[#allocation59_spill] sm:$0xff] }
 0xac5   : > { %v8624_v59 = vpop.eup %8623  ;;  %v6167_v19 = vadd.f32 %v6159_v39, %v6151_v21  ;;  %v6286_v30 = vmul.f32 %v8622_v36, %v11580_v8  ;;  %8635 = vpow2.f32 %v6482_v57  ;;  %v6508_v51 = vmul.f32 1.442695, %v6495_v42 }
 0xac6   : > { %v8626_v23 = vpop.eup %8625  ;;  %v6270_v56 = vadd.f32 %v8622_v36, %v6262_v44  ;;  %v6263_v20 = vmul.f32 %v8624_v59, %v6143_v12  ;;  %8637 = vpow2.f32 %v6506_v50  ;;  %v6590_v22 = vmax.f32 %v6462_v52, %v6579_v46 }
 0xac7   : > { %v8628_v0 = vpop.eup %8627  ;;  %v6294_v18 = vadd.f32 %v6286_v30, %v6278_v60  ;;  %v6279_v61 = vmul.f32 %v8624_v59, %v6167_v19  ;;  %v6287_v48 = vmul.f32 %v8626_v23, %v11601_v25  ;;  %8639 = vpow2.f32 %v6484_v53 }
 0xac8   : > { %v8630_v14 = vpop.eup %8629  ;;  %v6271_v2 = vadd.f32 %v8626_v23, %v6263_v20  ;;  %v6390_v35 = vmul.f32 %v8628_v0, %v6270_v56  ;;  %8641 = vpow2.f32 %v6508_v51  ;;  %v6598_v8 = vsub.f32 %v6462_v52, %v6590_v22 }
 0xac9   : > { %v6295_v28 = vadd.f32 %v6287_v48, %v6279_v61  ;;  %v6406_v10 = vmul.f32 %v8628_v0, %v6294_v18  ;;  %v6414_v16 = vmul.f32 %v8630_v14, %v11602_v17  ;;  %v6622_v26 = vsub.f32 %v6579_v46, %v6590_v22  ;;  %v10988_v48 = vpop.xlane.xlu0 %5830  ;;  %v11608_v17 = vld [vmem:[#allocation38_spill] sm:$0xff] }
 0xaca   : > { %8643 = vrcp.f32 %v6780_v24  ;;  %v6610_v49 = vmul.f32 1.442695, %v6598_v8  ;;  %v6591_v9 = vmax.f32 %v10963_v31, %v6581_v40  ;;  %v6718_v5 = vmax.f32 %v6590_v22, %v6707_v6 }
 0xacb   : > { %v8632_v34 = vpop.eup %8631  ;;  %v6398_v27 = vadd.f32 %v8630_v14, %v6390_v35  ;;  %v6422_v7 = vadd.f32 %v6414_v16, %v6406_v10  ;;  %v6634_v62 = vmul.f32 1.442695, %v6622_v26  ;;  %v6476_v13 = vmul.f32 1.442695, %v6467_v63  ;;  %v11605_v14 = vld [vmem:[#allocation68_spill] sm:$0xff]  ;;  %v11606_v35 = vld [vmem:[#allocation54_spill] sm:$0xff]  ;;  %v10998_v26 = vpop.xlane.xlu1 %5832 }
 0xacc   : > { %v8634_v32 = vpop.eup %8633  ;;  %v6391_v41 = vmul.f32 %v8632_v34, %v6271_v2  ;;  %v6407_v33 = vmul.f32 %v8632_v34, %v6295_v28  ;;  %8645 = vpow2.f32 %v6610_v49  ;;  %v6599_v52 = vsub.f32 %v10963_v31, %v6591_v9 }
 0xacd   : > { %v6415_v21 = vmul.f32 %v8634_v32, %v11603_v1  ;;  %8647 = vpow2.f32 %v6634_v62  ;;  %v6623_v24 = vsub.f32 %v6581_v40, %v6591_v9  ;;  %v6726_v46 = vsub.f32 %v6590_v22, %v6718_v5  ;;  %v11604_v22 = vld [vmem:[#allocation67_spill] sm:$0xff] }
 0xace   : > { %v6399_v55 = vadd.f32 %v8634_v32, %v6391_v41  ;;  %v6612_v58 = vmul.f32 1.442695, %v6599_v52  ;;  %v6750_v39 = vsub.f32 %v6707_v6, %v6718_v5  ;;  %v6719_v57 = vmax.f32 %v6591_v9, %v6709_v3  ;;  %v11609_v5 = vld [vmem:[#allocation35_spill] sm:$0xff]  ;;  %v11610_v41 = vld [vmem:[#allocation62_spill] sm:$0xff]  ;;  %v11611_v52 = vld [vmem:[#allocation72_spill] sm:$0xff] }
 0xacf   : > { %v8636_v50 = vpop.eup %8635  ;;  %v6423_v42 = vadd.f32 %v6415_v21, %v6407_v33  ;;  %v6636_v36 = vmul.f32 1.442695, %v6623_v24  ;;  %v6738_v12 = vmul.f32 1.442695, %v6726_v46  ;;  %8649 = vpow2.f32 %v6476_v13  ;;  %v11612_v1 = vld [vmem:[#allocation55_spill] sm:$0xff] }
 0xad0   : > { %v8638_v63 = vpop.eup %8637  ;;  %v6518_v44 = vmul.f32 %v8636_v50, %v6398_v27  ;;  %8651 = vpow2.f32 %v6612_v58  ;;  %v6762_v60 = vmul.f32 1.442695, %v6750_v39  ;;  %v6491_v31 = vsub.f32 %v10765_v45, %v10859_v29  ;;  %v5943_v39 = vpop.xlane.xlu0 %5942 }
 0xad1   : > { %v8640_v53 = vpop.eup %8639  ;;  %v10981_v59 = vadd.f32 %v10948_v4, %v10944_v54  ;;  %8653 = vpow2.f32 %v6636_v36  ;;  %v6727_v19 = vsub.f32 %v6591_v9, %v6719_v57  ;;  %v6751_v30 = vsub.f32 %v6709_v3, %v6719_v57 }
 0xad2   : > { %v8642_v51 = vpop.eup %8641  ;;  %v6534_v40 = vmul.f32 %v8636_v50, %v6422_v7  ;;  %v6519_v23 = vmul.f32 %v8640_v53, %v6399_v55  ;;  %8655 = vpow2.f32 %v6738_v12  ;;  %v6419_v56 = vadd.f32 %v10930_v38, %v10925_v11  ;;  %v11607_v11 = vld [vmem:[#allocation63_spill] sm:$0xff] }
 0xad3   : > { %v6526_v20 = vadd.f32 %v8638_v63, %v6518_v44  ;;  %v6542_v0 = vmul.f32 %v8638_v63, %v11604_v22  ;;  %v6535_v18 = vmul.f32 %v8640_v53, %v6423_v42  ;;  %v6740_v45 = vmul.f32 1.442695, %v6727_v19  ;;  %v11613_v22 = vld [vmem:[#allocation31_spill] sm:$0xff] }
 0xad4   : > { %v8644_v61 = vpop.eup %8643  ;;  %8657 = vpow2.f32 %v6762_v60  ;;  %v6764_v25 = vmul.f32 1.442695, %v6751_v30  ;;  %v6500_v54 = vmul.f32 1.442695, %v6491_v31  ;;  %v6587_v4 = vmax.f32 %v10859_v29, %v10768_v43  ;;  %v5945_v31 = vpop.xlane.xlu1 %5944 }
 0xad5   : > { %v6527_v6 = vadd.f32 %v8642_v51, %v6519_v23  ;;  %v6543_v2 = vmul.f32 %v8642_v51, %v11605_v14  ;;  %8659 = vpow2.f32 %v6740_v45  ;;  %v6658_v38 = vmul.f32 %v11607_v11, %v11606_v35  ;;  %v6071_v14 = vpop.xlane.xlu0 %6070 }
 0xad6   : > { %v10993_v8 = vpop.eup %8645  ;;  %8661 = vpow2.f32 %v6764_v25  ;;  %v6595_v28 = vsub.f32 %v10859_v29, %v6587_v4  ;;  %v6619_v10 = vsub.f32 %v10768_v43, %v6587_v4  ;;  %v6715_v16 = vmax.f32 %v6587_v4, %v11608_v17 }
 0xad7   : > { %v11000_v49 = vpop.eup %8647  ;;  %v6646_v9 = vmul.f32 %v10993_v8, %v6526_v20  ;;  %8663 = vpow2.f32 %v6500_v54  ;;  %v6674_v34 = vadd.f32 %v11609_v5, %v6658_v38  ;;  %v5840_v27 = vsub.f32 -inf, %v10988_v48 }
 0xad8   : > { %v11005_v7 = vadd.f32 %v6542_v0, %v6534_v40  ;;  %v6604_v62 = vmul.f32 1.442695, %v6595_v28  ;;  %v6628_v3 = vmul.f32 1.442695, %v6619_v10  ;;  %v6723_v29 = vsub.f32 %v6587_v4, %v6715_v16  ;;  %v11614_v28 = vld [vmem:[#allocation74_spill] sm:$0xff] }
 0xad9   : > { %v8650_v13 = vpop.eup %8649  ;;  %v6654_v43 = vadd.f32 %v11000_v49, %v6646_v9  ;;  %v6747_v32 = vsub.f32 %v11608_v17, %v6715_v16  ;;  %v6786_v33 = vmul.f32 %v11610_v41, %v6674_v34  ;;  %v6794_v21 = vmul.f32 %v11612_v1, %v11611_v52  ;;  %v6073_v17 = vpop.xlane.xlu1 %6072 }
 0xada   : > { %v11012_v24 = vpop.eup %8651  ;;  %v11014_v46 = vadd.f32 %v6543_v2, %v6535_v18  ;;  %8665 = vpow2.f32 %v6604_v62  ;;  %v6732_v55 = vmul.f32 1.442695, %v6723_v29  ;;  %v5854_v58 = vmul.f32 1.442695, %v5840_v27  ;;  %v6199_v52 = vpop.xlane.xlu0 %6198 }
 0xadb   : > { %v11016_v57 = vpop.eup %8653  ;;  %v6647_v50 = vmul.f32 %v11012_v24, %v6527_v6  ;;  %v6515_v42 = vmul.f32 %v8650_v13, %v10913_v47  ;;  %8667 = vpow2.f32 %v6628_v3  ;;  %v6756_v36 = vmul.f32 1.442695, %v6747_v32  ;;  %v11615_v32 = vld [vmem:[#allocation70_spill] sm:$0xff] }
 0xadc   : > { %v11020_v12 = vpop.eup %8655  ;;  %v6531_v63 = vmul.f32 %v8650_v13, %v6419_v56  ;;  %8669 = vpow2.f32 %v6732_v55  ;;  %v5864_v44 = vsub.f32 %v10988_v48, %v10988_v48  ;;  %v5841_v60 = vsub.f32 -inf, %v10998_v26 }
 0xadd   : > { %v6655_v53 = vadd.f32 %v11016_v57, %v6647_v50  ;;  %v6774_v19 = vmul.f32 %v11020_v12, %v6654_v43  ;;  %8671 = vpow2.f32 %v6756_v36  ;;  %v6802_v30 = vadd.f32 %v6794_v21, %v6786_v33 }
 0xade   : > { %v11027_v51 = vpop.eup %8657  ;;  %8673 = vpow2.f32 %v5854_v58  ;;  %v5878_v47 = vmul.f32 1.442695, %v5864_v44  ;;  %v5856_v40 = vmul.f32 1.442695, %v5841_v60  ;;  %v5865_v23 = vsub.f32 %v10998_v26, %v10998_v26 }
 0xadf   : > { %v11031_v56 = vpop.eup %8659  ;;  %v6782_v20 = vadd.f32 %v11027_v51, %v6774_v19  ;;  %v11035_v0 = vmul.f32 %v11613_v22, %v6802_v30  ;;  %v5952_v18 = vmax.f32 %v10988_v48, %v5943_v39  ;;  %v11039_v45 = vmul.f32 %v8644_v61, %v10981_v59 }
 0xae0   : > { %v11041_v25 = vpop.eup %8661  ;;  %v6775_v54 = vmul.f32 %v11031_v56, %v6655_v53  ;;  %8675 = vpow2.f32 %v5878_v47  ;;  %v5880_v4 = vmul.f32 1.442695, %v5865_v23  ;;  %v5953_v6 = vmax.f32 %v10998_v26, %v5945_v31  ;;  %v11616_v53 = vld [vmem:[#allocation73_spill] sm:$0xff]  ;;  %v6201_v23 = vpop.xlane.xlu1 %6200 }
 0xae1   : > { %v8664_v2 = vpop.eup %8663  ;;  %8677 = vrcp.f32 %v6782_v20  ;;  %v5960_v35 = vsub.f32 %v10988_v48, %v5952_v18  ;;  %v5984_v11 = vsub.f32 %v5943_v39, %v5952_v18  ;;  %v11048_v38 = vmul.f32 %v10954_v15, %v10934_v37 }
 0xae2   : > { %v6783_v59 = vadd.f32 %v11041_v25, %v6775_v54  ;;  %v6523_v61 = vadd.f32 %v8664_v2, %v6515_v42  ;;  %v6539_v10 = vmul.f32 %v8664_v2, %v11614_v28  ;;  %8679 = vpow2.f32 %v5856_v40  ;;  %v11617_v54 = vld [vmem:[#allocation26_spill] sm:$0xff] }
 0xae3   : > { %8681 = vpow2.f32 %v5880_v4  ;;  %v5974_v16 = vmul.f32 1.442695, %v5960_v35  ;;  %v5998_v9 = vmul.f32 1.442695, %v5984_v11  ;;  %v5961_v5 = vsub.f32 %v10998_v26, %v5953_v6  ;;  %v6327_v11 = vpop.xlane.xlu0 %6326 }
 0xae4   : > { %v8666_v34 = vpop.eup %8665  ;;  %8683 = vrcp.f32 %v6783_v59  ;;  %v6547_v48 = vadd.f32 %v6539_v10, %v6531_v63  ;;  %v5985_v27 = vsub.f32 %v5945_v31, %v5953_v6  ;;  %v6080_v62 = vmax.f32 %v5952_v18, %v6071_v14 }
 0xae5   : > { %v8668_v3 = vpop.eup %8667  ;;  %v6643_v37 = vmul.f32 %v8666_v34, %v6523_v61  ;;  %8685 = vpow2.f32 %v5974_v16  ;;  %v5976_v15 = vmul.f32 1.442695, %v5961_v5  ;;  %v11053_v29 = vmax.f32 %v5953_v6, %v6073_v17  ;;  %v11618_v16 = vld [vmem:[#allocation25_spill] sm:$0xff] }
 0xae6   : > { %v8670_v13 = vpop.eup %8669  ;;  %v6659_v43 = vmul.f32 %v8666_v34, %v6547_v48  ;;  %v6667_v41 = vmul.f32 %v8668_v3, %v11615_v32  ;;  %8687 = vpow2.f32 %v5998_v9  ;;  %v6000_v33 = vmul.f32 1.442695, %v5985_v27  ;;  %v6329_v32 = vpop.xlane.xlu1 %6328 }
 0xae7   : > { %v8672_v1 = vpop.eup %8671  ;;  %v6651_v26 = vadd.f32 %v8668_v3, %v6643_v37  ;;  %8689 = vpow2.f32 %v5976_v15  ;;  %v6088_v21 = vsub.f32 %v5952_v18, %v6080_v62  ;;  %v6112_v55 = vsub.f32 %v6071_v14, %v6080_v62 }
 0xae8   : > { %v8674_v58 = vpop.eup %8673  ;;  %v6675_v39 = vadd.f32 %v6667_v41, %v6659_v43  ;;  %v6827_v50 = vpack.c.bf16 %v11048_v38, %v11039_v45  ;;  %8691 = vpow2.f32 %v6000_v33  ;;  %v6089_v42 = vsub.f32 %v5953_v6, %v11053_v29  ;;  %v11619_v33 = vld [vmem:[#allocation36_spill] sm:$0xff] }
 0xae9   : > { %v6771_v36 = vmul.f32 %v8670_v13, %v6651_v26  ;;  %v5888_v63 = vmul.f32 0.0, %v8674_v58  ;;  %v6102_v44 = vmul.f32 1.442695, %v6088_v21  ;;  %v6126_v60 = vmul.f32 1.442695, %v6112_v55 }
 0xaea   : > { %v8676_v31 = vpop.eup %8675  ;;  %v6795_v19 = vmul.f32 %v8672_v1, %v11616_v53  ;;  %v6104_v30 = vmul.f32 1.442695, %v6089_v42  ;;  %v6113_v47 = vsub.f32 %v6073_v17, %v11053_v29  ;;  %v6208_v40 = vmax.f32 %v6080_v62, %v6199_v52 }
 0xaeb   : > { %v11061_v20 = vpop.eup %8677  ;;  %v6779_v22 = vadd.f32 %v8672_v1, %v6771_v36  ;;  %v6787_v18 = vmul.f32 %v8670_v13, %v6675_v39  ;;  %v5904_v4 = vmul.f32 %v8676_v31, %v11617_v54  ;;  %8693 = vpow2.f32 %v6102_v44  ;;  %v6455_v36 = vpop.xlane.xlu0 %6454  ;;  %v11620_v44 = vld [vmem:[#allocation37_spill] sm:$0xff] }
 0xaec   : > { %v8680_v6 = vpop.eup %8679  ;;  %v5896_v14 = vadd.f32 %v8676_v31, %v5888_v63  ;;  %8695 = vpow2.f32 %v6126_v60  ;;  %v6128_v2 = vmul.f32 1.442695, %v6113_v47  ;;  %v6216_v35 = vsub.f32 %v6080_v62, %v6208_v40 }
 0xaed   : > { %v8682_v59 = vpop.eup %8681  ;;  %8697 = vrcp.f32 %v6779_v22  ;;  %v5912_v61 = vadd.f32 %v5904_v4, %v5888_v63  ;;  %v5889_v28 = vmul.f32 0.0, %v8680_v6  ;;  %v6240_v10 = vsub.f32 %v6199_v52, %v6208_v40 }
 0xaee   : > { %v11064_v17 = vpop.eup %8683  ;;  %v5905_v9 = vmul.f32 %v8682_v59, %v11618_v16  ;;  %8699 = vpow2.f32 %v6104_v30  ;;  %v6230_v5 = vmul.f32 1.442695, %v6216_v35  ;;  %v6209_v34 = vmax.f32 %v11053_v29, %v6201_v23 }
 0xaef   : > { %v8686_v48 = vpop.eup %8685  ;;  %v5897_v27 = vadd.f32 %v8682_v59, %v5889_v28  ;;  %8701 = vpow2.f32 %v6128_v2  ;;  %v6254_v3 = vmul.f32 1.442695, %v6240_v10  ;;  %v6336_v37 = vmax.f32 %v6208_v40, %v6327_v11  ;;  %v6457_v59 = vpop.xlane.xlu1 %6456 }
 0xaf0   : > { %v8688_v62 = vpop.eup %8687  ;;  %v5913_v15 = vadd.f32 %v5905_v9, %v5889_v28  ;;  %v6008_v13 = vmul.f32 %v8686_v48, %v5896_v14  ;;  %v6024_v43 = vmul.f32 %v8686_v48, %v5912_v61  ;;  %8703 = vpow2.f32 %v6230_v5  ;;  %v11621_v28 = vld [vmem:[#allocation44_spill] sm:$0xff] }
 0xaf1   : > { %v8690_v41 = vpop.eup %8689  ;;  %v6032_v52 = vmul.f32 %v8688_v62, %v11619_v33  ;;  %8705 = vpow2.f32 %v6254_v3  ;;  %v6217_v1 = vsub.f32 %v11053_v29, %v6209_v34  ;;  %v6241_v26 = vsub.f32 %v6201_v23, %v6209_v34 }
 0xaf2   : > { %v8692_v21 = vpop.eup %8691  ;;  %v6016_v55 = vadd.f32 %v8688_v62, %v6008_v13  ;;  %v6009_v58 = vmul.f32 %v8690_v41, %v5897_v27  ;;  %v6025_v39 = vmul.f32 %v8690_v41, %v5913_v15  ;;  %v6344_v42 = vsub.f32 %v6208_v40, %v6336_v37  ;;  %v11622_v41 = vld [vmem:[#allocation45_spill] sm:$0xff] }
 0xaf3   : > { %v6040_v63 = vadd.f32 %v6032_v52, %v6024_v43  ;;  %v6033_v60 = vmul.f32 %v8692_v21, %v11620_v44  ;;  %v6232_v31 = vmul.f32 1.442695, %v6217_v1  ;;  %v6256_v53 = vmul.f32 1.442695, %v6241_v26 }
 0xaf4   : > { %v6803_v30 = vadd.f32 %v6795_v19, %v6787_v18  ;;  %v6358_v47 = vmul.f32 1.442695, %v6344_v42  ;;  %v6368_v22 = vsub.f32 %v6327_v11, %v6336_v37  ;;  %v11071_v54 = vmax.f32 %v6209_v34, %v6329_v32 }
 0xaf5   : > { %v8694_v4 = vpop.eup %8693  ;;  %v6017_v6 = vadd.f32 %v8692_v21, %v6009_v58  ;;  %v6041_v29 = vadd.f32 %v6033_v60, %v6025_v39  ;;  %8707 = vpow2.f32 %v6232_v31  ;;  %v6464_v23 = vmax.f32 %v6336_v37, %v6455_v36 }
 0xaf6   : > { %v8696_v14 = vpop.eup %8695  ;;  %v6136_v2 = vmul.f32 %v8694_v4, %v6016_v55  ;;  %v6152_v35 = vmul.f32 %v8694_v4, %v6040_v63  ;;  %8709 = vpow2.f32 %v6256_v53  ;;  %v6382_v40 = vmul.f32 1.442695, %v6368_v22  ;;  %v11624_v55 = vld [vmem:[#allocation61_spill] sm:$0xff]  ;;  %v6585_v63 = vpop.xlane.xlu1 %6584  ;;  %v11625_v53 = vld [vmem:[#allocation48_spill] sm:$0xff] }
 0xaf7   : > { %v8698_v61 = vpop.eup %8697  ;;  %v6160_v10 = vmul.f32 %v8696_v14, %v11621_v28  ;;  %8711 = vpow2.f32 %v6358_v47  ;;  %v6345_v19 = vsub.f32 %v6209_v34, %v11071_v54  ;;  %v6369_v18 = vsub.f32 %v6329_v32, %v11071_v54  ;;  %v6583_v34 = vpop.xlane.xlu0 %6582  ;;  %v11623_v32 = vld [vmem:[#allocation71_spill] sm:$0xff] }
 0xaf8   : > { %v8700_v11 = vpop.eup %8699  ;;  %v6819_v16 = vmul.f32 %v8698_v61, %v6803_v30  ;;  %v6144_v9 = vadd.f32 %v8696_v14, %v6136_v2  ;;  %8713 = vpow2.f32 %v6382_v40  ;;  %v6472_v5 = vsub.f32 %v6336_v37, %v6464_v23 }
 0xaf9   : > { %v8702_v48 = vpop.eup %8701  ;;  %v6168_v27 = vadd.f32 %v6160_v10, %v6152_v35  ;;  %v6137_v3 = vmul.f32 %v8700_v11, %v6017_v6  ;;  %v6153_v62 = vmul.f32 %v8700_v11, %v6041_v29  ;;  %v6360_v15 = vmul.f32 1.442695, %v6345_v19  ;;  %v11626_v35 = vld [vmem:[#allocation53_spill] sm:$0xff] }
 0xafa   : > { %v8704_v13 = vpop.eup %8703  ;;  %v6826_v43 = vpack.c.bf16 %v6819_v16, %v11035_v0  ;;  %v6161_v33 = vmul.f32 %v8702_v48, %v11622_v41  ;;  %v6384_v52 = vmul.f32 1.442695, %v6369_v18  ;;  %v6486_v1 = vmul.f32 1.442695, %v6472_v5 }
 0xafb   : > { %v8706_v26 = vpop.eup %8705  ;;  %v6670_v21 = vmul.f32 %v11000_v49, %v11623_v32  ;;  %v11082_v37 = vmul.f32 %v11016_v57, %v11624_v55  ;;  %v6264_v58 = vmul.f32 %v8704_v13, %v6144_v9  ;;  %8715 = vpow2.f32 %v6360_v15  ;;  %v6711_v28 = vpop.xlane.xlu0 %6710 }
 0xafc   : > { %7458 = vmatprep.mubr.bf16.mxu0 %v6826_v43  ;;  %v6145_v39 = vadd.f32 %v8702_v48, %v6137_v3  ;;  %v6169_v42 = vadd.f32 %v6161_v33, %v6153_v62  ;;  %8717 = vpow2.f32 %v6384_v52  ;;  %v6496_v0 = vsub.f32 %v6455_v36, %v6464_v23 }
 0xafd   : > { %7459 = vmatmul.mubr.bf16.vlgmr.msra.gmra.mrb[120].mxu0 %v6827_v50  ;;  %8719 = vpow2.f32 %v6486_v1  ;;  %v6465_v44 = vmax.f32 %v11071_v54, %v6457_v59  ;;  %v6592_v49 = vmax.f32 %v6464_v23, %v6583_v34  ;;  %v6662_v57 = vmul.f32 %v10993_v8, %v11005_v7 }
 0xafe   : > { %v6272_v60 = vadd.f32 %v8706_v26, %v6264_v58  ;;  %v6280_v31 = vmul.f32 %v8704_v13, %v6168_v27  ;;  %v6288_v30 = vmul.f32 %v8706_v26, %v11625_v53  ;;  %v6510_v47 = vmul.f32 1.442695, %v6496_v0  ;;  %v11628_v58 = vld [vmem:[#allocation60_spill] sm:$0xff]  ;;  %v11629_v53 = vld [vmem:[#allocation30_spill] sm:$0xff] }
 0xaff   : > { %v8708_v22 = vpop.eup %8707  ;;  %v6473_v36 = vsub.f32 %v11071_v54, %v6465_v44  ;;  %v6497_v4 = vsub.f32 %v6457_v59, %v6465_v44  ;;  %v6600_v6 = vsub.f32 %v6464_v23, %v6592_v49  ;;  %v6624_v29 = vsub.f32 %v6583_v34, %v6592_v49  ;;  %v6713_v59 = vpop.xlane.xlu1 %6712  ;;  %v11627_v34 = vld [vmem:[#allocation28_spill] sm:$0xff] }
 0xb00   : > { %v8710_v45 = vpop.eup %8709  ;;  %v6265_v38 = vmul.f32 %v8708_v22, %v6145_v39  ;;  %v6281_v50 = vmul.f32 %v8708_v22, %v6169_v42  ;;  %8721 = vpow2.f32 %v6510_v47  ;;  %v6593_v14 = vmax.f32 %v6465_v44, %v6585_v63 }
 0xb01   : > { %v8712_v2 = vpop.eup %8711  ;;  %v6289_v40 = vmul.f32 %v8710_v45, %v11626_v35  ;;  %v6488_v8 = vmul.f32 1.442695, %v6473_v36  ;;  %v6512_v7 = vmul.f32 1.442695, %v6497_v4  ;;  %v6614_v61 = vmul.f32 1.442695, %v6600_v6 }
 0xb02   : > { %v8714_v10 = vpop.eup %8713  ;;  %v6296_v19 = vadd.f32 %v6288_v30, %v6280_v31  ;;  %v6273_v18 = vadd.f32 %v8710_v45, %v6265_v38  ;;  %v6392_v11 = vmul.f32 %v8712_v2, %v6272_v60  ;;  %v6638_v54 = vmul.f32 1.442695, %v6624_v29  ;;  %v11630_v4 = vld [vmem:[#allocation50_spill] sm:$0xff] }
 0xb03   : > { %v6297_v23 = vadd.f32 %v6289_v40, %v6281_v50  ;;  %8723 = vpow2.f32 %v6488_v8  ;;  %v6601_v16 = vsub.f32 %v6465_v44, %v6593_v14  ;;  %v6663_v9 = vmul.f32 %v11012_v24, %v11014_v46 }
 0xb04   : > { %v6400_v5 = vadd.f32 %v8714_v10, %v6392_v11  ;;  %8725 = vpow2.f32 %v6512_v7  ;;  %v6625_v48 = vsub.f32 %v6585_v63, %v6593_v14  ;;  %v6720_v27 = vmax.f32 %v6592_v49, %v6711_v28 }
 0xb05   : > { %v8716_v3 = vpop.eup %8715  ;;  %8727 = vpow2.f32 %v6614_v61  ;;  %v6616_v62 = vmul.f32 1.442695, %v6601_v16  ;;  %v6721_v15 = vmax.f32 %v6593_v14, %v6713_v59  ;;  %v6678_v13 = vadd.f32 %v6670_v21, %v6662_v57 }
 0xb06   : > { %v8718_v43 = vpop.eup %8717  ;;  %v6408_v41 = vmul.f32 %v8712_v2, %v6296_v19  ;;  %v6393_v33 = vmul.f32 %v8716_v3, %v6273_v18  ;;  %8729 = vpow2.f32 %v6638_v54  ;;  %v6640_v52 = vmul.f32 1.442695, %v6625_v48  ;;  %v11632_v19 = vld [vmem:[#allocation41_spill] sm:$0xff] }
 0xb07   : > { %v8720_v1 = vpop.eup %8719  ;;  %v6416_v26 = vmul.f32 %v8714_v10, %v11627_v34  ;;  %8731 = vpow2.f32 %v6616_v62  ;;  %v6728_v32 = vsub.f32 %v6592_v49, %v6720_v27  ;;  %v6752_v24 = vsub.f32 %v6711_v28, %v6720_v27 }
 0xb08   : > { %v6401_v46 = vadd.f32 %v8718_v43, %v6393_v33  ;;  %v6409_v55 = vmul.f32 %v8716_v3, %v6297_v23  ;;  %v6417_v39 = vmul.f32 %v8718_v43, %v11628_v58  ;;  %v6520_v42 = vmul.f32 %v8720_v1, %v6400_v5  ;;  %v11633_v43 = vld [vmem:[#allocation66_spill] sm:$0xff] }
 0xb09   : > { %8733 = vpow2.f32 %v6640_v52  ;;  %v6742_v0 = vmul.f32 1.442695, %v6728_v32  ;;  %v6766_v63 = vmul.f32 1.442695, %v6752_v24  ;;  %v6729_v21 = vsub.f32 %v6593_v14, %v6721_v15  ;;  %v11634_v52 = vld [vmem:[#allocation46_spill] sm:$0xff] }
 0xb0a   : > { %v8722_v44 = vpop.eup %8721  ;;  %v6753_v57 = vsub.f32 %v6713_v59, %v6721_v15  ;;  %v6679_v60 = vadd.f32 %v11082_v37, %v6663_v9  ;;  %v6790_v31 = vmul.f32 %v11020_v12, %v6678_v13  ;;  %v6798_v30 = vmul.f32 %v11027_v51, %v11629_v53  ;;  %v7412_v53 = vld [vmem:[%s11179_s5] ss:$0 sm:$0xff] }
 0xb0b   : > { %v6528_v49 = vadd.f32 %v8722_v44, %v6520_v42  ;;  %8735 = vpow2.f32 %v6742_v0  ;;  %v6744_v47 = vmul.f32 1.442695, %v6729_v21  ;;  %v6799_v6 = vmul.f32 %v11041_v25, %v11630_v4  ;;  %v11631_v25 = vld [vmem:[#allocation69_spill] sm:$0xff] }
 0xb0c   : > { %8737 = vpow2.f32 %v6766_v63  ;;  %v6768_v22 = vmul.f32 1.442695, %v6753_v57  ;;  %v6791_v36 = vmul.f32 %v11031_v56, %v6679_v60  ;;  %v6424_v45 = vadd.f32 %v6416_v26, %v6408_v41 }
 0xb0d   : > { %v8724_v29 = vpop.eup %8723  ;;  %v6425_v38 = vadd.f32 %v6417_v39, %v6409_v55  ;;  %8739 = vpow2.f32 %v6744_v47  ;;  %v6806_v12 = vadd.f32 %v6798_v30, %v6790_v31  ;;  %v6544_v28 = vmul.f32 %v8722_v44, %v11631_v25  ;;  %v11636_v39 = vld [vmem:[#allocation39_spill] sm:$0xff] }
 0xb0e   : > { %v8726_v37 = vpop.eup %8725  ;;  %v6521_v50 = vmul.f32 %v8724_v29, %v6401_v46  ;;  %v6807_v14 = vadd.f32 %v6799_v6, %v6791_v36  ;;  %8741 = vpow2.f32 %v6768_v22  ;;  %v6536_v61 = vmul.f32 %v8720_v1, %v6424_v45  ;;  %v11635_v46 = vld [vmem:[#allocation49_spill] sm:$0xff] }
 0xb0f   : > { %v8728_v2 = vpop.eup %8727  ;;  %v6822_v8 = vmul.f32 %v11061_v20, %v6806_v12  ;;  %v6537_v10 = vmul.f32 %v8724_v29, %v6425_v38  ;;  %v6545_v18 = vmul.f32 %v8726_v37, %v11632_v19 }
 0xb10   : > { %v8730_v51 = vpop.eup %8729  ;;  %v6529_v35 = vadd.f32 %v8726_v37, %v6521_v50  ;;  %v6648_v40 = vmul.f32 %v8728_v2, %v6528_v49  ;;  %v6823_v56 = vmul.f32 %v11064_v17, %v6807_v14  ;;  %v6552_v5 = vadd.f32 %v6544_v28, %v6536_v61 }
 0xb11   : > { %v8732_v7 = vpop.eup %8731  ;;  %v6553_v48 = vadd.f32 %v6545_v18, %v6537_v10  ;;  %v6672_v41 = vmul.f32 %v8730_v51, %v11633_v43 }
 0xb12   : > { %v6656_v11 = vadd.f32 %v8730_v51, %v6648_v40  ;;  %v6649_v54 = vmul.f32 %v8732_v7, %v6529_v35  ;;  %v6828_v59 = vpack.c.bf16 %v6823_v56, %v6822_v8  ;;  %v6664_v13 = vmul.f32 %v8728_v2, %v6552_v5 }
 0xb13   : > { %v8734_v23 = vpop.eup %8733  ;;  %v6665_v33 = vmul.f32 %v8732_v7, %v6553_v48 }
 0xb14   : > { %v6657_v16 = vadd.f32 %v8734_v23, %v6649_v54  ;;  %7462 = vmatprep.mubr.bf16.mxu1 %v6828_v59  ;;  %v6673_v1 = vmul.f32 %v8734_v23, %v11634_v52  ;;  %v6680_v26 = vadd.f32 %v6672_v41, %v6664_v13 }
 0xb15   : > { %v8736_v9 = vpop.eup %8735 }
 0xb16   : > { %v8738_v27 = vpop.eup %8737  ;;  %v6776_v20 = vmul.f32 %v8736_v9, %v6656_v11  ;;  %v6681_v32 = vadd.f32 %v6673_v1, %v6665_v33  ;;  %v6792_v24 = vmul.f32 %v8736_v9, %v6680_v26 }
 0xb17   : > { %v8740_v3 = vpop.eup %8739  ;;  %v6800_v55 = vmul.f32 %v8738_v27, %v11635_v46 }
 0xb18   : > { %v6784_v17 = vadd.f32 %v8738_v27, %v6776_v20  ;;  %v6777_v62 = vmul.f32 %v8740_v3, %v6657_v16  ;;  %v8742_v15 = vpop.eup %8741  ;;  %v6793_v58 = vmul.f32 %v8740_v3, %v6681_v32 }
 0xb19   : > { %v6801_v42 = vmul.f32 %v8742_v15, %v11636_v39  ;;  %v6808_v63 = vadd.f32 %v6800_v55, %v6792_v24 }
 0xb1a   : > { %8743 = vrcp.f32 %v6784_v17  ;;  %v6785_v34 = vadd.f32 %v8742_v15, %v6777_v62 }
 0xb1b   : > { %v6809_v21 = vadd.f32 %v6801_v42, %v6793_v58 }
 0xb1c   : > { %8745 = vrcp.f32 %v6785_v34 }
 0xb24   : > { %v8744_v0 = vpop.eup %8743 }
 0xb25   : > { %v6824_v57 = vmul.f32 %v8744_v0, %v6808_v63 }
 0xb26   : > { %v8746_v44 = vpop.eup %8745 }
 0xb27   : > { %v6825_v60 = vmul.f32 %v8746_v44, %v6809_v21 }
 0xb29   : > { %v6829_v31 = vpack.c.bf16 %v6825_v60, %v6824_v57 }
 0xb2b   : > { %7463 = vmatmul.mubr.bf16.vlgmr.msra.gmra.mrb[120].mxu1 %v6829_v31 }
 0xbd0   : > { %v7460_v30 = vpop.f32.mrb[120].mxu0 }
 0xbd1   : > { %v6944_v49 = vadd.f32 %v7460_v30, %v7412_v53  ;;  %v6935_v47 = vpop.f32.mrb[121].mxu0 }
 0xbd2   : > { %v6936_v22 = vadd.f32 %v7412_v53, %v6935_v47  ;;  %v7461_v36 = vpop.f32.mrb[122].mxu0 }
 0xbd3   : > { %6968 = vst [vmem:[%s9243_s11 + $0x10] sm:$0xff] %v6944_v49  ;;  %v6947_v4 = vadd.f32 %v7461_v36, %v7412_v53  ;;  %v6938_v6 = vpop.f32.mrb[123].mxu0 }
 0xbd4   : > { %6966 = vst [vmem:[%s9243_s11] sm:$0xff] %v6936_v22  ;;  %v6939_v29 = vadd.f32 %v7412_v53, %v6938_v6 }
 0xbd5   : > { %6969 = vst [vmem:[%s9243_s11 + $0x18] sm:$0xff] %v6947_v4 }
 0xbd6   : > { %6967 = vst [vmem:[%s9243_s11 + $0x8] sm:$0xff] %v6939_v29 }
 0xbfe   : > { %v7464_v45 = vpop.f32.mrb[120].mxu1 }
 0xbff   : > { %v6960_v38 = vadd.f32 %v7464_v45, %v7412_v53  ;;  %v6951_v37 = vpop.f32.mrb[121].mxu1 }
 0xc00   : > { %v6952_v50 = vadd.f32 %v7412_v53, %v6951_v37  ;;  %v7465_v12 = vpop.f32.mrb[122].mxu1 }
 0xc01   : > { %6972 = vst [vmem:[%s9243_s11 + $0x30] sm:$0xff] %v6960_v38  ;;  %v6963_v14 = vadd.f32 %v7465_v12, %v7412_v53  ;;  %v6954_v2 = vpop.f32.mrb[123].mxu1 }
 0xc02   : > { %6970 = vst [vmem:[%s9243_s11 + $0x20] sm:$0xff] %v6952_v50  ;;  %v6955_v51 = vadd.f32 %v7412_v53, %v6954_v2 }
 0xc03   : > { %6973 = vst [vmem:[%s9243_s11 + $0x38] sm:$0xff] %v6963_v14 }
 0xc04   : > { %6971 = vst [vmem:[%s9243_s11 + $0x28] sm:$0xff] %v6955_v51 }
 0xc05   : > { %8934 = shalt.err (!%p8931_p6)
}
 0xc06   : > { %s8935_s11 = scalar_lea.hbm %s11125_s26, 1024  ;;  %s8939_s12 = scalar_lea.hbm %s11180_s6, 2048 }
 0xc07   : > { %p8936_p5 = scmp.ne.s32.totalorder %s11125_s26, %s8935_s11  ;;  %p8940_p13 = scmp.lt.u32.totalorder %s11125_s26, %s11180_s6 }
 0xc08   : > { %p8941_p0 = scmp.lt.u32.totalorder %s8939_s12, %s8935_s11  ;;  %p8943_p9 = scmp.lt.u32.totalorder %s8935_s11, %s11125_s26 }
 0xc09   : > { %p8937_p11 = pnand %p8936_p5, %p11637_p8 }
 0xc0a   : > { %p8942_p7 = por %p8941_p0, %p8940_p13 }
 0xc0b   : > { %p8938_p12 = pneg %p8937_p11 }
 0xc0c   : > { %p8944_p10 = por %p8943_p9, %p8942_p7 }
 0xc0e   : > { %p8945_p1 = pnand %p8944_p10, %p8938_p12 }
 0xc10   : > { %8948 = shalt.err (!%p8945_p1)
}
 0xc11   : > { %s9021_s17 = smov 128   ;;  %s9022_s18 = smov 8  }
 0xc12   : > { %7503 = dma.vmem_to_hbm [thread:$0]  (%p11637_p8), %s11127_s30, 1024, %s11125_s26, %s6975_s25, %s9021_s17, %s9021_s17, %s9022_s18  }
 0xc13 PF: > { %s11638_s27 = sld [smem:[#allocation22_spill]]  ;;  %s7003_s1 = sand.u32 1, %s8987_s21  }
 0xc14   : > { %s7004_s14 = scalar_lea.sflag [#allocation6], %s7003_s1 }
 0xc19   : > { %p11639_p2 = scmp.ne.s32.totalorder %s11638_s27, 0 }
 0xc1b   : > { %p7516_p3 = pnand %p7104_p4, %p11639_p2 }
 0xc1d   : > { %8982 = dma.done.wait (!%p7516_p3), %s7004_s14, 1024  }
 0xc1e   : > { %8984 = vsyncadd (!%p7516_p3), %s7004_s14, 4294966272  ;;  %s11640_s24 = sld [smem:[#allocation20_spill]]  ;;  %s11641_s10 = sld [smem:[#allocation21_spill]] }
 0xc1f   : > { %s11642_s21 = smov %s8991_s22  ;;  %s11643_s22 = smov %s8995_s23 }
 0xc24   : > { %p21_p6 = scmp.ge.s32.totalorder %s11640_s24, 4   ;;  %s11644_s23 = smov %s11641_s10 }
 0xc26   :  { %23 = sbr.rel (!%p21_p6) target bundleno = 9 (0x9), region = 140 }
 0xc2d   :  { %7009 = vsyncpa [#allocation5], 1 }
 0xc2e   :  { %7011 = vsyncpa [#allocation5 + $0x1], 1 }
 0xc2f   :  { %7012 = vsyncpa [#allocation8], 1 }
 0xc30   :  { %7013 = vsyncpa [#allocation11], 1 }
 0xc31   :  { %7014 = vsyncpa [#allocation6], 1 }
 0xc32   :  { %7016 = vsyncpa [#allocation6 + $0x1], 1 }

</bundles_post_ra>
